<compile_context>
chip_gen: v7x
topology: tpu7x:2x2x1
jax: 0.10.0
libtpu: 0.0.40
codegen_flags: <defaults>
</compile_context>

<pallas_src>
import functools
import math

import jax
import jax.numpy as jnp
from jax import lax
from jax.experimental import pallas as pl
from jax.experimental.pallas import tpu as pltpu


# MXU-native operand dtype on all three generations; accumulation stays f32.
MATMUL_DTYPE = jnp.bfloat16
_TOL = 3e-2 if MATMUL_DTYPE == jnp.bfloat16 else 1e-4

_LANE = 128
# PyTorch gate order is [i, f, g, o]; we repack to [i, f, o, g] so one sigmoid
# covers the first 3 contiguous (128-lane) gate segments and one tanh the last.
_GATE_ORDER = (0, 1, 3, 2)


def _round_up(v, m=_LANE):
    return ((v + m - 1) // m) * m


# ----------------------------- Pallas kernel --------------------------------

def _gates_to_state(gates, c, hp):
    """Packed gate layout [i, f, o, g]; each segment is hp (128-aligned) lanes."""
    sig = jax.nn.sigmoid(gates[:, :3 * hp])          # one EUP dispatch for i,f,o
    i = sig[:, 0 * hp:1 * hp]
    f = sig[:, 1 * hp:2 * hp]
    o = sig[:, 2 * hp:3 * hp]
    g = jnp.tanh(gates[:, 3 * hp:4 * hp])            # one EUP dispatch for g
    c_new = f * c + i * g
    h_new = o * jnp.tanh(c_new)
    return h_new, c_new


def rae_kernel(seq_len, ep, hp,
               x_ref,
               wih1_ref, whh1_ref, b1_ref,   # encoder.rnn1  (F      -> hp gates)
               w2_ref, b2_ref,               # encoder.rnn2  fused [Wih;Whh]
               wih3_ref, whh3_ref, b3_ref,   # decoder.rnn1  (ep     -> ep gates)
               w4_ref, b4_ref,               # decoder.rnn2  fused [Wih;Whh]
               wlin_ref, blin_ref,           # decoder.dense (hp     -> fp)
               o_ref):
    f32 = jnp.float32

    # ---- Hoisted weight/bias reads (read once, loop bodies use values) -----
    whh1 = whh1_ref[...]
    w2, b2 = w2_ref[...], b2_ref[...]
    whh3 = whh3_ref[...]
    w4, b4 = w4_ref[...], b4_ref[...]

    # ---- Hoisted encoder layer-1 input projection (one batched matmul) -----
    xproj = (jnp.dot(x_ref[...].astype(MATMUL_DTYPE), wih1_ref[...],
                     preferred_element_type=f32)
             + b1_ref[...])                                     # (S, 4*hp)

    h1 = jnp.zeros((1, hp), f32); c1 = jnp.zeros((1, hp), f32)
    h2 = jnp.zeros((1, ep), f32); c2 = jnp.zeros((1, ep), f32)

    # ---- Encoder: two stacked LSTMs, statically unrolled over time ---------
    # TODO(synk): if seq_len ever grows beyond ~32, switch to lax.fori_loop
    # (unroll=k) to bound vreg live ranges; at S=8 static unroll is fine.
    for t in range(seq_len):
        # layer 1: only the recurrent matmul remains on the serial chain
        g1 = xproj[t:t + 1, :] + jnp.dot(h1.astype(MATMUL_DTYPE), whh1,
                                         preferred_element_type=f32)
        h1, c1 = _gates_to_state(g1, c1, hp)

        # layer 2: fused [h1 ; h2] @ [Wih2^T ; Whh2^T] — lane-aligned concat
        xc2 = jnp.concatenate([h1, h2], axis=1).astype(MATMUL_DTYPE)  # (1, hp+ep)
        g2 = jnp.dot(xc2, w2, preferred_element_type=f32) + b2
        h2, c2 = _gates_to_state(g2, c2, ep)

    z = h2                                                       # (1, ep)

    # ---- Hoisted decoder layer-3 z-projection (loop-invariant) -------------
    zg = (jnp.dot(z.astype(MATMUL_DTYPE), wih3_ref[...],
                  preferred_element_type=f32)
          + b3_ref[...])                                         # (1, 4*ep)

    h3 = jnp.zeros((1, ep), f32); c3 = jnp.zeros((1, ep), f32)
    h4 = jnp.zeros((1, hp), f32); c4 = jnp.zeros((1, hp), f32)

    # Register-resident decoder-output history: (S, hp) f32 is a single vreg
    # at S=8/hp=128; accumulate with a mask-select per step (no VMEM stores,
    # and no sub-tile concatenate along the sublane dim).
    h4_hist = jnp.zeros((seq_len, hp), f32)
    row_ids = lax.broadcasted_iota(jnp.int32, (seq_len, hp), 0)

    # ---- Decoder: two stacked LSTMs, statically unrolled over time ---------
    for t in range(seq_len):
        g3 = zg + jnp.dot(h3.astype(MATMUL_DTYPE), whh3,
                          preferred_element_type=f32)
        h3, c3 = _gates_to_state(g3, c3, ep)

        xc4 = jnp.concatenate([h3, h4], axis=1).astype(MATMUL_DTYPE)  # (1, ep+hp)
        g4 = jnp.dot(xc4, w4, preferred_element_type=f32) + b4
        h4, c4 = _gates_to_state(g4, c4, hp)

        h4_hist = jnp.where(row_ids == t,
                            jnp.broadcast_to(h4, (seq_len, hp)),
                            h4_hist)

    # ---- Batched final dense layer + single lane-dense output store --------
    out = (jnp.dot(h4_hist.astype(MATMUL_DTYPE), wlin_ref[...],
                   preferred_element_type=f32)
           + blin_ref[...])                                      # (S, fp)
    o_ref[...] = out


# ------------------------------- wrapper -------------------------------------

def _pack_w(w, hid, hid_pad, in_pad=None):
    """PyTorch (4*hid, in) weight -> (in_pad, 4*hid_pad) x@W layout with gates
    reordered to [i,f,o,g] and each gate segment zero-padded to hid_pad lanes."""
    gates = [w[k * hid:(k + 1) * hid, :] for k in _GATE_ORDER]
    gates = [jnp.pad(g, ((0, hid_pad - hid), (0, 0))) for g in gates]
    w_t = jnp.concatenate(gates, axis=0).T                       # (in, 4*hid_pad)
    if in_pad is not None and in_pad > w_t.shape[0]:
        w_t = jnp.pad(w_t, ((0, in_pad - w_t.shape[0]), (0, 0)))
    return w_t.astype(MATMUL_DTYPE)


def _pack_b(bih, bhh, hid, hid_pad):
    """Fold the two PyTorch biases; reorder gates and pad each segment."""
    b = bih + bhh
    gates = [b[k * hid:(k + 1) * hid] for k in _GATE_ORDER]
    gates = [jnp.pad(g, (0, hid_pad - hid)) for g in gates]
    return jnp.concatenate(gates, axis=0).reshape(1, -1).astype(jnp.float32)


@functools.partial(jax.jit, static_argnums=(2,))
def rae_forward(x, params, embed_dim):
    seq_len, n_features = x.shape
    E, H = embed_dim, 2 * embed_dim
    EP, HP = _round_up(E), _round_up(H)     # 128-lane-aligned gate segments
    FP = _round_up(n_features)              # lane-dense final output store

    # encoder.rnn1 : F -> H
    wih1 = _pack_w(params["enc1"]["wih"], H, HP)                        # (F, 4HP)
    whh1 = _pack_w(params["enc1"]["whh"], H, HP, in_pad=HP)             # (HP,4HP)
    b1 = _pack_b(params["enc1"]["bih"], params["enc1"]["bhh"], H, HP)
    # encoder.rnn2 : H -> E, fused [Wih^T ; Whh^T] for [h1 ; h2] @ W
    w2 = jnp.concatenate(
        [_pack_w(params["enc2"]["wih"], E, EP, in_pad=HP),
         _pack_w(params["enc2"]["whh"], E, EP, in_pad=EP)], axis=0)     # (HP+EP,4EP)
    b2 = _pack_b(params["enc2"]["bih"], params["enc2"]["bhh"], E, EP)
    # decoder.rnn1 : E -> E
    wih3 = _pack_w(params["dec1"]["wih"], E, EP, in_pad=EP)
    whh3 = _pack_w(params["dec1"]["whh"], E, EP, in_pad=EP)
    b3 = _pack_b(params["dec1"]["bih"], params["dec1"]["bhh"], E, EP)
    # decoder.rnn2 : E -> H, fused [Wih^T ; Whh^T] for [h3 ; h4] @ W
    w4 = jnp.concatenate(
        [_pack_w(params["dec2"]["wih"], H, HP, in_pad=EP),
         _pack_w(params["dec2"]["whh"], H, HP, in_pad=HP)], axis=0)     # (EP+HP,4HP)
    b4 = _pack_b(params["dec2"]["bih"], params["dec2"]["bhh"], H, HP)
    # decoder.dense : H -> F, padded so the output store is lane-dense
    wlin = jnp.pad(params["lin_w"].T,
                   ((0, HP - H), (0, FP - n_features))).astype(MATMUL_DTYPE)
    blin = jnp.pad(params["lin_b"],
                   (0, FP - n_features)).reshape(1, -1).astype(jnp.float32)

    flat = (x, wih1, whh1, b1, w2, b2, wih3, whh3, b3, w4, b4, wlin, blin)
    kernel = functools.partial(rae_kernel, seq_len, EP, HP)
    vmem = pl.BlockSpec(memory_space=pltpu.MemorySpace.VMEM)

    # Everything (weights + activations) is well under 0.5 MiB, far below the
    # VMEM scoped limit on all of v5e/v6e/v7x — no grid / pipelining machinery.
    out_pad = pl.pallas_call(
        kernel,
        out_shape=jax.ShapeDtypeStruct((seq_len, FP), jnp.float32),
        in_specs=[vmem] * len(flat),
        out_specs=vmem,
    )(*flat)
    return out_pad[:, :n_features]


# ----------------------- deterministic parameter init ------------------------

def init_params(key, n_features, embed_dim):
    E, H, F = embed_dim, 2 * embed_dim, n_features
    keys = iter(jax.random.split(key, 20))

    def u(shape, hid):
        bound = 1.0 / math.sqrt(hid)
        return jax.random.uniform(next(keys), shape, jnp.float32, -bound, bound)

    def lstm(in_dim, hid):
        return {"wih": u((4 * hid, in_dim), hid),
                "whh": u((4 * hid, hid), hid),
                "bih": u((4 * hid,), hid),
                "bhh": u((4 * hid,), hid)}

    return {
        "enc1": lstm(F, H),     # Encoder.rnn1
        "enc2": lstm(H, E),     # Encoder.rnn2
        "dec1": lstm(E, E),     # Decoder.rnn1
        "dec2": lstm(E, H),     # Decoder.rnn2
        "lin_w": u((F, H), H),  # Decoder.dense_layers.weight
        "lin_b": u((F,), H),    # Decoder.dense_layers.bias
    }


# ----------------------- pure-JAX reference (for checking) -------------------

def _lstm_ref(xs, p):
    hid = p["whh"].shape[1]
    wih_t, whh_t = p["wih"].T, p["whh"].T
    b = p["bih"] + p["bhh"]

    def step(carry, x_t):
        h, c = carry
        gates = x_t @ wih_t + h @ whh_t + b
        i = jax.nn.sigmoid(gates[0 * hid:1 * hid])
        f = jax.nn.sigmoid(gates[1 * hid:2 * hid])
        g = jnp.tanh(gates[2 * hid:3 * hid])
        o = jax.nn.sigmoid(gates[3 * hid:4 * hid])
        c = f * c + i * g
        h = o * jnp.tanh(c)
        return (h, c), h

    (h, _), ys = lax.scan(step, (jnp.zeros(hid), jnp.zeros(hid)), xs)
    return ys, h


def rae_ref(x, params, embed_dim):
    seq_len = x.shape[0]
    ys1, _ = _lstm_ref(x, params["enc1"])
    _, z = _lstm_ref(ys1, params["enc2"])
    xs = jnp.tile(z[None, :], (seq_len, 1))
    ys3, _ = _lstm_ref(xs, params["dec1"])
    ys4, _ = _lstm_ref(ys3, params["dec2"])
    return ys4 @ params["lin_w"].T + params["lin_b"]


# ---------------------------------- main --------------------------------------

if __name__ == "__main__":
    seq_len, n_features, embed_dim = 8, 4, 32

    key = jax.random.PRNGKey(0)
    k_x, k_p = jax.random.split(key)
    x = jax.random.normal(k_x, (seq_len, n_features), jnp.float32)
    params = init_params(k_p, n_features, embed_dim)

    out = rae_forward(x, params, embed_dim)
    out = jax.block_until_ready(out)

    ref = rae_ref(x, params, embed_dim)
    assert out.shape == (seq_len, n_features)
    # Tolerance reflects bf16 matmul operands (f32 accumulation) vs. the
    # full-f32 reference; set MATMUL_DTYPE = jnp.float32 for 1e-4 agreement.
    assert jnp.allclose(out, ref, atol=_TOL, rtol=_TOL), "mismatch vs reference"

    print("KERNEL_OK")
</pallas_src>

<mosaic_0001>
module attributes {stable_mosaic.version = 11 : i64} {
  func.func @rae_kernel(%arg0: memref<8x4xf32, #tpu.memory_space<vmem>>, %arg1: memref<4x512xbf16, #tpu.memory_space<vmem>>, %arg2: memref<128x512xbf16, #tpu.memory_space<vmem>>, %arg3: memref<1x512xf32, #tpu.memory_space<vmem>>, %arg4: memref<256x512xbf16, #tpu.memory_space<vmem>>, %arg5: memref<1x512xf32, #tpu.memory_space<vmem>>, %arg6: memref<128x512xbf16, #tpu.memory_space<vmem>>, %arg7: memref<128x512xbf16, #tpu.memory_space<vmem>>, %arg8: memref<1x512xf32, #tpu.memory_space<vmem>>, %arg9: memref<256x512xbf16, #tpu.memory_space<vmem>>, %arg10: memref<1x512xf32, #tpu.memory_space<vmem>>, %arg11: memref<128x128xbf16, #tpu.memory_space<vmem>>, %arg12: memref<1x128xf32, #tpu.memory_space<vmem>>, %arg13: memref<8x128xf32, #tpu.memory_space<vmem>>) attributes {dimension_semantics = [], scalar_prefetch = 0 : i64, scratch_operands = 0 : i64, tpu.core_type = #tpu.core_type<tc>} {
    %c0 = arith.constant 0 : index
    %c0_0 = arith.constant 0 : index
    %0 = vector.load %arg2[%c0, %c0_0] : memref<128x512xbf16, #tpu.memory_space<vmem>>, vector<128x512xbf16>
    %c0_1 = arith.constant 0 : index
    %c0_2 = arith.constant 0 : index
    %1 = vector.load %arg4[%c0_1, %c0_2] : memref<256x512xbf16, #tpu.memory_space<vmem>>, vector<256x512xbf16>
    %c0_3 = arith.constant 0 : index
    %c0_4 = arith.constant 0 : index
    %2 = vector.load %arg5[%c0_3, %c0_4] : memref<1x512xf32, #tpu.memory_space<vmem>>, vector<1x512xf32>
    %c0_5 = arith.constant 0 : index
    %c0_6 = arith.constant 0 : index
    %3 = vector.load %arg7[%c0_5, %c0_6] : memref<128x512xbf16, #tpu.memory_space<vmem>>, vector<128x512xbf16>
    %c0_7 = arith.constant 0 : index
    %c0_8 = arith.constant 0 : index
    %4 = vector.load %arg9[%c0_7, %c0_8] : memref<256x512xbf16, #tpu.memory_space<vmem>>, vector<256x512xbf16>
    %c0_9 = arith.constant 0 : index
    %c0_10 = arith.constant 0 : index
    %5 = vector.load %arg10[%c0_9, %c0_10] : memref<1x512xf32, #tpu.memory_space<vmem>>, vector<1x512xf32>
    %c0_11 = arith.constant 0 : index
    %c0_12 = arith.constant 0 : index
    %6 = vector.load %arg0[%c0_11, %c0_12] : memref<8x4xf32, #tpu.memory_space<vmem>>, vector<8x4xf32>
    %7 = arith.truncf %6 : vector<8x4xf32> to vector<8x4xbf16>
    %c0_13 = arith.constant 0 : index
    %c0_14 = arith.constant 0 : index
    %8 = vector.load %arg1[%c0_13, %c0_14] : memref<4x512xbf16, #tpu.memory_space<vmem>>, vector<4x512xbf16>
    %cst = arith.constant dense<0.000000e+00> : vector<8x512xf32>
    %9 = tpu.matmul %7, %8, %cst {dimension_numbers = #tpu.dot_dimension_numbers<[1], [0], [0], [1], [0, 0, 1, 1], [], []>} : vector<8x4xbf16>, vector<4x512xbf16>, vector<8x512xf32> -> vector<8x512xf32>
    %c0_15 = arith.constant 0 : index
    %c0_16 = arith.constant 0 : index
    %10 = vector.load %arg3[%c0_15, %c0_16] : memref<1x512xf32, #tpu.memory_space<vmem>>, vector<1x512xf32>
    %11 = vector.broadcast %10 : vector<1x512xf32> to vector<8x512xf32>
    %12 = arith.addf %9, %11 : vector<8x512xf32>
    %cst_17 = arith.constant 0.000000e+00 : f32
    %13 = vector.broadcast %cst_17 : f32 to vector<1x128xf32>
    %cst_18 = arith.constant 0.000000e+00 : f32
    %14 = vector.broadcast %cst_18 : f32 to vector<1x128xf32>
    %cst_19 = arith.constant 0.000000e+00 : f32
    %15 = vector.broadcast %cst_19 : f32 to vector<1x128xf32>
    %cst_20 = arith.constant 0.000000e+00 : f32
    %16 = vector.broadcast %cst_20 : f32 to vector<1x128xf32>
    %17 = vector.extract_strided_slice %12 {offsets = [0, 0], sizes = [1, 512], strides = [1, 1]} : vector<8x512xf32> to vector<1x512xf32>
    %18 = arith.truncf %13 : vector<1x128xf32> to vector<1x128xbf16>
    %cst_21 = arith.constant dense<0.000000e+00> : vector<1x512xf32>
    %19 = tpu.matmul %18, %0, %cst_21 {dimension_numbers = #tpu.dot_dimension_numbers<[1], [0], [0], [1], [0, 0, 1, 1], [], []>} : vector<1x128xbf16>, vector<128x512xbf16>, vector<1x512xf32> -> vector<1x512xf32>
    %20 = arith.addf %17, %19 : vector<1x512xf32>
    %21 = vector.extract_strided_slice %20 {offsets = [0, 0], sizes = [1, 384], strides = [1, 1]} : vector<1x512xf32> to vector<1x384xf32>
    %22 = arith.negf %21 : vector<1x384xf32>
    %23 = math.exp %22 : vector<1x384xf32>
    %cst_22 = arith.constant 1.000000e+00 : f32
    %24 = vector.broadcast %cst_22 : f32 to vector<1x384xf32>
    %25 = arith.addf %24, %23 : vector<1x384xf32>
    %26 = arith.divf %24, %25 : vector<1x384xf32>
    %27 = vector.extract_strided_slice %26 {offsets = [0, 0], sizes = [1, 128], strides = [1, 1]} : vector<1x384xf32> to vector<1x128xf32>
    %28 = vector.extract_strided_slice %26 {offsets = [0, 128], sizes = [1, 128], strides = [1, 1]} : vector<1x384xf32> to vector<1x128xf32>
    %29 = vector.extract_strided_slice %26 {offsets = [0, 256], sizes = [1, 128], strides = [1, 1]} : vector<1x384xf32> to vector<1x128xf32>
    %30 = vector.extract_strided_slice %20 {offsets = [0, 384], sizes = [1, 128], strides = [1, 1]} : vector<1x512xf32> to vector<1x128xf32>
    %31 = math.tanh %30 : vector<1x128xf32>
    %32 = arith.mulf %28, %14 : vector<1x128xf32>
    %33 = arith.mulf %27, %31 : vector<1x128xf32>
    %34 = arith.addf %32, %33 : vector<1x128xf32>
    %35 = math.tanh %34 : vector<1x128xf32>
    %36 = arith.mulf %29, %35 : vector<1x128xf32>
    %37 = tpu.concatenate %36, %15 in 1 : vector<1x128xf32>, vector<1x128xf32> -> vector<1x256xf32>
    %38 = arith.truncf %37 : vector<1x256xf32> to vector<1x256xbf16>
    %cst_23 = arith.constant dense<0.000000e+00> : vector<1x512xf32>
    %39 = tpu.matmul %38, %1, %cst_23 {dimension_numbers = #tpu.dot_dimension_numbers<[1], [0], [0], [1], [0, 0, 1, 1], [], []>} : vector<1x256xbf16>, vector<256x512xbf16>, vector<1x512xf32> -> vector<1x512xf32>
    %40 = arith.addf %39, %2 : vector<1x512xf32>
    %41 = vector.extract_strided_slice %40 {offsets = [0, 0], sizes = [1, 384], strides = [1, 1]} : vector<1x512xf32> to vector<1x384xf32>
    %42 = arith.negf %41 : vector<1x384xf32>
    %43 = math.exp %42 : vector<1x384xf32>
    %cst_24 = arith.constant 1.000000e+00 : f32
    %44 = vector.broadcast %cst_24 : f32 to vector<1x384xf32>
    %45 = arith.addf %44, %43 : vector<1x384xf32>
    %46 = arith.divf %44, %45 : vector<1x384xf32>
    %47 = vector.extract_strided_slice %46 {offsets = [0, 0], sizes = [1, 128], strides = [1, 1]} : vector<1x384xf32> to vector<1x128xf32>
    %48 = vector.extract_strided_slice %46 {offsets = [0, 128], sizes = [1, 128], strides = [1, 1]} : vector<1x384xf32> to vector<1x128xf32>
    %49 = vector.extract_strided_slice %46 {offsets = [0, 256], sizes = [1, 128], strides = [1, 1]} : vector<1x384xf32> to vector<1x128xf32>
    %50 = vector.extract_strided_slice %40 {offsets = [0, 384], sizes = [1, 128], strides = [1, 1]} : vector<1x512xf32> to vector<1x128xf32>
    %51 = math.tanh %50 : vector<1x128xf32>
    %52 = arith.mulf %48, %16 : vector<1x128xf32>
    %53 = arith.mulf %47, %51 : vector<1x128xf32>
    %54 = arith.addf %52, %53 : vector<1x128xf32>
    %55 = math.tanh %54 : vector<1x128xf32>
    %56 = arith.mulf %49, %55 : vector<1x128xf32>
    %57 = vector.extract_strided_slice %12 {offsets = [1, 0], sizes = [1, 512], strides = [1, 1]} : vector<8x512xf32> to vector<1x512xf32>
    %58 = arith.truncf %36 : vector<1x128xf32> to vector<1x128xbf16>
    %cst_25 = arith.constant dense<0.000000e+00> : vector<1x512xf32>
    %59 = tpu.matmul %58, %0, %cst_25 {dimension_numbers = #tpu.dot_dimension_numbers<[1], [0], [0], [1], [0, 0, 1, 1], [], []>} : vector<1x128xbf16>, vector<128x512xbf16>, vector<1x512xf32> -> vector<1x512xf32>
    %60 = arith.addf %57, %59 : vector<1x512xf32>
    %61 = vector.extract_strided_slice %60 {offsets = [0, 0], sizes = [1, 384], strides = [1, 1]} : vector<1x512xf32> to vector<1x384xf32>
    %62 = arith.negf %61 : vector<1x384xf32>
    %63 = math.exp %62 : vector<1x384xf32>
    %cst_26 = arith.constant 1.000000e+00 : f32
    %64 = vector.broadcast %cst_26 : f32 to vector<1x384xf32>
    %65 = arith.addf %64, %63 : vector<1x384xf32>
    %66 = arith.divf %64, %65 : vector<1x384xf32>
    %67 = vector.extract_strided_slice %66 {offsets = [0, 0], sizes = [1, 128], strides = [1, 1]} : vector<1x384xf32> to vector<1x128xf32>
    %68 = vector.extract_strided_slice %66 {offsets = [0, 128], sizes = [1, 128], strides = [1, 1]} : vector<1x384xf32> to vector<1x128xf32>
    %69 = vector.extract_strided_slice %66 {offsets = [0, 256], sizes = [1, 128], strides = [1, 1]} : vector<1x384xf32> to vector<1x128xf32>
    %70 = vector.extract_strided_slice %60 {offsets = [0, 384], sizes = [1, 128], strides = [1, 1]} : vector<1x512xf32> to vector<1x128xf32>
    %71 = math.tanh %70 : vector<1x128xf32>
    %72 = arith.mulf %68, %34 : vector<1x128xf32>
    %73 = arith.mulf %67, %71 : vector<1x128xf32>
    %74 = arith.addf %72, %73 : vector<1x128xf32>
    %75 = math.tanh %74 : vector<1x128xf32>
    %76 = arith.mulf %69, %75 : vector<1x128xf32>
    %77 = tpu.concatenate %76, %56 in 1 : vector<1x128xf32>, vector<1x128xf32> -> vector<1x256xf32>
    %78 = arith.truncf %77 : vector<1x256xf32> to vector<1x256xbf16>
    %cst_27 = arith.constant dense<0.000000e+00> : vector<1x512xf32>
    %79 = tpu.matmul %78, %1, %cst_27 {dimension_numbers = #tpu.dot_dimension_numbers<[1], [0], [0], [1], [0, 0, 1, 1], [], []>} : vector<1x256xbf16>, vector<256x512xbf16>, vector<1x512xf32> -> vector<1x512xf32>
    %80 = arith.addf %79, %2 : vector<1x512xf32>
    %81 = vector.extract_strided_slice %80 {offsets = [0, 0], sizes = [1, 384], strides = [1, 1]} : vector<1x512xf32> to vector<1x384xf32>
    %82 = arith.negf %81 : vector<1x384xf32>
    %83 = math.exp %82 : vector<1x384xf32>
    %cst_28 = arith.constant 1.000000e+00 : f32
    %84 = vector.broadcast %cst_28 : f32 to vector<1x384xf32>
    %85 = arith.addf %84, %83 : vector<1x384xf32>
    %86 = arith.divf %84, %85 : vector<1x384xf32>
    %87 = vector.extract_strided_slice %86 {offsets = [0, 0], sizes = [1, 128], strides = [1, 1]} : vector<1x384xf32> to vector<1x128xf32>
    %88 = vector.extract_strided_slice %86 {offsets = [0, 128], sizes = [1, 128], strides = [1, 1]} : vector<1x384xf32> to vector<1x128xf32>
    %89 = vector.extract_strided_slice %86 {offsets = [0, 256], sizes = [1, 128], strides = [1, 1]} : vector<1x384xf32> to vector<1x128xf32>
    %90 = vector.extract_strided_slice %80 {offsets = [0, 384], sizes = [1, 128], strides = [1, 1]} : vector<1x512xf32> to vector<1x128xf32>
    %91 = math.tanh %90 : vector<1x128xf32>
    %92 = arith.mulf %88, %54 : vector<1x128xf32>
    %93 = arith.mulf %87, %91 : vector<1x128xf32>
    %94 = arith.addf %92, %93 : vector<1x128xf32>
    %95 = math.tanh %94 : vector<1x128xf32>
    %96 = arith.mulf %89, %95 : vector<1x128xf32>
    %97 = vector.extract_strided_slice %12 {offsets = [2, 0], sizes = [1, 512], strides = [1, 1]} : vector<8x512xf32> to vector<1x512xf32>
    %98 = arith.truncf %76 : vector<1x128xf32> to vector<1x128xbf16>
    %cst_29 = arith.constant dense<0.000000e+00> : vector<1x512xf32>
    %99 = tpu.matmul %98, %0, %cst_29 {dimension_numbers = #tpu.dot_dimension_numbers<[1], [0], [0], [1], [0, 0, 1, 1], [], []>} : vector<1x128xbf16>, vector<128x512xbf16>, vector<1x512xf32> -> vector<1x512xf32>
    %100 = arith.addf %97, %99 : vector<1x512xf32>
    %101 = vector.extract_strided_slice %100 {offsets = [0, 0], sizes = [1, 384], strides = [1, 1]} : vector<1x512xf32> to vector<1x384xf32>
    %102 = arith.negf %101 : vector<1x384xf32>
    %103 = math.exp %102 : vector<1x384xf32>
    %cst_30 = arith.constant 1.000000e+00 : f32
    %104 = vector.broadcast %cst_30 : f32 to vector<1x384xf32>
    %105 = arith.addf %104, %103 : vector<1x384xf32>
    %106 = arith.divf %104, %105 : vector<1x384xf32>
    %107 = vector.extract_strided_slice %106 {offsets = [0, 0], sizes = [1, 128], strides = [1, 1]} : vector<1x384xf32> to vector<1x128xf32>
    %108 = vector.extract_strided_slice %106 {offsets = [0, 128], sizes = [1, 128], strides = [1, 1]} : vector<1x384xf32> to vector<1x128xf32>
    %109 = vector.extract_strided_slice %106 {offsets = [0, 256], sizes = [1, 128], strides = [1, 1]} : vector<1x384xf32> to vector<1x128xf32>
    %110 = vector.extract_strided_slice %100 {offsets = [0, 384], sizes = [1, 128], strides = [1, 1]} : vector<1x512xf32> to vector<1x128xf32>
    %111 = math.tanh %110 : vector<1x128xf32>
    %112 = arith.mulf %108, %74 : vector<1x128xf32>
    %113 = arith.mulf %107, %111 : vector<1x128xf32>
    %114 = arith.addf %112, %113 : vector<1x128xf32>
    %115 = math.tanh %114 : vector<1x128xf32>
    %116 = arith.mulf %109, %115 : vector<1x128xf32>
    %117 = tpu.concatenate %116, %96 in 1 : vector<1x128xf32>, vector<1x128xf32> -> vector<1x256xf32>
    %118 = arith.truncf %117 : vector<1x256xf32> to vector<1x256xbf16>
    %cst_31 = arith.constant dense<0.000000e+00> : vector<1x512xf32>
    %119 = tpu.matmul %118, %1, %cst_31 {dimension_numbers = #tpu.dot_dimension_numbers<[1], [0], [0], [1], [0, 0, 1, 1], [], []>} : vector<1x256xbf16>, vector<256x512xbf16>, vector<1x512xf32> -> vector<1x512xf32>
    %120 = arith.addf %119, %2 : vector<1x512xf32>
    %121 = vector.extract_strided_slice %120 {offsets = [0, 0], sizes = [1, 384], strides = [1, 1]} : vector<1x512xf32> to vector<1x384xf32>
    %122 = arith.negf %121 : vector<1x384xf32>
    %123 = math.exp %122 : vector<1x384xf32>
    %cst_32 = arith.constant 1.000000e+00 : f32
    %124 = vector.broadcast %cst_32 : f32 to vector<1x384xf32>
    %125 = arith.addf %124, %123 : vector<1x384xf32>
    %126 = arith.divf %124, %125 : vector<1x384xf32>
    %127 = vector.extract_strided_slice %126 {offsets = [0, 0], sizes = [1, 128], strides = [1, 1]} : vector<1x384xf32> to vector<1x128xf32>
    %128 = vector.extract_strided_slice %126 {offsets = [0, 128], sizes = [1, 128], strides = [1, 1]} : vector<1x384xf32> to vector<1x128xf32>
    %129 = vector.extract_strided_slice %126 {offsets = [0, 256], sizes = [1, 128], strides = [1, 1]} : vector<1x384xf32> to vector<1x128xf32>
    %130 = vector.extract_strided_slice %120 {offsets = [0, 384], sizes = [1, 128], strides = [1, 1]} : vector<1x512xf32> to vector<1x128xf32>
    %131 = math.tanh %130 : vector<1x128xf32>
    %132 = arith.mulf %128, %94 : vector<1x128xf32>
    %133 = arith.mulf %127, %131 : vector<1x128xf32>
    %134 = arith.addf %132, %133 : vector<1x128xf32>
    %135 = math.tanh %134 : vector<1x128xf32>
    %136 = arith.mulf %129, %135 : vector<1x128xf32>
    %137 = vector.extract_strided_slice %12 {offsets = [3, 0], sizes = [1, 512], strides = [1, 1]} : vector<8x512xf32> to vector<1x512xf32>
    %138 = arith.truncf %116 : vector<1x128xf32> to vector<1x128xbf16>
    %cst_33 = arith.constant dense<0.000000e+00> : vector<1x512xf32>
    %139 = tpu.matmul %138, %0, %cst_33 {dimension_numbers = #tpu.dot_dimension_numbers<[1], [0], [0], [1], [0, 0, 1, 1], [], []>} : vector<1x128xbf16>, vector<128x512xbf16>, vector<1x512xf32> -> vector<1x512xf32>
    %140 = arith.addf %137, %139 : vector<1x512xf32>
    %141 = vector.extract_strided_slice %140 {offsets = [0, 0], sizes = [1, 384], strides = [1, 1]} : vector<1x512xf32> to vector<1x384xf32>
    %142 = arith.negf %141 : vector<1x384xf32>
    %143 = math.exp %142 : vector<1x384xf32>
    %cst_34 = arith.constant 1.000000e+00 : f32
    %144 = vector.broadcast %cst_34 : f32 to vector<1x384xf32>
    %145 = arith.addf %144, %143 : vector<1x384xf32>
    %146 = arith.divf %144, %145 : vector<1x384xf32>
    %147 = vector.extract_strided_slice %146 {offsets = [0, 0], sizes = [1, 128], strides = [1, 1]} : vector<1x384xf32> to vector<1x128xf32>
    %148 = vector.extract_strided_slice %146 {offsets = [0, 128], sizes = [1, 128], strides = [1, 1]} : vector<1x384xf32> to vector<1x128xf32>
    %149 = vector.extract_strided_slice %146 {offsets = [0, 256], sizes = [1, 128], strides = [1, 1]} : vector<1x384xf32> to vector<1x128xf32>
    %150 = vector.extract_strided_slice %140 {offsets = [0, 384], sizes = [1, 128], strides = [1, 1]} : vector<1x512xf32> to vector<1x128xf32>
    %151 = math.tanh %150 : vector<1x128xf32>
    %152 = arith.mulf %148, %114 : vector<1x128xf32>
    %153 = arith.mulf %147, %151 : vector<1x128xf32>
    %154 = arith.addf %152, %153 : vector<1x128xf32>
    %155 = math.tanh %154 : vector<1x128xf32>
    %156 = arith.mulf %149, %155 : vector<1x128xf32>
    %157 = tpu.concatenate %156, %136 in 1 : vector<1x128xf32>, vector<1x128xf32> -> vector<1x256xf32>
    %158 = arith.truncf %157 : vector<1x256xf32> to vector<1x256xbf16>
    %cst_35 = arith.constant dense<0.000000e+00> : vector<1x512xf32>
    %159 = tpu.matmul %158, %1, %cst_35 {dimension_numbers = #tpu.dot_dimension_numbers<[1], [0], [0], [1], [0, 0, 1, 1], [], []>} : vector<1x256xbf16>, vector<256x512xbf16>, vector<1x512xf32> -> vector<1x512xf32>
    %160 = arith.addf %159, %2 : vector<1x512xf32>
    %161 = vector.extract_strided_slice %160 {offsets = [0, 0], sizes = [1, 384], strides = [1, 1]} : vector<1x512xf32> to vector<1x384xf32>
    %162 = arith.negf %161 : vector<1x384xf32>
    %163 = math.exp %162 : vector<1x384xf32>
    %cst_36 = arith.constant 1.000000e+00 : f32
    %164 = vector.broadcast %cst_36 : f32 to vector<1x384xf32>
    %165 = arith.addf %164, %163 : vector<1x384xf32>
    %166 = arith.divf %164, %165 : vector<1x384xf32>
    %167 = vector.extract_strided_slice %166 {offsets = [0, 0], sizes = [1, 128], strides = [1, 1]} : vector<1x384xf32> to vector<1x128xf32>
    %168 = vector.extract_strided_slice %166 {offsets = [0, 128], sizes = [1, 128], strides = [1, 1]} : vector<1x384xf32> to vector<1x128xf32>
    %169 = vector.extract_strided_slice %166 {offsets = [0, 256], sizes = [1, 128], strides = [1, 1]} : vector<1x384xf32> to vector<1x128xf32>
    %170 = vector.extract_strided_slice %160 {offsets = [0, 384], sizes = [1, 128], strides = [1, 1]} : vector<1x512xf32> to vector<1x128xf32>
    %171 = math.tanh %170 : vector<1x128xf32>
    %172 = arith.mulf %168, %134 : vector<1x128xf32>
    %173 = arith.mulf %167, %171 : vector<1x128xf32>
    %174 = arith.addf %172, %173 : vector<1x128xf32>
    %175 = math.tanh %174 : vector<1x128xf32>
    %176 = arith.mulf %169, %175 : vector<1x128xf32>
    %177 = vector.extract_strided_slice %12 {offsets = [4, 0], sizes = [1, 512], strides = [1, 1]} : vector<8x512xf32> to vector<1x512xf32>
    %178 = arith.truncf %156 : vector<1x128xf32> to vector<1x128xbf16>
    %cst_37 = arith.constant dense<0.000000e+00> : vector<1x512xf32>
    %179 = tpu.matmul %178, %0, %cst_37 {dimension_numbers = #tpu.dot_dimension_numbers<[1], [0], [0], [1], [0, 0, 1, 1], [], []>} : vector<1x128xbf16>, vector<128x512xbf16>, vector<1x512xf32> -> vector<1x512xf32>
    %180 = arith.addf %177, %179 : vector<1x512xf32>
    %181 = vector.extract_strided_slice %180 {offsets = [0, 0], sizes = [1, 384], strides = [1, 1]} : vector<1x512xf32> to vector<1x384xf32>
    %182 = arith.negf %181 : vector<1x384xf32>
    %183 = math.exp %182 : vector<1x384xf32>
    %cst_38 = arith.constant 1.000000e+00 : f32
    %184 = vector.broadcast %cst_38 : f32 to vector<1x384xf32>
    %185 = arith.addf %184, %183 : vector<1x384xf32>
    %186 = arith.divf %184, %185 : vector<1x384xf32>
    %187 = vector.extract_strided_slice %186 {offsets = [0, 0], sizes = [1, 128], strides = [1, 1]} : vector<1x384xf32> to vector<1x128xf32>
    %188 = vector.extract_strided_slice %186 {offsets = [0, 128], sizes = [1, 128], strides = [1, 1]} : vector<1x384xf32> to vector<1x128xf32>
    %189 = vector.extract_strided_slice %186 {offsets = [0, 256], sizes = [1, 128], strides = [1, 1]} : vector<1x384xf32> to vector<1x128xf32>
    %190 = vector.extract_strided_slice %180 {offsets = [0, 384], sizes = [1, 128], strides = [1, 1]} : vector<1x512xf32> to vector<1x128xf32>
    %191 = math.tanh %190 : vector<1x128xf32>
    %192 = arith.mulf %188, %154 : vector<1x128xf32>
    %193 = arith.mulf %187, %191 : vector<1x128xf32>
    %194 = arith.addf %192, %193 : vector<1x128xf32>
    %195 = math.tanh %194 : vector<1x128xf32>
    %196 = arith.mulf %189, %195 : vector<1x128xf32>
    %197 = tpu.concatenate %196, %176 in 1 : vector<1x128xf32>, vector<1x128xf32> -> vector<1x256xf32>
    %198 = arith.truncf %197 : vector<1x256xf32> to vector<1x256xbf16>
    %cst_39 = arith.constant dense<0.000000e+00> : vector<1x512xf32>
    %199 = tpu.matmul %198, %1, %cst_39 {dimension_numbers = #tpu.dot_dimension_numbers<[1], [0], [0], [1], [0, 0, 1, 1], [], []>} : vector<1x256xbf16>, vector<256x512xbf16>, vector<1x512xf32> -> vector<1x512xf32>
    %200 = arith.addf %199, %2 : vector<1x512xf32>
    %201 = vector.extract_strided_slice %200 {offsets = [0, 0], sizes = [1, 384], strides = [1, 1]} : vector<1x512xf32> to vector<1x384xf32>
    %202 = arith.negf %201 : vector<1x384xf32>
    %203 = math.exp %202 : vector<1x384xf32>
    %cst_40 = arith.constant 1.000000e+00 : f32
    %204 = vector.broadcast %cst_40 : f32 to vector<1x384xf32>
    %205 = arith.addf %204, %203 : vector<1x384xf32>
    %206 = arith.divf %204, %205 : vector<1x384xf32>
    %207 = vector.extract_strided_slice %206 {offsets = [0, 0], sizes = [1, 128], strides = [1, 1]} : vector<1x384xf32> to vector<1x128xf32>
    %208 = vector.extract_strided_slice %206 {offsets = [0, 128], sizes = [1, 128], strides = [1, 1]} : vector<1x384xf32> to vector<1x128xf32>
    %209 = vector.extract_strided_slice %206 {offsets = [0, 256], sizes = [1, 128], strides = [1, 1]} : vector<1x384xf32> to vector<1x128xf32>
    %210 = vector.extract_strided_slice %200 {offsets = [0, 384], sizes = [1, 128], strides = [1, 1]} : vector<1x512xf32> to vector<1x128xf32>
    %211 = math.tanh %210 : vector<1x128xf32>
    %212 = arith.mulf %208, %174 : vector<1x128xf32>
    %213 = arith.mulf %207, %211 : vector<1x128xf32>
    %214 = arith.addf %212, %213 : vector<1x128xf32>
    %215 = math.tanh %214 : vector<1x128xf32>
    %216 = arith.mulf %209, %215 : vector<1x128xf32>
    %217 = vector.extract_strided_slice %12 {offsets = [5, 0], sizes = [1, 512], strides = [1, 1]} : vector<8x512xf32> to vector<1x512xf32>
    %218 = arith.truncf %196 : vector<1x128xf32> to vector<1x128xbf16>
    %cst_41 = arith.constant dense<0.000000e+00> : vector<1x512xf32>
    %219 = tpu.matmul %218, %0, %cst_41 {dimension_numbers = #tpu.dot_dimension_numbers<[1], [0], [0], [1], [0, 0, 1, 1], [], []>} : vector<1x128xbf16>, vector<128x512xbf16>, vector<1x512xf32> -> vector<1x512xf32>
    %220 = arith.addf %217, %219 : vector<1x512xf32>
    %221 = vector.extract_strided_slice %220 {offsets = [0, 0], sizes = [1, 384], strides = [1, 1]} : vector<1x512xf32> to vector<1x384xf32>
    %222 = arith.negf %221 : vector<1x384xf32>
    %223 = math.exp %222 : vector<1x384xf32>
    %cst_42 = arith.constant 1.000000e+00 : f32
    %224 = vector.broadcast %cst_42 : f32 to vector<1x384xf32>
    %225 = arith.addf %224, %223 : vector<1x384xf32>
    %226 = arith.divf %224, %225 : vector<1x384xf32>
    %227 = vector.extract_strided_slice %226 {offsets = [0, 0], sizes = [1, 128], strides = [1, 1]} : vector<1x384xf32> to vector<1x128xf32>
    %228 = vector.extract_strided_slice %226 {offsets = [0, 128], sizes = [1, 128], strides = [1, 1]} : vector<1x384xf32> to vector<1x128xf32>
    %229 = vector.extract_strided_slice %226 {offsets = [0, 256], sizes = [1, 128], strides = [1, 1]} : vector<1x384xf32> to vector<1x128xf32>
    %230 = vector.extract_strided_slice %220 {offsets = [0, 384], sizes = [1, 128], strides = [1, 1]} : vector<1x512xf32> to vector<1x128xf32>
    %231 = math.tanh %230 : vector<1x128xf32>
    %232 = arith.mulf %228, %194 : vector<1x128xf32>
    %233 = arith.mulf %227, %231 : vector<1x128xf32>
    %234 = arith.addf %232, %233 : vector<1x128xf32>
    %235 = math.tanh %234 : vector<1x128xf32>
    %236 = arith.mulf %229, %235 : vector<1x128xf32>
    %237 = tpu.concatenate %236, %216 in 1 : vector<1x128xf32>, vector<1x128xf32> -> vector<1x256xf32>
    %238 = arith.truncf %237 : vector<1x256xf32> to vector<1x256xbf16>
    %cst_43 = arith.constant dense<0.000000e+00> : vector<1x512xf32>
    %239 = tpu.matmul %238, %1, %cst_43 {dimension_numbers = #tpu.dot_dimension_numbers<[1], [0], [0], [1], [0, 0, 1, 1], [], []>} : vector<1x256xbf16>, vector<256x512xbf16>, vector<1x512xf32> -> vector<1x512xf32>
    %240 = arith.addf %239, %2 : vector<1x512xf32>
    %241 = vector.extract_strided_slice %240 {offsets = [0, 0], sizes = [1, 384], strides = [1, 1]} : vector<1x512xf32> to vector<1x384xf32>
    %242 = arith.negf %241 : vector<1x384xf32>
    %243 = math.exp %242 : vector<1x384xf32>
    %cst_44 = arith.constant 1.000000e+00 : f32
    %244 = vector.broadcast %cst_44 : f32 to vector<1x384xf32>
    %245 = arith.addf %244, %243 : vector<1x384xf32>
    %246 = arith.divf %244, %245 : vector<1x384xf32>
    %247 = vector.extract_strided_slice %246 {offsets = [0, 0], sizes = [1, 128], strides = [1, 1]} : vector<1x384xf32> to vector<1x128xf32>
    %248 = vector.extract_strided_slice %246 {offsets = [0, 128], sizes = [1, 128], strides = [1, 1]} : vector<1x384xf32> to vector<1x128xf32>
    %249 = vector.extract_strided_slice %246 {offsets = [0, 256], sizes = [1, 128], strides = [1, 1]} : vector<1x384xf32> to vector<1x128xf32>
    %250 = vector.extract_strided_slice %240 {offsets = [0, 384], sizes = [1, 128], strides = [1, 1]} : vector<1x512xf32> to vector<1x128xf32>
    %251 = math.tanh %250 : vector<1x128xf32>
    %252 = arith.mulf %248, %214 : vector<1x128xf32>
    %253 = arith.mulf %247, %251 : vector<1x128xf32>
    %254 = arith.addf %252, %253 : vector<1x128xf32>
    %255 = math.tanh %254 : vector<1x128xf32>
    %256 = arith.mulf %249, %255 : vector<1x128xf32>
    %257 = vector.extract_strided_slice %12 {offsets = [6, 0], sizes = [1, 512], strides = [1, 1]} : vector<8x512xf32> to vector<1x512xf32>
    %258 = arith.truncf %236 : vector<1x128xf32> to vector<1x128xbf16>
    %cst_45 = arith.constant dense<0.000000e+00> : vector<1x512xf32>
    %259 = tpu.matmul %258, %0, %cst_45 {dimension_numbers = #tpu.dot_dimension_numbers<[1], [0], [0], [1], [0, 0, 1, 1], [], []>} : vector<1x128xbf16>, vector<128x512xbf16>, vector<1x512xf32> -> vector<1x512xf32>
    %260 = arith.addf %257, %259 : vector<1x512xf32>
    %261 = vector.extract_strided_slice %260 {offsets = [0, 0], sizes = [1, 384], strides = [1, 1]} : vector<1x512xf32> to vector<1x384xf32>
    %262 = arith.negf %261 : vector<1x384xf32>
    %263 = math.exp %262 : vector<1x384xf32>
    %cst_46 = arith.constant 1.000000e+00 : f32
    %264 = vector.broadcast %cst_46 : f32 to vector<1x384xf32>
    %265 = arith.addf %264, %263 : vector<1x384xf32>
    %266 = arith.divf %264, %265 : vector<1x384xf32>
    %267 = vector.extract_strided_slice %266 {offsets = [0, 0], sizes = [1, 128], strides = [1, 1]} : vector<1x384xf32> to vector<1x128xf32>
    %268 = vector.extract_strided_slice %266 {offsets = [0, 128], sizes = [1, 128], strides = [1, 1]} : vector<1x384xf32> to vector<1x128xf32>
    %269 = vector.extract_strided_slice %266 {offsets = [0, 256], sizes = [1, 128], strides = [1, 1]} : vector<1x384xf32> to vector<1x128xf32>
    %270 = vector.extract_strided_slice %260 {offsets = [0, 384], sizes = [1, 128], strides = [1, 1]} : vector<1x512xf32> to vector<1x128xf32>
    %271 = math.tanh %270 : vector<1x128xf32>
    %272 = arith.mulf %268, %234 : vector<1x128xf32>
    %273 = arith.mulf %267, %271 : vector<1x128xf32>
    %274 = arith.addf %272, %273 : vector<1x128xf32>
    %275 = math.tanh %274 : vector<1x128xf32>
    %276 = arith.mulf %269, %275 : vector<1x128xf32>
    %277 = tpu.concatenate %276, %256 in 1 : vector<1x128xf32>, vector<1x128xf32> -> vector<1x256xf32>
    %278 = arith.truncf %277 : vector<1x256xf32> to vector<1x256xbf16>
    %cst_47 = arith.constant dense<0.000000e+00> : vector<1x512xf32>
    %279 = tpu.matmul %278, %1, %cst_47 {dimension_numbers = #tpu.dot_dimension_numbers<[1], [0], [0], [1], [0, 0, 1, 1], [], []>} : vector<1x256xbf16>, vector<256x512xbf16>, vector<1x512xf32> -> vector<1x512xf32>
    %280 = arith.addf %279, %2 : vector<1x512xf32>
    %281 = vector.extract_strided_slice %280 {offsets = [0, 0], sizes = [1, 384], strides = [1, 1]} : vector<1x512xf32> to vector<1x384xf32>
    %282 = arith.negf %281 : vector<1x384xf32>
    %283 = math.exp %282 : vector<1x384xf32>
    %cst_48 = arith.constant 1.000000e+00 : f32
    %284 = vector.broadcast %cst_48 : f32 to vector<1x384xf32>
    %285 = arith.addf %284, %283 : vector<1x384xf32>
    %286 = arith.divf %284, %285 : vector<1x384xf32>
    %287 = vector.extract_strided_slice %286 {offsets = [0, 0], sizes = [1, 128], strides = [1, 1]} : vector<1x384xf32> to vector<1x128xf32>
    %288 = vector.extract_strided_slice %286 {offsets = [0, 128], sizes = [1, 128], strides = [1, 1]} : vector<1x384xf32> to vector<1x128xf32>
    %289 = vector.extract_strided_slice %286 {offsets = [0, 256], sizes = [1, 128], strides = [1, 1]} : vector<1x384xf32> to vector<1x128xf32>
    %290 = vector.extract_strided_slice %280 {offsets = [0, 384], sizes = [1, 128], strides = [1, 1]} : vector<1x512xf32> to vector<1x128xf32>
    %291 = math.tanh %290 : vector<1x128xf32>
    %292 = arith.mulf %288, %254 : vector<1x128xf32>
    %293 = arith.mulf %287, %291 : vector<1x128xf32>
    %294 = arith.addf %292, %293 : vector<1x128xf32>
    %295 = math.tanh %294 : vector<1x128xf32>
    %296 = arith.mulf %289, %295 : vector<1x128xf32>
    %297 = vector.extract_strided_slice %12 {offsets = [7, 0], sizes = [1, 512], strides = [1, 1]} : vector<8x512xf32> to vector<1x512xf32>
    %298 = arith.truncf %276 : vector<1x128xf32> to vector<1x128xbf16>
    %cst_49 = arith.constant dense<0.000000e+00> : vector<1x512xf32>
    %299 = tpu.matmul %298, %0, %cst_49 {dimension_numbers = #tpu.dot_dimension_numbers<[1], [0], [0], [1], [0, 0, 1, 1], [], []>} : vector<1x128xbf16>, vector<128x512xbf16>, vector<1x512xf32> -> vector<1x512xf32>
    %300 = arith.addf %297, %299 : vector<1x512xf32>
    %301 = vector.extract_strided_slice %300 {offsets = [0, 0], sizes = [1, 384], strides = [1, 1]} : vector<1x512xf32> to vector<1x384xf32>
    %302 = arith.negf %301 : vector<1x384xf32>
    %303 = math.exp %302 : vector<1x384xf32>
    %cst_50 = arith.constant 1.000000e+00 : f32
    %304 = vector.broadcast %cst_50 : f32 to vector<1x384xf32>
    %305 = arith.addf %304, %303 : vector<1x384xf32>
    %306 = arith.divf %304, %305 : vector<1x384xf32>
    %307 = vector.extract_strided_slice %306 {offsets = [0, 0], sizes = [1, 128], strides = [1, 1]} : vector<1x384xf32> to vector<1x128xf32>
    %308 = vector.extract_strided_slice %306 {offsets = [0, 128], sizes = [1, 128], strides = [1, 1]} : vector<1x384xf32> to vector<1x128xf32>
    %309 = vector.extract_strided_slice %306 {offsets = [0, 256], sizes = [1, 128], strides = [1, 1]} : vector<1x384xf32> to vector<1x128xf32>
    %310 = vector.extract_strided_slice %300 {offsets = [0, 384], sizes = [1, 128], strides = [1, 1]} : vector<1x512xf32> to vector<1x128xf32>
    %311 = math.tanh %310 : vector<1x128xf32>
    %312 = arith.mulf %308, %274 : vector<1x128xf32>
    %313 = arith.mulf %307, %311 : vector<1x128xf32>
    %314 = arith.addf %312, %313 : vector<1x128xf32>
    %315 = math.tanh %314 : vector<1x128xf32>
    %316 = arith.mulf %309, %315 : vector<1x128xf32>
    %317 = tpu.concatenate %316, %296 in 1 : vector<1x128xf32>, vector<1x128xf32> -> vector<1x256xf32>
    %318 = arith.truncf %317 : vector<1x256xf32> to vector<1x256xbf16>
    %cst_51 = arith.constant dense<0.000000e+00> : vector<1x512xf32>
    %319 = tpu.matmul %318, %1, %cst_51 {dimension_numbers = #tpu.dot_dimension_numbers<[1], [0], [0], [1], [0, 0, 1, 1], [], []>} : vector<1x256xbf16>, vector<256x512xbf16>, vector<1x512xf32> -> vector<1x512xf32>
    %320 = arith.addf %319, %2 : vector<1x512xf32>
    %321 = vector.extract_strided_slice %320 {offsets = [0, 0], sizes = [1, 384], strides = [1, 1]} : vector<1x512xf32> to vector<1x384xf32>
    %322 = arith.negf %321 : vector<1x384xf32>
    %323 = math.exp %322 : vector<1x384xf32>
    %cst_52 = arith.constant 1.000000e+00 : f32
    %324 = vector.broadcast %cst_52 : f32 to vector<1x384xf32>
    %325 = arith.addf %324, %323 : vector<1x384xf32>
    %326 = arith.divf %324, %325 : vector<1x384xf32>
    %327 = vector.extract_strided_slice %326 {offsets = [0, 0], sizes = [1, 128], strides = [1, 1]} : vector<1x384xf32> to vector<1x128xf32>
    %328 = vector.extract_strided_slice %326 {offsets = [0, 128], sizes = [1, 128], strides = [1, 1]} : vector<1x384xf32> to vector<1x128xf32>
    %329 = vector.extract_strided_slice %326 {offsets = [0, 256], sizes = [1, 128], strides = [1, 1]} : vector<1x384xf32> to vector<1x128xf32>
    %330 = vector.extract_strided_slice %320 {offsets = [0, 384], sizes = [1, 128], strides = [1, 1]} : vector<1x512xf32> to vector<1x128xf32>
    %331 = math.tanh %330 : vector<1x128xf32>
    %332 = arith.mulf %328, %294 : vector<1x128xf32>
    %333 = arith.mulf %327, %331 : vector<1x128xf32>
    %334 = arith.addf %332, %333 : vector<1x128xf32>
    %335 = math.tanh %334 : vector<1x128xf32>
    %336 = arith.mulf %329, %335 : vector<1x128xf32>
    %337 = arith.truncf %336 : vector<1x128xf32> to vector<1x128xbf16>
    %c0_53 = arith.constant 0 : index
    %c0_54 = arith.constant 0 : index
    %338 = vector.load %arg6[%c0_53, %c0_54] : memref<128x512xbf16, #tpu.memory_space<vmem>>, vector<128x512xbf16>
    %cst_55 = arith.constant dense<0.000000e+00> : vector<1x512xf32>
    %339 = tpu.matmul %337, %338, %cst_55 {dimension_numbers = #tpu.dot_dimension_numbers<[1], [0], [0], [1], [0, 0, 1, 1], [], []>} : vector<1x128xbf16>, vector<128x512xbf16>, vector<1x512xf32> -> vector<1x512xf32>
    %c0_56 = arith.constant 0 : index
    %c0_57 = arith.constant 0 : index
    %340 = vector.load %arg8[%c0_56, %c0_57] : memref<1x512xf32, #tpu.memory_space<vmem>>, vector<1x512xf32>
    %341 = arith.addf %339, %340 : vector<1x512xf32>
    %cst_58 = arith.constant 0.000000e+00 : f32
    %342 = vector.broadcast %cst_58 : f32 to vector<1x128xf32>
    %cst_59 = arith.constant 0.000000e+00 : f32
    %343 = vector.broadcast %cst_59 : f32 to vector<1x128xf32>
    %cst_60 = arith.constant 0.000000e+00 : f32
    %344 = vector.broadcast %cst_60 : f32 to vector<1x128xf32>
    %cst_61 = arith.constant 0.000000e+00 : f32
    %345 = vector.broadcast %cst_61 : f32 to vector<1x128xf32>
    %cst_62 = arith.constant 0.000000e+00 : f32
    %346 = vector.broadcast %cst_62 : f32 to vector<8x128xf32>
    %347 = tpu.iota {dimensions = array<i32: 0>} : vector<8x128xi32>
    %348 = arith.truncf %342 : vector<1x128xf32> to vector<1x128xbf16>
    %cst_63 = arith.constant dense<0.000000e+00> : vector<1x512xf32>
    %349 = tpu.matmul %348, %3, %cst_63 {dimension_numbers = #tpu.dot_dimension_numbers<[1], [0], [0], [1], [0, 0, 1, 1], [], []>} : vector<1x128xbf16>, vector<128x512xbf16>, vector<1x512xf32> -> vector<1x512xf32>
    %350 = arith.addf %341, %349 : vector<1x512xf32>
    %351 = vector.extract_strided_slice %350 {offsets = [0, 0], sizes = [1, 384], strides = [1, 1]} : vector<1x512xf32> to vector<1x384xf32>
    %352 = arith.negf %351 : vector<1x384xf32>
    %353 = math.exp %352 : vector<1x384xf32>
    %cst_64 = arith.constant 1.000000e+00 : f32
    %354 = vector.broadcast %cst_64 : f32 to vector<1x384xf32>
    %355 = arith.addf %354, %353 : vector<1x384xf32>
    %356 = arith.divf %354, %355 : vector<1x384xf32>
    %357 = vector.extract_strided_slice %356 {offsets = [0, 0], sizes = [1, 128], strides = [1, 1]} : vector<1x384xf32> to vector<1x128xf32>
    %358 = vector.extract_strided_slice %356 {offsets = [0, 128], sizes = [1, 128], strides = [1, 1]} : vector<1x384xf32> to vector<1x128xf32>
    %359 = vector.extract_strided_slice %356 {offsets = [0, 256], sizes = [1, 128], strides = [1, 1]} : vector<1x384xf32> to vector<1x128xf32>
    %360 = vector.extract_strided_slice %350 {offsets = [0, 384], sizes = [1, 128], strides = [1, 1]} : vector<1x512xf32> to vector<1x128xf32>
    %361 = math.tanh %360 : vector<1x128xf32>
    %362 = arith.mulf %358, %343 : vector<1x128xf32>
    %363 = arith.mulf %357, %361 : vector<1x128xf32>
    %364 = arith.addf %362, %363 : vector<1x128xf32>
    %365 = math.tanh %364 : vector<1x128xf32>
    %366 = arith.mulf %359, %365 : vector<1x128xf32>
    %367 = tpu.concatenate %366, %344 in 1 : vector<1x128xf32>, vector<1x128xf32> -> vector<1x256xf32>
    %368 = arith.truncf %367 : vector<1x256xf32> to vector<1x256xbf16>
    %cst_65 = arith.constant dense<0.000000e+00> : vector<1x512xf32>
    %369 = tpu.matmul %368, %4, %cst_65 {dimension_numbers = #tpu.dot_dimension_numbers<[1], [0], [0], [1], [0, 0, 1, 1], [], []>} : vector<1x256xbf16>, vector<256x512xbf16>, vector<1x512xf32> -> vector<1x512xf32>
    %370 = arith.addf %369, %5 : vector<1x512xf32>
    %371 = vector.extract_strided_slice %370 {offsets = [0, 0], sizes = [1, 384], strides = [1, 1]} : vector<1x512xf32> to vector<1x384xf32>
    %372 = arith.negf %371 : vector<1x384xf32>
    %373 = math.exp %372 : vector<1x384xf32>
    %cst_66 = arith.constant 1.000000e+00 : f32
    %374 = vector.broadcast %cst_66 : f32 to vector<1x384xf32>
    %375 = arith.addf %374, %373 : vector<1x384xf32>
    %376 = arith.divf %374, %375 : vector<1x384xf32>
    %377 = vector.extract_strided_slice %376 {offsets = [0, 0], sizes = [1, 128], strides = [1, 1]} : vector<1x384xf32> to vector<1x128xf32>
    %378 = vector.extract_strided_slice %376 {offsets = [0, 128], sizes = [1, 128], strides = [1, 1]} : vector<1x384xf32> to vector<1x128xf32>
    %379 = vector.extract_strided_slice %376 {offsets = [0, 256], sizes = [1, 128], strides = [1, 1]} : vector<1x384xf32> to vector<1x128xf32>
    %380 = vector.extract_strided_slice %370 {offsets = [0, 384], sizes = [1, 128], strides = [1, 1]} : vector<1x512xf32> to vector<1x128xf32>
    %381 = math.tanh %380 : vector<1x128xf32>
    %382 = arith.mulf %378, %345 : vector<1x128xf32>
    %383 = arith.mulf %377, %381 : vector<1x128xf32>
    %384 = arith.addf %382, %383 : vector<1x128xf32>
    %385 = math.tanh %384 : vector<1x128xf32>
    %386 = arith.mulf %379, %385 : vector<1x128xf32>
    %c0_i32 = arith.constant 0 : i32
    %387 = vector.broadcast %c0_i32 : i32 to vector<8x128xi32>
    %388 = arith.cmpi eq, %347, %387 : vector<8x128xi32>
    %389 = vector.shape_cast %386 : vector<1x128xf32> to vector<1x128xf32>
    %390 = vector.broadcast %389 : vector<1x128xf32> to vector<8x128xf32>
    %391 = arith.select %388, %390, %346 : vector<8x128xi1>, vector<8x128xf32>
    %392 = arith.truncf %366 : vector<1x128xf32> to vector<1x128xbf16>
    %cst_67 = arith.constant dense<0.000000e+00> : vector<1x512xf32>
    %393 = tpu.matmul %392, %3, %cst_67 {dimension_numbers = #tpu.dot_dimension_numbers<[1], [0], [0], [1], [0, 0, 1, 1], [], []>} : vector<1x128xbf16>, vector<128x512xbf16>, vector<1x512xf32> -> vector<1x512xf32>
    %394 = arith.addf %341, %393 : vector<1x512xf32>
    %395 = vector.extract_strided_slice %394 {offsets = [0, 0], sizes = [1, 384], strides = [1, 1]} : vector<1x512xf32> to vector<1x384xf32>
    %396 = arith.negf %395 : vector<1x384xf32>
    %397 = math.exp %396 : vector<1x384xf32>
    %cst_68 = arith.constant 1.000000e+00 : f32
    %398 = vector.broadcast %cst_68 : f32 to vector<1x384xf32>
    %399 = arith.addf %398, %397 : vector<1x384xf32>
    %400 = arith.divf %398, %399 : vector<1x384xf32>
    %401 = vector.extract_strided_slice %400 {offsets = [0, 0], sizes = [1, 128], strides = [1, 1]} : vector<1x384xf32> to vector<1x128xf32>
    %402 = vector.extract_strided_slice %400 {offsets = [0, 128], sizes = [1, 128], strides = [1, 1]} : vector<1x384xf32> to vector<1x128xf32>
    %403 = vector.extract_strided_slice %400 {offsets = [0, 256], sizes = [1, 128], strides = [1, 1]} : vector<1x384xf32> to vector<1x128xf32>
    %404 = vector.extract_strided_slice %394 {offsets = [0, 384], sizes = [1, 128], strides = [1, 1]} : vector<1x512xf32> to vector<1x128xf32>
    %405 = math.tanh %404 : vector<1x128xf32>
    %406 = arith.mulf %402, %364 : vector<1x128xf32>
    %407 = arith.mulf %401, %405 : vector<1x128xf32>
    %408 = arith.addf %406, %407 : vector<1x128xf32>
    %409 = math.tanh %408 : vector<1x128xf32>
    %410 = arith.mulf %403, %409 : vector<1x128xf32>
    %411 = tpu.concatenate %410, %386 in 1 : vector<1x128xf32>, vector<1x128xf32> -> vector<1x256xf32>
    %412 = arith.truncf %411 : vector<1x256xf32> to vector<1x256xbf16>
    %cst_69 = arith.constant dense<0.000000e+00> : vector<1x512xf32>
    %413 = tpu.matmul %412, %4, %cst_69 {dimension_numbers = #tpu.dot_dimension_numbers<[1], [0], [0], [1], [0, 0, 1, 1], [], []>} : vector<1x256xbf16>, vector<256x512xbf16>, vector<1x512xf32> -> vector<1x512xf32>
    %414 = arith.addf %413, %5 : vector<1x512xf32>
    %415 = vector.extract_strided_slice %414 {offsets = [0, 0], sizes = [1, 384], strides = [1, 1]} : vector<1x512xf32> to vector<1x384xf32>
    %416 = arith.negf %415 : vector<1x384xf32>
    %417 = math.exp %416 : vector<1x384xf32>
    %cst_70 = arith.constant 1.000000e+00 : f32
    %418 = vector.broadcast %cst_70 : f32 to vector<1x384xf32>
    %419 = arith.addf %418, %417 : vector<1x384xf32>
    %420 = arith.divf %418, %419 : vector<1x384xf32>
    %421 = vector.extract_strided_slice %420 {offsets = [0, 0], sizes = [1, 128], strides = [1, 1]} : vector<1x384xf32> to vector<1x128xf32>
    %422 = vector.extract_strided_slice %420 {offsets = [0, 128], sizes = [1, 128], strides = [1, 1]} : vector<1x384xf32> to vector<1x128xf32>
    %423 = vector.extract_strided_slice %420 {offsets = [0, 256], sizes = [1, 128], strides = [1, 1]} : vector<1x384xf32> to vector<1x128xf32>
    %424 = vector.extract_strided_slice %414 {offsets = [0, 384], sizes = [1, 128], strides = [1, 1]} : vector<1x512xf32> to vector<1x128xf32>
    %425 = math.tanh %424 : vector<1x128xf32>
    %426 = arith.mulf %422, %384 : vector<1x128xf32>
    %427 = arith.mulf %421, %425 : vector<1x128xf32>
    %428 = arith.addf %426, %427 : vector<1x128xf32>
    %429 = math.tanh %428 : vector<1x128xf32>
    %430 = arith.mulf %423, %429 : vector<1x128xf32>
    %c1_i32 = arith.constant 1 : i32
    %431 = vector.broadcast %c1_i32 : i32 to vector<8x128xi32>
    %432 = arith.cmpi eq, %347, %431 : vector<8x128xi32>
    %433 = vector.shape_cast %430 : vector<1x128xf32> to vector<1x128xf32>
    %434 = vector.broadcast %433 : vector<1x128xf32> to vector<8x128xf32>
    %435 = arith.select %432, %434, %391 : vector<8x128xi1>, vector<8x128xf32>
    %436 = arith.truncf %410 : vector<1x128xf32> to vector<1x128xbf16>
    %cst_71 = arith.constant dense<0.000000e+00> : vector<1x512xf32>
    %437 = tpu.matmul %436, %3, %cst_71 {dimension_numbers = #tpu.dot_dimension_numbers<[1], [0], [0], [1], [0, 0, 1, 1], [], []>} : vector<1x128xbf16>, vector<128x512xbf16>, vector<1x512xf32> -> vector<1x512xf32>
    %438 = arith.addf %341, %437 : vector<1x512xf32>
    %439 = vector.extract_strided_slice %438 {offsets = [0, 0], sizes = [1, 384], strides = [1, 1]} : vector<1x512xf32> to vector<1x384xf32>
    %440 = arith.negf %439 : vector<1x384xf32>
    %441 = math.exp %440 : vector<1x384xf32>
    %cst_72 = arith.constant 1.000000e+00 : f32
    %442 = vector.broadcast %cst_72 : f32 to vector<1x384xf32>
    %443 = arith.addf %442, %441 : vector<1x384xf32>
    %444 = arith.divf %442, %443 : vector<1x384xf32>
    %445 = vector.extract_strided_slice %444 {offsets = [0, 0], sizes = [1, 128], strides = [1, 1]} : vector<1x384xf32> to vector<1x128xf32>
    %446 = vector.extract_strided_slice %444 {offsets = [0, 128], sizes = [1, 128], strides = [1, 1]} : vector<1x384xf32> to vector<1x128xf32>
    %447 = vector.extract_strided_slice %444 {offsets = [0, 256], sizes = [1, 128], strides = [1, 1]} : vector<1x384xf32> to vector<1x128xf32>
    %448 = vector.extract_strided_slice %438 {offsets = [0, 384], sizes = [1, 128], strides = [1, 1]} : vector<1x512xf32> to vector<1x128xf32>
    %449 = math.tanh %448 : vector<1x128xf32>
    %450 = arith.mulf %446, %408 : vector<1x128xf32>
    %451 = arith.mulf %445, %449 : vector<1x128xf32>
    %452 = arith.addf %450, %451 : vector<1x128xf32>
    %453 = math.tanh %452 : vector<1x128xf32>
    %454 = arith.mulf %447, %453 : vector<1x128xf32>
    %455 = tpu.concatenate %454, %430 in 1 : vector<1x128xf32>, vector<1x128xf32> -> vector<1x256xf32>
    %456 = arith.truncf %455 : vector<1x256xf32> to vector<1x256xbf16>
    %cst_73 = arith.constant dense<0.000000e+00> : vector<1x512xf32>
    %457 = tpu.matmul %456, %4, %cst_73 {dimension_numbers = #tpu.dot_dimension_numbers<[1], [0], [0], [1], [0, 0, 1, 1], [], []>} : vector<1x256xbf16>, vector<256x512xbf16>, vector<1x512xf32> -> vector<1x512xf32>
    %458 = arith.addf %457, %5 : vector<1x512xf32>
    %459 = vector.extract_strided_slice %458 {offsets = [0, 0], sizes = [1, 384], strides = [1, 1]} : vector<1x512xf32> to vector<1x384xf32>
    %460 = arith.negf %459 : vector<1x384xf32>
    %461 = math.exp %460 : vector<1x384xf32>
    %cst_74 = arith.constant 1.000000e+00 : f32
    %462 = vector.broadcast %cst_74 : f32 to vector<1x384xf32>
    %463 = arith.addf %462, %461 : vector<1x384xf32>
    %464 = arith.divf %462, %463 : vector<1x384xf32>
    %465 = vector.extract_strided_slice %464 {offsets = [0, 0], sizes = [1, 128], strides = [1, 1]} : vector<1x384xf32> to vector<1x128xf32>
    %466 = vector.extract_strided_slice %464 {offsets = [0, 128], sizes = [1, 128], strides = [1, 1]} : vector<1x384xf32> to vector<1x128xf32>
    %467 = vector.extract_strided_slice %464 {offsets = [0, 256], sizes = [1, 128], strides = [1, 1]} : vector<1x384xf32> to vector<1x128xf32>
    %468 = vector.extract_strided_slice %458 {offsets = [0, 384], sizes = [1, 128], strides = [1, 1]} : vector<1x512xf32> to vector<1x128xf32>
    %469 = math.tanh %468 : vector<1x128xf32>
    %470 = arith.mulf %466, %428 : vector<1x128xf32>
    %471 = arith.mulf %465, %469 : vector<1x128xf32>
    %472 = arith.addf %470, %471 : vector<1x128xf32>
    %473 = math.tanh %472 : vector<1x128xf32>
    %474 = arith.mulf %467, %473 : vector<1x128xf32>
    %c2_i32 = arith.constant 2 : i32
    %475 = vector.broadcast %c2_i32 : i32 to vector<8x128xi32>
    %476 = arith.cmpi eq, %347, %475 : vector<8x128xi32>
    %477 = vector.shape_cast %474 : vector<1x128xf32> to vector<1x128xf32>
    %478 = vector.broadcast %477 : vector<1x128xf32> to vector<8x128xf32>
    %479 = arith.select %476, %478, %435 : vector<8x128xi1>, vector<8x128xf32>
    %480 = arith.truncf %454 : vector<1x128xf32> to vector<1x128xbf16>
    %cst_75 = arith.constant dense<0.000000e+00> : vector<1x512xf32>
    %481 = tpu.matmul %480, %3, %cst_75 {dimension_numbers = #tpu.dot_dimension_numbers<[1], [0], [0], [1], [0, 0, 1, 1], [], []>} : vector<1x128xbf16>, vector<128x512xbf16>, vector<1x512xf32> -> vector<1x512xf32>
    %482 = arith.addf %341, %481 : vector<1x512xf32>
    %483 = vector.extract_strided_slice %482 {offsets = [0, 0], sizes = [1, 384], strides = [1, 1]} : vector<1x512xf32> to vector<1x384xf32>
    %484 = arith.negf %483 : vector<1x384xf32>
    %485 = math.exp %484 : vector<1x384xf32>
    %cst_76 = arith.constant 1.000000e+00 : f32
    %486 = vector.broadcast %cst_76 : f32 to vector<1x384xf32>
    %487 = arith.addf %486, %485 : vector<1x384xf32>
    %488 = arith.divf %486, %487 : vector<1x384xf32>
    %489 = vector.extract_strided_slice %488 {offsets = [0, 0], sizes = [1, 128], strides = [1, 1]} : vector<1x384xf32> to vector<1x128xf32>
    %490 = vector.extract_strided_slice %488 {offsets = [0, 128], sizes = [1, 128], strides = [1, 1]} : vector<1x384xf32> to vector<1x128xf32>
    %491 = vector.extract_strided_slice %488 {offsets = [0, 256], sizes = [1, 128], strides = [1, 1]} : vector<1x384xf32> to vector<1x128xf32>
    %492 = vector.extract_strided_slice %482 {offsets = [0, 384], sizes = [1, 128], strides = [1, 1]} : vector<1x512xf32> to vector<1x128xf32>
    %493 = math.tanh %492 : vector<1x128xf32>
    %494 = arith.mulf %490, %452 : vector<1x128xf32>
    %495 = arith.mulf %489, %493 : vector<1x128xf32>
    %496 = arith.addf %494, %495 : vector<1x128xf32>
    %497 = math.tanh %496 : vector<1x128xf32>
    %498 = arith.mulf %491, %497 : vector<1x128xf32>
    %499 = tpu.concatenate %498, %474 in 1 : vector<1x128xf32>, vector<1x128xf32> -> vector<1x256xf32>
    %500 = arith.truncf %499 : vector<1x256xf32> to vector<1x256xbf16>
    %cst_77 = arith.constant dense<0.000000e+00> : vector<1x512xf32>
    %501 = tpu.matmul %500, %4, %cst_77 {dimension_numbers = #tpu.dot_dimension_numbers<[1], [0], [0], [1], [0, 0, 1, 1], [], []>} : vector<1x256xbf16>, vector<256x512xbf16>, vector<1x512xf32> -> vector<1x512xf32>
    %502 = arith.addf %501, %5 : vector<1x512xf32>
    %503 = vector.extract_strided_slice %502 {offsets = [0, 0], sizes = [1, 384], strides = [1, 1]} : vector<1x512xf32> to vector<1x384xf32>
    %504 = arith.negf %503 : vector<1x384xf32>
    %505 = math.exp %504 : vector<1x384xf32>
    %cst_78 = arith.constant 1.000000e+00 : f32
    %506 = vector.broadcast %cst_78 : f32 to vector<1x384xf32>
    %507 = arith.addf %506, %505 : vector<1x384xf32>
    %508 = arith.divf %506, %507 : vector<1x384xf32>
    %509 = vector.extract_strided_slice %508 {offsets = [0, 0], sizes = [1, 128], strides = [1, 1]} : vector<1x384xf32> to vector<1x128xf32>
    %510 = vector.extract_strided_slice %508 {offsets = [0, 128], sizes = [1, 128], strides = [1, 1]} : vector<1x384xf32> to vector<1x128xf32>
    %511 = vector.extract_strided_slice %508 {offsets = [0, 256], sizes = [1, 128], strides = [1, 1]} : vector<1x384xf32> to vector<1x128xf32>
    %512 = vector.extract_strided_slice %502 {offsets = [0, 384], sizes = [1, 128], strides = [1, 1]} : vector<1x512xf32> to vector<1x128xf32>
    %513 = math.tanh %512 : vector<1x128xf32>
    %514 = arith.mulf %510, %472 : vector<1x128xf32>
    %515 = arith.mulf %509, %513 : vector<1x128xf32>
    %516 = arith.addf %514, %515 : vector<1x128xf32>
    %517 = math.tanh %516 : vector<1x128xf32>
    %518 = arith.mulf %511, %517 : vector<1x128xf32>
    %c3_i32 = arith.constant 3 : i32
    %519 = vector.broadcast %c3_i32 : i32 to vector<8x128xi32>
    %520 = arith.cmpi eq, %347, %519 : vector<8x128xi32>
    %521 = vector.shape_cast %518 : vector<1x128xf32> to vector<1x128xf32>
    %522 = vector.broadcast %521 : vector<1x128xf32> to vector<8x128xf32>
    %523 = arith.select %520, %522, %479 : vector<8x128xi1>, vector<8x128xf32>
    %524 = arith.truncf %498 : vector<1x128xf32> to vector<1x128xbf16>
    %cst_79 = arith.constant dense<0.000000e+00> : vector<1x512xf32>
    %525 = tpu.matmul %524, %3, %cst_79 {dimension_numbers = #tpu.dot_dimension_numbers<[1], [0], [0], [1], [0, 0, 1, 1], [], []>} : vector<1x128xbf16>, vector<128x512xbf16>, vector<1x512xf32> -> vector<1x512xf32>
    %526 = arith.addf %341, %525 : vector<1x512xf32>
    %527 = vector.extract_strided_slice %526 {offsets = [0, 0], sizes = [1, 384], strides = [1, 1]} : vector<1x512xf32> to vector<1x384xf32>
    %528 = arith.negf %527 : vector<1x384xf32>
    %529 = math.exp %528 : vector<1x384xf32>
    %cst_80 = arith.constant 1.000000e+00 : f32
    %530 = vector.broadcast %cst_80 : f32 to vector<1x384xf32>
    %531 = arith.addf %530, %529 : vector<1x384xf32>
    %532 = arith.divf %530, %531 : vector<1x384xf32>
    %533 = vector.extract_strided_slice %532 {offsets = [0, 0], sizes = [1, 128], strides = [1, 1]} : vector<1x384xf32> to vector<1x128xf32>
    %534 = vector.extract_strided_slice %532 {offsets = [0, 128], sizes = [1, 128], strides = [1, 1]} : vector<1x384xf32> to vector<1x128xf32>
    %535 = vector.extract_strided_slice %532 {offsets = [0, 256], sizes = [1, 128], strides = [1, 1]} : vector<1x384xf32> to vector<1x128xf32>
    %536 = vector.extract_strided_slice %526 {offsets = [0, 384], sizes = [1, 128], strides = [1, 1]} : vector<1x512xf32> to vector<1x128xf32>
    %537 = math.tanh %536 : vector<1x128xf32>
    %538 = arith.mulf %534, %496 : vector<1x128xf32>
    %539 = arith.mulf %533, %537 : vector<1x128xf32>
    %540 = arith.addf %538, %539 : vector<1x128xf32>
    %541 = math.tanh %540 : vector<1x128xf32>
    %542 = arith.mulf %535, %541 : vector<1x128xf32>
    %543 = tpu.concatenate %542, %518 in 1 : vector<1x128xf32>, vector<1x128xf32> -> vector<1x256xf32>
    %544 = arith.truncf %543 : vector<1x256xf32> to vector<1x256xbf16>
    %cst_81 = arith.constant dense<0.000000e+00> : vector<1x512xf32>
    %545 = tpu.matmul %544, %4, %cst_81 {dimension_numbers = #tpu.dot_dimension_numbers<[1], [0], [0], [1], [0, 0, 1, 1], [], []>} : vector<1x256xbf16>, vector<256x512xbf16>, vector<1x512xf32> -> vector<1x512xf32>
    %546 = arith.addf %545, %5 : vector<1x512xf32>
    %547 = vector.extract_strided_slice %546 {offsets = [0, 0], sizes = [1, 384], strides = [1, 1]} : vector<1x512xf32> to vector<1x384xf32>
    %548 = arith.negf %547 : vector<1x384xf32>
    %549 = math.exp %548 : vector<1x384xf32>
    %cst_82 = arith.constant 1.000000e+00 : f32
    %550 = vector.broadcast %cst_82 : f32 to vector<1x384xf32>
    %551 = arith.addf %550, %549 : vector<1x384xf32>
    %552 = arith.divf %550, %551 : vector<1x384xf32>
    %553 = vector.extract_strided_slice %552 {offsets = [0, 0], sizes = [1, 128], strides = [1, 1]} : vector<1x384xf32> to vector<1x128xf32>
    %554 = vector.extract_strided_slice %552 {offsets = [0, 128], sizes = [1, 128], strides = [1, 1]} : vector<1x384xf32> to vector<1x128xf32>
    %555 = vector.extract_strided_slice %552 {offsets = [0, 256], sizes = [1, 128], strides = [1, 1]} : vector<1x384xf32> to vector<1x128xf32>
    %556 = vector.extract_strided_slice %546 {offsets = [0, 384], sizes = [1, 128], strides = [1, 1]} : vector<1x512xf32> to vector<1x128xf32>
    %557 = math.tanh %556 : vector<1x128xf32>
    %558 = arith.mulf %554, %516 : vector<1x128xf32>
    %559 = arith.mulf %553, %557 : vector<1x128xf32>
    %560 = arith.addf %558, %559 : vector<1x128xf32>
    %561 = math.tanh %560 : vector<1x128xf32>
    %562 = arith.mulf %555, %561 : vector<1x128xf32>
    %c4_i32 = arith.constant 4 : i32
    %563 = vector.broadcast %c4_i32 : i32 to vector<8x128xi32>
    %564 = arith.cmpi eq, %347, %563 : vector<8x128xi32>
    %565 = vector.shape_cast %562 : vector<1x128xf32> to vector<1x128xf32>
    %566 = vector.broadcast %565 : vector<1x128xf32> to vector<8x128xf32>
    %567 = arith.select %564, %566, %523 : vector<8x128xi1>, vector<8x128xf32>
    %568 = arith.truncf %542 : vector<1x128xf32> to vector<1x128xbf16>
    %cst_83 = arith.constant dense<0.000000e+00> : vector<1x512xf32>
    %569 = tpu.matmul %568, %3, %cst_83 {dimension_numbers = #tpu.dot_dimension_numbers<[1], [0], [0], [1], [0, 0, 1, 1], [], []>} : vector<1x128xbf16>, vector<128x512xbf16>, vector<1x512xf32> -> vector<1x512xf32>
    %570 = arith.addf %341, %569 : vector<1x512xf32>
    %571 = vector.extract_strided_slice %570 {offsets = [0, 0], sizes = [1, 384], strides = [1, 1]} : vector<1x512xf32> to vector<1x384xf32>
    %572 = arith.negf %571 : vector<1x384xf32>
    %573 = math.exp %572 : vector<1x384xf32>
    %cst_84 = arith.constant 1.000000e+00 : f32
    %574 = vector.broadcast %cst_84 : f32 to vector<1x384xf32>
    %575 = arith.addf %574, %573 : vector<1x384xf32>
    %576 = arith.divf %574, %575 : vector<1x384xf32>
    %577 = vector.extract_strided_slice %576 {offsets = [0, 0], sizes = [1, 128], strides = [1, 1]} : vector<1x384xf32> to vector<1x128xf32>
    %578 = vector.extract_strided_slice %576 {offsets = [0, 128], sizes = [1, 128], strides = [1, 1]} : vector<1x384xf32> to vector<1x128xf32>
    %579 = vector.extract_strided_slice %576 {offsets = [0, 256], sizes = [1, 128], strides = [1, 1]} : vector<1x384xf32> to vector<1x128xf32>
    %580 = vector.extract_strided_slice %570 {offsets = [0, 384], sizes = [1, 128], strides = [1, 1]} : vector<1x512xf32> to vector<1x128xf32>
    %581 = math.tanh %580 : vector<1x128xf32>
    %582 = arith.mulf %578, %540 : vector<1x128xf32>
    %583 = arith.mulf %577, %581 : vector<1x128xf32>
    %584 = arith.addf %582, %583 : vector<1x128xf32>
    %585 = math.tanh %584 : vector<1x128xf32>
    %586 = arith.mulf %579, %585 : vector<1x128xf32>
    %587 = tpu.concatenate %586, %562 in 1 : vector<1x128xf32>, vector<1x128xf32> -> vector<1x256xf32>
    %588 = arith.truncf %587 : vector<1x256xf32> to vector<1x256xbf16>
    %cst_85 = arith.constant dense<0.000000e+00> : vector<1x512xf32>
    %589 = tpu.matmul %588, %4, %cst_85 {dimension_numbers = #tpu.dot_dimension_numbers<[1], [0], [0], [1], [0, 0, 1, 1], [], []>} : vector<1x256xbf16>, vector<256x512xbf16>, vector<1x512xf32> -> vector<1x512xf32>
    %590 = arith.addf %589, %5 : vector<1x512xf32>
    %591 = vector.extract_strided_slice %590 {offsets = [0, 0], sizes = [1, 384], strides = [1, 1]} : vector<1x512xf32> to vector<1x384xf32>
    %592 = arith.negf %591 : vector<1x384xf32>
    %593 = math.exp %592 : vector<1x384xf32>
    %cst_86 = arith.constant 1.000000e+00 : f32
    %594 = vector.broadcast %cst_86 : f32 to vector<1x384xf32>
    %595 = arith.addf %594, %593 : vector<1x384xf32>
    %596 = arith.divf %594, %595 : vector<1x384xf32>
    %597 = vector.extract_strided_slice %596 {offsets = [0, 0], sizes = [1, 128], strides = [1, 1]} : vector<1x384xf32> to vector<1x128xf32>
    %598 = vector.extract_strided_slice %596 {offsets = [0, 128], sizes = [1, 128], strides = [1, 1]} : vector<1x384xf32> to vector<1x128xf32>
    %599 = vector.extract_strided_slice %596 {offsets = [0, 256], sizes = [1, 128], strides = [1, 1]} : vector<1x384xf32> to vector<1x128xf32>
    %600 = vector.extract_strided_slice %590 {offsets = [0, 384], sizes = [1, 128], strides = [1, 1]} : vector<1x512xf32> to vector<1x128xf32>
    %601 = math.tanh %600 : vector<1x128xf32>
    %602 = arith.mulf %598, %560 : vector<1x128xf32>
    %603 = arith.mulf %597, %601 : vector<1x128xf32>
    %604 = arith.addf %602, %603 : vector<1x128xf32>
    %605 = math.tanh %604 : vector<1x128xf32>
    %606 = arith.mulf %599, %605 : vector<1x128xf32>
    %c5_i32 = arith.constant 5 : i32
    %607 = vector.broadcast %c5_i32 : i32 to vector<8x128xi32>
    %608 = arith.cmpi eq, %347, %607 : vector<8x128xi32>
    %609 = vector.shape_cast %606 : vector<1x128xf32> to vector<1x128xf32>
    %610 = vector.broadcast %609 : vector<1x128xf32> to vector<8x128xf32>
    %611 = arith.select %608, %610, %567 : vector<8x128xi1>, vector<8x128xf32>
    %612 = arith.truncf %586 : vector<1x128xf32> to vector<1x128xbf16>
    %cst_87 = arith.constant dense<0.000000e+00> : vector<1x512xf32>
    %613 = tpu.matmul %612, %3, %cst_87 {dimension_numbers = #tpu.dot_dimension_numbers<[1], [0], [0], [1], [0, 0, 1, 1], [], []>} : vector<1x128xbf16>, vector<128x512xbf16>, vector<1x512xf32> -> vector<1x512xf32>
    %614 = arith.addf %341, %613 : vector<1x512xf32>
    %615 = vector.extract_strided_slice %614 {offsets = [0, 0], sizes = [1, 384], strides = [1, 1]} : vector<1x512xf32> to vector<1x384xf32>
    %616 = arith.negf %615 : vector<1x384xf32>
    %617 = math.exp %616 : vector<1x384xf32>
    %cst_88 = arith.constant 1.000000e+00 : f32
    %618 = vector.broadcast %cst_88 : f32 to vector<1x384xf32>
    %619 = arith.addf %618, %617 : vector<1x384xf32>
    %620 = arith.divf %618, %619 : vector<1x384xf32>
    %621 = vector.extract_strided_slice %620 {offsets = [0, 0], sizes = [1, 128], strides = [1, 1]} : vector<1x384xf32> to vector<1x128xf32>
    %622 = vector.extract_strided_slice %620 {offsets = [0, 128], sizes = [1, 128], strides = [1, 1]} : vector<1x384xf32> to vector<1x128xf32>
    %623 = vector.extract_strided_slice %620 {offsets = [0, 256], sizes = [1, 128], strides = [1, 1]} : vector<1x384xf32> to vector<1x128xf32>
    %624 = vector.extract_strided_slice %614 {offsets = [0, 384], sizes = [1, 128], strides = [1, 1]} : vector<1x512xf32> to vector<1x128xf32>
    %625 = math.tanh %624 : vector<1x128xf32>
    %626 = arith.mulf %622, %584 : vector<1x128xf32>
    %627 = arith.mulf %621, %625 : vector<1x128xf32>
    %628 = arith.addf %626, %627 : vector<1x128xf32>
    %629 = math.tanh %628 : vector<1x128xf32>
    %630 = arith.mulf %623, %629 : vector<1x128xf32>
    %631 = tpu.concatenate %630, %606 in 1 : vector<1x128xf32>, vector<1x128xf32> -> vector<1x256xf32>
    %632 = arith.truncf %631 : vector<1x256xf32> to vector<1x256xbf16>
    %cst_89 = arith.constant dense<0.000000e+00> : vector<1x512xf32>
    %633 = tpu.matmul %632, %4, %cst_89 {dimension_numbers = #tpu.dot_dimension_numbers<[1], [0], [0], [1], [0, 0, 1, 1], [], []>} : vector<1x256xbf16>, vector<256x512xbf16>, vector<1x512xf32> -> vector<1x512xf32>
    %634 = arith.addf %633, %5 : vector<1x512xf32>
    %635 = vector.extract_strided_slice %634 {offsets = [0, 0], sizes = [1, 384], strides = [1, 1]} : vector<1x512xf32> to vector<1x384xf32>
    %636 = arith.negf %635 : vector<1x384xf32>
    %637 = math.exp %636 : vector<1x384xf32>
    %cst_90 = arith.constant 1.000000e+00 : f32
    %638 = vector.broadcast %cst_90 : f32 to vector<1x384xf32>
    %639 = arith.addf %638, %637 : vector<1x384xf32>
    %640 = arith.divf %638, %639 : vector<1x384xf32>
    %641 = vector.extract_strided_slice %640 {offsets = [0, 0], sizes = [1, 128], strides = [1, 1]} : vector<1x384xf32> to vector<1x128xf32>
    %642 = vector.extract_strided_slice %640 {offsets = [0, 128], sizes = [1, 128], strides = [1, 1]} : vector<1x384xf32> to vector<1x128xf32>
    %643 = vector.extract_strided_slice %640 {offsets = [0, 256], sizes = [1, 128], strides = [1, 1]} : vector<1x384xf32> to vector<1x128xf32>
    %644 = vector.extract_strided_slice %634 {offsets = [0, 384], sizes = [1, 128], strides = [1, 1]} : vector<1x512xf32> to vector<1x128xf32>
    %645 = math.tanh %644 : vector<1x128xf32>
    %646 = arith.mulf %642, %604 : vector<1x128xf32>
    %647 = arith.mulf %641, %645 : vector<1x128xf32>
    %648 = arith.addf %646, %647 : vector<1x128xf32>
    %649 = math.tanh %648 : vector<1x128xf32>
    %650 = arith.mulf %643, %649 : vector<1x128xf32>
    %c6_i32 = arith.constant 6 : i32
    %651 = vector.broadcast %c6_i32 : i32 to vector<8x128xi32>
    %652 = arith.cmpi eq, %347, %651 : vector<8x128xi32>
    %653 = vector.shape_cast %650 : vector<1x128xf32> to vector<1x128xf32>
    %654 = vector.broadcast %653 : vector<1x128xf32> to vector<8x128xf32>
    %655 = arith.select %652, %654, %611 : vector<8x128xi1>, vector<8x128xf32>
    %656 = arith.truncf %630 : vector<1x128xf32> to vector<1x128xbf16>
    %cst_91 = arith.constant dense<0.000000e+00> : vector<1x512xf32>
    %657 = tpu.matmul %656, %3, %cst_91 {dimension_numbers = #tpu.dot_dimension_numbers<[1], [0], [0], [1], [0, 0, 1, 1], [], []>} : vector<1x128xbf16>, vector<128x512xbf16>, vector<1x512xf32> -> vector<1x512xf32>
    %658 = arith.addf %341, %657 : vector<1x512xf32>
    %659 = vector.extract_strided_slice %658 {offsets = [0, 0], sizes = [1, 384], strides = [1, 1]} : vector<1x512xf32> to vector<1x384xf32>
    %660 = arith.negf %659 : vector<1x384xf32>
    %661 = math.exp %660 : vector<1x384xf32>
    %cst_92 = arith.constant 1.000000e+00 : f32
    %662 = vector.broadcast %cst_92 : f32 to vector<1x384xf32>
    %663 = arith.addf %662, %661 : vector<1x384xf32>
    %664 = arith.divf %662, %663 : vector<1x384xf32>
    %665 = vector.extract_strided_slice %664 {offsets = [0, 0], sizes = [1, 128], strides = [1, 1]} : vector<1x384xf32> to vector<1x128xf32>
    %666 = vector.extract_strided_slice %664 {offsets = [0, 128], sizes = [1, 128], strides = [1, 1]} : vector<1x384xf32> to vector<1x128xf32>
    %667 = vector.extract_strided_slice %664 {offsets = [0, 256], sizes = [1, 128], strides = [1, 1]} : vector<1x384xf32> to vector<1x128xf32>
    %668 = vector.extract_strided_slice %658 {offsets = [0, 384], sizes = [1, 128], strides = [1, 1]} : vector<1x512xf32> to vector<1x128xf32>
    %669 = math.tanh %668 : vector<1x128xf32>
    %670 = arith.mulf %666, %628 : vector<1x128xf32>
    %671 = arith.mulf %665, %669 : vector<1x128xf32>
    %672 = arith.addf %670, %671 : vector<1x128xf32>
    %673 = math.tanh %672 : vector<1x128xf32>
    %674 = arith.mulf %667, %673 : vector<1x128xf32>
    %675 = tpu.concatenate %674, %650 in 1 : vector<1x128xf32>, vector<1x128xf32> -> vector<1x256xf32>
    %676 = arith.truncf %675 : vector<1x256xf32> to vector<1x256xbf16>
    %cst_93 = arith.constant dense<0.000000e+00> : vector<1x512xf32>
    %677 = tpu.matmul %676, %4, %cst_93 {dimension_numbers = #tpu.dot_dimension_numbers<[1], [0], [0], [1], [0, 0, 1, 1], [], []>} : vector<1x256xbf16>, vector<256x512xbf16>, vector<1x512xf32> -> vector<1x512xf32>
    %678 = arith.addf %677, %5 : vector<1x512xf32>
    %679 = vector.extract_strided_slice %678 {offsets = [0, 0], sizes = [1, 384], strides = [1, 1]} : vector<1x512xf32> to vector<1x384xf32>
    %680 = arith.negf %679 : vector<1x384xf32>
    %681 = math.exp %680 : vector<1x384xf32>
    %cst_94 = arith.constant 1.000000e+00 : f32
    %682 = vector.broadcast %cst_94 : f32 to vector<1x384xf32>
    %683 = arith.addf %682, %681 : vector<1x384xf32>
    %684 = arith.divf %682, %683 : vector<1x384xf32>
    %685 = vector.extract_strided_slice %684 {offsets = [0, 0], sizes = [1, 128], strides = [1, 1]} : vector<1x384xf32> to vector<1x128xf32>
    %686 = vector.extract_strided_slice %684 {offsets = [0, 128], sizes = [1, 128], strides = [1, 1]} : vector<1x384xf32> to vector<1x128xf32>
    %687 = vector.extract_strided_slice %684 {offsets = [0, 256], sizes = [1, 128], strides = [1, 1]} : vector<1x384xf32> to vector<1x128xf32>
    %688 = vector.extract_strided_slice %678 {offsets = [0, 384], sizes = [1, 128], strides = [1, 1]} : vector<1x512xf32> to vector<1x128xf32>
    %689 = math.tanh %688 : vector<1x128xf32>
    %690 = arith.mulf %686, %648 : vector<1x128xf32>
    %691 = arith.mulf %685, %689 : vector<1x128xf32>
    %692 = arith.addf %690, %691 : vector<1x128xf32>
    %693 = math.tanh %692 : vector<1x128xf32>
    %694 = arith.mulf %687, %693 : vector<1x128xf32>
    %c7_i32 = arith.constant 7 : i32
    %695 = vector.broadcast %c7_i32 : i32 to vector<8x128xi32>
    %696 = arith.cmpi eq, %347, %695 : vector<8x128xi32>
    %697 = vector.shape_cast %694 : vector<1x128xf32> to vector<1x128xf32>
    %698 = vector.broadcast %697 : vector<1x128xf32> to vector<8x128xf32>
    %699 = arith.select %696, %698, %655 : vector<8x128xi1>, vector<8x128xf32>
    %700 = arith.truncf %699 : vector<8x128xf32> to vector<8x128xbf16>
    %c0_95 = arith.constant 0 : index
    %c0_96 = arith.constant 0 : index
    %701 = vector.load %arg11[%c0_95, %c0_96] : memref<128x128xbf16, #tpu.memory_space<vmem>>, vector<128x128xbf16>
    %cst_97 = arith.constant dense<0.000000e+00> : vector<8x128xf32>
    %702 = tpu.matmul %700, %701, %cst_97 {dimension_numbers = #tpu.dot_dimension_numbers<[1], [0], [0], [1], [0, 0, 1, 1], [], []>} : vector<8x128xbf16>, vector<128x128xbf16>, vector<8x128xf32> -> vector<8x128xf32>
    %c0_98 = arith.constant 0 : index
    %c0_99 = arith.constant 0 : index
    %703 = vector.load %arg12[%c0_98, %c0_99] : memref<1x128xf32, #tpu.memory_space<vmem>>, vector<1x128xf32>
    %704 = vector.broadcast %703 : vector<1x128xf32> to vector<8x128xf32>
    %705 = arith.addf %702, %704 : vector<8x128xf32>
    %c0_100 = arith.constant 0 : index
    %c0_101 = arith.constant 0 : index
    %706 = vector.load %arg13[%c0_100, %c0_101] : memref<8x128xf32, #tpu.memory_space<vmem>>, vector<8x128xf32>
    tpu.vector_store %arg13[%c0_100, %c0_101], %705 {strides = array<i32>} : memref<8x128xf32, #tpu.memory_space<vmem>>, vector<8x128xf32>,
    return
  }
}

</mosaic_0001>

<bundles_post_ra>
// kernel: rae_forward.1
= control target key start
LH: loop header
LB: loop body
LE: loop exit
PB: predicated region body
PF: predicated region fallthrough
CT: control target
= control target key end

     0   :  { %v244_v0 = vlaneseq  ;;  %v7124_v2 = vmov 1983009808   ;;  %v12177_v4 = vmov 0   ;;  %vm286_vm0 = vcmask 1041408   ;;  %s12163_s2 = inlined_call_operand.vmem [shape: bf16[128,512], index: 2, kind: input, shape index: {}]   ;;  %s12164_s1 = inlined_call_operand.vmem [shape: bf16[4,512], index: 1, kind: input, shape index: {}]   ;;  %s12165_s0 = inlined_call_operand.vmem [shape: f32[8,4], index: 0, kind: input, shape index: {}]   ;;  %s12166_s4 = inlined_call_operand.vmem [shape: bf16[256,512], index: 4, kind: input, shape index: {}]   ;;  %s12167_s3 = inlined_call_operand.vmem [shape: f32[1,512], index: 3, kind: input, shape index: {}]   ;;  %s12168_s5 = inlined_call_operand.vmem [shape: f32[1,512], index: 5, kind: input, shape index: {}]   ;;  %s12169_s6 = inlined_call_operand.vmem [shape: bf16[128,512], index: 6, kind: input, shape index: {}]   ;;  %s12170_s7 = inlined_call_operand.vmem [shape: bf16[128,512], index: 7, kind: input, shape index: {}]   ;;  %s12171_s9 = inlined_call_operand.vmem [shape: bf16[256,512], index: 9, kind: input, shape index: {}]   ;;  %s12172_s8 = inlined_call_operand.vmem [shape: f32[1,512], index: 8, kind: input, shape index: {}]   ;;  %s12173_s10 = inlined_call_operand.vmem [shape: f32[1,512], index: 10, kind: input, shape index: {}]   ;;  %s12174_s11 = inlined_call_operand.vmem [shape: bf16[128,128], index: 11, kind: input, shape index: {}]   ;;  %s12175_s12 = inlined_call_operand.vmem [shape: f32[1,128], index: 12, kind: input, shape index: {}]   ;;  %s12176_s13 = inlined_call_operand.vmem [shape: f32[8,128], index: 13, kind: output, shape index: {}]  }
   0x1   :  { %v7202_v1 = vld [vmem:[%s12163_s2 + $0x4] ss:$16 sps:$4 sm:$0xff]   ;;  %v267_v3 = vunpack.c.l.s4 %v7124_v2  ;;  %331 = vmatprep.mubr.bf16.mxu1 %v12177_v4  ;;  %573 = vmatprep.mubr.bf16.mxu0 %v12177_v4  ;;  %v7209_v5 = vld [vmem:[%s12163_s2] ss:$16 sps:$4 sm:$0xff]   ;;  %vm282_vm1 = vcmask 31744   ;;  %vm7128_vm9 = vmmov 0  }
   0x2   :  { %12796 = vst [vmem:[#allocation2_spill] sm:$0xff] %v7202_v1  ;;  %v7211_v6 = vshrl.u32 %v244_v0, 7  ;;  %541 = vmatprep.subr.bf16.mxu0 %v7202_v1  ;;  %v7217_v7 = vld [vmem:[%s12163_s2 + $0x24] ss:$16 sps:$4 sm:$0xff]   ;;  %v7226_v10 = vld [vmem:[%s12163_s2 + $0x20] ss:$16 sps:$4 sm:$0xff]  }
   0x3   :  { %v241_v8 = vld [vmem:[%s12164_s1] sm:$0xff]  ;;  %v268_v9 = vunpack.c.0.s8 %v267_v3  ;;  %542 = vmatpush1.bf16.msra.mxu0 %v7209_v5  ;;  %v7269_v26 = vld [vmem:[%s12163_s2 + $0xc] ss:$16 sps:$4 sm:$0xff]   ;;  %v7290_v29 = vld [vmem:[%s12163_s2 + $0x8] ss:$16 sps:$4 sm:$0xff]  }
   0x4   :  { %12797 = vst [vmem:[#allocation3_spill] sm:$0xff] %v7211_v6  ;;  %v265_v11 = vcombine.high %v241_v8, %v241_v8  ;;  %543 = vmatprep.subr.bf16.mxu0 %v7217_v7  ;;  %v7233_v13 = vld [vmem:[%s12163_s2 + $0x44] ss:$16 sps:$4 sm:$0xff]   ;;  %v7238_v16 = vld [vmem:[%s12163_s2 + $0x40] ss:$16 sps:$4 sm:$0xff]   ;;  %12798 = vst [vmem:[#allocation4_spill] sm:$0xff] %v7269_v26 }
   0x5   :  { %v271_v12 = vsub.s32 %v268_v9, %v7211_v6  ;;  %v239_v17 = vld [vmem:[%s12165_s0] sm:$0xff]  ;;  %v7301_v31 = vld [vmem:[%s12163_s2 + $0x2c] ss:$16 sps:$4 sm:$0xff]   ;;  %v7314_v33 = vld [vmem:[%s12163_s2 + $0x28] ss:$16 sps:$4 sm:$0xff]  }
   0x6   :  { %v7249_v21 = vld [vmem:[%s12163_s2 + $0x64] ss:$16 sps:$4 sm:$0xff]   ;;  %v240_v22 = vpack.c.bf16 %v239_v17, %v239_v17  ;;  %v7256_v23 = vld [vmem:[%s12163_s2 + $0x60] ss:$16 sps:$4 sm:$0xff]   ;;  %v7326_v35 = vld [vmem:[%s12163_s2 + $0x4c] ss:$16 sps:$4 sm:$0xff]  }
   0x7   :  { %v272_v14 = vrot.slane %v241_v8, %v271_v12  ;;  %v279_v15 = vrot.slane %v265_v11, %v271_v12  ;;  %544 = vmatpush1.bf16.msra.mxu0 %v7226_v10  ;;  %v7264_v25 = vld [vmem:[%s12163_s2 + $0x84] ss:$16 sps:$4 sm:$0xff]   ;;  %v7276_v27 = vld [vmem:[%s12163_s2 + $0x80] ss:$16 sps:$4 sm:$0xff]   ;;  %v7339_v37 = vld [vmem:[%s12163_s2 + $0x48] ss:$16 sps:$4 sm:$0xff]  }
   0x8   :  { %545 = vmatprep.subr.bf16.mxu0 %v7233_v13  ;;  %v7283_v28 = vld [vmem:[%s12163_s2 + $0xa4] ss:$16 sps:$4 sm:$0xff]   ;;  %v7295_v30 = vld [vmem:[%s12163_s2 + $0xa0] ss:$16 sps:$4 sm:$0xff]   ;;  %v7351_v39 = vld [vmem:[%s12163_s2 + $0x6c] ss:$16 sps:$4 sm:$0xff]  }
   0x9   :  { %v280_v18 = vcombine.high %v272_v14, %v272_v14  ;;  %v288_v19 = vsel %vm286_vm0, %v272_v14, 0  ;;  %v281_v20 = vcombine.high %v279_v15, %v279_v15  ;;  %v294_v24 = vsel %vm286_vm0, %v279_v15, 0  ;;  %v7306_v32 = vld [vmem:[%s12163_s2 + $0xc4] ss:$16 sps:$4 sm:$0xff]   ;;  %v7319_v34 = vld [vmem:[%s12163_s2 + $0xc0] ss:$16 sps:$4 sm:$0xff]  }
   0xa   :  { %v7331_v36 = vld [vmem:[%s12163_s2 + $0xe4] ss:$16 sps:$4 sm:$0xff]   ;;  %v7344_v38 = vld [vmem:[%s12163_s2 + $0xe0] ss:$16 sps:$4 sm:$0xff]   ;;  %v7358_v40 = vld [vmem:[%s12163_s2 + $0x68] ss:$16 sps:$4 sm:$0xff]  }
   0xb   :  { %5516 = vmatprep.subr.msk.bf16.mxu1 %vm286_vm0, %v280_v18  ;;  %546 = vmatpush1.bf16.msra.mxu0 %v7238_v16  ;;  %v7364_v41 = vld [vmem:[%s12163_s2 + $0x8c] ss:$16 sps:$4 sm:$0xff]   ;;  %v7371_v42 = vld [vmem:[%s12163_s2 + $0x88] ss:$16 sps:$4 sm:$0xff]   ;;  %v7415_v49 = vld [vmem:[%s12166_s4 + $0x4] ss:$16 sps:$4 sm:$0xff]  }
   0xc   :  { %300 = vmatpush1.bf16.msra.mxu1 %v288_v19  ;;  %547 = vmatprep.subr.bf16.mxu0 %v7249_v21  ;;  %v7377_v43 = vld [vmem:[%s12163_s2 + $0xac] ss:$16 sps:$4 sm:$0xff]   ;;  %v7383_v44 = vld [vmem:[%s12163_s2 + $0xa8] ss:$16 sps:$4 sm:$0xff]   ;;  %v7426_v51 = vld [vmem:[%s12166_s4] ss:$16 sps:$4 sm:$0xff]  }
   0xd   :  { %5518 = vmatprep.subr.msk.bf16.mxu1 %vm286_vm0, %v281_v20  ;;  %v7389_v45 = vld [vmem:[%s12163_s2 + $0xcc] ss:$16 sps:$4 sm:$0xff]   ;;  %v7395_v46 = vld [vmem:[%s12163_s2 + $0xc8] ss:$16 sps:$4 sm:$0xff]   ;;  %v7439_v53 = vld [vmem:[%s12166_s4 + $0x24] ss:$16 sps:$4 sm:$0xff]  }
   0xe   :  { %v7401_v47 = vld [vmem:[%s12163_s2 + $0xec] ss:$16 sps:$4 sm:$0xff]   ;;  %v7407_v48 = vld [vmem:[%s12163_s2 + $0xe8] ss:$16 sps:$4 sm:$0xff]   ;;  %v7449_v55 = vld [vmem:[%s12166_s4 + $0x20] ss:$16 sps:$4 sm:$0xff]  }
   0xf   :  { %5517 = vmatmul.mubr.msk.bf16.vlgmr.msra.gmra.mrb[0].mxu1 %vm282_vm1, %v240_v22  ;;  %548 = vmatpush1.bf16.msra.mxu0 %v7256_v23  ;;  %v7420_v50 = vld [vmem:[%s12166_s4 + $0xc] ss:$16 sps:$4 sm:$0xff]   ;;  %v7431_v52 = vld [vmem:[%s12166_s4 + $0x8] ss:$16 sps:$4 sm:$0xff]   ;;  %v7461_v57 = vld [vmem:[%s12166_s4 + $0x44] ss:$16 sps:$4 sm:$0xff]  }
  0x10   :  { %341 = vmatpush1.bf16.msra.mxu1 %v294_v24  ;;  %549 = vmatprep.subr.bf16.mxu0 %v7264_v25  ;;  %v7444_v54 = vld [vmem:[%s12166_s4 + $0x2c] ss:$16 sps:$4 sm:$0xff]   ;;  %v7454_v56 = vld [vmem:[%s12166_s4 + $0x28] ss:$16 sps:$4 sm:$0xff]   ;;  %v7471_v59 = vld [vmem:[%s12166_s4 + $0x40] ss:$16 sps:$4 sm:$0xff]  }
  0x11   :  { %372 = vmatprep.mubr.bf16.mxu1 %v12177_v4  ;;  %582 = vmatprep.subr.bf16.mxu1 %v7269_v26  ;;  %v7466_v58 = vld [vmem:[%s12166_s4 + $0x4c] ss:$16 sps:$4 sm:$0xff]   ;;  %v7476_v60 = vld [vmem:[%s12166_s4 + $0x48] ss:$16 sps:$4 sm:$0xff]   ;;  %v7483_v61 = vld [vmem:[%s12166_s4 + $0x64] ss:$16 sps:$4 sm:$0xff]  }
  0x12   :  { %v7490_v62 = vld [vmem:[%s12166_s4 + $0x6c] ss:$16 sps:$4 sm:$0xff]   ;;  %v7499_v63 = vld [vmem:[%s12166_s4 + $0x60] ss:$16 sps:$4 sm:$0xff]   ;;  %v7504_v0 = vld [vmem:[%s12166_s4 + $0x68] ss:$16 sps:$4 sm:$0xff]  }
  0x13   :  { %550 = vmatpush1.bf16.msra.mxu0 %v7276_v27  ;;  %12799 = vst [vmem:[#allocation5_spill] sm:$0xff] %v7499_v63  ;;  %12800 = vst [vmem:[#allocation6_spill] sm:$0xff] %v7504_v0  ;;  %v7511_v2 = vld [vmem:[%s12166_s4 + $0x84] ss:$16 sps:$4 sm:$0xff]   ;;  %v7516_v3 = vld [vmem:[%s12166_s4 + $0x8c] ss:$16 sps:$4 sm:$0xff]  }
  0x14   :  { %551 = vmatprep.subr.bf16.mxu0 %v7283_v28  ;;  %12801 = vst [vmem:[#allocation7_spill] sm:$0xff] %v7511_v2  ;;  %12802 = vst [vmem:[#allocation8_spill] sm:$0xff] %v7516_v3  ;;  %v7521_v8 = vld [vmem:[%s12166_s4 + $0x80] ss:$16 sps:$4 sm:$0xff]   ;;  %v7526_v9 = vld [vmem:[%s12166_s4 + $0x88] ss:$16 sps:$4 sm:$0xff]  }
  0x15   :  { %12803 = vst [vmem:[#allocation9_spill] sm:$0xff] %v7521_v8  ;;  %12804 = vst [vmem:[#allocation10_spill] sm:$0xff] %v7526_v9  ;;  %v7535_v11 = vld [vmem:[%s12166_s4 + $0xa4] ss:$16 sps:$4 sm:$0xff]   ;;  %v7540_v12 = vld [vmem:[%s12166_s4 + $0xac] ss:$16 sps:$4 sm:$0xff]  }
  0x16   :  { %12805 = vst [vmem:[#allocation11_spill] sm:$0xff] %v7535_v11  ;;  %12806 = vst [vmem:[#allocation12_spill] sm:$0xff] %v7540_v12  ;;  %v7545_v14 = vld [vmem:[%s12166_s4 + $0xa0] ss:$16 sps:$4 sm:$0xff]   ;;  %v7550_v15 = vld [vmem:[%s12166_s4 + $0xa8] ss:$16 sps:$4 sm:$0xff]  }
  0x17   :  { %5519 = vmatmul.mubr.msk.bf16.vlgmr.msra.gmra.mrb[4].mxu1 %vm282_vm1, %v240_v22  ;;  %552 = vmatpush1.bf16.msra.mxu0 %v7295_v30  ;;  %12807 = vst [vmem:[#allocation13_spill] sm:$0xff] %v7545_v14  ;;  %12808 = vst [vmem:[#allocation14_spill] sm:$0xff] %v7550_v15  ;;  %v7559_v17 = vld [vmem:[%s12166_s4 + $0xc4] ss:$16 sps:$4 sm:$0xff]   ;;  %v7564_v18 = vld [vmem:[%s12166_s4 + $0xcc] ss:$16 sps:$4 sm:$0xff]  }
  0x18   :  { %583 = vmatpush1.bf16.msra.mxu1 %v7290_v29  ;;  %553 = vmatprep.subr.bf16.mxu0 %v7306_v32  ;;  %12809 = vst [vmem:[#allocation15_spill] sm:$0xff] %v7559_v17  ;;  %12810 = vst [vmem:[#allocation16_spill] sm:$0xff] %v7564_v18  ;;  %v7569_v19 = vld [vmem:[%s12166_s4 + $0xc0] ss:$16 sps:$4 sm:$0xff]   ;;  %v7574_v20 = vld [vmem:[%s12166_s4 + $0xc8] ss:$16 sps:$4 sm:$0xff]  }
  0x19   :  { %584 = vmatprep.subr.bf16.mxu1 %v7301_v31  ;;  %614 = vmatprep.mubr.bf16.mxu1 %v12177_v4  ;;  %12811 = vst [vmem:[#allocation17_spill] sm:$0xff] %v7569_v19  ;;  %12812 = vst [vmem:[#allocation18_spill] sm:$0xff] %v7574_v20  ;;  %v7583_v22 = vld [vmem:[%s12166_s4 + $0xe4] ss:$16 sps:$4 sm:$0xff]   ;;  %v7588_v24 = vld [vmem:[%s12166_s4 + $0xec] ss:$16 sps:$4 sm:$0xff]  }
  0x1a   :  { %12813 = vst [vmem:[#allocation19_spill] sm:$0xff] %v7583_v22  ;;  %12814 = vst [vmem:[#allocation20_spill] sm:$0xff] %v7588_v24 }
  0x1b   :  { %554 = vmatpush1.bf16.msra.mxu0 %v7319_v34 }
  0x1c   :  { %585 = vmatpush1.bf16.msra.mxu1 %v7314_v33  ;;  %555 = vmatprep.subr.bf16.mxu0 %v7331_v36 }
  0x1d   :  { %586 = vmatprep.subr.bf16.mxu1 %v7326_v35 }
  0x1f   :  { %556 = vmatpush1.bf16.msra.mxu0 %v7344_v38 }
  0x20   :  { %587 = vmatpush1.bf16.msra.mxu1 %v7339_v37  ;;  %994 = vmatprep.subr.bf16.mxu0 %v7415_v49 }
  0x21   :  { %588 = vmatprep.subr.bf16.mxu1 %v7351_v39 }
  0x22   :  { %574 = vmatmul.mubr.bf16.vlgmr.msra.gmra.mrb[0].mxu0 %v12177_v4 }
  0x23   :  { %995 = vmatpush1.bf16.msra.mxu0 %v7426_v51 }
  0x24   :  { %589 = vmatpush1.bf16.msra.mxu1 %v7358_v40  ;;  %996 = vmatprep.subr.bf16.mxu0 %v7439_v53 }
  0x25   :  { %590 = vmatprep.subr.bf16.mxu1 %v7364_v41 }
  0x27   :  { %997 = vmatpush1.bf16.msra.mxu0 %v7449_v55 }
  0x28   :  { %591 = vmatpush1.bf16.msra.mxu1 %v7371_v42  ;;  %998 = vmatprep.subr.bf16.mxu0 %v7461_v57 }
  0x29   :  { %592 = vmatprep.subr.bf16.mxu1 %v7377_v43 }
  0x2b   :  { %999 = vmatpush1.bf16.msra.mxu0 %v7471_v59 }
  0x2c   :  { %593 = vmatpush1.bf16.msra.mxu1 %v7383_v44  ;;  %1000 = vmatprep.subr.bf16.mxu0 %v7483_v61 }
  0x2d   :  { %594 = vmatprep.subr.bf16.mxu1 %v7389_v45 }
  0x2f   :  { %1001 = vmatpush1.bf16.msra.mxu0 %v7499_v63 }
  0x30   :  { %595 = vmatpush1.bf16.msra.mxu1 %v7395_v46  ;;  %1002 = vmatprep.subr.bf16.mxu0 %v7511_v2 }
  0x31   :  { %596 = vmatprep.subr.bf16.mxu1 %v7401_v47 }
  0x33   :  { %1003 = vmatpush1.bf16.msra.mxu0 %v7521_v8 }
  0x34   :  { %597 = vmatpush1.bf16.msra.mxu1 %v7407_v48  ;;  %1004 = vmatprep.subr.bf16.mxu0 %v7535_v11 }
  0x35   :  { %1035 = vmatprep.subr.bf16.mxu1 %v7420_v50 }
  0x37   :  { %615 = vmatmul.mubr.bf16.vlgmr.msra.gmra.mrb[8].mxu1 %v12177_v4  ;;  %1005 = vmatpush1.bf16.msra.mxu0 %v7545_v14  ;;  %v7593_v4 = vld [vmem:[%s12166_s4 + $0xe0] ss:$16 sps:$4 sm:$0xff]  }
  0x38   :  { %1036 = vmatpush1.bf16.msra.mxu1 %v7431_v52  ;;  %1006 = vmatprep.subr.bf16.mxu0 %v7559_v17  ;;  %12815 = vst [vmem:[#allocation21_spill] sm:$0xff] %v7593_v4  ;;  %v7761_v17 = vld [vmem:[%s12166_s4 + $0x1c0] ss:$16 sps:$4 sm:$0xff]  }
  0x39   :  { %1037 = vmatprep.subr.bf16.mxu1 %v7444_v54  ;;  %12843 = vst [vmem:[#allocation49_spill] sm:$0xff] %v7761_v17 }
  0x3b   :  { %1007 = vmatpush1.bf16.msra.mxu0 %v7569_v19  ;;  %v7598_v19 = vld [vmem:[%s12166_s4 + $0xe8] ss:$16 sps:$4 sm:$0xff]  }
  0x3c   :  { %1038 = vmatpush1.bf16.msra.mxu1 %v7454_v56  ;;  %12816 = vst [vmem:[#allocation22_spill] sm:$0xff] %v7598_v19  ;;  %1008 = vmatprep.subr.bf16.mxu0 %v7583_v22  ;;  %v7617_v22 = vld [vmem:[%s12166_s4 + $0x100] ss:$16 sps:$4 sm:$0xff]  }
  0x3d   :  { %1039 = vmatprep.subr.bf16.mxu1 %v7466_v58  ;;  %12819 = vst [vmem:[#allocation25_spill] sm:$0xff] %v7617_v22 }
  0x3f   :  { %1009 = vmatpush1.bf16.msra.mxu0 %v7593_v4  ;;  %v7622_v4 = vld [vmem:[%s12166_s4 + $0x108] ss:$16 sps:$4 sm:$0xff]  }
  0x40   :  { %1040 = vmatpush1.bf16.msra.mxu1 %v7476_v60  ;;  %12820 = vst [vmem:[#allocation26_spill] sm:$0xff] %v7622_v4 }
  0x41   :  { %1041 = vmatprep.subr.bf16.mxu1 %v7490_v62 }
  0x44   :  { %1042 = vmatpush1.bf16.msra.mxu1 %v7504_v0 }
  0x45   :  { %1043 = vmatprep.subr.bf16.mxu1 %v7516_v3 }
  0x48   :  { %1044 = vmatpush1.bf16.msra.mxu1 %v7526_v9  ;;  %v7801_v9 = vsub.s32 0, %v7211_v6 }
  0x49   :  { %1045 = vmatprep.subr.bf16.mxu1 %v7540_v12 }
  0x4a   :  { %12849 = vst [vmem:[#allocation55_spill] sm:$0xff] %v7801_v9 }
  0x4c   :  { %1046 = vmatpush1.bf16.msra.mxu1 %v7550_v15  ;;  %v7766_v15 = vld [vmem:[%s12166_s4 + $0x1c8] ss:$16 sps:$4 sm:$0xff]  }
  0x4d   :  { %1047 = vmatprep.subr.bf16.mxu1 %v7564_v18  ;;  %v7612_v18 = vld [vmem:[%s12166_s4 + $0x10c] ss:$16 sps:$4 sm:$0xff]   ;;  %12844 = vst [vmem:[#allocation50_spill] sm:$0xff] %v7766_v15 }
  0x4e   :  { %12818 = vst [vmem:[#allocation24_spill] sm:$0xff] %v7612_v18 }
  0x50   :  { %1048 = vmatpush1.bf16.msra.mxu1 %v7574_v20  ;;  %v7607_v20 = vld [vmem:[%s12166_s4 + $0x104] ss:$16 sps:$4 sm:$0xff]  }
  0x51   :  { %1049 = vmatprep.subr.bf16.mxu1 %v7588_v24  ;;  %12817 = vst [vmem:[#allocation23_spill] sm:$0xff] %v7607_v20  ;;  %1010 = vmatprep.subr.bf16.mxu0 %v7607_v20  ;;  %v7636_v24 = vld [vmem:[%s12166_s4 + $0x12c] ss:$16 sps:$4 sm:$0xff]   ;;  %v7641_v20 = vld [vmem:[%s12166_s4 + $0x120] ss:$16 sps:$4 sm:$0xff]  }
  0x52   :  { %1011 = vmatpush1.bf16.msra.mxu0 %v7617_v22  ;;  %12822 = vst [vmem:[#allocation28_spill] sm:$0xff] %v7636_v24  ;;  %12823 = vst [vmem:[#allocation29_spill] sm:$0xff] %v7641_v20  ;;  %v7646_v22 = vld [vmem:[%s12166_s4 + $0x128] ss:$16 sps:$4 sm:$0xff]  }
  0x53   :  { %12824 = vst [vmem:[#allocation30_spill] sm:$0xff] %v7646_v22 }
  0x54   :  { %1050 = vmatpush1.bf16.msra.mxu1 %v7598_v19  ;;  %v7631_v19 = vld [vmem:[%s12166_s4 + $0x124] ss:$16 sps:$4 sm:$0xff]  }
  0x55   :  { %1051 = vmatprep.subr.bf16.mxu1 %v7612_v18  ;;  %12821 = vst [vmem:[#allocation27_spill] sm:$0xff] %v7631_v19  ;;  %1012 = vmatprep.subr.bf16.mxu0 %v7631_v19  ;;  %v7660_v18 = vld [vmem:[%s12166_s4 + $0x14c] ss:$16 sps:$4 sm:$0xff]   ;;  %v7665_v19 = vld [vmem:[%s12166_s4 + $0x140] ss:$16 sps:$4 sm:$0xff]  }
  0x56   :  { %1013 = vmatpush1.bf16.msra.mxu0 %v7641_v20  ;;  %12826 = vst [vmem:[#allocation32_spill] sm:$0xff] %v7660_v18  ;;  %12827 = vst [vmem:[#allocation33_spill] sm:$0xff] %v7665_v19  ;;  %v7670_v20 = vld [vmem:[%s12166_s4 + $0x148] ss:$16 sps:$4 sm:$0xff]  }
  0x57   :  { %12828 = vst [vmem:[#allocation34_spill] sm:$0xff] %v7670_v20 }
  0x58   :  { %1052 = vmatpush1.bf16.msra.mxu1 %v7622_v4  ;;  %v7655_v4 = vld [vmem:[%s12166_s4 + $0x144] ss:$16 sps:$4 sm:$0xff]  }
  0x59   :  { %1053 = vmatprep.subr.bf16.mxu1 %v7636_v24  ;;  %12825 = vst [vmem:[#allocation31_spill] sm:$0xff] %v7655_v4  ;;  %1014 = vmatprep.subr.bf16.mxu0 %v7655_v4  ;;  %v7684_v24 = vld [vmem:[%s12166_s4 + $0x16c] ss:$16 sps:$4 sm:$0xff]   ;;  %v7689_v4 = vld [vmem:[%s12166_s4 + $0x160] ss:$16 sps:$4 sm:$0xff]  }
  0x5a   :  { %1015 = vmatpush1.bf16.msra.mxu0 %v7665_v19  ;;  %12830 = vst [vmem:[#allocation36_spill] sm:$0xff] %v7684_v24  ;;  %12831 = vst [vmem:[#allocation37_spill] sm:$0xff] %v7689_v4  ;;  %v7694_v19 = vld [vmem:[%s12166_s4 + $0x168] ss:$16 sps:$4 sm:$0xff]  }
  0x5b   :  { %12832 = vst [vmem:[#allocation38_spill] sm:$0xff] %v7694_v19 }
  0x5c   :  { %1054 = vmatpush1.bf16.msra.mxu1 %v7646_v22  ;;  %v7679_v22 = vld [vmem:[%s12166_s4 + $0x164] ss:$16 sps:$4 sm:$0xff]  }
  0x5d   :  { %1055 = vmatprep.subr.bf16.mxu1 %v7660_v18  ;;  %12829 = vst [vmem:[#allocation35_spill] sm:$0xff] %v7679_v22  ;;  %1016 = vmatprep.subr.bf16.mxu0 %v7679_v22  ;;  %v7708_v18 = vld [vmem:[%s12166_s4 + $0x18c] ss:$16 sps:$4 sm:$0xff]   ;;  %v7713_v22 = vld [vmem:[%s12166_s4 + $0x180] ss:$16 sps:$4 sm:$0xff]  }
  0x5e   :  { %1017 = vmatpush1.bf16.msra.mxu0 %v7689_v4  ;;  %12834 = vst [vmem:[#allocation40_spill] sm:$0xff] %v7708_v18  ;;  %12835 = vst [vmem:[#allocation41_spill] sm:$0xff] %v7713_v22  ;;  %v7718_v4 = vld [vmem:[%s12166_s4 + $0x188] ss:$16 sps:$4 sm:$0xff]  }
  0x5f   :  { %12836 = vst [vmem:[#allocation42_spill] sm:$0xff] %v7718_v4 }
  0x60   :  { %1056 = vmatpush1.bf16.msra.mxu1 %v7670_v20  ;;  %v7703_v20 = vld [vmem:[%s12166_s4 + $0x184] ss:$16 sps:$4 sm:$0xff]  }
  0x61   :  { %1057 = vmatprep.subr.bf16.mxu1 %v7684_v24  ;;  %12833 = vst [vmem:[#allocation39_spill] sm:$0xff] %v7703_v20  ;;  %1018 = vmatprep.subr.bf16.mxu0 %v7703_v20  ;;  %v7732_v24 = vld [vmem:[%s12166_s4 + $0x1ac] ss:$16 sps:$4 sm:$0xff]   ;;  %v7737_v20 = vld [vmem:[%s12166_s4 + $0x1a0] ss:$16 sps:$4 sm:$0xff]  }
  0x62   :  { %1019 = vmatpush1.bf16.msra.mxu0 %v7713_v22  ;;  %12838 = vst [vmem:[#allocation44_spill] sm:$0xff] %v7732_v24  ;;  %12839 = vst [vmem:[#allocation45_spill] sm:$0xff] %v7737_v20  ;;  %v7742_v22 = vld [vmem:[%s12166_s4 + $0x1a8] ss:$16 sps:$4 sm:$0xff]  }
  0x63   :  { %12840 = vst [vmem:[#allocation46_spill] sm:$0xff] %v7742_v22 }
  0x64   :  { %1058 = vmatpush1.bf16.msra.mxu1 %v7694_v19  ;;  %v7727_v19 = vld [vmem:[%s12166_s4 + $0x1a4] ss:$16 sps:$4 sm:$0xff]  }
  0x65   :  { %1059 = vmatprep.subr.bf16.mxu1 %v7708_v18  ;;  %12837 = vst [vmem:[#allocation43_spill] sm:$0xff] %v7727_v19  ;;  %v7752_v18 = vld [vmem:[%s12166_s4 + $0x1cc] ss:$16 sps:$4 sm:$0xff]   ;;  %1020 = vmatprep.subr.bf16.mxu0 %v7727_v19 }
  0x66   :  { %12842 = vst [vmem:[#allocation48_spill] sm:$0xff] %v7752_v18  ;;  %1021 = vmatpush1.bf16.msra.mxu0 %v7737_v20  ;;  %v7773_v20 = vld [vmem:[%s12166_s4 + $0x1e4] ss:$16 sps:$4 sm:$0xff]  }
  0x67   :  { %12845 = vst [vmem:[#allocation51_spill] sm:$0xff] %v7773_v20 }
  0x68   :  { %1060 = vmatpush1.bf16.msra.mxu1 %v7718_v4  ;;  %v7747_v4 = vld [vmem:[%s12166_s4 + $0x1c4] ss:$16 sps:$4 sm:$0xff]  }
  0x69   :  { %12841 = vst [vmem:[#allocation47_spill] sm:$0xff] %v7747_v4  ;;  %1061 = vmatprep.subr.bf16.mxu1 %v7732_v24  ;;  %1022 = vmatprep.subr.bf16.mxu0 %v7747_v4  ;;  %v12247_v24 = vmov 0.0|0.0   ;;  %v7792_v4 = vld [vmem:[%s12166_s4 + $0x1e8] ss:$16 sps:$4 sm:$0xff]  }
  0x6a   :  { %1026 = vmatprep.mubr.bf16.mxu0 %v12247_v24  ;;  %1067 = vmatprep.mubr.bf16.mxu1 %v12247_v24  ;;  %12848 = vst [vmem:[#allocation54_spill] sm:$0xff] %v7792_v4 }
  0x6b   :  { %1023 = vmatpush1.bf16.msra.mxu0 %v7761_v17 }
  0x6c   :  { %1062 = vmatpush1.bf16.msra.mxu1 %v7742_v22  ;;  %v7778_v22 = vld [vmem:[%s12166_s4 + $0x1ec] ss:$16 sps:$4 sm:$0xff]   ;;  %1024 = vmatprep.subr.bf16.mxu0 %v7773_v20 }
  0x6d   :  { %1063 = vmatprep.subr.bf16.mxu1 %v7752_v18  ;;  %12846 = vst [vmem:[#allocation52_spill] sm:$0xff] %v7778_v22  ;;  %v7787_v18 = vld [vmem:[%s12166_s4 + $0x1e0] ss:$16 sps:$4 sm:$0xff]  }
  0x6e   :  { %12847 = vst [vmem:[#allocation53_spill] sm:$0xff] %v7787_v18 }
  0x6f   :  { %1025 = vmatpush1.bf16.msra.mxu0 %v7787_v18  ;;  %v242_v18 = vld [vmem:[%s12167_s3] sm:$0xf] }
  0x70   :  { %1064 = vmatpush1.bf16.msra.mxu1 %v7766_v15  ;;  %1100 = vmatprep.subr.bf16.mxu0 %v7202_v1 }
  0x71   :  { %1065 = vmatprep.subr.bf16.mxu1 %v7778_v22 }
  0x74   :  { %1066 = vmatpush1.bf16.msra.mxu1 %v7792_v4  ;;  %v7807_v4 = vsub.s32 1, %v7211_v6 }
  0x75   :  { %1141 = vmatprep.subr.bf16.mxu1 %v7269_v26  ;;  %v247_v26 = vrot.slane %v242_v18, %v7801_v9  ;;  %v7818_v9 = vsub.s32 2, %v7211_v6 }
  0x76   :  { %12850 = vst [vmem:[#allocation56_spill] sm:$0xff] %v7807_v4  ;;  %v251_v1 = vrot.slane %v242_v18, %v7807_v4 }
  0x77   :  { %12853 = vst [vmem:[#allocation59_spill] sm:$0xff] %v7818_v9 }
  0xe2   :  { %v333_v24 = vpop.f32.mrb[0].mxu1 }
  0xe3   :  { %v335_v15 = vpop.f32.mrb[1].mxu1 }
  0xe4   :  { %v337_v17 = vpop.f32.mrb[2].mxu1 }
  0xe5   :  { %v338_v19 = vpop.f32.mrb[3].mxu1  ;;  %v7811_v17 = vadd.f32 %v333_v24, %v247_v26  ;;  %v7821_v26 = vsub.s32 3, %v7211_v6 }
  0xe6   :  { %v7813_v19 = vadd.f32 %v335_v15, %v251_v1  ;;  %v255_v15 = vrot.slane %v242_v18, %v7818_v9 }
  0xe7   :  { %12851 = vst [vmem:[#allocation57_spill] sm:$0xff] %v7811_v17  ;;  %12854 = vst [vmem:[#allocation60_spill] sm:$0xff] %v7821_v26 }
  0xe8   :  { %12852 = vst [vmem:[#allocation58_spill] sm:$0xff] %v7813_v19 }
  0xea   :  { %v374_v14 = vpop.f32.mrb[4].mxu1 }
  0xeb   :  { %v376_v12 = vpop.f32.mrb[5].mxu1 }
  0xec   :  { %v378_v11 = vpop.f32.mrb[6].mxu1 }
  0xed   :  { %v379_v20 = vpop.f32.mrb[7].mxu1 }
  0xf5   :  { %v575_v11 = vpop.f32.mrb[0].mxu0 }
  0xf6   :  { %v623_v22 = vadd.f32 %v575_v11, %v7811_v17  ;;  %v577_v8 = vpop.f32.mrb[1].mxu0  ;;  %v259_v11 = vrot.slane %v242_v18, %v7821_v26 }
  0xf7   :  { %v624_v20 = vadd.f32 %v577_v8, %v7813_v19  ;;  %v579_v3 = vpop.f32.mrb[2].mxu0  ;;  %v7825_v8 = vadd.f32 %v374_v14, %v255_v15 }
  0xf8   :  { %v5552_v2 = vmul.f32 -1.442695, %v623_v22  ;;  %v580_v0 = vpop.f32.mrb[3].mxu0 }
  0xf9   :  { %v5553_v63 = vmul.f32 -1.442695, %v624_v20  ;;  %v7827_v0 = vadd.f32 %v376_v12, %v259_v11 }
  0xfa   :  { %6228 = vpow2.f32 %v5552_v2 }
  0xfb   :  { %6230 = vpow2.f32 %v5553_v63 }
 0x104   :  { %v6229_v1 = vpop.eup %6228 }
 0x105   :  { %v6231_v24 = vpop.eup %6230  ;;  %v636_v3 = vadd.f32 1.0, %v6229_v1 }
 0x106   :  { %v637_v17 = vadd.f32 1.0, %v6231_v24 }
 0x108   :  { %6232 = vrcp.f32 %v637_v17 }
 0x109   :  { %6234 = vrcp.f32 %v636_v3 }
 0x10a   :  { %v616_v2 = vpop.f32.mrb[8].mxu1 }
 0x10b   :  { %v625_v63 = vadd.f32 %v616_v2, %v7825_v8  ;;  %v618_v22 = vpop.f32.mrb[9].mxu1 }
 0x10c   :  { %v626_v20 = vadd.f32 %v618_v22, %v7827_v0  ;;  %v620_v6 = vpop.f32.mrb[10].mxu1  ;;  %v12873_v22 = vld [vmem:[#allocation22_spill] sm:$0xff] }
 0x10d   :  { %v5554_v19 = vmul.f32 -1.442695, %v625_v63  ;;  %v621_v9 = vpop.f32.mrb[11].mxu1  ;;  %v12872_v63 = vld [vmem:[#allocation21_spill] sm:$0xff] }
 0x10e   :  { %6236 = vtanh.f32 %v626_v20  ;;  %v12855_v9 = vmov 0   ;;  %v12874_v20 = vld [vmem:[#allocation23_spill] sm:$0xff] }
 0x10f   :  { %6238 = vpow2.f32 %v5554_v19  ;;  %v12871_v19 = vld [vmem:[#allocation20_spill] sm:$0xff] }
 0x112   :  { %v6233_v18 = vpop.eup %6232 }
 0x113   :  { %v6235_v24 = vpop.eup %6234  ;;  %v646_v1 = vmul.f32 0.0, %v6233_v18  ;;  %v12875_v18 = vld [vmem:[#allocation24_spill] sm:$0xff] }
 0x118   :  { %v6237_v14 = vpop.eup %6236 }
 0x119   :  { %v6239_v15 = vpop.eup %6238  ;;  %v647_v12 = vmul.f32 %v6237_v14, %v6235_v24  ;;  %v12876_v24 = vld [vmem:[#allocation25_spill] sm:$0xff]  ;;  %v12877_v14 = vld [vmem:[#allocation26_spill] sm:$0xff] }
 0x11a   :  { %v638_v11 = vadd.f32 1.0, %v6239_v15  ;;  %v12878_v15 = vld [vmem:[#allocation27_spill] sm:$0xff] }
 0x11b   :  { %v7831_v26 = vadd.f32 %v647_v12, %v646_v1  ;;  %v12879_v1 = vld [vmem:[#allocation28_spill] sm:$0xff]  ;;  %v12880_v12 = vld [vmem:[#allocation29_spill] sm:$0xff] }
 0x11c   :  { %6240 = vrcp.f32 %v638_v11  ;;  %v12881_v11 = vld [vmem:[#allocation30_spill] sm:$0xff] }
 0x11d   :  { %6242 = vtanh.f32 %v7831_v26 }
 0x126   :  { %v6241_v17 = vpop.eup %6240 }
 0x127   :  { %v6243_v2 = vpop.eup %6242 }
 0x128   :  { %v650_v6 = vmul.f32 %v6243_v2, %v6241_v17  ;;  %v12882_v17 = vld [vmem:[#allocation31_spill] sm:$0xff]  ;;  %v12883_v2 = vld [vmem:[#allocation32_spill] sm:$0xff] }
 0x12a   :  { %v651_v3 = vpack.c.bf16 %v650_v6, %v650_v6  ;;  %v12884_v6 = vld [vmem:[#allocation33_spill] sm:$0xff] }
 0x12c   :  { %1027 = vmatmul.mubr.bf16.vlgmr.msra.gmra.mrb[4].mxu0 %v651_v3  ;;  %1068 = vmatmul.mubr.bf16.vlgmr.msra.gmra.mrb[12].mxu1 %v651_v3 }
 0x12d   :  { %1101 = vmatpush1.bf16.msra.mxu0 %v7209_v5  ;;  %1142 = vmatpush1.bf16.msra.mxu1 %v7290_v29  ;;  %v12856_v5 = vld [vmem:[#allocation5_spill] sm:$0xff] }
 0x12e   :  { %1102 = vmatprep.subr.bf16.mxu0 %v7217_v7  ;;  %1143 = vmatprep.subr.bf16.mxu1 %v7301_v31  ;;  %v12857_v7 = vld [vmem:[#allocation6_spill] sm:$0xff] }
 0x12f   :  { %1132 = vmatprep.mubr.bf16.mxu0 %v12855_v9  ;;  %1173 = vmatprep.mubr.bf16.mxu1 %v12855_v9 }
 0x131   :  { %1103 = vmatpush1.bf16.msra.mxu0 %v7226_v10  ;;  %1144 = vmatpush1.bf16.msra.mxu1 %v7314_v33  ;;  %v12858_v10 = vld [vmem:[#allocation7_spill] sm:$0xff] }
 0x132   :  { %1104 = vmatprep.subr.bf16.mxu0 %v7233_v13  ;;  %1145 = vmatprep.subr.bf16.mxu1 %v7326_v35  ;;  %v12859_v13 = vld [vmem:[#allocation8_spill] sm:$0xff] }
 0x135   :  { %1105 = vmatpush1.bf16.msra.mxu0 %v7238_v16  ;;  %1146 = vmatpush1.bf16.msra.mxu1 %v7339_v37  ;;  %v12860_v16 = vld [vmem:[#allocation9_spill] sm:$0xff] }
 0x136   :  { %1106 = vmatprep.subr.bf16.mxu0 %v7249_v21  ;;  %1147 = vmatprep.subr.bf16.mxu1 %v7351_v39  ;;  %v12861_v21 = vld [vmem:[#allocation10_spill] sm:$0xff] }
 0x139   :  { %1107 = vmatpush1.bf16.msra.mxu0 %v7256_v23  ;;  %1148 = vmatpush1.bf16.msra.mxu1 %v7358_v40  ;;  %v12862_v23 = vld [vmem:[#allocation11_spill] sm:$0xff] }
 0x13a   :  { %1108 = vmatprep.subr.bf16.mxu0 %v7264_v25  ;;  %1149 = vmatprep.subr.bf16.mxu1 %v7364_v41  ;;  %v12863_v25 = vld [vmem:[#allocation12_spill] sm:$0xff] }
 0x13d   :  { %1109 = vmatpush1.bf16.msra.mxu0 %v7276_v27  ;;  %1150 = vmatpush1.bf16.msra.mxu1 %v7371_v42  ;;  %v12864_v27 = vld [vmem:[#allocation13_spill] sm:$0xff] }
 0x13e   :  { %1110 = vmatprep.subr.bf16.mxu0 %v7283_v28  ;;  %1151 = vmatprep.subr.bf16.mxu1 %v7377_v43  ;;  %v12865_v28 = vld [vmem:[#allocation14_spill] sm:$0xff] }
 0x141   :  { %1111 = vmatpush1.bf16.msra.mxu0 %v7295_v30  ;;  %1152 = vmatpush1.bf16.msra.mxu1 %v7383_v44  ;;  %v12866_v30 = vld [vmem:[#allocation15_spill] sm:$0xff] }
 0x142   :  { %1112 = vmatprep.subr.bf16.mxu0 %v7306_v32  ;;  %1153 = vmatprep.subr.bf16.mxu1 %v7389_v45  ;;  %v12867_v32 = vld [vmem:[#allocation16_spill] sm:$0xff] }
 0x145   :  { %1113 = vmatpush1.bf16.msra.mxu0 %v7319_v34  ;;  %1154 = vmatpush1.bf16.msra.mxu1 %v7395_v46  ;;  %v12868_v34 = vld [vmem:[#allocation17_spill] sm:$0xff] }
 0x146   :  { %1114 = vmatprep.subr.bf16.mxu0 %v7331_v36  ;;  %1155 = vmatprep.subr.bf16.mxu1 %v7401_v47  ;;  %v12869_v36 = vld [vmem:[#allocation18_spill] sm:$0xff] }
 0x149   :  { %1115 = vmatpush1.bf16.msra.mxu0 %v7344_v38  ;;  %1156 = vmatpush1.bf16.msra.mxu1 %v7407_v48  ;;  %v12870_v38 = vld [vmem:[#allocation19_spill] sm:$0xff] }
 0x14a   :  { %1238 = vmatprep.subr.bf16.mxu0 %v7415_v49  ;;  %1279 = vmatprep.subr.bf16.mxu1 %v7420_v50 }
 0x14c   :  { %1133 = vmatmul.mubr.bf16.vlgmr.msra.gmra.mrb[8].mxu0 %v651_v3  ;;  %1174 = vmatmul.mubr.bf16.vlgmr.msra.gmra.mrb[16].mxu1 %v651_v3  ;;  %v12885_v3 = vld [vmem:[#allocation34_spill] sm:$0xff] }
 0x14d   :  { %1239 = vmatpush1.bf16.msra.mxu0 %v7426_v51  ;;  %1280 = vmatpush1.bf16.msra.mxu1 %v7431_v52 }
 0x14e   :  { %1240 = vmatprep.subr.bf16.mxu0 %v7439_v53  ;;  %1281 = vmatprep.subr.bf16.mxu1 %v7444_v54 }
 0x151   :  { %1241 = vmatpush1.bf16.msra.mxu0 %v7449_v55  ;;  %1282 = vmatpush1.bf16.msra.mxu1 %v7454_v56 }
 0x152   :  { %1242 = vmatprep.subr.bf16.mxu0 %v7461_v57  ;;  %1283 = vmatprep.subr.bf16.mxu1 %v7466_v58 }
 0x155   :  { %1243 = vmatpush1.bf16.msra.mxu0 %v7471_v59  ;;  %1284 = vmatpush1.bf16.msra.mxu1 %v7476_v60 }
 0x156   :  { %1244 = vmatprep.subr.bf16.mxu0 %v7483_v61  ;;  %1285 = vmatprep.subr.bf16.mxu1 %v7490_v62 }
 0x159   :  { %1245 = vmatpush1.bf16.msra.mxu0 %v12856_v5  ;;  %1286 = vmatpush1.bf16.msra.mxu1 %v12857_v7 }
 0x15a   :  { %1246 = vmatprep.subr.bf16.mxu0 %v12858_v10  ;;  %1287 = vmatprep.subr.bf16.mxu1 %v12859_v13 }
 0x15d   :  { %1247 = vmatpush1.bf16.msra.mxu0 %v12860_v16  ;;  %1288 = vmatpush1.bf16.msra.mxu1 %v12861_v21 }
 0x15e   :  { %1248 = vmatprep.subr.bf16.mxu0 %v12862_v23  ;;  %1289 = vmatprep.subr.bf16.mxu1 %v12863_v25 }
 0x161   :  { %1249 = vmatpush1.bf16.msra.mxu0 %v12864_v27  ;;  %1290 = vmatpush1.bf16.msra.mxu1 %v12865_v28 }
 0x162   :  { %1250 = vmatprep.subr.bf16.mxu0 %v12866_v30  ;;  %1291 = vmatprep.subr.bf16.mxu1 %v12867_v32 }
 0x165   :  { %1251 = vmatpush1.bf16.msra.mxu0 %v12868_v34  ;;  %1292 = vmatpush1.bf16.msra.mxu1 %v12869_v36  ;;  %v12911_v36 = vld [vmem:[#allocation59_spill] sm:$0xff] }
 0x166   :  { %1252 = vmatprep.subr.bf16.mxu0 %v12870_v38  ;;  %1293 = vmatprep.subr.bf16.mxu1 %v12871_v19 }
 0x169   :  { %1253 = vmatpush1.bf16.msra.mxu0 %v12872_v63  ;;  %1294 = vmatpush1.bf16.msra.mxu1 %v12873_v22 }
 0x16a   :  { %1254 = vmatprep.subr.bf16.mxu0 %v12874_v20  ;;  %1295 = vmatprep.subr.bf16.mxu1 %v12875_v18  ;;  %v12886_v18 = vld [vmem:[#allocation35_spill] sm:$0xff] }
 0x16d   :  { %1255 = vmatpush1.bf16.msra.mxu0 %v12876_v24  ;;  %1296 = vmatpush1.bf16.msra.mxu1 %v12877_v14  ;;  %v12887_v24 = vld [vmem:[#allocation36_spill] sm:$0xff]  ;;  %v12888_v14 = vld [vmem:[#allocation37_spill] sm:$0xff] }
 0x16e   :  { %1256 = vmatprep.subr.bf16.mxu0 %v12878_v15  ;;  %1297 = vmatprep.subr.bf16.mxu1 %v12879_v1  ;;  %v12889_v15 = vld [vmem:[#allocation38_spill] sm:$0xff]  ;;  %v12890_v1 = vld [vmem:[#allocation39_spill] sm:$0xff] }
 0x171   :  { %1257 = vmatpush1.bf16.msra.mxu0 %v12880_v12  ;;  %1298 = vmatpush1.bf16.msra.mxu1 %v12881_v11  ;;  %v12891_v12 = vld [vmem:[#allocation40_spill] sm:$0xff]  ;;  %v12892_v11 = vld [vmem:[#allocation41_spill] sm:$0xff] }
 0x172   :  { %1258 = vmatprep.subr.bf16.mxu0 %v12882_v17  ;;  %1299 = vmatprep.subr.bf16.mxu1 %v12883_v2  ;;  %v12893_v17 = vld [vmem:[#allocation42_spill] sm:$0xff]  ;;  %v12894_v2 = vld [vmem:[#allocation43_spill] sm:$0xff] }
 0x175   :  { %1259 = vmatpush1.bf16.msra.mxu0 %v12884_v6  ;;  %1300 = vmatpush1.bf16.msra.mxu1 %v12885_v3  ;;  %v12895_v6 = vld [vmem:[#allocation44_spill] sm:$0xff]  ;;  %v12896_v3 = vld [vmem:[#allocation45_spill] sm:$0xff] }
 0x176   :  { %1260 = vmatprep.subr.bf16.mxu0 %v12886_v18  ;;  %1301 = vmatprep.subr.bf16.mxu1 %v12887_v24  ;;  %v12897_v18 = vld [vmem:[#allocation46_spill] sm:$0xff]  ;;  %v12898_v24 = vld [vmem:[#allocation47_spill] sm:$0xff] }
 0x179   :  { %1261 = vmatpush1.bf16.msra.mxu0 %v12888_v14  ;;  %1302 = vmatpush1.bf16.msra.mxu1 %v12889_v15  ;;  %v12899_v14 = vld [vmem:[#allocation48_spill] sm:$0xff]  ;;  %v12900_v15 = vld [vmem:[#allocation49_spill] sm:$0xff] }
 0x17a   :  { %1262 = vmatprep.subr.bf16.mxu0 %v12890_v1  ;;  %1303 = vmatprep.subr.bf16.mxu1 %v12891_v12  ;;  %v12901_v1 = vld [vmem:[#allocation50_spill] sm:$0xff]  ;;  %v12902_v12 = vld [vmem:[#allocation51_spill] sm:$0xff] }
 0x17d   :  { %1263 = vmatpush1.bf16.msra.mxu0 %v12892_v11  ;;  %1304 = vmatpush1.bf16.msra.mxu1 %v12893_v17  ;;  %v12903_v11 = vld [vmem:[#allocation52_spill] sm:$0xff]  ;;  %v12904_v17 = vld [vmem:[#allocation53_spill] sm:$0xff] }
 0x17e   :  { %1264 = vmatprep.subr.bf16.mxu0 %v12894_v2  ;;  %1305 = vmatprep.subr.bf16.mxu1 %v12895_v6  ;;  %v12905_v2 = vld [vmem:[#allocation54_spill] sm:$0xff] }
 0x17f   :  { %v12906_v6 = vld [vmem:[#allocation2_spill] sm:$0xff] }
 0x181   :  { %1265 = vmatpush1.bf16.msra.mxu0 %v12896_v3  ;;  %1306 = vmatpush1.bf16.msra.mxu1 %v12897_v18  ;;  %v12907_v3 = vld [vmem:[#allocation4_spill] sm:$0xff] }
 0x182   :  { %1266 = vmatprep.subr.bf16.mxu0 %v12898_v24  ;;  %1307 = vmatprep.subr.bf16.mxu1 %v12899_v14  ;;  %v141_v14 = vld [vmem:[%s12168_s5] sm:$0xf]  ;;  %v12908_v24 = vld [vmem:[#allocation55_spill] sm:$0xff] }
 0x185   :  { %1267 = vmatpush1.bf16.msra.mxu0 %v12900_v15  ;;  %1308 = vmatpush1.bf16.msra.mxu1 %v12901_v1  ;;  %v7936_v15 = vrot.slane %v141_v14, %v12908_v24  ;;  %v7939_v1 = vrot.slane %v141_v14, %v7807_v4  ;;  %v7944_v24 = vrot.slane %v141_v14, %v12911_v36  ;;  %v12913_v4 = vld [vmem:[#allocation60_spill] sm:$0xff] }
 0x186   :  { %1268 = vmatprep.subr.bf16.mxu0 %v12902_v12  ;;  %1309 = vmatprep.subr.bf16.mxu1 %v12903_v11  ;;  %v7947_v34 = vrot.slane %v141_v14, %v12913_v4 }
 0x187   :  { %12909 = vst [vmem:[#allocation5_spill] sm:$0xff] %v7936_v15  ;;  %12910 = vst [vmem:[#allocation6_spill] sm:$0xff] %v7939_v1 }
 0x188   :  { %12912 = vst [vmem:[#allocation7_spill] sm:$0xff] %v7944_v24  ;;  %12914 = vst [vmem:[#allocation8_spill] sm:$0xff] %v7947_v34 }
 0x189   :  { %1269 = vmatpush1.bf16.msra.mxu0 %v12904_v17  ;;  %1310 = vmatpush1.bf16.msra.mxu1 %v12905_v2 }
 0x18a   :  { %1344 = vmatprep.subr.bf16.mxu0 %v12906_v6  ;;  %1385 = vmatprep.subr.bf16.mxu1 %v12907_v3 }
 0x1ff   :  { %v1028_v12 = vpop.f32.mrb[4].mxu0  ;;  %v1069_v11 = vpop.f32.mrb[12].mxu1 }
 0x200   :  { %v1029_v17 = vadd.f32 %v1028_v12, %v7936_v15  ;;  %v1030_v18 = vpop.f32.mrb[5].mxu0  ;;  %v1071_v2 = vpop.f32.mrb[13].mxu1  ;;  %v1070_v12 = vadd.f32 %v1069_v11, %v7944_v24 }
 0x201   :  { %v1031_v6 = vadd.f32 %v1030_v18, %v7939_v1  ;;  %v1032_v20 = vpop.f32.mrb[6].mxu0  ;;  %v1073_v3 = vpop.f32.mrb[14].mxu1  ;;  %v1072_v15 = vadd.f32 %v1071_v2, %v7947_v34 }
 0x202   :  { %v5619_v22 = vmul.f32 -1.442695, %v1029_v17  ;;  %v1033_v63 = vpop.f32.mrb[7].mxu0  ;;  %v1074_v19 = vpop.f32.mrb[15].mxu1  ;;  %v5621_v32 = vmul.f32 -1.442695, %v1070_v12 }
 0x203   :  { %v5620_v38 = vmul.f32 -1.442695, %v1031_v6 }
 0x204   :  { %6244 = vpow2.f32 %v5619_v22 }
 0x205   :  { %6246 = vpow2.f32 %v5620_v38 }
 0x206   :  { %6248 = vtanh.f32 %v1072_v15 }
 0x207   :  { %6250 = vpow2.f32 %v5621_v32 }
 0x20e   :  { %v6245_v18 = vpop.eup %6244 }
 0x20f   :  { %v1085_v20 = vadd.f32 1.0, %v6245_v18  ;;  %v6247_v17 = vpop.eup %6246 }
 0x210   :  { %v1086_v19 = vadd.f32 1.0, %v6247_v17  ;;  %v6249_v63 = vpop.eup %6248  ;;  %v12916_v17 = vld [vmem:[#allocation57_spill] sm:$0xff] }
 0x211   :  { %6252 = vrcp.f32 %v1085_v20  ;;  %v6251_v6 = vpop.eup %6250 }
 0x212   :  { %6254 = vrcp.f32 %v1086_v19  ;;  %v1087_v14 = vadd.f32 1.0, %v6251_v6 }
 0x214   :  { %6256 = vrcp.f32 %v1087_v14 }
 0x21b   :  { %v6253_v22 = vpop.eup %6252 }
 0x21c   :  { %v1096_v38 = vmul.f32 %v6253_v22, %v6249_v63  ;;  %v6255_v3 = vpop.eup %6254  ;;  %v12917_v22 = vld [vmem:[#allocation58_spill] sm:$0xff] }
 0x21d   :  { %v1095_v4 = vmul.f32 0.0, %v6255_v3 }
 0x21e   :  { %v6257_v14 = vpop.eup %6256 }
 0x21f   :  { %v1134_v36 = vpop.f32.mrb[8].mxu0  ;;  %v1175_v11 = vpop.f32.mrb[16].mxu1  ;;  %v7951_v24 = vadd.f32 %v1096_v38, %v1095_v4 }
 0x220   :  { %v1186_v2 = vrot.slane %v1134_v36, 7  ;;  %v1136_v12 = vpop.f32.mrb[9].mxu0  ;;  %v1177_v18 = vpop.f32.mrb[17].mxu1  ;;  %v1188_v4 = vrot.slane %v1175_v11, 7 }
 0x221   :  { %12915 = vst [vmem:[#allocation9_spill] sm:$0xff] %v7951_v24  ;;  %v1187_v15 = vrot.slane %v1136_v12, 7  ;;  %v1138_v32 = vpop.f32.mrb[10].mxu0  ;;  %v1179_v20 = vpop.f32.mrb[18].mxu1  ;;  %6258 = vtanh.f32 %v7951_v24  ;;  %v1189_v36 = vrot.slane %v1177_v18, 7 }
 0x222   :  { %v1194_v19 = vadd.f32 %v1186_v2, %v12916_v17  ;;  %v1139_v34 = vpop.f32.mrb[11].mxu0  ;;  %v1180_v63 = vpop.f32.mrb[19].mxu1  ;;  %v1196_v38 = vadd.f32 %v1188_v4, %v7825_v8 }
 0x223   :  { %v1195_v6 = vadd.f32 %v1187_v15, %v12917_v22  ;;  %v1197_v32 = vadd.f32 %v1189_v36, %v7827_v0 }
 0x224   :  { %v5622_v3 = vmul.f32 -1.442695, %v1194_v19  ;;  %v5624_v24 = vmul.f32 -1.442695, %v1196_v38 }
 0x225   :  { %v5623_v1 = vmul.f32 -1.442695, %v1195_v6 }
 0x226   :  { %6260 = vpow2.f32 %v5622_v3  ;;  %v1218_v3 = vrot.slane %v7831_v26, 7  ;;  %v7965_v26 = vld [vmem:[%s12163_s2] ss:$16 sps:$4 sm:$0xff]  }
 0x227   :  { %6262 = vpow2.f32 %v5623_v1 }
 0x228   :  { %6264 = vtanh.f32 %v1197_v32 }
 0x229   :  { %6266 = vpow2.f32 %v5624_v24 }
 0x22b   :  { %v6259_v12 = vpop.eup %6258 }
 0x22c   :  { %v1099_v20 = vmul.f32 %v6259_v12, %v6257_v14 }
 0x22e   :  { %v1226_v30 = vrot.slane %v1099_v20, 7 }
 0x230   :  { %v6261_v2 = vpop.eup %6260  ;;  %v1229_v63 = vpack.c.bf16 %v1226_v30, %v1226_v30 }
 0x231   :  { %v1207_v34 = vadd.f32 1.0, %v6261_v2  ;;  %v6263_v15 = vpop.eup %6262 }
 0x232   :  { %v1208_v19 = vadd.f32 1.0, %v6263_v15  ;;  %v1234_v11 = vshrl.u32 %v1229_v63, 16  ;;  %v6265_v1 = vpop.eup %6264  ;;  %v7981_v63 = vld [vmem:[%s12163_s2 + $0x20] ss:$16 sps:$4 sm:$0xff]  }
 0x233   :  { %6268 = vrcp.f32 %v1207_v34  ;;  %v6267_v18 = vpop.eup %6266  ;;  %v7972_v34 = vld [vmem:[%s12163_s2 + $0x24] ss:$16 sps:$4 sm:$0xff]  }
 0x234   :  { %6270 = vrcp.f32 %v1208_v19  ;;  %1270 = vmatprep.mubr.bf16.mxu0 %v1234_v11  ;;  %1311 = vmatprep.mubr.bf16.mxu1 %v1234_v11  ;;  %v1209_v38 = vadd.f32 1.0, %v6267_v18  ;;  %v12945_v15 = vld [vmem:[#allocation42_spill] sm:$0xff]  ;;  %v12946_v19 = vld [vmem:[#allocation43_spill] sm:$0xff]  ;;  %v12947_v11 = vld [vmem:[#allocation44_spill] sm:$0xff] }
 0x235   :  { %v12949_v18 = vld [vmem:[#allocation46_spill] sm:$0xff] }
 0x236   :  { %6272 = vrcp.f32 %v1209_v38  ;;  %v12954_v38 = vld [vmem:[#allocation51_spill] sm:$0xff] }
 0x23d   :  { %v6269_v6 = vpop.eup %6268 }
 0x23e   :  { %v1221_v4 = vmul.f32 %v6269_v6, %v6265_v1  ;;  %v6271_v36 = vpop.eup %6270  ;;  %v12948_v1 = vld [vmem:[#allocation45_spill] sm:$0xff]  ;;  %v12950_v6 = vld [vmem:[#allocation47_spill] sm:$0xff] }
 0x23f   :  { %v1220_v14 = vmul.f32 %v6271_v36, %v1218_v3  ;;  %v12951_v3 = vld [vmem:[#allocation48_spill] sm:$0xff]  ;;  %v12953_v36 = vld [vmem:[#allocation50_spill] sm:$0xff] }
 0x240   :  { %v6273_v30 = vpop.eup %6272 }
 0x241   :  { %v7959_v12 = vadd.f32 %v1221_v4, %v1220_v14  ;;  %v12952_v4 = vld [vmem:[#allocation49_spill] sm:$0xff]  ;;  %v12955_v14 = vld [vmem:[#allocation52_spill] sm:$0xff] }
 0x243   :  { %6274 = vtanh.f32 %v7959_v12 }
 0x24d   :  { %v6275_v24 = vpop.eup %6274 }
 0x24e   :  { %v1224_v32 = vmul.f32 %v6275_v24, %v6273_v30  ;;  %v12956_v30 = vld [vmem:[#allocation53_spill] sm:$0xff]  ;;  %v12957_v24 = vld [vmem:[#allocation54_spill] sm:$0xff] }
 0x250   :  { %v1228_v20 = vpack.c.bf16 %v1224_v32, %v1224_v32  ;;  %v8136_v32 = vld [vmem:[%s12163_s2 + $0x4] ss:$16 sps:$4 sm:$0xff]  }
 0x251   :  { %12958 = vst [vmem:[#allocation10_spill] sm:$0xff] %v8136_v32 }
 0x252   :  { %v1231_v2 = vshrl.u32 %v1228_v20, 16  ;;  %v8142_v20 = vld [vmem:[%s12163_s2 + $0xc] ss:$16 sps:$4 sm:$0xff]  }
 0x253   :  { %12959 = vst [vmem:[#allocation11_spill] sm:$0xff] %v8142_v20 }
 0x254   :  { %1271 = vmatmul.mubr.bf16.vlgmr.msra.gmra.mrb[12].mxu0 %v1231_v2  ;;  %1312 = vmatmul.mubr.bf16.vlgmr.msra.gmra.mrb[20].mxu1 %v1231_v2 }
 0x255   :  { %1345 = vmatpush1.bf16.msra.mxu0 %v7965_v26  ;;  %1386 = vmatpush1.bf16.msra.mxu1 %v7290_v29  ;;  %v7988_v29 = vld [vmem:[%s12163_s2 + $0x44] ss:$16 sps:$4 sm:$0xff]  }
 0x256   :  { %1346 = vmatprep.subr.bf16.mxu0 %v7972_v34  ;;  %1387 = vmatprep.subr.bf16.mxu1 %v7301_v31  ;;  %v7995_v31 = vld [vmem:[%s12163_s2 + $0x40] ss:$16 sps:$4 sm:$0xff]  }
 0x257   :  { %1376 = vmatprep.mubr.bf16.mxu0 %v12855_v9  ;;  %1417 = vmatprep.mubr.bf16.mxu1 %v12855_v9 }
 0x259   :  { %1347 = vmatpush1.bf16.msra.mxu0 %v7981_v63  ;;  %1388 = vmatpush1.bf16.msra.mxu1 %v7314_v33  ;;  %v8002_v33 = vld [vmem:[%s12163_s2 + $0x64] ss:$16 sps:$4 sm:$0xff]  }
 0x25a   :  { %1348 = vmatprep.subr.bf16.mxu0 %v7988_v29  ;;  %1389 = vmatprep.subr.bf16.mxu1 %v7326_v35  ;;  %v8009_v35 = vld [vmem:[%s12163_s2 + $0x60] ss:$16 sps:$4 sm:$0xff]  }
 0x25d   :  { %1349 = vmatpush1.bf16.msra.mxu0 %v7995_v31  ;;  %1390 = vmatpush1.bf16.msra.mxu1 %v7339_v37  ;;  %v8016_v37 = vld [vmem:[%s12163_s2 + $0x84] ss:$16 sps:$4 sm:$0xff]  }
 0x25e   :  { %1350 = vmatprep.subr.bf16.mxu0 %v8002_v33  ;;  %1391 = vmatprep.subr.bf16.mxu1 %v7351_v39  ;;  %v8023_v39 = vld [vmem:[%s12163_s2 + $0x80] ss:$16 sps:$4 sm:$0xff]  }
 0x261   :  { %1351 = vmatpush1.bf16.msra.mxu0 %v8009_v35  ;;  %1392 = vmatpush1.bf16.msra.mxu1 %v7358_v40  ;;  %v8030_v40 = vld [vmem:[%s12163_s2 + $0xa4] ss:$16 sps:$4 sm:$0xff]  }
 0x262   :  { %1352 = vmatprep.subr.bf16.mxu0 %v8016_v37  ;;  %1393 = vmatprep.subr.bf16.mxu1 %v7364_v41  ;;  %v8037_v41 = vld [vmem:[%s12163_s2 + $0xa0] ss:$16 sps:$4 sm:$0xff]  }
 0x265   :  { %1353 = vmatpush1.bf16.msra.mxu0 %v8023_v39  ;;  %1394 = vmatpush1.bf16.msra.mxu1 %v7371_v42  ;;  %v8044_v42 = vld [vmem:[%s12163_s2 + $0xc4] ss:$16 sps:$4 sm:$0xff]  }
 0x266   :  { %1354 = vmatprep.subr.bf16.mxu0 %v8030_v40  ;;  %1395 = vmatprep.subr.bf16.mxu1 %v7377_v43  ;;  %v8051_v43 = vld [vmem:[%s12163_s2 + $0xc0] ss:$16 sps:$4 sm:$0xff]  }
 0x269   :  { %1355 = vmatpush1.bf16.msra.mxu0 %v8037_v41  ;;  %1396 = vmatpush1.bf16.msra.mxu1 %v7383_v44  ;;  %v8058_v44 = vld [vmem:[%s12163_s2 + $0xe4] ss:$16 sps:$4 sm:$0xff]  }
 0x26a   :  { %1356 = vmatprep.subr.bf16.mxu0 %v8044_v42  ;;  %1397 = vmatprep.subr.bf16.mxu1 %v7389_v45  ;;  %v8065_v45 = vld [vmem:[%s12163_s2 + $0xe0] ss:$16 sps:$4 sm:$0xff]  }
 0x26d   :  { %1357 = vmatpush1.bf16.msra.mxu0 %v8051_v43  ;;  %1398 = vmatpush1.bf16.msra.mxu1 %v7395_v46  ;;  %v12918_v46 = vld [vmem:[#allocation15_spill] sm:$0xff] }
 0x26e   :  { %1358 = vmatprep.subr.bf16.mxu0 %v8058_v44  ;;  %1399 = vmatprep.subr.bf16.mxu1 %v7401_v47  ;;  %v12919_v47 = vld [vmem:[#allocation16_spill] sm:$0xff] }
 0x271   :  { %1359 = vmatpush1.bf16.msra.mxu0 %v8065_v45  ;;  %1400 = vmatpush1.bf16.msra.mxu1 %v7407_v48  ;;  %v12920_v48 = vld [vmem:[#allocation17_spill] sm:$0xff] }
 0x272   :  { %1480 = vmatprep.subr.bf16.mxu0 %v7415_v49  ;;  %1521 = vmatprep.subr.bf16.mxu1 %v7420_v50  ;;  %v12921_v49 = vld [vmem:[#allocation18_spill] sm:$0xff]  ;;  %v12922_v50 = vld [vmem:[#allocation19_spill] sm:$0xff] }
 0x274   :  { %1377 = vmatmul.mubr.bf16.vlgmr.msra.gmra.mrb[16].mxu0 %v1231_v2  ;;  %1418 = vmatmul.mubr.bf16.vlgmr.msra.gmra.mrb[24].mxu1 %v1231_v2 }
 0x275   :  { %1481 = vmatpush1.bf16.msra.mxu0 %v7426_v51  ;;  %1522 = vmatpush1.bf16.msra.mxu1 %v7431_v52  ;;  %v12923_v51 = vld [vmem:[#allocation20_spill] sm:$0xff]  ;;  %v12924_v52 = vld [vmem:[#allocation21_spill] sm:$0xff] }
 0x276   :  { %1482 = vmatprep.subr.bf16.mxu0 %v7439_v53  ;;  %1523 = vmatprep.subr.bf16.mxu1 %v7444_v54  ;;  %v12925_v53 = vld [vmem:[#allocation22_spill] sm:$0xff]  ;;  %v12926_v54 = vld [vmem:[#allocation23_spill] sm:$0xff] }
 0x279   :  { %1483 = vmatpush1.bf16.msra.mxu0 %v7449_v55  ;;  %1524 = vmatpush1.bf16.msra.mxu1 %v7454_v56  ;;  %v12927_v55 = vld [vmem:[#allocation24_spill] sm:$0xff]  ;;  %v12928_v56 = vld [vmem:[#allocation25_spill] sm:$0xff] }
 0x27a   :  { %1484 = vmatprep.subr.bf16.mxu0 %v7461_v57  ;;  %1525 = vmatprep.subr.bf16.mxu1 %v7466_v58  ;;  %v12929_v57 = vld [vmem:[#allocation26_spill] sm:$0xff]  ;;  %v12930_v58 = vld [vmem:[#allocation27_spill] sm:$0xff] }
 0x27d   :  { %1485 = vmatpush1.bf16.msra.mxu0 %v7471_v59  ;;  %1526 = vmatpush1.bf16.msra.mxu1 %v7476_v60  ;;  %v12931_v59 = vld [vmem:[#allocation28_spill] sm:$0xff]  ;;  %v12932_v60 = vld [vmem:[#allocation29_spill] sm:$0xff] }
 0x27e   :  { %1486 = vmatprep.subr.bf16.mxu0 %v7483_v61  ;;  %1527 = vmatprep.subr.bf16.mxu1 %v7490_v62  ;;  %v12933_v61 = vld [vmem:[#allocation30_spill] sm:$0xff]  ;;  %v12934_v62 = vld [vmem:[#allocation31_spill] sm:$0xff] }
 0x281   :  { %1487 = vmatpush1.bf16.msra.mxu0 %v12856_v5  ;;  %1528 = vmatpush1.bf16.msra.mxu1 %v12857_v7  ;;  %v12935_v5 = vld [vmem:[#allocation32_spill] sm:$0xff]  ;;  %v12936_v7 = vld [vmem:[#allocation33_spill] sm:$0xff] }
 0x282   :  { %1488 = vmatprep.subr.bf16.mxu0 %v12858_v10  ;;  %1529 = vmatprep.subr.bf16.mxu1 %v12859_v13  ;;  %v12937_v10 = vld [vmem:[#allocation34_spill] sm:$0xff]  ;;  %v12938_v13 = vld [vmem:[#allocation35_spill] sm:$0xff] }
 0x285   :  { %1489 = vmatpush1.bf16.msra.mxu0 %v12860_v16  ;;  %1530 = vmatpush1.bf16.msra.mxu1 %v12861_v21  ;;  %v12939_v16 = vld [vmem:[#allocation36_spill] sm:$0xff]  ;;  %v12940_v21 = vld [vmem:[#allocation37_spill] sm:$0xff] }
 0x286   :  { %1490 = vmatprep.subr.bf16.mxu0 %v12862_v23  ;;  %1531 = vmatprep.subr.bf16.mxu1 %v12863_v25  ;;  %v12941_v23 = vld [vmem:[#allocation38_spill] sm:$0xff]  ;;  %v12942_v25 = vld [vmem:[#allocation39_spill] sm:$0xff] }
 0x289   :  { %1491 = vmatpush1.bf16.msra.mxu0 %v12864_v27  ;;  %1532 = vmatpush1.bf16.msra.mxu1 %v12865_v28  ;;  %v12943_v27 = vld [vmem:[#allocation40_spill] sm:$0xff]  ;;  %v12944_v28 = vld [vmem:[#allocation41_spill] sm:$0xff] }
 0x28a   :  { %1492 = vmatprep.subr.bf16.mxu0 %v12918_v46  ;;  %1533 = vmatprep.subr.bf16.mxu1 %v12919_v47  ;;  %v12960_v47 = vld [vmem:[#allocation5_spill] sm:$0xff] }
 0x28d   :  { %1493 = vmatpush1.bf16.msra.mxu0 %v12920_v48  ;;  %1534 = vmatpush1.bf16.msra.mxu1 %v12921_v49 }
 0x28e   :  { %1494 = vmatprep.subr.bf16.mxu0 %v12922_v50  ;;  %1535 = vmatprep.subr.bf16.mxu1 %v12923_v51  ;;  %v12961_v51 = vld [vmem:[#allocation6_spill] sm:$0xff] }
 0x291   :  { %1495 = vmatpush1.bf16.msra.mxu0 %v12924_v52  ;;  %1536 = vmatpush1.bf16.msra.mxu1 %v12925_v53 }
 0x292   :  { %1496 = vmatprep.subr.bf16.mxu0 %v12926_v54  ;;  %1537 = vmatprep.subr.bf16.mxu1 %v12927_v55 }
 0x295   :  { %1497 = vmatpush1.bf16.msra.mxu0 %v12928_v56  ;;  %1538 = vmatpush1.bf16.msra.mxu1 %v12929_v57 }
 0x296   :  { %1498 = vmatprep.subr.bf16.mxu0 %v12930_v58  ;;  %1539 = vmatprep.subr.bf16.mxu1 %v12931_v59  ;;  %v12962_v59 = vld [vmem:[#allocation7_spill] sm:$0xff] }
 0x299   :  { %1499 = vmatpush1.bf16.msra.mxu0 %v12932_v60  ;;  %1540 = vmatpush1.bf16.msra.mxu1 %v12933_v61  ;;  %v12963_v61 = vld [vmem:[#allocation8_spill] sm:$0xff] }
 0x29a   :  { %1500 = vmatprep.subr.bf16.mxu0 %v12934_v62  ;;  %1541 = vmatprep.subr.bf16.mxu1 %v12935_v5 }
 0x29d   :  { %1501 = vmatpush1.bf16.msra.mxu0 %v12936_v7  ;;  %1542 = vmatpush1.bf16.msra.mxu1 %v12937_v10 }
 0x29e   :  { %1502 = vmatprep.subr.bf16.mxu0 %v12938_v13  ;;  %1543 = vmatprep.subr.bf16.mxu1 %v12939_v16 }
 0x2a1   :  { %1503 = vmatpush1.bf16.msra.mxu0 %v12940_v21  ;;  %1544 = vmatpush1.bf16.msra.mxu1 %v12941_v23 }
 0x2a2   :  { %1504 = vmatprep.subr.bf16.mxu0 %v12942_v25  ;;  %1545 = vmatprep.subr.bf16.mxu1 %v12943_v27 }
 0x2a5   :  { %1505 = vmatpush1.bf16.msra.mxu0 %v12944_v28  ;;  %1546 = vmatpush1.bf16.msra.mxu1 %v12945_v15 }
 0x2a6   :  { %1506 = vmatprep.subr.bf16.mxu0 %v12946_v19  ;;  %1547 = vmatprep.subr.bf16.mxu1 %v12947_v11  ;;  %v12964_v19 = vld [vmem:[#allocation9_spill] sm:$0xff] }
 0x2a9   :  { %1507 = vmatpush1.bf16.msra.mxu0 %v12948_v1  ;;  %1548 = vmatpush1.bf16.msra.mxu1 %v12949_v18 }
 0x2aa   :  { %1508 = vmatprep.subr.bf16.mxu0 %v12950_v6  ;;  %1549 = vmatprep.subr.bf16.mxu1 %v12951_v3 }
 0x2ad   :  { %1509 = vmatpush1.bf16.msra.mxu0 %v12952_v4  ;;  %1550 = vmatpush1.bf16.msra.mxu1 %v12953_v36 }
 0x2ae   :  { %1510 = vmatprep.subr.bf16.mxu0 %v12954_v38  ;;  %1551 = vmatprep.subr.bf16.mxu1 %v12955_v14 }
 0x2b1   :  { %1511 = vmatpush1.bf16.msra.mxu0 %v12956_v30  ;;  %1552 = vmatpush1.bf16.msra.mxu1 %v12957_v24 }
 0x2b2   :  { %1586 = vmatprep.subr.bf16.mxu0 %v8136_v32  ;;  %1627 = vmatprep.subr.bf16.mxu1 %v8142_v20 }
 0x327   :  { %v1272_v2 = vpop.f32.mrb[12].mxu0  ;;  %v1313_v46 = vpop.f32.mrb[20].mxu1 }
 0x328   :  { %v1273_v48 = vadd.f32 %v1272_v2, %v12960_v47  ;;  %v1274_v49 = vpop.f32.mrb[13].mxu0  ;;  %v1315_v50 = vpop.f32.mrb[21].mxu1  ;;  %v1314_v60 = vadd.f32 %v1313_v46, %v12962_v59 }
 0x329   :  { %v1275_v52 = vadd.f32 %v1274_v49, %v12961_v51  ;;  %v1276_v53 = vpop.f32.mrb[14].mxu0  ;;  %v1317_v54 = vpop.f32.mrb[22].mxu1  ;;  %v1316_v62 = vadd.f32 %v1315_v50, %v12963_v61 }
 0x32a   :  { %v5625_v55 = vmul.f32 -1.442695, %v1273_v48  ;;  %v1277_v56 = vpop.f32.mrb[15].mxu0  ;;  %v1318_v57 = vpop.f32.mrb[23].mxu1  ;;  %v5627_v5 = vmul.f32 -1.442695, %v1314_v60 }
 0x32b   :  { %v5626_v58 = vmul.f32 -1.442695, %v1275_v52 }
 0x32c   :  { %6276 = vpow2.f32 %v5625_v55 }
 0x32d   :  { %6278 = vpow2.f32 %v5626_v58 }
 0x32e   :  { %6280 = vtanh.f32 %v1316_v62 }
 0x32f   :  { %6282 = vpow2.f32 %v5627_v5 }
 0x336   :  { %v6277_v7 = vpop.eup %6276 }
 0x337   :  { %v1329_v10 = vadd.f32 1.0, %v6277_v7  ;;  %v6279_v13 = vpop.eup %6278 }
 0x338   :  { %v1330_v16 = vadd.f32 1.0, %v6279_v13  ;;  %v6281_v21 = vpop.eup %6280 }
 0x339   :  { %6284 = vrcp.f32 %v1329_v10  ;;  %v6283_v23 = vpop.eup %6282 }
 0x33a   :  { %6286 = vrcp.f32 %v1330_v16  ;;  %v1331_v15 = vadd.f32 1.0, %v6283_v23 }
 0x33c   :  { %6288 = vrcp.f32 %v1331_v15 }
 0x343   :  { %v6285_v25 = vpop.eup %6284 }
 0x344   :  { %v1340_v27 = vmul.f32 %v6285_v25, %v6281_v21  ;;  %v6287_v28 = vpop.eup %6286 }
 0x345   :  { %v1339_v11 = vmul.f32 %v6287_v28, %v12964_v19  ;;  %v1462_v28 = vrot.slane %v7959_v12, 7  ;;  %v8165_v12 = vld [vmem:[%s12163_s2 + $0x8] ss:$16 sps:$4 sm:$0xff]  }
 0x346   :  { %v6289_v55 = vpop.eup %6288 }
 0x347   :  { %v1378_v1 = vpop.f32.mrb[16].mxu0  ;;  %v1419_v18 = vpop.f32.mrb[24].mxu1  ;;  %v8150_v6 = vadd.f32 %v1340_v27, %v1339_v11 }
 0x348   :  { %v1430_v3 = vrot.slane %v1378_v1, 6  ;;  %v1380_v4 = vpop.f32.mrb[17].mxu0  ;;  %v1421_v36 = vpop.f32.mrb[25].mxu1  ;;  %v1432_v52 = vrot.slane %v1419_v18, 6 }
 0x349   :  { %v1431_v38 = vrot.slane %v1380_v4, 6  ;;  %v1382_v14 = vpop.f32.mrb[18].mxu0  ;;  %v1423_v30 = vpop.f32.mrb[26].mxu1  ;;  %6290 = vtanh.f32 %v8150_v6  ;;  %v1433_v53 = vrot.slane %v1421_v36, 6 }
 0x34a   :  { %v1438_v24 = vadd.f32 %v1430_v3, %v12916_v17  ;;  %v1383_v2 = vpop.f32.mrb[19].mxu0  ;;  %v1424_v46 = vpop.f32.mrb[27].mxu1  ;;  %v1440_v54 = vadd.f32 %v1432_v52, %v7825_v8  ;;  %v8172_v30 = vld [vmem:[%s12163_s2 + $0x2c] ss:$16 sps:$4 sm:$0xff]   ;;  %v8223_v52 = vld [vmem:[%s12163_s2 + $0x88] ss:$16 sps:$4 sm:$0xff]  }
 0x34b   :  { %v1439_v48 = vadd.f32 %v1431_v38, %v12917_v22  ;;  %v1441_v57 = vadd.f32 %v1433_v53, %v7827_v0  ;;  %v8188_v2 = vld [vmem:[%s12163_s2 + $0x4c] ss:$16 sps:$4 sm:$0xff]   ;;  %v8195_v46 = vld [vmem:[%s12163_s2 + $0x48] ss:$16 sps:$4 sm:$0xff]  }
 0x34c   :  { %v5628_v49 = vmul.f32 -1.442695, %v1438_v24  ;;  %v5630_v60 = vmul.f32 -1.442695, %v1440_v54  ;;  %v8181_v24 = vld [vmem:[%s12163_s2 + $0x28] ss:$16 sps:$4 sm:$0xff]  }
 0x34d   :  { %v5629_v50 = vmul.f32 -1.442695, %v1439_v48  ;;  %v8202_v48 = vld [vmem:[%s12163_s2 + $0x6c] ss:$16 sps:$4 sm:$0xff]   ;;  %v8237_v54 = vld [vmem:[%s12163_s2 + $0xa8] ss:$16 sps:$4 sm:$0xff]  }
 0x34e   :  { %6292 = vpow2.f32 %v5628_v49  ;;  %v8209_v49 = vld [vmem:[%s12163_s2 + $0x68] ss:$16 sps:$4 sm:$0xff]   ;;  %v8230_v53 = vld [vmem:[%s12163_s2 + $0xac] ss:$16 sps:$4 sm:$0xff]  }
 0x34f   :  { %6294 = vpow2.f32 %v5629_v50  ;;  %v8216_v50 = vld [vmem:[%s12163_s2 + $0x8c] ss:$16 sps:$4 sm:$0xff]  }
 0x350   :  { %6296 = vtanh.f32 %v1441_v57  ;;  %v8258_v57 = vld [vmem:[%s12163_s2 + $0xec] ss:$16 sps:$4 sm:$0xff]  }
 0x351   :  { %6298 = vpow2.f32 %v5630_v60  ;;  %v8271_v60 = vld [vmem:[%s12166_s4 + $0x4] ss:$16 sps:$4 sm:$0xff]  }
 0x353   :  { %v6291_v56 = vpop.eup %6290 }
 0x354   :  { %v1343_v58 = vmul.f32 %v6291_v56, %v6289_v55  ;;  %v8244_v55 = vld [vmem:[%s12163_s2 + $0xcc] ss:$16 sps:$4 sm:$0xff]   ;;  %v8251_v56 = vld [vmem:[%s12163_s2 + $0xc8] ss:$16 sps:$4 sm:$0xff]  }
 0x356   :  { %v1470_v62 = vrot.slane %v1343_v58, 6  ;;  %v8265_v58 = vld [vmem:[%s12163_s2 + $0xe8] ss:$16 sps:$4 sm:$0xff]  }
 0x358   :  { %v6293_v5 = vpop.eup %6292  ;;  %v1473_v10 = vpack.c.bf16 %v1470_v62, %v1470_v62  ;;  %v8277_v62 = vld [vmem:[%s12166_s4 + $0xc] ss:$16 sps:$4 sm:$0xff]  }
 0x359   :  { %v1451_v7 = vadd.f32 1.0, %v6293_v5  ;;  %v6295_v13 = vpop.eup %6294  ;;  %v8283_v5 = vld [vmem:[%s12166_s4] ss:$16 sps:$4 sm:$0xff]  }
 0x35a   :  { %v1452_v16 = vadd.f32 1.0, %v6295_v13  ;;  %v1477_v21 = vrot.slane %v1473_v10, 1  ;;  %v6297_v23 = vpop.eup %6296  ;;  %v8295_v10 = vld [vmem:[%s12166_s4 + $0x24] ss:$16 sps:$4 sm:$0xff]   ;;  %v8301_v13 = vld [vmem:[%s12166_s4 + $0x2c] ss:$16 sps:$4 sm:$0xff]  }
 0x35b   :  { %6300 = vrcp.f32 %v1451_v7  ;;  %v6299_v25 = vpop.eup %6298  ;;  %v8289_v7 = vld [vmem:[%s12166_s4 + $0x8] ss:$16 sps:$4 sm:$0xff]  }
 0x35c   :  { %6302 = vrcp.f32 %v1452_v16  ;;  %1512 = vmatprep.mubr.bf16.mxu0 %v1477_v21  ;;  %1553 = vmatprep.mubr.bf16.mxu1 %v1477_v21  ;;  %v1453_v11 = vadd.f32 1.0, %v6299_v25  ;;  %v8307_v16 = vld [vmem:[%s12166_s4 + $0x20] ss:$16 sps:$4 sm:$0xff]   ;;  %v8313_v21 = vld [vmem:[%s12166_s4 + $0x28] ss:$16 sps:$4 sm:$0xff]  }
 0x35d   :  { %12965 = vst [vmem:[#allocation12_spill] sm:$0xff] %v8307_v16  ;;  %12966 = vst [vmem:[#allocation13_spill] sm:$0xff] %v8313_v21  ;;  %v8325_v25 = vld [vmem:[%s12166_s4 + $0x4c] ss:$16 sps:$4 sm:$0xff]  }
 0x35e   :  { %6304 = vrcp.f32 %v1453_v11  ;;  %12968 = vst [vmem:[#allocation2_spill] sm:$0xff] %v8325_v25  ;;  %v8355_v11 = vld [vmem:[%s12166_s4 + $0x60] ss:$16 sps:$4 sm:$0xff]  }
 0x35f   :  { %12973 = vst [vmem:[#allocation16_spill] sm:$0xff] %v8355_v11 }
 0x365   :  { %v6301_v27 = vpop.eup %6300 }
 0x366   :  { %v1465_v15 = vmul.f32 %v6301_v27, %v6297_v23  ;;  %v6303_v19 = vpop.eup %6302  ;;  %v8319_v23 = vld [vmem:[%s12166_s4 + $0x44] ss:$16 sps:$4 sm:$0xff]   ;;  %v8331_v27 = vld [vmem:[%s12166_s4 + $0x40] ss:$16 sps:$4 sm:$0xff]  }
 0x367   :  { %v1464_v1 = vmul.f32 %v6303_v19, %v1462_v28  ;;  %12967 = vst [vmem:[#allocation14_spill] sm:$0xff] %v8319_v23  ;;  %12969 = vst [vmem:[#allocation4_spill] sm:$0xff] %v8331_v27  ;;  %v8337_v28 = vld [vmem:[%s12166_s4 + $0x48] ss:$16 sps:$4 sm:$0xff]   ;;  %v8349_v19 = vld [vmem:[%s12166_s4 + $0x6c] ss:$16 sps:$4 sm:$0xff]  }
 0x368   :  { %v6305_v3 = vpop.eup %6304  ;;  %12970 = vst [vmem:[#allocation57_spill] sm:$0xff] %v8337_v28  ;;  %12972 = vst [vmem:[#allocation15_spill] sm:$0xff] %v8349_v19 }
 0x369   :  { %v8158_v18 = vadd.f32 %v1465_v15, %v1464_v1  ;;  %v8343_v15 = vld [vmem:[%s12166_s4 + $0x64] ss:$16 sps:$4 sm:$0xff]   ;;  %v8361_v1 = vld [vmem:[%s12166_s4 + $0x68] ss:$16 sps:$4 sm:$0xff]  }
 0x36a   :  { %12971 = vst [vmem:[#allocation58_spill] sm:$0xff] %v8343_v15  ;;  %12974 = vst [vmem:[#allocation17_spill] sm:$0xff] %v8361_v1 }
 0x36b   :  { %6306 = vtanh.f32 %v8158_v18 }
 0x375   :  { %v6307_v4 = vpop.eup %6306 }
 0x376   :  { %v1468_v36 = vmul.f32 %v6307_v4, %v6305_v3  ;;  %v8367_v3 = vld [vmem:[%s12166_s4 + $0x84] ss:$16 sps:$4 sm:$0xff]   ;;  %v8373_v4 = vld [vmem:[%s12166_s4 + $0x8c] ss:$16 sps:$4 sm:$0xff]  }
 0x377   :  { %12975 = vst [vmem:[#allocation18_spill] sm:$0xff] %v8367_v3  ;;  %12976 = vst [vmem:[#allocation19_spill] sm:$0xff] %v8373_v4 }
 0x378   :  { %v1472_v38 = vpack.c.bf16 %v1468_v36, %v1468_v36  ;;  %v8379_v36 = vld [vmem:[%s12166_s4 + $0x80] ss:$16 sps:$4 sm:$0xff]  }
 0x379   :  { %12977 = vst [vmem:[#allocation20_spill] sm:$0xff] %v8379_v36 }
 0x37a   :  { %v1476_v14 = vrot.slane %v1472_v38, 1  ;;  %v8385_v38 = vld [vmem:[%s12166_s4 + $0x88] ss:$16 sps:$4 sm:$0xff]  }
 0x37b   :  { %12978 = vst [vmem:[#allocation21_spill] sm:$0xff] %v8385_v38 }
 0x37c   :  { %1513 = vmatmul.mubr.bf16.vlgmr.msra.gmra.mrb[20].mxu0 %v1476_v14  ;;  %1554 = vmatmul.mubr.bf16.vlgmr.msra.gmra.mrb[28].mxu1 %v1476_v14 }
 0x37d   :  { %1587 = vmatpush1.bf16.msra.mxu0 %v7965_v26  ;;  %1628 = vmatpush1.bf16.msra.mxu1 %v8165_v12 }
 0x37e   :  { %1588 = vmatprep.subr.bf16.mxu0 %v7972_v34  ;;  %1629 = vmatprep.subr.bf16.mxu1 %v8172_v30 }
 0x37f   :  { %1618 = vmatprep.mubr.bf16.mxu0 %v12855_v9  ;;  %1659 = vmatprep.mubr.bf16.mxu1 %v12855_v9 }
 0x381   :  { %1589 = vmatpush1.bf16.msra.mxu0 %v7981_v63  ;;  %1630 = vmatpush1.bf16.msra.mxu1 %v8181_v24 }
 0x382   :  { %1590 = vmatprep.subr.bf16.mxu0 %v7988_v29  ;;  %1631 = vmatprep.subr.bf16.mxu1 %v8188_v2 }
 0x385   :  { %1591 = vmatpush1.bf16.msra.mxu0 %v7995_v31  ;;  %1632 = vmatpush1.bf16.msra.mxu1 %v8195_v46 }
 0x386   :  { %1592 = vmatprep.subr.bf16.mxu0 %v8002_v33  ;;  %1633 = vmatprep.subr.bf16.mxu1 %v8202_v48 }
 0x389   :  { %1593 = vmatpush1.bf16.msra.mxu0 %v8009_v35  ;;  %1634 = vmatpush1.bf16.msra.mxu1 %v8209_v49 }
 0x38a   :  { %1594 = vmatprep.subr.bf16.mxu0 %v8016_v37  ;;  %1635 = vmatprep.subr.bf16.mxu1 %v8216_v50 }
 0x38d   :  { %1595 = vmatpush1.bf16.msra.mxu0 %v8023_v39  ;;  %1636 = vmatpush1.bf16.msra.mxu1 %v8223_v52 }
 0x38e   :  { %1596 = vmatprep.subr.bf16.mxu0 %v8030_v40  ;;  %1637 = vmatprep.subr.bf16.mxu1 %v8230_v53 }
 0x391   :  { %1597 = vmatpush1.bf16.msra.mxu0 %v8037_v41  ;;  %1638 = vmatpush1.bf16.msra.mxu1 %v8237_v54 }
 0x392   :  { %1598 = vmatprep.subr.bf16.mxu0 %v8044_v42  ;;  %1639 = vmatprep.subr.bf16.mxu1 %v8244_v55 }
 0x395   :  { %1599 = vmatpush1.bf16.msra.mxu0 %v8051_v43  ;;  %1640 = vmatpush1.bf16.msra.mxu1 %v8251_v56 }
 0x396   :  { %1600 = vmatprep.subr.bf16.mxu0 %v8058_v44  ;;  %1641 = vmatprep.subr.bf16.mxu1 %v8258_v57 }
 0x399   :  { %1601 = vmatpush1.bf16.msra.mxu0 %v8065_v45  ;;  %1642 = vmatpush1.bf16.msra.mxu1 %v8265_v58 }
 0x39a   :  { %1726 = vmatprep.subr.bf16.mxu0 %v8271_v60  ;;  %1767 = vmatprep.subr.bf16.mxu1 %v8277_v62 }
 0x39c   :  { %1619 = vmatmul.mubr.bf16.vlgmr.msra.gmra.mrb[24].mxu0 %v1476_v14  ;;  %1660 = vmatmul.mubr.bf16.vlgmr.msra.gmra.mrb[32].mxu1 %v1476_v14  ;;  %v8391_v14 = vld [vmem:[%s12166_s4 + $0xa4] ss:$16 sps:$4 sm:$0xff]  }
 0x39d   :  { %1727 = vmatpush1.bf16.msra.mxu0 %v8283_v5  ;;  %1768 = vmatpush1.bf16.msra.mxu1 %v8289_v7  ;;  %12979 = vst [vmem:[#allocation22_spill] sm:$0xff] %v8391_v14 }
 0x39e   :  { %1728 = vmatprep.subr.bf16.mxu0 %v8295_v10  ;;  %1769 = vmatprep.subr.bf16.mxu1 %v8301_v13 }
 0x3a1   :  { %1729 = vmatpush1.bf16.msra.mxu0 %v8307_v16  ;;  %1770 = vmatpush1.bf16.msra.mxu1 %v8313_v21 }
 0x3a2   :  { %1730 = vmatprep.subr.bf16.mxu0 %v8319_v23  ;;  %1771 = vmatprep.subr.bf16.mxu1 %v8325_v25 }
 0x3a5   :  { %1731 = vmatpush1.bf16.msra.mxu0 %v8331_v27  ;;  %1772 = vmatpush1.bf16.msra.mxu1 %v8337_v28 }
 0x3a6   :  { %1732 = vmatprep.subr.bf16.mxu0 %v8343_v15  ;;  %1773 = vmatprep.subr.bf16.mxu1 %v8349_v19 }
 0x3a9   :  { %1733 = vmatpush1.bf16.msra.mxu0 %v8355_v11  ;;  %1774 = vmatpush1.bf16.msra.mxu1 %v8361_v1 }
 0x3aa   :  { %1734 = vmatprep.subr.bf16.mxu0 %v8367_v3  ;;  %1775 = vmatprep.subr.bf16.mxu1 %v8373_v4  ;;  %v8397_v4 = vld [vmem:[%s12166_s4 + $0xac] ss:$16 sps:$4 sm:$0xff]  }
 0x3ab   :  { %12980 = vst [vmem:[#allocation23_spill] sm:$0xff] %v8397_v4 }
 0x3ad   :  { %1735 = vmatpush1.bf16.msra.mxu0 %v8379_v36  ;;  %1776 = vmatpush1.bf16.msra.mxu1 %v8385_v38  ;;  %v8403_v36 = vld [vmem:[%s12166_s4 + $0xa0] ss:$16 sps:$4 sm:$0xff]   ;;  %v8409_v38 = vld [vmem:[%s12166_s4 + $0xa8] ss:$16 sps:$4 sm:$0xff]  }
 0x3ae   :  { %1736 = vmatprep.subr.bf16.mxu0 %v8391_v14  ;;  %1777 = vmatprep.subr.bf16.mxu1 %v8397_v4  ;;  %12981 = vst [vmem:[#allocation24_spill] sm:$0xff] %v8403_v36  ;;  %12982 = vst [vmem:[#allocation25_spill] sm:$0xff] %v8409_v38  ;;  %v8415_v14 = vld [vmem:[%s12166_s4 + $0xc4] ss:$16 sps:$4 sm:$0xff]   ;;  %v8421_v4 = vld [vmem:[%s12166_s4 + $0xcc] ss:$16 sps:$4 sm:$0xff]  }
 0x3af   :  { %12983 = vst [vmem:[#allocation26_spill] sm:$0xff] %v8415_v14  ;;  %12984 = vst [vmem:[#allocation27_spill] sm:$0xff] %v8421_v4 }
 0x3b1   :  { %1737 = vmatpush1.bf16.msra.mxu0 %v8403_v36  ;;  %1778 = vmatpush1.bf16.msra.mxu1 %v8409_v38  ;;  %v8427_v36 = vld [vmem:[%s12166_s4 + $0xc0] ss:$16 sps:$4 sm:$0xff]   ;;  %v8433_v38 = vld [vmem:[%s12166_s4 + $0xc8] ss:$16 sps:$4 sm:$0xff]  }
 0x3b2   :  { %1738 = vmatprep.subr.bf16.mxu0 %v8415_v14  ;;  %1779 = vmatprep.subr.bf16.mxu1 %v8421_v4  ;;  %12985 = vst [vmem:[#allocation28_spill] sm:$0xff] %v8427_v36  ;;  %12986 = vst [vmem:[#allocation29_spill] sm:$0xff] %v8433_v38  ;;  %v8439_v14 = vld [vmem:[%s12166_s4 + $0xe4] ss:$16 sps:$4 sm:$0xff]   ;;  %v8445_v4 = vld [vmem:[%s12166_s4 + $0xec] ss:$16 sps:$4 sm:$0xff]  }
 0x3b3   :  { %12987 = vst [vmem:[#allocation30_spill] sm:$0xff] %v8439_v14  ;;  %12988 = vst [vmem:[#allocation31_spill] sm:$0xff] %v8445_v4 }
 0x3b5   :  { %1739 = vmatpush1.bf16.msra.mxu0 %v8427_v36  ;;  %1780 = vmatpush1.bf16.msra.mxu1 %v8433_v38  ;;  %v8451_v36 = vld [vmem:[%s12166_s4 + $0xe0] ss:$16 sps:$4 sm:$0xff]   ;;  %v8457_v38 = vld [vmem:[%s12166_s4 + $0xe8] ss:$16 sps:$4 sm:$0xff]  }
 0x3b6   :  { %1740 = vmatprep.subr.bf16.mxu0 %v8439_v14  ;;  %1781 = vmatprep.subr.bf16.mxu1 %v8445_v4  ;;  %12989 = vst [vmem:[#allocation32_spill] sm:$0xff] %v8451_v36  ;;  %12990 = vst [vmem:[#allocation33_spill] sm:$0xff] %v8457_v38  ;;  %v8463_v14 = vld [vmem:[%s12166_s4 + $0x104] ss:$16 sps:$4 sm:$0xff]   ;;  %v8469_v4 = vld [vmem:[%s12166_s4 + $0x10c] ss:$16 sps:$4 sm:$0xff]  }
 0x3b7   :  { %12991 = vst [vmem:[#allocation34_spill] sm:$0xff] %v8463_v14  ;;  %12992 = vst [vmem:[#allocation35_spill] sm:$0xff] %v8469_v4 }
 0x3b9   :  { %1741 = vmatpush1.bf16.msra.mxu0 %v8451_v36  ;;  %1782 = vmatpush1.bf16.msra.mxu1 %v8457_v38  ;;  %v8475_v36 = vld [vmem:[%s12166_s4 + $0x100] ss:$16 sps:$4 sm:$0xff]   ;;  %v8481_v38 = vld [vmem:[%s12166_s4 + $0x108] ss:$16 sps:$4 sm:$0xff]  }
 0x3ba   :  { %1742 = vmatprep.subr.bf16.mxu0 %v8463_v14  ;;  %1783 = vmatprep.subr.bf16.mxu1 %v8469_v4  ;;  %12993 = vst [vmem:[#allocation36_spill] sm:$0xff] %v8475_v36  ;;  %12994 = vst [vmem:[#allocation37_spill] sm:$0xff] %v8481_v38  ;;  %v8487_v14 = vld [vmem:[%s12166_s4 + $0x124] ss:$16 sps:$4 sm:$0xff]   ;;  %v8493_v4 = vld [vmem:[%s12166_s4 + $0x12c] ss:$16 sps:$4 sm:$0xff]  }
 0x3bb   :  { %12995 = vst [vmem:[#allocation38_spill] sm:$0xff] %v8487_v14  ;;  %12996 = vst [vmem:[#allocation39_spill] sm:$0xff] %v8493_v4 }
 0x3bd   :  { %1743 = vmatpush1.bf16.msra.mxu0 %v8475_v36  ;;  %1784 = vmatpush1.bf16.msra.mxu1 %v8481_v38  ;;  %v8499_v36 = vld [vmem:[%s12166_s4 + $0x120] ss:$16 sps:$4 sm:$0xff]   ;;  %v8505_v38 = vld [vmem:[%s12166_s4 + $0x128] ss:$16 sps:$4 sm:$0xff]  }
 0x3be   :  { %1744 = vmatprep.subr.bf16.mxu0 %v8487_v14  ;;  %1785 = vmatprep.subr.bf16.mxu1 %v8493_v4  ;;  %12997 = vst [vmem:[#allocation40_spill] sm:$0xff] %v8499_v36  ;;  %12998 = vst [vmem:[#allocation41_spill] sm:$0xff] %v8505_v38  ;;  %v8511_v14 = vld [vmem:[%s12166_s4 + $0x144] ss:$16 sps:$4 sm:$0xff]   ;;  %v8517_v4 = vld [vmem:[%s12166_s4 + $0x14c] ss:$16 sps:$4 sm:$0xff]  }
 0x3bf   :  { %12999 = vst [vmem:[#allocation42_spill] sm:$0xff] %v8511_v14  ;;  %13000 = vst [vmem:[#allocation43_spill] sm:$0xff] %v8517_v4 }
 0x3c1   :  { %1745 = vmatpush1.bf16.msra.mxu0 %v8499_v36  ;;  %1786 = vmatpush1.bf16.msra.mxu1 %v8505_v38  ;;  %v8523_v36 = vld [vmem:[%s12166_s4 + $0x140] ss:$16 sps:$4 sm:$0xff]   ;;  %v8529_v38 = vld [vmem:[%s12166_s4 + $0x148] ss:$16 sps:$4 sm:$0xff]  }
 0x3c2   :  { %1746 = vmatprep.subr.bf16.mxu0 %v8511_v14  ;;  %1787 = vmatprep.subr.bf16.mxu1 %v8517_v4  ;;  %13001 = vst [vmem:[#allocation44_spill] sm:$0xff] %v8523_v36  ;;  %13002 = vst [vmem:[#allocation45_spill] sm:$0xff] %v8529_v38  ;;  %v8535_v14 = vld [vmem:[%s12166_s4 + $0x164] ss:$16 sps:$4 sm:$0xff]   ;;  %v8541_v4 = vld [vmem:[%s12166_s4 + $0x16c] ss:$16 sps:$4 sm:$0xff]  }
 0x3c3   :  { %13003 = vst [vmem:[#allocation46_spill] sm:$0xff] %v8535_v14  ;;  %13004 = vst [vmem:[#allocation47_spill] sm:$0xff] %v8541_v4 }
 0x3c5   :  { %1747 = vmatpush1.bf16.msra.mxu0 %v8523_v36  ;;  %1788 = vmatpush1.bf16.msra.mxu1 %v8529_v38  ;;  %v8547_v36 = vld [vmem:[%s12166_s4 + $0x160] ss:$16 sps:$4 sm:$0xff]   ;;  %v8553_v38 = vld [vmem:[%s12166_s4 + $0x168] ss:$16 sps:$4 sm:$0xff]  }
 0x3c6   :  { %1748 = vmatprep.subr.bf16.mxu0 %v8535_v14  ;;  %1789 = vmatprep.subr.bf16.mxu1 %v8541_v4  ;;  %13005 = vst [vmem:[#allocation48_spill] sm:$0xff] %v8547_v36  ;;  %13006 = vst [vmem:[#allocation49_spill] sm:$0xff] %v8553_v38  ;;  %v8559_v14 = vld [vmem:[%s12166_s4 + $0x184] ss:$16 sps:$4 sm:$0xff]   ;;  %v8565_v4 = vld [vmem:[%s12166_s4 + $0x18c] ss:$16 sps:$4 sm:$0xff]  }
 0x3c7   :  { %13007 = vst [vmem:[#allocation50_spill] sm:$0xff] %v8559_v14  ;;  %13008 = vst [vmem:[#allocation51_spill] sm:$0xff] %v8565_v4 }
 0x3c9   :  { %1749 = vmatpush1.bf16.msra.mxu0 %v8547_v36  ;;  %1790 = vmatpush1.bf16.msra.mxu1 %v8553_v38  ;;  %v8571_v36 = vld [vmem:[%s12166_s4 + $0x180] ss:$16 sps:$4 sm:$0xff]   ;;  %v8577_v38 = vld [vmem:[%s12166_s4 + $0x188] ss:$16 sps:$4 sm:$0xff]  }
 0x3ca   :  { %1750 = vmatprep.subr.bf16.mxu0 %v8559_v14  ;;  %1791 = vmatprep.subr.bf16.mxu1 %v8565_v4  ;;  %13009 = vst [vmem:[#allocation52_spill] sm:$0xff] %v8571_v36  ;;  %13010 = vst [vmem:[#allocation53_spill] sm:$0xff] %v8577_v38  ;;  %v8583_v14 = vld [vmem:[%s12166_s4 + $0x1a4] ss:$16 sps:$4 sm:$0xff]   ;;  %v8589_v4 = vld [vmem:[%s12166_s4 + $0x1ac] ss:$16 sps:$4 sm:$0xff]  }
 0x3cb   :  { %13011 = vst [vmem:[#allocation54_spill] sm:$0xff] %v8583_v14  ;;  %13012 = vst [vmem:[#allocation5_spill] sm:$0xff] %v8589_v4 }
 0x3cd   :  { %1751 = vmatpush1.bf16.msra.mxu0 %v8571_v36  ;;  %1792 = vmatpush1.bf16.msra.mxu1 %v8577_v38  ;;  %v8595_v36 = vld [vmem:[%s12166_s4 + $0x1a0] ss:$16 sps:$4 sm:$0xff]   ;;  %v8601_v38 = vld [vmem:[%s12166_s4 + $0x1a8] ss:$16 sps:$4 sm:$0xff]  }
 0x3ce   :  { %1752 = vmatprep.subr.bf16.mxu0 %v8583_v14  ;;  %1793 = vmatprep.subr.bf16.mxu1 %v8589_v4  ;;  %13013 = vst [vmem:[#allocation6_spill] sm:$0xff] %v8595_v36  ;;  %13014 = vst [vmem:[#allocation9_spill] sm:$0xff] %v8601_v38  ;;  %v8607_v14 = vld [vmem:[%s12166_s4 + $0x1c4] ss:$16 sps:$4 sm:$0xff]   ;;  %v8613_v4 = vld [vmem:[%s12166_s4 + $0x1cc] ss:$16 sps:$4 sm:$0xff]  }
 0x3cf   :  { %13015 = vst [vmem:[#allocation61_spill] sm:$0xff] %v8607_v14  ;;  %13016 = vst [vmem:[#allocation62_spill] sm:$0xff] %v8613_v4 }
 0x3d1   :  { %1753 = vmatpush1.bf16.msra.mxu0 %v8595_v36  ;;  %1794 = vmatpush1.bf16.msra.mxu1 %v8601_v38  ;;  %v8619_v36 = vld [vmem:[%s12166_s4 + $0x1c0] ss:$16 sps:$4 sm:$0xff]   ;;  %v8625_v38 = vld [vmem:[%s12166_s4 + $0x1c8] ss:$16 sps:$4 sm:$0xff]  }
 0x3d2   :  { %1754 = vmatprep.subr.bf16.mxu0 %v8607_v14  ;;  %1795 = vmatprep.subr.bf16.mxu1 %v8613_v4  ;;  %13017 = vst [vmem:[#allocation63_spill] sm:$0xff] %v8619_v36  ;;  %13018 = vst [vmem:[#allocation64_spill] sm:$0xff] %v8625_v38  ;;  %v8631_v14 = vld [vmem:[%s12166_s4 + $0x1e4] ss:$16 sps:$4 sm:$0xff]   ;;  %v8637_v4 = vld [vmem:[%s12166_s4 + $0x1ec] ss:$16 sps:$4 sm:$0xff]  }
 0x3d3   :  { %13019 = vst [vmem:[#allocation65_spill] sm:$0xff] %v8631_v14  ;;  %13020 = vst [vmem:[#allocation66_spill] sm:$0xff] %v8637_v4 }
 0x3d5   :  { %1755 = vmatpush1.bf16.msra.mxu0 %v8619_v36  ;;  %1796 = vmatpush1.bf16.msra.mxu1 %v8625_v38  ;;  %v8643_v36 = vld [vmem:[%s12166_s4 + $0x1e0] ss:$16 sps:$4 sm:$0xff]   ;;  %v8649_v38 = vld [vmem:[%s12166_s4 + $0x1e8] ss:$16 sps:$4 sm:$0xff]  }
 0x3d6   :  { %1756 = vmatprep.subr.bf16.mxu0 %v8631_v14  ;;  %1797 = vmatprep.subr.bf16.mxu1 %v8637_v4  ;;  %13021 = vst [vmem:[#allocation67_spill] sm:$0xff] %v8643_v36  ;;  %13022 = vst [vmem:[#allocation68_spill] sm:$0xff] %v8649_v38 }
 0x3d9   :  { %1757 = vmatpush1.bf16.msra.mxu0 %v8643_v36  ;;  %1798 = vmatpush1.bf16.msra.mxu1 %v8649_v38 }
 0x3da   :  { %1832 = vmatprep.subr.bf16.mxu0 %v8136_v32  ;;  %1873 = vmatprep.subr.bf16.mxu1 %v8142_v20 }
 0x44f   :  { %v1514_v14 = vpop.f32.mrb[20].mxu0  ;;  %v1555_v4 = vpop.f32.mrb[28].mxu1 }
 0x450   :  { %v1515_v3 = vadd.f32 %v1514_v14, %v12960_v47  ;;  %v1516_v1 = vpop.f32.mrb[21].mxu0  ;;  %v1557_v11 = vpop.f32.mrb[29].mxu1  ;;  %v1556_v32 = vadd.f32 %v1555_v4, %v12962_v59 }
 0x451   :  { %v1517_v19 = vadd.f32 %v1516_v1, %v12961_v51  ;;  %v1518_v36 = vpop.f32.mrb[22].mxu0  ;;  %v1559_v15 = vpop.f32.mrb[30].mxu1  ;;  %v1558_v20 = vadd.f32 %v1557_v11, %v12963_v61 }
 0x452   :  { %v5631_v28 = vmul.f32 -1.442695, %v1515_v3  ;;  %v1519_v27 = vpop.f32.mrb[23].mxu0  ;;  %v1560_v25 = vpop.f32.mrb[31].mxu1  ;;  %v5633_v38 = vmul.f32 -1.442695, %v1556_v32 }
 0x453   :  { %v5632_v23 = vmul.f32 -1.442695, %v1517_v19 }
 0x454   :  { %6308 = vpow2.f32 %v5631_v28 }
 0x455   :  { %6310 = vpow2.f32 %v5632_v23 }
 0x456   :  { %6312 = vtanh.f32 %v1558_v20 }
 0x457   :  { %6314 = vpow2.f32 %v5633_v38 }
 0x45e   :  { %v6309_v21 = vpop.eup %6308 }
 0x45f   :  { %v1571_v16 = vadd.f32 1.0, %v6309_v21  ;;  %v6311_v14 = vpop.eup %6310 }
 0x460   :  { %v1572_v1 = vadd.f32 1.0, %v6311_v14  ;;  %v6313_v15 = vpop.eup %6312 }
 0x461   :  { %6316 = vrcp.f32 %v1571_v16  ;;  %v6315_v3 = vpop.eup %6314 }
 0x462   :  { %6318 = vrcp.f32 %v1572_v1  ;;  %v1573_v28 = vadd.f32 1.0, %v6315_v3 }
 0x464   :  { %6320 = vrcp.f32 %v1573_v28 }
 0x46b   :  { %v6317_v27 = vpop.eup %6316 }
 0x46c   :  { %v1582_v25 = vmul.f32 %v6317_v27, %v6313_v15  ;;  %v6319_v19 = vpop.eup %6318 }
 0x46d   :  { %v1581_v23 = vmul.f32 %v6319_v19, %v8150_v6 }
 0x46e   :  { %v6321_v28 = vpop.eup %6320 }
 0x46f   :  { %v1620_v4 = vpop.f32.mrb[24].mxu0  ;;  %v1661_v36 = vpop.f32.mrb[32].mxu1  ;;  %v8659_v11 = vadd.f32 %v1582_v25, %v1581_v23 }
 0x470   :  { %v1672_v32 = vrot.slane %v1620_v4, 5  ;;  %v1622_v21 = vpop.f32.mrb[25].mxu0  ;;  %v1663_v20 = vpop.f32.mrb[33].mxu1  ;;  %v1674_v25 = vrot.slane %v1661_v36, 5 }
 0x471   :  { %13023 = vst [vmem:[#allocation69_spill] sm:$0xff] %v8659_v11  ;;  %v1673_v38 = vrot.slane %v1622_v21, 5  ;;  %v1624_v16 = vpop.f32.mrb[26].mxu0  ;;  %v1665_v14 = vpop.f32.mrb[34].mxu1  ;;  %6322 = vtanh.f32 %v8659_v11  ;;  %v1675_v23 = vrot.slane %v1663_v20, 5 }
 0x472   :  { %v1680_v1 = vadd.f32 %v1672_v32, %v12916_v17  ;;  %v1625_v15 = vpop.f32.mrb[27].mxu0  ;;  %v1666_v27 = vpop.f32.mrb[35].mxu1  ;;  %v1682_v4 = vadd.f32 %v1674_v25, %v7825_v8  ;;  %v1704_v25 = vrot.slane %v8158_v18, 7  ;;  %v13039_v18 = vld [vmem:[#allocation23_spill] sm:$0xff] }
 0x473   :  { %v1681_v3 = vadd.f32 %v1673_v38, %v12917_v22  ;;  %v1683_v16 = vadd.f32 %v1675_v23, %v7827_v0 }
 0x474   :  { %v5634_v6 = vmul.f32 -1.442695, %v1680_v1  ;;  %v5636_v11 = vmul.f32 -1.442695, %v1682_v4 }
 0x475   :  { %v5635_v19 = vmul.f32 -1.442695, %v1681_v3 }
 0x476   :  { %6324 = vpow2.f32 %v5634_v6 }
 0x477   :  { %6326 = vpow2.f32 %v5635_v19 }
 0x478   :  { %6328 = vtanh.f32 %v1683_v16 }
 0x479   :  { %6330 = vpow2.f32 %v5636_v11 }
 0x47b   :  { %v6323_v21 = vpop.eup %6322 }
 0x47c   :  { %v1585_v14 = vmul.f32 %v6323_v21, %v6321_v28 }
 0x47e   :  { %v1712_v61 = vrot.slane %v1585_v14, 5 }
 0x480   :  { %v6325_v32 = vpop.eup %6324  ;;  %v1715_v27 = vpack.c.bf16 %v1712_v61, %v1712_v61 }
 0x481   :  { %v1693_v15 = vadd.f32 1.0, %v6325_v32  ;;  %v6327_v38 = vpop.eup %6326 }
 0x482   :  { %v1694_v1 = vadd.f32 1.0, %v6327_v38  ;;  %v1721_v36 = vshrl.u32 %v1715_v27, 16  ;;  %v6329_v3 = vpop.eup %6328  ;;  %v13040_v38 = vld [vmem:[#allocation24_spill] sm:$0xff] }
 0x483   :  { %6332 = vrcp.f32 %v1693_v15  ;;  %v6331_v6 = vpop.eup %6330 }
 0x484   :  { %6334 = vrcp.f32 %v1694_v1  ;;  %v1723_v20 = vrot.slane %v1721_v36, 1  ;;  %v1695_v28 = vadd.f32 1.0, %v6331_v6  ;;  %v13041_v1 = vld [vmem:[#allocation25_spill] sm:$0xff]  ;;  %v13042_v36 = vld [vmem:[#allocation26_spill] sm:$0xff] }
 0x485   :  { %v13045_v6 = vld [vmem:[#allocation29_spill] sm:$0xff] }
 0x486   :  { %1758 = vmatprep.mubr.bf16.mxu0 %v1723_v20  ;;  %1799 = vmatprep.mubr.bf16.mxu1 %v1723_v20  ;;  %6336 = vrcp.f32 %v1695_v28  ;;  %v13043_v20 = vld [vmem:[#allocation27_spill] sm:$0xff]  ;;  %v13050_v28 = vld [vmem:[#allocation34_spill] sm:$0xff] }
 0x48d   :  { %v6333_v19 = vpop.eup %6332 }
 0x48e   :  { %v1707_v23 = vmul.f32 %v6333_v19, %v6329_v3  ;;  %v6335_v4 = vpop.eup %6334  ;;  %v13044_v3 = vld [vmem:[#allocation28_spill] sm:$0xff]  ;;  %v13046_v19 = vld [vmem:[#allocation30_spill] sm:$0xff] }
 0x48f   :  { %v1706_v21 = vmul.f32 %v6335_v4, %v1704_v25  ;;  %v13047_v25 = vld [vmem:[#allocation31_spill] sm:$0xff]  ;;  %v13049_v4 = vld [vmem:[#allocation33_spill] sm:$0xff] }
 0x490   :  { %v6337_v61 = vpop.eup %6336 }
 0x491   :  { %v8667_v16 = vadd.f32 %v1707_v23, %v1706_v21  ;;  %v13048_v23 = vld [vmem:[#allocation32_spill] sm:$0xff]  ;;  %v13051_v21 = vld [vmem:[#allocation35_spill] sm:$0xff] }
 0x493   :  { %6338 = vtanh.f32 %v8667_v16 }
 0x49d   :  { %v6339_v11 = vpop.eup %6338 }
 0x49e   :  { %v1710_v14 = vmul.f32 %v6339_v11, %v6337_v61  ;;  %v13052_v61 = vld [vmem:[#allocation36_spill] sm:$0xff]  ;;  %v13053_v11 = vld [vmem:[#allocation37_spill] sm:$0xff] }
 0x4a0   :  { %v1714_v32 = vpack.c.bf16 %v1710_v14, %v1710_v14  ;;  %v13054_v14 = vld [vmem:[#allocation38_spill] sm:$0xff] }
 0x4a2   :  { %v1717_v15 = vshrl.u32 %v1714_v32, 16  ;;  %v13055_v32 = vld [vmem:[#allocation39_spill] sm:$0xff] }
 0x4a4   :  { %v1719_v27 = vrot.slane %v1717_v15, 1  ;;  %v13056_v15 = vld [vmem:[#allocation40_spill] sm:$0xff] }
 0x4a6   :  { %1759 = vmatmul.mubr.bf16.vlgmr.msra.gmra.mrb[28].mxu0 %v1719_v27  ;;  %1800 = vmatmul.mubr.bf16.vlgmr.msra.gmra.mrb[36].mxu1 %v1719_v27 }
 0x4a7   :  { %1833 = vmatpush1.bf16.msra.mxu0 %v7965_v26  ;;  %1874 = vmatpush1.bf16.msra.mxu1 %v8165_v12  ;;  %v13024_v26 = vld [vmem:[#allocation12_spill] sm:$0xff] }
 0x4a8   :  { %1834 = vmatprep.subr.bf16.mxu0 %v7972_v34  ;;  %1875 = vmatprep.subr.bf16.mxu1 %v8172_v30  ;;  %v13025_v34 = vld [vmem:[#allocation13_spill] sm:$0xff] }
 0x4a9   :  { %1864 = vmatprep.mubr.bf16.mxu0 %v12855_v9  ;;  %1905 = vmatprep.mubr.bf16.mxu1 %v12855_v9 }
 0x4ab   :  { %1835 = vmatpush1.bf16.msra.mxu0 %v7981_v63  ;;  %1876 = vmatpush1.bf16.msra.mxu1 %v8181_v24  ;;  %v13026_v63 = vld [vmem:[#allocation14_spill] sm:$0xff] }
 0x4ac   :  { %1836 = vmatprep.subr.bf16.mxu0 %v7988_v29  ;;  %1877 = vmatprep.subr.bf16.mxu1 %v8188_v2  ;;  %v13027_v29 = vld [vmem:[#allocation2_spill] sm:$0xff] }
 0x4af   :  { %1837 = vmatpush1.bf16.msra.mxu0 %v7995_v31  ;;  %1878 = vmatpush1.bf16.msra.mxu1 %v8195_v46  ;;  %v13028_v31 = vld [vmem:[#allocation4_spill] sm:$0xff] }
 0x4b0   :  { %1838 = vmatprep.subr.bf16.mxu0 %v8002_v33  ;;  %1879 = vmatprep.subr.bf16.mxu1 %v8202_v48  ;;  %v13029_v33 = vld [vmem:[#allocation57_spill] sm:$0xff] }
 0x4b3   :  { %1839 = vmatpush1.bf16.msra.mxu0 %v8009_v35  ;;  %1880 = vmatpush1.bf16.msra.mxu1 %v8209_v49  ;;  %v13030_v35 = vld [vmem:[#allocation58_spill] sm:$0xff] }
 0x4b4   :  { %1840 = vmatprep.subr.bf16.mxu0 %v8016_v37  ;;  %1881 = vmatprep.subr.bf16.mxu1 %v8216_v50  ;;  %v13031_v37 = vld [vmem:[#allocation15_spill] sm:$0xff] }
 0x4b7   :  { %1841 = vmatpush1.bf16.msra.mxu0 %v8023_v39  ;;  %1882 = vmatpush1.bf16.msra.mxu1 %v8223_v52  ;;  %v13032_v39 = vld [vmem:[#allocation16_spill] sm:$0xff] }
 0x4b8   :  { %1842 = vmatprep.subr.bf16.mxu0 %v8030_v40  ;;  %1883 = vmatprep.subr.bf16.mxu1 %v8230_v53  ;;  %v13033_v40 = vld [vmem:[#allocation17_spill] sm:$0xff] }
 0x4bb   :  { %1843 = vmatpush1.bf16.msra.mxu0 %v8037_v41  ;;  %1884 = vmatpush1.bf16.msra.mxu1 %v8237_v54  ;;  %v13034_v41 = vld [vmem:[#allocation18_spill] sm:$0xff] }
 0x4bc   :  { %1844 = vmatprep.subr.bf16.mxu0 %v8044_v42  ;;  %1885 = vmatprep.subr.bf16.mxu1 %v8244_v55  ;;  %v13035_v42 = vld [vmem:[#allocation19_spill] sm:$0xff] }
 0x4bf   :  { %1845 = vmatpush1.bf16.msra.mxu0 %v8051_v43  ;;  %1886 = vmatpush1.bf16.msra.mxu1 %v8251_v56  ;;  %v13036_v43 = vld [vmem:[#allocation20_spill] sm:$0xff] }
 0x4c0   :  { %1846 = vmatprep.subr.bf16.mxu0 %v8058_v44  ;;  %1887 = vmatprep.subr.bf16.mxu1 %v8258_v57  ;;  %v13037_v44 = vld [vmem:[#allocation21_spill] sm:$0xff] }
 0x4c3   :  { %1847 = vmatpush1.bf16.msra.mxu0 %v8065_v45  ;;  %1888 = vmatpush1.bf16.msra.mxu1 %v8265_v58  ;;  %v13038_v45 = vld [vmem:[#allocation22_spill] sm:$0xff] }
 0x4c4   :  { %1968 = vmatprep.subr.bf16.mxu0 %v8271_v60  ;;  %2009 = vmatprep.subr.bf16.mxu1 %v8277_v62 }
 0x4c6   :  { %1865 = vmatmul.mubr.bf16.vlgmr.msra.gmra.mrb[32].mxu0 %v1719_v27  ;;  %1906 = vmatmul.mubr.bf16.vlgmr.msra.gmra.mrb[40].mxu1 %v1719_v27  ;;  %v13057_v27 = vld [vmem:[#allocation41_spill] sm:$0xff] }
 0x4c7   :  { %1969 = vmatpush1.bf16.msra.mxu0 %v8283_v5  ;;  %2010 = vmatpush1.bf16.msra.mxu1 %v8289_v7 }
 0x4c8   :  { %1970 = vmatprep.subr.bf16.mxu0 %v8295_v10  ;;  %2011 = vmatprep.subr.bf16.mxu1 %v8301_v13 }
 0x4cb   :  { %1971 = vmatpush1.bf16.msra.mxu0 %v13024_v26  ;;  %2012 = vmatpush1.bf16.msra.mxu1 %v13025_v34 }
 0x4cc   :  { %1972 = vmatprep.subr.bf16.mxu0 %v13026_v63  ;;  %2013 = vmatprep.subr.bf16.mxu1 %v13027_v29 }
 0x4cf   :  { %1973 = vmatpush1.bf16.msra.mxu0 %v13028_v31  ;;  %2014 = vmatpush1.bf16.msra.mxu1 %v13029_v33 }
 0x4d0   :  { %1974 = vmatprep.subr.bf16.mxu0 %v13030_v35  ;;  %2015 = vmatprep.subr.bf16.mxu1 %v13031_v37 }
 0x4d3   :  { %1975 = vmatpush1.bf16.msra.mxu0 %v13032_v39  ;;  %2016 = vmatpush1.bf16.msra.mxu1 %v13033_v40 }
 0x4d4   :  { %1976 = vmatprep.subr.bf16.mxu0 %v13034_v41  ;;  %2017 = vmatprep.subr.bf16.mxu1 %v13035_v42 }
 0x4d7   :  { %1977 = vmatpush1.bf16.msra.mxu0 %v13036_v43  ;;  %2018 = vmatpush1.bf16.msra.mxu1 %v13037_v44 }
 0x4d8   :  { %1978 = vmatprep.subr.bf16.mxu0 %v13038_v45  ;;  %2019 = vmatprep.subr.bf16.mxu1 %v13039_v18 }
 0x4db   :  { %1979 = vmatpush1.bf16.msra.mxu0 %v13040_v38  ;;  %2020 = vmatpush1.bf16.msra.mxu1 %v13041_v1 }
 0x4dc   :  { %1980 = vmatprep.subr.bf16.mxu0 %v13042_v36  ;;  %2021 = vmatprep.subr.bf16.mxu1 %v13043_v20 }
 0x4df   :  { %1981 = vmatpush1.bf16.msra.mxu0 %v13044_v3  ;;  %2022 = vmatpush1.bf16.msra.mxu1 %v13045_v6 }
 0x4e0   :  { %1982 = vmatprep.subr.bf16.mxu0 %v13046_v19  ;;  %2023 = vmatprep.subr.bf16.mxu1 %v13047_v25  ;;  %v13058_v25 = vld [vmem:[#allocation42_spill] sm:$0xff] }
 0x4e3   :  { %1983 = vmatpush1.bf16.msra.mxu0 %v13048_v23  ;;  %2024 = vmatpush1.bf16.msra.mxu1 %v13049_v4  ;;  %v13059_v23 = vld [vmem:[#allocation43_spill] sm:$0xff]  ;;  %v13060_v4 = vld [vmem:[#allocation44_spill] sm:$0xff] }
 0x4e4   :  { %1984 = vmatprep.subr.bf16.mxu0 %v13050_v28  ;;  %2025 = vmatprep.subr.bf16.mxu1 %v13051_v21  ;;  %v13061_v28 = vld [vmem:[#allocation45_spill] sm:$0xff]  ;;  %v13062_v21 = vld [vmem:[#allocation46_spill] sm:$0xff] }
 0x4e7   :  { %1985 = vmatpush1.bf16.msra.mxu0 %v13052_v61  ;;  %2026 = vmatpush1.bf16.msra.mxu1 %v13053_v11  ;;  %v13063_v61 = vld [vmem:[#allocation47_spill] sm:$0xff]  ;;  %v13064_v11 = vld [vmem:[#allocation48_spill] sm:$0xff] }
 0x4e8   :  { %1986 = vmatprep.subr.bf16.mxu0 %v13054_v14  ;;  %2027 = vmatprep.subr.bf16.mxu1 %v13055_v32  ;;  %v13065_v14 = vld [vmem:[#allocation49_spill] sm:$0xff]  ;;  %v13066_v32 = vld [vmem:[#allocation50_spill] sm:$0xff] }
 0x4eb   :  { %1987 = vmatpush1.bf16.msra.mxu0 %v13056_v15  ;;  %2028 = vmatpush1.bf16.msra.mxu1 %v13057_v27  ;;  %v13067_v15 = vld [vmem:[#allocation51_spill] sm:$0xff]  ;;  %v13068_v27 = vld [vmem:[#allocation52_spill] sm:$0xff] }
 0x4ec   :  { %1988 = vmatprep.subr.bf16.mxu0 %v13058_v25  ;;  %2029 = vmatprep.subr.bf16.mxu1 %v13059_v23  ;;  %v13069_v25 = vld [vmem:[#allocation53_spill] sm:$0xff]  ;;  %v13070_v23 = vld [vmem:[#allocation54_spill] sm:$0xff] }
 0x4ef   :  { %1989 = vmatpush1.bf16.msra.mxu0 %v13060_v4  ;;  %2030 = vmatpush1.bf16.msra.mxu1 %v13061_v28  ;;  %v13071_v4 = vld [vmem:[#allocation5_spill] sm:$0xff]  ;;  %v13072_v28 = vld [vmem:[#allocation6_spill] sm:$0xff] }
 0x4f0   :  { %1990 = vmatprep.subr.bf16.mxu0 %v13062_v21  ;;  %2031 = vmatprep.subr.bf16.mxu1 %v13063_v61  ;;  %v13073_v21 = vld [vmem:[#allocation9_spill] sm:$0xff] }
 0x4f1   :  { %v13074_v61 = vld [vmem:[#allocation61_spill] sm:$0xff] }
 0x4f3   :  { %1991 = vmatpush1.bf16.msra.mxu0 %v13064_v11  ;;  %2032 = vmatpush1.bf16.msra.mxu1 %v13065_v14  ;;  %v13075_v11 = vld [vmem:[#allocation62_spill] sm:$0xff]  ;;  %v13076_v14 = vld [vmem:[#allocation63_spill] sm:$0xff] }
 0x4f4   :  { %1992 = vmatprep.subr.bf16.mxu0 %v13066_v32  ;;  %2033 = vmatprep.subr.bf16.mxu1 %v13067_v15  ;;  %v13077_v32 = vld [vmem:[#allocation64_spill] sm:$0xff]  ;;  %v13078_v15 = vld [vmem:[#allocation65_spill] sm:$0xff] }
 0x4f7   :  { %1993 = vmatpush1.bf16.msra.mxu0 %v13068_v27  ;;  %2034 = vmatpush1.bf16.msra.mxu1 %v13069_v25  ;;  %v13079_v27 = vld [vmem:[#allocation66_spill] sm:$0xff]  ;;  %v13080_v25 = vld [vmem:[#allocation67_spill] sm:$0xff] }
 0x4f8   :  { %1994 = vmatprep.subr.bf16.mxu0 %v13070_v23  ;;  %2035 = vmatprep.subr.bf16.mxu1 %v13071_v4  ;;  %v13081_v23 = vld [vmem:[#allocation68_spill] sm:$0xff]  ;;  %v13082_v4 = vld [vmem:[#allocation10_spill] sm:$0xff] }
 0x4fb   :  { %1995 = vmatpush1.bf16.msra.mxu0 %v13072_v28  ;;  %2036 = vmatpush1.bf16.msra.mxu1 %v13073_v21  ;;  %v13083_v28 = vld [vmem:[#allocation11_spill] sm:$0xff] }
 0x4fc   :  { %1996 = vmatprep.subr.bf16.mxu0 %v13074_v61  ;;  %2037 = vmatprep.subr.bf16.mxu1 %v13075_v11 }
 0x4ff   :  { %1997 = vmatpush1.bf16.msra.mxu0 %v13076_v14  ;;  %2038 = vmatpush1.bf16.msra.mxu1 %v13077_v32 }
 0x500   :  { %1998 = vmatprep.subr.bf16.mxu0 %v13078_v15  ;;  %2039 = vmatprep.subr.bf16.mxu1 %v13079_v27 }
 0x503   :  { %1999 = vmatpush1.bf16.msra.mxu0 %v13080_v25  ;;  %2040 = vmatpush1.bf16.msra.mxu1 %v13081_v23  ;;  %v13084_v23 = vld [vmem:[#allocation8_spill] sm:$0xff] }
 0x504   :  { %2074 = vmatprep.subr.bf16.mxu0 %v13082_v4  ;;  %2115 = vmatprep.subr.bf16.mxu1 %v13083_v28 }
 0x579   :  { %v1760_v21 = vpop.f32.mrb[28].mxu0  ;;  %v1801_v61 = vpop.f32.mrb[36].mxu1 }
 0x57a   :  { %v1761_v11 = vadd.f32 %v1760_v21, %v12960_v47  ;;  %v1762_v19 = vpop.f32.mrb[29].mxu0  ;;  %v1803_v14 = vpop.f32.mrb[37].mxu1  ;;  %v1802_v4 = vadd.f32 %v1801_v61, %v12962_v59 }
 0x57b   :  { %v1763_v32 = vadd.f32 %v1762_v19, %v12961_v51  ;;  %v1764_v6 = vpop.f32.mrb[30].mxu0  ;;  %v1805_v15 = vpop.f32.mrb[38].mxu1  ;;  %v1804_v28 = vadd.f32 %v1803_v14, %v13084_v23 }
 0x57c   :  { %v5637_v3 = vmul.f32 -1.442695, %v1761_v11  ;;  %v1765_v27 = vpop.f32.mrb[31].mxu0  ;;  %v1806_v20 = vpop.f32.mrb[39].mxu1  ;;  %v5639_v36 = vmul.f32 -1.442695, %v1802_v4 }
 0x57d   :  { %v5638_v25 = vmul.f32 -1.442695, %v1763_v32 }
 0x57e   :  { %6340 = vpow2.f32 %v5637_v3 }
 0x57f   :  { %6342 = vpow2.f32 %v5638_v25  ;;  %v13085_v25 = vld [vmem:[#allocation69_spill] sm:$0xff] }
 0x580   :  { %6344 = vtanh.f32 %v1804_v28 }
 0x581   :  { %6346 = vpow2.f32 %v5639_v36 }
 0x588   :  { %v6341_v1 = vpop.eup %6340 }
 0x589   :  { %v1817_v38 = vadd.f32 1.0, %v6341_v1  ;;  %v6343_v21 = vpop.eup %6342 }
 0x58a   :  { %v1818_v19 = vadd.f32 1.0, %v6343_v21  ;;  %v6345_v6 = vpop.eup %6344 }
 0x58b   :  { %6348 = vrcp.f32 %v1817_v38  ;;  %v6347_v11 = vpop.eup %6346 }
 0x58c   :  { %6350 = vrcp.f32 %v1818_v19  ;;  %v1819_v3 = vadd.f32 1.0, %v6347_v11 }
 0x58e   :  { %6352 = vrcp.f32 %v1819_v3 }
 0x595   :  { %v6349_v15 = vpop.eup %6348 }
 0x596   :  { %v1828_v20 = vmul.f32 %v6349_v15, %v6345_v6  ;;  %v6351_v32 = vpop.eup %6350 }
 0x597   :  { %v1827_v27 = vmul.f32 %v6351_v32, %v13085_v25 }
 0x598   :  { %v6353_v3 = vpop.eup %6352 }
 0x599   :  { %v1866_v61 = vpop.f32.mrb[32].mxu0  ;;  %v1907_v59 = vpop.f32.mrb[40].mxu1  ;;  %v8773_v14 = vadd.f32 %v1828_v20, %v1827_v27 }
 0x59a   :  { %v1918_v4 = vrot.slane %v1866_v61, 4  ;;  %v1868_v1 = vpop.f32.mrb[33].mxu0  ;;  %v1909_v28 = vpop.f32.mrb[41].mxu1  ;;  %v1920_v20 = vrot.slane %v1907_v59, 4 }
 0x59b   :  { %13086 = vst [vmem:[#allocation12_spill] sm:$0xff] %v8773_v14  ;;  %v1919_v36 = vrot.slane %v1868_v1, 4  ;;  %v1870_v38 = vpop.f32.mrb[34].mxu0  ;;  %v1911_v21 = vpop.f32.mrb[42].mxu1  ;;  %6354 = vtanh.f32 %v8773_v14  ;;  %v1921_v27 = vrot.slane %v1909_v28, 4 }
 0x59c   :  { %v1926_v19 = vadd.f32 %v1918_v4, %v12916_v17  ;;  %v1871_v6 = vpop.f32.mrb[35].mxu0  ;;  %v1912_v15 = vpop.f32.mrb[43].mxu1  ;;  %v1928_v61 = vadd.f32 %v1920_v20, %v7825_v8 }
 0x59d   :  { %v1927_v11 = vadd.f32 %v1919_v36, %v12917_v22  ;;  %v1929_v38 = vadd.f32 %v1921_v27, %v7827_v0 }
 0x59e   :  { %v5640_v32 = vmul.f32 -1.442695, %v1926_v19  ;;  %v5642_v14 = vmul.f32 -1.442695, %v1928_v61 }
 0x59f   :  { %v5641_v25 = vmul.f32 -1.442695, %v1927_v11 }
 0x5a0   :  { %6356 = vpow2.f32 %v5640_v32 }
 0x5a1   :  { %6358 = vpow2.f32 %v5641_v25  ;;  %v1950_v25 = vrot.slane %v8667_v16, 7  ;;  %v8787_v16 = vld [vmem:[%s12163_s2] ss:$16 sps:$4 sm:$0xff]  }
 0x5a2   :  { %6360 = vtanh.f32 %v1929_v38 }
 0x5a3   :  { %6362 = vpow2.f32 %v5642_v14 }
 0x5a5   :  { %v6355_v1 = vpop.eup %6354 }
 0x5a6   :  { %v1831_v21 = vmul.f32 %v6355_v1, %v6353_v3 }
 0x5a8   :  { %v1958_v23 = vrot.slane %v1831_v21, 4 }
 0x5aa   :  { %v6357_v4 = vpop.eup %6356  ;;  %v1961_v15 = vpack.c.bf16 %v1958_v23, %v1958_v23 }
 0x5ab   :  { %v1939_v6 = vadd.f32 1.0, %v6357_v4  ;;  %v6359_v36 = vpop.eup %6358 }
 0x5ac   :  { %v1940_v19 = vadd.f32 1.0, %v6359_v36  ;;  %v1965_v59 = vrot.slane %v1961_v15, 2  ;;  %v6361_v28 = vpop.eup %6360  ;;  %v8803_v15 = vld [vmem:[%s12163_s2 + $0x20] ss:$16 sps:$4 sm:$0xff]   ;;  %v13112_v36 = vld [vmem:[#allocation49_spill] sm:$0xff] }
 0x5ad   :  { %6364 = vrcp.f32 %v1939_v6  ;;  %v6363_v11 = vpop.eup %6362  ;;  %v8794_v6 = vld [vmem:[%s12163_s2 + $0x24] ss:$16 sps:$4 sm:$0xff]  }
 0x5ae   :  { %6366 = vrcp.f32 %v1940_v19  ;;  %2000 = vmatprep.mubr.bf16.mxu0 %v1965_v59  ;;  %2041 = vmatprep.mubr.bf16.mxu1 %v1965_v59  ;;  %v1941_v61 = vadd.f32 1.0, %v6363_v11  ;;  %v13113_v19 = vld [vmem:[#allocation50_spill] sm:$0xff]  ;;  %v13114_v59 = vld [vmem:[#allocation51_spill] sm:$0xff]  ;;  %v13116_v11 = vld [vmem:[#allocation53_spill] sm:$0xff] }
 0x5b0   :  { %6368 = vrcp.f32 %v1941_v61  ;;  %v13121_v61 = vld [vmem:[#allocation61_spill] sm:$0xff] }
 0x5b7   :  { %v6365_v32 = vpop.eup %6364 }
 0x5b8   :  { %v1953_v20 = vmul.f32 %v6365_v32, %v6361_v28  ;;  %v6367_v27 = vpop.eup %6366  ;;  %v13115_v28 = vld [vmem:[#allocation52_spill] sm:$0xff]  ;;  %v13117_v32 = vld [vmem:[#allocation54_spill] sm:$0xff] }
 0x5b9   :  { %v1952_v3 = vmul.f32 %v6367_v27, %v1950_v25  ;;  %v13118_v25 = vld [vmem:[#allocation5_spill] sm:$0xff] }
 0x5ba   :  { %v6369_v23 = vpop.eup %6368  ;;  %v13120_v27 = vld [vmem:[#allocation9_spill] sm:$0xff] }
 0x5bb   :  { %v8781_v1 = vadd.f32 %v1953_v20, %v1952_v3  ;;  %v13119_v20 = vld [vmem:[#allocation6_spill] sm:$0xff] }
 0x5bc   :  { %v13122_v3 = vld [vmem:[#allocation62_spill] sm:$0xff] }
 0x5bd   :  { %6370 = vtanh.f32 %v8781_v1 }
 0x5c7   :  { %v6371_v14 = vpop.eup %6370 }
 0x5c8   :  { %v1956_v38 = vmul.f32 %v6371_v14, %v6369_v23  ;;  %v13123_v23 = vld [vmem:[#allocation63_spill] sm:$0xff]  ;;  %v13124_v14 = vld [vmem:[#allocation64_spill] sm:$0xff] }
 0x5ca   :  { %v1960_v21 = vpack.c.bf16 %v1956_v38, %v1956_v38  ;;  %v13125_v38 = vld [vmem:[#allocation65_spill] sm:$0xff] }
 0x5cc   :  { %v1964_v4 = vrot.slane %v1960_v21, 2  ;;  %v13126_v21 = vld [vmem:[#allocation66_spill] sm:$0xff] }
 0x5ce   :  { %2001 = vmatmul.mubr.bf16.vlgmr.msra.gmra.mrb[36].mxu0 %v1964_v4  ;;  %2042 = vmatmul.mubr.bf16.vlgmr.msra.gmra.mrb[44].mxu1 %v1964_v4 }
 0x5cf   :  { %2075 = vmatpush1.bf16.msra.mxu0 %v8787_v16  ;;  %2116 = vmatpush1.bf16.msra.mxu1 %v8165_v12  ;;  %v8810_v12 = vld [vmem:[%s12163_s2 + $0x44] ss:$16 sps:$4 sm:$0xff]  }
 0x5d0   :  { %2076 = vmatprep.subr.bf16.mxu0 %v8794_v6  ;;  %2117 = vmatprep.subr.bf16.mxu1 %v8172_v30  ;;  %v8817_v30 = vld [vmem:[%s12163_s2 + $0x40] ss:$16 sps:$4 sm:$0xff]  }
 0x5d1   :  { %2106 = vmatprep.mubr.bf16.mxu0 %v12855_v9  ;;  %2147 = vmatprep.mubr.bf16.mxu1 %v12855_v9 }
 0x5d3   :  { %2077 = vmatpush1.bf16.msra.mxu0 %v8803_v15  ;;  %2118 = vmatpush1.bf16.msra.mxu1 %v8181_v24  ;;  %v8824_v24 = vld [vmem:[%s12163_s2 + $0x64] ss:$16 sps:$4 sm:$0xff]  }
 0x5d4   :  { %2078 = vmatprep.subr.bf16.mxu0 %v8810_v12  ;;  %2119 = vmatprep.subr.bf16.mxu1 %v8188_v2  ;;  %v8831_v2 = vld [vmem:[%s12163_s2 + $0x60] ss:$16 sps:$4 sm:$0xff]  }
 0x5d7   :  { %2079 = vmatpush1.bf16.msra.mxu0 %v8817_v30  ;;  %2120 = vmatpush1.bf16.msra.mxu1 %v8195_v46  ;;  %v8838_v46 = vld [vmem:[%s12163_s2 + $0x84] ss:$16 sps:$4 sm:$0xff]  }
 0x5d8   :  { %2080 = vmatprep.subr.bf16.mxu0 %v8824_v24  ;;  %2121 = vmatprep.subr.bf16.mxu1 %v8202_v48  ;;  %v8845_v48 = vld [vmem:[%s12163_s2 + $0x80] ss:$16 sps:$4 sm:$0xff]  }
 0x5db   :  { %2081 = vmatpush1.bf16.msra.mxu0 %v8831_v2  ;;  %2122 = vmatpush1.bf16.msra.mxu1 %v8209_v49  ;;  %v8852_v49 = vld [vmem:[%s12163_s2 + $0xa4] ss:$16 sps:$4 sm:$0xff]  }
 0x5dc   :  { %2082 = vmatprep.subr.bf16.mxu0 %v8838_v46  ;;  %2123 = vmatprep.subr.bf16.mxu1 %v8216_v50  ;;  %v8859_v50 = vld [vmem:[%s12163_s2 + $0xa0] ss:$16 sps:$4 sm:$0xff]  }
 0x5df   :  { %2083 = vmatpush1.bf16.msra.mxu0 %v8845_v48  ;;  %2124 = vmatpush1.bf16.msra.mxu1 %v8223_v52  ;;  %v8866_v52 = vld [vmem:[%s12163_s2 + $0xc4] ss:$16 sps:$4 sm:$0xff]  }
 0x5e0   :  { %2084 = vmatprep.subr.bf16.mxu0 %v8852_v49  ;;  %2125 = vmatprep.subr.bf16.mxu1 %v8230_v53  ;;  %v8873_v53 = vld [vmem:[%s12163_s2 + $0xc0] ss:$16 sps:$4 sm:$0xff]  }
 0x5e3   :  { %2085 = vmatpush1.bf16.msra.mxu0 %v8859_v50  ;;  %2126 = vmatpush1.bf16.msra.mxu1 %v8237_v54  ;;  %v8880_v54 = vld [vmem:[%s12163_s2 + $0xe4] ss:$16 sps:$4 sm:$0xff]  }
 0x5e4   :  { %2086 = vmatprep.subr.bf16.mxu0 %v8866_v52  ;;  %2127 = vmatprep.subr.bf16.mxu1 %v8244_v55  ;;  %v8887_v55 = vld [vmem:[%s12163_s2 + $0xe0] ss:$16 sps:$4 sm:$0xff]  }
 0x5e7   :  { %2087 = vmatpush1.bf16.msra.mxu0 %v8873_v53  ;;  %2128 = vmatpush1.bf16.msra.mxu1 %v8251_v56  ;;  %v13087_v56 = vld [vmem:[#allocation24_spill] sm:$0xff] }
 0x5e8   :  { %2088 = vmatprep.subr.bf16.mxu0 %v8880_v54  ;;  %2129 = vmatprep.subr.bf16.mxu1 %v8258_v57  ;;  %v13088_v57 = vld [vmem:[#allocation25_spill] sm:$0xff] }
 0x5eb   :  { %2089 = vmatpush1.bf16.msra.mxu0 %v8887_v55  ;;  %2130 = vmatpush1.bf16.msra.mxu1 %v8265_v58  ;;  %v13089_v58 = vld [vmem:[#allocation26_spill] sm:$0xff] }
 0x5ec   :  { %2214 = vmatprep.subr.bf16.mxu0 %v8271_v60  ;;  %2255 = vmatprep.subr.bf16.mxu1 %v8277_v62  ;;  %v13090_v60 = vld [vmem:[#allocation27_spill] sm:$0xff]  ;;  %v13091_v62 = vld [vmem:[#allocation28_spill] sm:$0xff] }
 0x5ee   :  { %2107 = vmatmul.mubr.bf16.vlgmr.msra.gmra.mrb[40].mxu0 %v1964_v4  ;;  %2148 = vmatmul.mubr.bf16.vlgmr.msra.gmra.mrb[48].mxu1 %v1964_v4  ;;  %v13127_v4 = vld [vmem:[#allocation67_spill] sm:$0xff] }
 0x5ef   :  { %2215 = vmatpush1.bf16.msra.mxu0 %v8283_v5  ;;  %2256 = vmatpush1.bf16.msra.mxu1 %v8289_v7  ;;  %v13092_v5 = vld [vmem:[#allocation29_spill] sm:$0xff]  ;;  %v13093_v7 = vld [vmem:[#allocation30_spill] sm:$0xff] }
 0x5f0   :  { %2216 = vmatprep.subr.bf16.mxu0 %v8295_v10  ;;  %2257 = vmatprep.subr.bf16.mxu1 %v8301_v13  ;;  %v13094_v10 = vld [vmem:[#allocation31_spill] sm:$0xff]  ;;  %v13095_v13 = vld [vmem:[#allocation32_spill] sm:$0xff] }
 0x5f3   :  { %2217 = vmatpush1.bf16.msra.mxu0 %v13024_v26  ;;  %2258 = vmatpush1.bf16.msra.mxu1 %v13025_v34  ;;  %v13096_v26 = vld [vmem:[#allocation33_spill] sm:$0xff]  ;;  %v13097_v34 = vld [vmem:[#allocation34_spill] sm:$0xff] }
 0x5f4   :  { %2218 = vmatprep.subr.bf16.mxu0 %v13026_v63  ;;  %2259 = vmatprep.subr.bf16.mxu1 %v13027_v29  ;;  %v13098_v63 = vld [vmem:[#allocation35_spill] sm:$0xff]  ;;  %v13099_v29 = vld [vmem:[#allocation36_spill] sm:$0xff] }
 0x5f7   :  { %2219 = vmatpush1.bf16.msra.mxu0 %v13028_v31  ;;  %2260 = vmatpush1.bf16.msra.mxu1 %v13029_v33  ;;  %v13100_v31 = vld [vmem:[#allocation37_spill] sm:$0xff]  ;;  %v13101_v33 = vld [vmem:[#allocation38_spill] sm:$0xff] }
 0x5f8   :  { %2220 = vmatprep.subr.bf16.mxu0 %v13030_v35  ;;  %2261 = vmatprep.subr.bf16.mxu1 %v13031_v37  ;;  %v13102_v35 = vld [vmem:[#allocation39_spill] sm:$0xff]  ;;  %v13103_v37 = vld [vmem:[#allocation40_spill] sm:$0xff] }
 0x5fb   :  { %2221 = vmatpush1.bf16.msra.mxu0 %v13032_v39  ;;  %2262 = vmatpush1.bf16.msra.mxu1 %v13033_v40  ;;  %v13104_v39 = vld [vmem:[#allocation41_spill] sm:$0xff]  ;;  %v13105_v40 = vld [vmem:[#allocation42_spill] sm:$0xff] }
 0x5fc   :  { %2222 = vmatprep.subr.bf16.mxu0 %v13034_v41  ;;  %2263 = vmatprep.subr.bf16.mxu1 %v13035_v42  ;;  %v13106_v41 = vld [vmem:[#allocation43_spill] sm:$0xff]  ;;  %v13107_v42 = vld [vmem:[#allocation44_spill] sm:$0xff] }
 0x5ff   :  { %2223 = vmatpush1.bf16.msra.mxu0 %v13036_v43  ;;  %2264 = vmatpush1.bf16.msra.mxu1 %v13037_v44  ;;  %v13108_v43 = vld [vmem:[#allocation45_spill] sm:$0xff]  ;;  %v13109_v44 = vld [vmem:[#allocation46_spill] sm:$0xff] }
 0x600   :  { %2224 = vmatprep.subr.bf16.mxu0 %v13038_v45  ;;  %2265 = vmatprep.subr.bf16.mxu1 %v13039_v18  ;;  %v13110_v45 = vld [vmem:[#allocation47_spill] sm:$0xff]  ;;  %v13111_v18 = vld [vmem:[#allocation48_spill] sm:$0xff] }
 0x603   :  { %2225 = vmatpush1.bf16.msra.mxu0 %v13087_v56  ;;  %2266 = vmatpush1.bf16.msra.mxu1 %v13088_v57  ;;  %v13128_v56 = vld [vmem:[#allocation68_spill] sm:$0xff] }
 0x604   :  { %2226 = vmatprep.subr.bf16.mxu0 %v13089_v58  ;;  %2267 = vmatprep.subr.bf16.mxu1 %v13090_v60  ;;  %v8958_v57 = vld [vmem:[%s12163_s2 + $0x4] ss:$16 sps:$4 sm:$0xff]   ;;  %v8964_v58 = vld [vmem:[%s12163_s2 + $0xc] ss:$16 sps:$4 sm:$0xff]  }
 0x607   :  { %2227 = vmatpush1.bf16.msra.mxu0 %v13091_v62  ;;  %2268 = vmatpush1.bf16.msra.mxu1 %v13092_v5 }
 0x608   :  { %2228 = vmatprep.subr.bf16.mxu0 %v13093_v7  ;;  %2269 = vmatprep.subr.bf16.mxu1 %v13094_v10 }
 0x60b   :  { %2229 = vmatpush1.bf16.msra.mxu0 %v13095_v13  ;;  %2270 = vmatpush1.bf16.msra.mxu1 %v13096_v26 }
 0x60c   :  { %2230 = vmatprep.subr.bf16.mxu0 %v13097_v34  ;;  %2271 = vmatprep.subr.bf16.mxu1 %v13098_v63 }
 0x60f   :  { %2231 = vmatpush1.bf16.msra.mxu0 %v13099_v29  ;;  %2272 = vmatpush1.bf16.msra.mxu1 %v13100_v31 }
 0x610   :  { %2232 = vmatprep.subr.bf16.mxu0 %v13101_v33  ;;  %2273 = vmatprep.subr.bf16.mxu1 %v13102_v35  ;;  %v13129_v35 = vld [vmem:[#allocation7_spill] sm:$0xff] }
 0x613   :  { %2233 = vmatpush1.bf16.msra.mxu0 %v13103_v37  ;;  %2274 = vmatpush1.bf16.msra.mxu1 %v13104_v39  ;;  %v13130_v39 = vld [vmem:[#allocation8_spill] sm:$0xff] }
 0x614   :  { %2234 = vmatprep.subr.bf16.mxu0 %v13105_v40  ;;  %2275 = vmatprep.subr.bf16.mxu1 %v13106_v41 }
 0x617   :  { %2235 = vmatpush1.bf16.msra.mxu0 %v13107_v42  ;;  %2276 = vmatpush1.bf16.msra.mxu1 %v13108_v43 }
 0x618   :  { %2236 = vmatprep.subr.bf16.mxu0 %v13109_v44  ;;  %2277 = vmatprep.subr.bf16.mxu1 %v13110_v45 }
 0x61b   :  { %2237 = vmatpush1.bf16.msra.mxu0 %v13111_v18  ;;  %2278 = vmatpush1.bf16.msra.mxu1 %v13112_v36 }
 0x61c   :  { %2238 = vmatprep.subr.bf16.mxu0 %v13113_v19  ;;  %2279 = vmatprep.subr.bf16.mxu1 %v13114_v59 }
 0x61f   :  { %2239 = vmatpush1.bf16.msra.mxu0 %v13115_v28  ;;  %2280 = vmatpush1.bf16.msra.mxu1 %v13116_v11 }
 0x620   :  { %2240 = vmatprep.subr.bf16.mxu0 %v13117_v32  ;;  %2281 = vmatprep.subr.bf16.mxu1 %v13118_v25  ;;  %v13131_v32 = vld [vmem:[#allocation12_spill] sm:$0xff] }
 0x623   :  { %2241 = vmatpush1.bf16.msra.mxu0 %v13119_v20  ;;  %2282 = vmatpush1.bf16.msra.mxu1 %v13120_v27 }
 0x624   :  { %2242 = vmatprep.subr.bf16.mxu0 %v13121_v61  ;;  %2283 = vmatprep.subr.bf16.mxu1 %v13122_v3 }
 0x627   :  { %2243 = vmatpush1.bf16.msra.mxu0 %v13123_v23  ;;  %2284 = vmatpush1.bf16.msra.mxu1 %v13124_v14 }
 0x628   :  { %2244 = vmatprep.subr.bf16.mxu0 %v13125_v38  ;;  %2285 = vmatprep.subr.bf16.mxu1 %v13126_v21 }
 0x62b   :  { %2245 = vmatpush1.bf16.msra.mxu0 %v13127_v4  ;;  %2286 = vmatpush1.bf16.msra.mxu1 %v13128_v56 }
 0x62c   :  { %2320 = vmatprep.subr.bf16.mxu0 %v8958_v57  ;;  %2361 = vmatprep.subr.bf16.mxu1 %v8964_v58 }
 0x6a1   :  { %v2002_v60 = vpop.f32.mrb[36].mxu0  ;;  %v2043_v62 = vpop.f32.mrb[44].mxu1 }
 0x6a2   :  { %v2003_v5 = vadd.f32 %v2002_v60, %v12960_v47  ;;  %v2004_v7 = vpop.f32.mrb[37].mxu0  ;;  %v2045_v10 = vpop.f32.mrb[45].mxu1  ;;  %v2044_v37 = vadd.f32 %v2043_v62, %v13129_v35 }
 0x6a3   :  { %v2005_v13 = vadd.f32 %v2004_v7, %v12961_v51  ;;  %v2006_v26 = vpop.f32.mrb[38].mxu0  ;;  %v2047_v34 = vpop.f32.mrb[46].mxu1  ;;  %v2046_v40 = vadd.f32 %v2045_v10, %v13130_v39 }
 0x6a4   :  { %v5643_v63 = vmul.f32 -1.442695, %v2003_v5  ;;  %v2007_v29 = vpop.f32.mrb[39].mxu0  ;;  %v2048_v31 = vpop.f32.mrb[47].mxu1  ;;  %v5645_v41 = vmul.f32 -1.442695, %v2044_v37 }
 0x6a5   :  { %v5644_v33 = vmul.f32 -1.442695, %v2005_v13 }
 0x6a6   :  { %6372 = vpow2.f32 %v5643_v63 }
 0x6a7   :  { %6374 = vpow2.f32 %v5644_v33 }
 0x6a8   :  { %6376 = vtanh.f32 %v2046_v40 }
 0x6a9   :  { %6378 = vpow2.f32 %v5645_v41 }
 0x6b0   :  { %v6373_v42 = vpop.eup %6372 }
 0x6b1   :  { %v2059_v43 = vadd.f32 1.0, %v6373_v42  ;;  %v6375_v44 = vpop.eup %6374 }
 0x6b2   :  { %v2060_v45 = vadd.f32 1.0, %v6375_v44  ;;  %v6377_v18 = vpop.eup %6376 }
 0x6b3   :  { %6380 = vrcp.f32 %v2059_v43  ;;  %v6379_v36 = vpop.eup %6378 }
 0x6b4   :  { %6382 = vrcp.f32 %v2060_v45  ;;  %v2061_v11 = vadd.f32 1.0, %v6379_v36 }
 0x6b6   :  { %6384 = vrcp.f32 %v2061_v11  ;;  %v2192_v11 = vrot.slane %v8781_v1, 7  ;;  %v8987_v1 = vld [vmem:[%s12163_s2 + $0x8] ss:$16 sps:$4 sm:$0xff]  }
 0x6bd   :  { %v6381_v19 = vpop.eup %6380 }
 0x6be   :  { %v2070_v59 = vmul.f32 %v6381_v19, %v6377_v18  ;;  %v6383_v28 = vpop.eup %6382 }
 0x6bf   :  { %v2069_v25 = vmul.f32 %v6383_v28, %v13131_v32 }
 0x6c0   :  { %v6385_v63 = vpop.eup %6384 }
 0x6c1   :  { %v2108_v20 = vpop.f32.mrb[40].mxu0  ;;  %v2149_v27 = vpop.f32.mrb[48].mxu1  ;;  %v8972_v61 = vadd.f32 %v2070_v59, %v2069_v25 }
 0x6c2   :  { %v2160_v3 = vrot.slane %v2108_v20, 3  ;;  %v2110_v23 = vpop.f32.mrb[41].mxu0  ;;  %v2151_v14 = vpop.f32.mrb[49].mxu1  ;;  %v2162_v13 = vrot.slane %v2149_v27, 3 }
 0x6c3   :  { %v2161_v38 = vrot.slane %v2110_v23, 3  ;;  %v2112_v21 = vpop.f32.mrb[42].mxu0  ;;  %v2153_v4 = vpop.f32.mrb[50].mxu1  ;;  %6386 = vtanh.f32 %v8972_v61  ;;  %v2163_v26 = vrot.slane %v2151_v14, 3 }
 0x6c4   :  { %v2168_v56 = vadd.f32 %v2160_v3, %v12916_v17  ;;  %v2113_v60 = vpop.f32.mrb[43].mxu0  ;;  %v2154_v62 = vpop.f32.mrb[51].mxu1  ;;  %v2170_v34 = vadd.f32 %v2162_v13, %v7825_v8  ;;  %v9031_v13 = vld [vmem:[%s12163_s2 + $0x68] ss:$16 sps:$4 sm:$0xff]  }
 0x6c5   :  { %v2169_v5 = vadd.f32 %v2161_v38, %v12917_v22  ;;  %v2171_v31 = vadd.f32 %v2163_v26, %v7827_v0  ;;  %v8994_v60 = vld [vmem:[%s12163_s2 + $0x2c] ss:$16 sps:$4 sm:$0xff]   ;;  %v9003_v62 = vld [vmem:[%s12163_s2 + $0x28] ss:$16 sps:$4 sm:$0xff]  }
 0x6c6   :  { %v5646_v7 = vmul.f32 -1.442695, %v2168_v56  ;;  %v5648_v37 = vmul.f32 -1.442695, %v2170_v34  ;;  %v9038_v26 = vld [vmem:[%s12163_s2 + $0x8c] ss:$16 sps:$4 sm:$0xff]  }
 0x6c7   :  { %v5647_v10 = vmul.f32 -1.442695, %v2169_v5  ;;  %v9010_v5 = vld [vmem:[%s12163_s2 + $0x4c] ss:$16 sps:$4 sm:$0xff]   ;;  %v9045_v34 = vld [vmem:[%s12163_s2 + $0x88] ss:$16 sps:$4 sm:$0xff]  }
 0x6c8   :  { %6388 = vpow2.f32 %v5646_v7  ;;  %v9017_v7 = vld [vmem:[%s12163_s2 + $0x48] ss:$16 sps:$4 sm:$0xff]  }
 0x6c9   :  { %6390 = vpow2.f32 %v5647_v10  ;;  %v9024_v10 = vld [vmem:[%s12163_s2 + $0x6c] ss:$16 sps:$4 sm:$0xff]  }
 0x6ca   :  { %6392 = vtanh.f32 %v2171_v31  ;;  %v9066_v31 = vld [vmem:[%s12163_s2 + $0xcc] ss:$16 sps:$4 sm:$0xff]  }
 0x6cb   :  { %6394 = vpow2.f32 %v5648_v37  ;;  %v9080_v37 = vld [vmem:[%s12163_s2 + $0xec] ss:$16 sps:$4 sm:$0xff]  }
 0x6cd   :  { %v6387_v29 = vpop.eup %6386 }
 0x6ce   :  { %v2073_v33 = vmul.f32 %v6387_v29, %v6385_v63  ;;  %v9052_v63 = vld [vmem:[%s12163_s2 + $0xac] ss:$16 sps:$4 sm:$0xff]   ;;  %v9059_v29 = vld [vmem:[%s12163_s2 + $0xa8] ss:$16 sps:$4 sm:$0xff]  }
 0x6d0   :  { %v2200_v40 = vrot.slane %v2073_v33, 3  ;;  %v9073_v33 = vld [vmem:[%s12163_s2 + $0xc8] ss:$16 sps:$4 sm:$0xff]  }
 0x6d2   :  { %v6389_v41 = vpop.eup %6388  ;;  %v2203_v43 = vpack.c.bf16 %v2200_v40, %v2200_v40  ;;  %v9087_v40 = vld [vmem:[%s12163_s2 + $0xe8] ss:$16 sps:$4 sm:$0xff]  }
 0x6d3   :  { %v2181_v42 = vadd.f32 1.0, %v6389_v41  ;;  %v6391_v44 = vpop.eup %6390  ;;  %v9093_v41 = vld [vmem:[%s12166_s4 + $0x4] ss:$16 sps:$4 sm:$0xff]  }
 0x6d4   :  { %v2182_v45 = vadd.f32 1.0, %v6391_v44  ;;  %v2209_v18 = vshrl.u32 %v2203_v43, 16  ;;  %v6393_v19 = vpop.eup %6392  ;;  %v9105_v43 = vld [vmem:[%s12166_s4] ss:$16 sps:$4 sm:$0xff]   ;;  %v9111_v44 = vld [vmem:[%s12166_s4 + $0x8] ss:$16 sps:$4 sm:$0xff]  }
 0x6d5   :  { %6396 = vrcp.f32 %v2181_v42  ;;  %v6395_v59 = vpop.eup %6394  ;;  %v9099_v42 = vld [vmem:[%s12166_s4 + $0xc] ss:$16 sps:$4 sm:$0xff]  }
 0x6d6   :  { %6398 = vrcp.f32 %v2182_v45  ;;  %v2211_v36 = vrot.slane %v2209_v18, 2  ;;  %v2183_v20 = vadd.f32 1.0, %v6395_v59  ;;  %v9117_v45 = vld [vmem:[%s12166_s4 + $0x24] ss:$16 sps:$4 sm:$0xff]   ;;  %v9123_v18 = vld [vmem:[%s12166_s4 + $0x2c] ss:$16 sps:$4 sm:$0xff]  }
 0x6d7   :  { %v9141_v59 = vld [vmem:[%s12166_s4 + $0x44] ss:$16 sps:$4 sm:$0xff]  }
 0x6d8   :  { %2246 = vmatprep.mubr.bf16.mxu0 %v2211_v36  ;;  %2287 = vmatprep.mubr.bf16.mxu1 %v2211_v36  ;;  %6400 = vrcp.f32 %v2183_v20  ;;  %v9129_v36 = vld [vmem:[%s12166_s4 + $0x20] ss:$16 sps:$4 sm:$0xff]   ;;  %13134 = vst [vmem:[#allocation2_spill] sm:$0xff] %v9141_v59  ;;  %v9171_v20 = vld [vmem:[%s12166_s4 + $0x6c] ss:$16 sps:$4 sm:$0xff]  }
 0x6d9   :  { %13132 = vst [vmem:[#allocation13_spill] sm:$0xff] %v9129_v36  ;;  %13139 = vst [vmem:[#allocation16_spill] sm:$0xff] %v9171_v20 }
 0x6df   :  { %v6397_v28 = vpop.eup %6396 }
 0x6e0   :  { %v2195_v32 = vmul.f32 %v6397_v28, %v6393_v19  ;;  %v6399_v25 = vpop.eup %6398  ;;  %v9135_v19 = vld [vmem:[%s12166_s4 + $0x28] ss:$16 sps:$4 sm:$0xff]   ;;  %v9147_v28 = vld [vmem:[%s12166_s4 + $0x4c] ss:$16 sps:$4 sm:$0xff]  }
 0x6e1   :  { %v2194_v27 = vmul.f32 %v6399_v25, %v2192_v11  ;;  %13133 = vst [vmem:[#allocation14_spill] sm:$0xff] %v9135_v19  ;;  %13135 = vst [vmem:[#allocation4_spill] sm:$0xff] %v9147_v28  ;;  %v9153_v11 = vld [vmem:[%s12166_s4 + $0x40] ss:$16 sps:$4 sm:$0xff]   ;;  %v9165_v25 = vld [vmem:[%s12166_s4 + $0x64] ss:$16 sps:$4 sm:$0xff]  }
 0x6e2   :  { %v6401_v23 = vpop.eup %6400  ;;  %13136 = vst [vmem:[#allocation57_spill] sm:$0xff] %v9153_v11  ;;  %13138 = vst [vmem:[#allocation15_spill] sm:$0xff] %v9165_v25 }
 0x6e3   :  { %v8980_v3 = vadd.f32 %v2195_v32, %v2194_v27  ;;  %v9159_v32 = vld [vmem:[%s12166_s4 + $0x48] ss:$16 sps:$4 sm:$0xff]   ;;  %v9177_v27 = vld [vmem:[%s12166_s4 + $0x60] ss:$16 sps:$4 sm:$0xff]  }
 0x6e4   :  { %13137 = vst [vmem:[#allocation58_spill] sm:$0xff] %v9159_v32  ;;  %13140 = vst [vmem:[#allocation17_spill] sm:$0xff] %v9177_v27 }
 0x6e5   :  { %6402 = vtanh.f32 %v8980_v3 }
 0x6ef   :  { %v6403_v14 = vpop.eup %6402 }
 0x6f0   :  { %v2198_v38 = vmul.f32 %v6403_v14, %v6401_v23  ;;  %v9183_v23 = vld [vmem:[%s12166_s4 + $0x68] ss:$16 sps:$4 sm:$0xff]   ;;  %v9189_v14 = vld [vmem:[%s12166_s4 + $0x84] ss:$16 sps:$4 sm:$0xff]  }
 0x6f1   :  { %13141 = vst [vmem:[#allocation18_spill] sm:$0xff] %v9183_v23  ;;  %13142 = vst [vmem:[#allocation19_spill] sm:$0xff] %v9189_v14 }
 0x6f2   :  { %v2202_v21 = vpack.c.bf16 %v2198_v38, %v2198_v38  ;;  %v9195_v38 = vld [vmem:[%s12166_s4 + $0x8c] ss:$16 sps:$4 sm:$0xff]  }
 0x6f3   :  { %13143 = vst [vmem:[#allocation20_spill] sm:$0xff] %v9195_v38 }
 0x6f4   :  { %v2205_v4 = vshrl.u32 %v2202_v21, 16  ;;  %v9201_v21 = vld [vmem:[%s12166_s4 + $0x80] ss:$16 sps:$4 sm:$0xff]  }
 0x6f5   :  { %13144 = vst [vmem:[#allocation21_spill] sm:$0xff] %v9201_v21 }
 0x6f6   :  { %v2207_v56 = vrot.slane %v2205_v4, 2  ;;  %v9207_v4 = vld [vmem:[%s12166_s4 + $0x88] ss:$16 sps:$4 sm:$0xff]  }
 0x6f7   :  { %13145 = vst [vmem:[#allocation22_spill] sm:$0xff] %v9207_v4 }
 0x6f8   :  { %2247 = vmatmul.mubr.bf16.vlgmr.msra.gmra.mrb[44].mxu0 %v2207_v56  ;;  %2288 = vmatmul.mubr.bf16.vlgmr.msra.gmra.mrb[52].mxu1 %v2207_v56 }
 0x6f9   :  { %2321 = vmatpush1.bf16.msra.mxu0 %v8787_v16  ;;  %2362 = vmatpush1.bf16.msra.mxu1 %v8987_v1 }
 0x6fa   :  { %2322 = vmatprep.subr.bf16.mxu0 %v8794_v6  ;;  %2363 = vmatprep.subr.bf16.mxu1 %v8994_v60 }
 0x6fb   :  { %2352 = vmatprep.mubr.bf16.mxu0 %v12855_v9  ;;  %2393 = vmatprep.mubr.bf16.mxu1 %v12855_v9 }
 0x6fd   :  { %2323 = vmatpush1.bf16.msra.mxu0 %v8803_v15  ;;  %2364 = vmatpush1.bf16.msra.mxu1 %v9003_v62 }
 0x6fe   :  { %2324 = vmatprep.subr.bf16.mxu0 %v8810_v12  ;;  %2365 = vmatprep.subr.bf16.mxu1 %v9010_v5 }
 0x701   :  { %2325 = vmatpush1.bf16.msra.mxu0 %v8817_v30  ;;  %2366 = vmatpush1.bf16.msra.mxu1 %v9017_v7 }
 0x702   :  { %2326 = vmatprep.subr.bf16.mxu0 %v8824_v24  ;;  %2367 = vmatprep.subr.bf16.mxu1 %v9024_v10 }
 0x705   :  { %2327 = vmatpush1.bf16.msra.mxu0 %v8831_v2  ;;  %2368 = vmatpush1.bf16.msra.mxu1 %v9031_v13 }
 0x706   :  { %2328 = vmatprep.subr.bf16.mxu0 %v8838_v46  ;;  %2369 = vmatprep.subr.bf16.mxu1 %v9038_v26 }
 0x709   :  { %2329 = vmatpush1.bf16.msra.mxu0 %v8845_v48  ;;  %2370 = vmatpush1.bf16.msra.mxu1 %v9045_v34 }
 0x70a   :  { %2330 = vmatprep.subr.bf16.mxu0 %v8852_v49  ;;  %2371 = vmatprep.subr.bf16.mxu1 %v9052_v63 }
 0x70d   :  { %2331 = vmatpush1.bf16.msra.mxu0 %v8859_v50  ;;  %2372 = vmatpush1.bf16.msra.mxu1 %v9059_v29 }
 0x70e   :  { %2332 = vmatprep.subr.bf16.mxu0 %v8866_v52  ;;  %2373 = vmatprep.subr.bf16.mxu1 %v9066_v31 }
 0x711   :  { %2333 = vmatpush1.bf16.msra.mxu0 %v8873_v53  ;;  %2374 = vmatpush1.bf16.msra.mxu1 %v9073_v33 }
 0x712   :  { %2334 = vmatprep.subr.bf16.mxu0 %v8880_v54  ;;  %2375 = vmatprep.subr.bf16.mxu1 %v9080_v37 }
 0x715   :  { %2335 = vmatpush1.bf16.msra.mxu0 %v8887_v55  ;;  %2376 = vmatpush1.bf16.msra.mxu1 %v9087_v40 }
 0x716   :  { %2456 = vmatprep.subr.bf16.mxu0 %v9093_v41  ;;  %2497 = vmatprep.subr.bf16.mxu1 %v9099_v42 }
 0x718   :  { %2353 = vmatmul.mubr.bf16.vlgmr.msra.gmra.mrb[48].mxu0 %v2207_v56  ;;  %2394 = vmatmul.mubr.bf16.vlgmr.msra.gmra.mrb[56].mxu1 %v2207_v56  ;;  %v9213_v56 = vld [vmem:[%s12166_s4 + $0xa4] ss:$16 sps:$4 sm:$0xff]  }
 0x719   :  { %2457 = vmatpush1.bf16.msra.mxu0 %v9105_v43  ;;  %2498 = vmatpush1.bf16.msra.mxu1 %v9111_v44  ;;  %13146 = vst [vmem:[#allocation23_spill] sm:$0xff] %v9213_v56 }
 0x71a   :  { %2458 = vmatprep.subr.bf16.mxu0 %v9117_v45  ;;  %2499 = vmatprep.subr.bf16.mxu1 %v9123_v18 }
 0x71d   :  { %2459 = vmatpush1.bf16.msra.mxu0 %v9129_v36  ;;  %2500 = vmatpush1.bf16.msra.mxu1 %v9135_v19 }
 0x71e   :  { %2460 = vmatprep.subr.bf16.mxu0 %v9141_v59  ;;  %2501 = vmatprep.subr.bf16.mxu1 %v9147_v28 }
 0x721   :  { %2461 = vmatpush1.bf16.msra.mxu0 %v9153_v11  ;;  %2502 = vmatpush1.bf16.msra.mxu1 %v9159_v32 }
 0x722   :  { %2462 = vmatprep.subr.bf16.mxu0 %v9165_v25  ;;  %2503 = vmatprep.subr.bf16.mxu1 %v9171_v20 }
 0x725   :  { %2463 = vmatpush1.bf16.msra.mxu0 %v9177_v27  ;;  %2504 = vmatpush1.bf16.msra.mxu1 %v9183_v23 }
 0x726   :  { %2464 = vmatprep.subr.bf16.mxu0 %v9189_v14  ;;  %2505 = vmatprep.subr.bf16.mxu1 %v9195_v38  ;;  %v9219_v38 = vld [vmem:[%s12166_s4 + $0xac] ss:$16 sps:$4 sm:$0xff]  }
 0x727   :  { %13147 = vst [vmem:[#allocation10_spill] sm:$0xff] %v9219_v38 }
 0x729   :  { %2465 = vmatpush1.bf16.msra.mxu0 %v9201_v21  ;;  %2506 = vmatpush1.bf16.msra.mxu1 %v9207_v4  ;;  %v9225_v21 = vld [vmem:[%s12166_s4 + $0xa0] ss:$16 sps:$4 sm:$0xff]   ;;  %v9231_v4 = vld [vmem:[%s12166_s4 + $0xa8] ss:$16 sps:$4 sm:$0xff]  }
 0x72a   :  { %2466 = vmatprep.subr.bf16.mxu0 %v9213_v56  ;;  %2507 = vmatprep.subr.bf16.mxu1 %v9219_v38  ;;  %13148 = vst [vmem:[#allocation11_spill] sm:$0xff] %v9225_v21  ;;  %13149 = vst [vmem:[#allocation69_spill] sm:$0xff] %v9231_v4  ;;  %v9237_v56 = vld [vmem:[%s12166_s4 + $0xc4] ss:$16 sps:$4 sm:$0xff]   ;;  %v9243_v38 = vld [vmem:[%s12166_s4 + $0xcc] ss:$16 sps:$4 sm:$0xff]  }
 0x72b   :  { %13150 = vst [vmem:[#allocation24_spill] sm:$0xff] %v9237_v56  ;;  %13151 = vst [vmem:[#allocation25_spill] sm:$0xff] %v9243_v38 }
 0x72d   :  { %2467 = vmatpush1.bf16.msra.mxu0 %v9225_v21  ;;  %2508 = vmatpush1.bf16.msra.mxu1 %v9231_v4  ;;  %v9249_v21 = vld [vmem:[%s12166_s4 + $0xc0] ss:$16 sps:$4 sm:$0xff]   ;;  %v9255_v4 = vld [vmem:[%s12166_s4 + $0xc8] ss:$16 sps:$4 sm:$0xff]  }
 0x72e   :  { %2468 = vmatprep.subr.bf16.mxu0 %v9237_v56  ;;  %2509 = vmatprep.subr.bf16.mxu1 %v9243_v38  ;;  %13152 = vst [vmem:[#allocation26_spill] sm:$0xff] %v9249_v21  ;;  %13153 = vst [vmem:[#allocation27_spill] sm:$0xff] %v9255_v4  ;;  %v9261_v56 = vld [vmem:[%s12166_s4 + $0xe4] ss:$16 sps:$4 sm:$0xff]   ;;  %v9267_v38 = vld [vmem:[%s12166_s4 + $0xec] ss:$16 sps:$4 sm:$0xff]  }
 0x72f   :  { %13154 = vst [vmem:[#allocation28_spill] sm:$0xff] %v9261_v56  ;;  %13155 = vst [vmem:[#allocation29_spill] sm:$0xff] %v9267_v38 }
 0x731   :  { %2469 = vmatpush1.bf16.msra.mxu0 %v9249_v21  ;;  %2510 = vmatpush1.bf16.msra.mxu1 %v9255_v4  ;;  %v9273_v21 = vld [vmem:[%s12166_s4 + $0xe0] ss:$16 sps:$4 sm:$0xff]   ;;  %v9279_v4 = vld [vmem:[%s12166_s4 + $0xe8] ss:$16 sps:$4 sm:$0xff]  }
 0x732   :  { %2470 = vmatprep.subr.bf16.mxu0 %v9261_v56  ;;  %2511 = vmatprep.subr.bf16.mxu1 %v9267_v38  ;;  %13156 = vst [vmem:[#allocation30_spill] sm:$0xff] %v9273_v21  ;;  %13157 = vst [vmem:[#allocation31_spill] sm:$0xff] %v9279_v4  ;;  %v9285_v56 = vld [vmem:[%s12166_s4 + $0x104] ss:$16 sps:$4 sm:$0xff]   ;;  %v9291_v38 = vld [vmem:[%s12166_s4 + $0x10c] ss:$16 sps:$4 sm:$0xff]  }
 0x733   :  { %13158 = vst [vmem:[#allocation32_spill] sm:$0xff] %v9285_v56  ;;  %13159 = vst [vmem:[#allocation33_spill] sm:$0xff] %v9291_v38 }
 0x735   :  { %2471 = vmatpush1.bf16.msra.mxu0 %v9273_v21  ;;  %2512 = vmatpush1.bf16.msra.mxu1 %v9279_v4  ;;  %v9297_v21 = vld [vmem:[%s12166_s4 + $0x100] ss:$16 sps:$4 sm:$0xff]   ;;  %v9303_v4 = vld [vmem:[%s12166_s4 + $0x108] ss:$16 sps:$4 sm:$0xff]  }
 0x736   :  { %2472 = vmatprep.subr.bf16.mxu0 %v9285_v56  ;;  %2513 = vmatprep.subr.bf16.mxu1 %v9291_v38  ;;  %13160 = vst [vmem:[#allocation34_spill] sm:$0xff] %v9297_v21  ;;  %13161 = vst [vmem:[#allocation35_spill] sm:$0xff] %v9303_v4  ;;  %v9309_v56 = vld [vmem:[%s12166_s4 + $0x124] ss:$16 sps:$4 sm:$0xff]   ;;  %v9315_v38 = vld [vmem:[%s12166_s4 + $0x12c] ss:$16 sps:$4 sm:$0xff]  }
 0x737   :  { %13162 = vst [vmem:[#allocation36_spill] sm:$0xff] %v9309_v56  ;;  %13163 = vst [vmem:[#allocation37_spill] sm:$0xff] %v9315_v38 }
 0x739   :  { %2473 = vmatpush1.bf16.msra.mxu0 %v9297_v21  ;;  %2514 = vmatpush1.bf16.msra.mxu1 %v9303_v4  ;;  %v9321_v21 = vld [vmem:[%s12166_s4 + $0x120] ss:$16 sps:$4 sm:$0xff]   ;;  %v9327_v4 = vld [vmem:[%s12166_s4 + $0x128] ss:$16 sps:$4 sm:$0xff]  }
 0x73a   :  { %2474 = vmatprep.subr.bf16.mxu0 %v9309_v56  ;;  %2515 = vmatprep.subr.bf16.mxu1 %v9315_v38  ;;  %13164 = vst [vmem:[#allocation38_spill] sm:$0xff] %v9321_v21  ;;  %13165 = vst [vmem:[#allocation39_spill] sm:$0xff] %v9327_v4  ;;  %v9333_v56 = vld [vmem:[%s12166_s4 + $0x144] ss:$16 sps:$4 sm:$0xff]   ;;  %v9339_v38 = vld [vmem:[%s12166_s4 + $0x14c] ss:$16 sps:$4 sm:$0xff]  }
 0x73b   :  { %13166 = vst [vmem:[#allocation40_spill] sm:$0xff] %v9333_v56  ;;  %13167 = vst [vmem:[#allocation41_spill] sm:$0xff] %v9339_v38 }
 0x73d   :  { %2475 = vmatpush1.bf16.msra.mxu0 %v9321_v21  ;;  %2516 = vmatpush1.bf16.msra.mxu1 %v9327_v4  ;;  %v9345_v21 = vld [vmem:[%s12166_s4 + $0x140] ss:$16 sps:$4 sm:$0xff]   ;;  %v9351_v4 = vld [vmem:[%s12166_s4 + $0x148] ss:$16 sps:$4 sm:$0xff]  }
 0x73e   :  { %2476 = vmatprep.subr.bf16.mxu0 %v9333_v56  ;;  %2517 = vmatprep.subr.bf16.mxu1 %v9339_v38  ;;  %13168 = vst [vmem:[#allocation42_spill] sm:$0xff] %v9345_v21  ;;  %13169 = vst [vmem:[#allocation43_spill] sm:$0xff] %v9351_v4  ;;  %v9357_v56 = vld [vmem:[%s12166_s4 + $0x164] ss:$16 sps:$4 sm:$0xff]   ;;  %v9363_v38 = vld [vmem:[%s12166_s4 + $0x16c] ss:$16 sps:$4 sm:$0xff]  }
 0x73f   :  { %13170 = vst [vmem:[#allocation44_spill] sm:$0xff] %v9357_v56  ;;  %13171 = vst [vmem:[#allocation45_spill] sm:$0xff] %v9363_v38 }
 0x741   :  { %2477 = vmatpush1.bf16.msra.mxu0 %v9345_v21  ;;  %2518 = vmatpush1.bf16.msra.mxu1 %v9351_v4  ;;  %v9369_v21 = vld [vmem:[%s12166_s4 + $0x160] ss:$16 sps:$4 sm:$0xff]   ;;  %v9375_v4 = vld [vmem:[%s12166_s4 + $0x168] ss:$16 sps:$4 sm:$0xff]  }
 0x742   :  { %2478 = vmatprep.subr.bf16.mxu0 %v9357_v56  ;;  %2519 = vmatprep.subr.bf16.mxu1 %v9363_v38  ;;  %13172 = vst [vmem:[#allocation46_spill] sm:$0xff] %v9369_v21  ;;  %13173 = vst [vmem:[#allocation47_spill] sm:$0xff] %v9375_v4  ;;  %v9381_v56 = vld [vmem:[%s12166_s4 + $0x184] ss:$16 sps:$4 sm:$0xff]   ;;  %v9387_v38 = vld [vmem:[%s12166_s4 + $0x18c] ss:$16 sps:$4 sm:$0xff]  }
 0x743   :  { %13174 = vst [vmem:[#allocation48_spill] sm:$0xff] %v9381_v56  ;;  %13175 = vst [vmem:[#allocation49_spill] sm:$0xff] %v9387_v38 }
 0x745   :  { %2479 = vmatpush1.bf16.msra.mxu0 %v9369_v21  ;;  %2520 = vmatpush1.bf16.msra.mxu1 %v9375_v4  ;;  %v9393_v21 = vld [vmem:[%s12166_s4 + $0x180] ss:$16 sps:$4 sm:$0xff]   ;;  %v9399_v4 = vld [vmem:[%s12166_s4 + $0x188] ss:$16 sps:$4 sm:$0xff]  }
 0x746   :  { %2480 = vmatprep.subr.bf16.mxu0 %v9381_v56  ;;  %2521 = vmatprep.subr.bf16.mxu1 %v9387_v38  ;;  %13176 = vst [vmem:[#allocation50_spill] sm:$0xff] %v9393_v21  ;;  %13177 = vst [vmem:[#allocation51_spill] sm:$0xff] %v9399_v4  ;;  %v9405_v56 = vld [vmem:[%s12166_s4 + $0x1a4] ss:$16 sps:$4 sm:$0xff]   ;;  %v9411_v38 = vld [vmem:[%s12166_s4 + $0x1ac] ss:$16 sps:$4 sm:$0xff]  }
 0x747   :  { %13178 = vst [vmem:[#allocation52_spill] sm:$0xff] %v9405_v56  ;;  %13179 = vst [vmem:[#allocation53_spill] sm:$0xff] %v9411_v38 }
 0x749   :  { %2481 = vmatpush1.bf16.msra.mxu0 %v9393_v21  ;;  %2522 = vmatpush1.bf16.msra.mxu1 %v9399_v4  ;;  %v9417_v21 = vld [vmem:[%s12166_s4 + $0x1a0] ss:$16 sps:$4 sm:$0xff]   ;;  %v9423_v4 = vld [vmem:[%s12166_s4 + $0x1a8] ss:$16 sps:$4 sm:$0xff]  }
 0x74a   :  { %2482 = vmatprep.subr.bf16.mxu0 %v9405_v56  ;;  %2523 = vmatprep.subr.bf16.mxu1 %v9411_v38  ;;  %13180 = vst [vmem:[#allocation54_spill] sm:$0xff] %v9417_v21  ;;  %13181 = vst [vmem:[#allocation5_spill] sm:$0xff] %v9423_v4  ;;  %v9429_v56 = vld [vmem:[%s12166_s4 + $0x1c4] ss:$16 sps:$4 sm:$0xff]   ;;  %v9435_v38 = vld [vmem:[%s12166_s4 + $0x1cc] ss:$16 sps:$4 sm:$0xff]  }
 0x74b   :  { %13182 = vst [vmem:[#allocation6_spill] sm:$0xff] %v9429_v56  ;;  %13183 = vst [vmem:[#allocation9_spill] sm:$0xff] %v9435_v38 }
 0x74d   :  { %2483 = vmatpush1.bf16.msra.mxu0 %v9417_v21  ;;  %2524 = vmatpush1.bf16.msra.mxu1 %v9423_v4  ;;  %v9441_v21 = vld [vmem:[%s12166_s4 + $0x1c0] ss:$16 sps:$4 sm:$0xff]   ;;  %v9447_v4 = vld [vmem:[%s12166_s4 + $0x1c8] ss:$16 sps:$4 sm:$0xff]  }
 0x74e   :  { %2484 = vmatprep.subr.bf16.mxu0 %v9429_v56  ;;  %2525 = vmatprep.subr.bf16.mxu1 %v9435_v38  ;;  %13184 = vst [vmem:[#allocation61_spill] sm:$0xff] %v9441_v21  ;;  %13185 = vst [vmem:[#allocation62_spill] sm:$0xff] %v9447_v4  ;;  %v9453_v56 = vld [vmem:[%s12166_s4 + $0x1e4] ss:$16 sps:$4 sm:$0xff]   ;;  %v9459_v38 = vld [vmem:[%s12166_s4 + $0x1ec] ss:$16 sps:$4 sm:$0xff]  }
 0x74f   :  { %13186 = vst [vmem:[#allocation63_spill] sm:$0xff] %v9453_v56  ;;  %13187 = vst [vmem:[#allocation64_spill] sm:$0xff] %v9459_v38 }
 0x751   :  { %2485 = vmatpush1.bf16.msra.mxu0 %v9441_v21  ;;  %2526 = vmatpush1.bf16.msra.mxu1 %v9447_v4  ;;  %v9465_v21 = vld [vmem:[%s12166_s4 + $0x1e0] ss:$16 sps:$4 sm:$0xff]   ;;  %v9471_v4 = vld [vmem:[%s12166_s4 + $0x1e8] ss:$16 sps:$4 sm:$0xff]  }
 0x752   :  { %2486 = vmatprep.subr.bf16.mxu0 %v9453_v56  ;;  %2527 = vmatprep.subr.bf16.mxu1 %v9459_v38  ;;  %13188 = vst [vmem:[#allocation65_spill] sm:$0xff] %v9465_v21  ;;  %13189 = vst [vmem:[#allocation66_spill] sm:$0xff] %v9471_v4 }
 0x755   :  { %2487 = vmatpush1.bf16.msra.mxu0 %v9465_v21  ;;  %2528 = vmatpush1.bf16.msra.mxu1 %v9471_v4 }
 0x756   :  { %2562 = vmatprep.subr.bf16.mxu0 %v8958_v57  ;;  %2603 = vmatprep.subr.bf16.mxu1 %v8964_v58 }
 0x7cb   :  { %v2248_v56 = vpop.f32.mrb[44].mxu0  ;;  %v2289_v38 = vpop.f32.mrb[52].mxu1 }
 0x7cc   :  { %v2249_v14 = vadd.f32 %v2248_v56, %v12960_v47  ;;  %v2250_v23 = vpop.f32.mrb[45].mxu0  ;;  %v2291_v27 = vpop.f32.mrb[53].mxu1  ;;  %v2290_v57 = vadd.f32 %v2289_v38, %v13129_v35 }
 0x7cd   :  { %v2251_v20 = vadd.f32 %v2250_v23, %v12961_v51  ;;  %v2252_v21 = vpop.f32.mrb[46].mxu0  ;;  %v2293_v25 = vpop.f32.mrb[54].mxu1  ;;  %v2292_v58 = vadd.f32 %v2291_v27, %v13130_v39 }
 0x7ce   :  { %v5649_v32 = vmul.f32 -1.442695, %v2249_v14  ;;  %v2253_v11 = vpop.f32.mrb[47].mxu0  ;;  %v2294_v28 = vpop.f32.mrb[55].mxu1  ;;  %v5651_v4 = vmul.f32 -1.442695, %v2290_v57 }
 0x7cf   :  { %v5650_v59 = vmul.f32 -1.442695, %v2251_v20 }
 0x7d0   :  { %6404 = vpow2.f32 %v5649_v32 }
 0x7d1   :  { %6406 = vpow2.f32 %v5650_v59 }
 0x7d2   :  { %6408 = vtanh.f32 %v2292_v58 }
 0x7d3   :  { %6410 = vpow2.f32 %v5651_v4 }
 0x7da   :  { %v6405_v19 = vpop.eup %6404 }
 0x7db   :  { %v2305_v36 = vadd.f32 1.0, %v6405_v19  ;;  %v6407_v56 = vpop.eup %6406 }
 0x7dc   :  { %v2306_v23 = vadd.f32 1.0, %v6407_v56  ;;  %v6409_v25 = vpop.eup %6408 }
 0x7dd   :  { %6412 = vrcp.f32 %v2305_v36  ;;  %v6411_v14 = vpop.eup %6410 }
 0x7de   :  { %6414 = vrcp.f32 %v2306_v23  ;;  %v2307_v32 = vadd.f32 1.0, %v6411_v14 }
 0x7e0   :  { %6416 = vrcp.f32 %v2307_v32 }
 0x7e7   :  { %v6413_v11 = vpop.eup %6412 }
 0x7e8   :  { %v2316_v28 = vmul.f32 %v6413_v11, %v6409_v25  ;;  %v6415_v20 = vpop.eup %6414 }
 0x7e9   :  { %v2315_v59 = vmul.f32 %v6415_v20, %v8972_v61 }
 0x7ea   :  { %v6417_v32 = vpop.eup %6416 }
 0x7eb   :  { %v2354_v38 = vpop.f32.mrb[48].mxu0  ;;  %v2395_v21 = vpop.f32.mrb[56].mxu1  ;;  %v9481_v27 = vadd.f32 %v2316_v28, %v2315_v59 }
 0x7ec   :  { %v2406_v57 = vrot.slane %v2354_v38, 2  ;;  %v2356_v19 = vpop.f32.mrb[49].mxu0  ;;  %v2397_v58 = vpop.f32.mrb[57].mxu1  ;;  %v2408_v28 = vrot.slane %v2395_v21, 2 }
 0x7ed   :  { %13190 = vst [vmem:[#allocation67_spill] sm:$0xff] %v9481_v27  ;;  %v2407_v4 = vrot.slane %v2356_v19, 2  ;;  %v2358_v36 = vpop.f32.mrb[50].mxu0  ;;  %v2399_v56 = vpop.f32.mrb[58].mxu1  ;;  %6418 = vtanh.f32 %v9481_v27  ;;  %v2409_v59 = vrot.slane %v2397_v58, 2 }
 0x7ee   :  { %v2414_v23 = vadd.f32 %v2406_v57, %v12916_v17  ;;  %v2359_v25 = vpop.f32.mrb[51].mxu0  ;;  %v2400_v11 = vpop.f32.mrb[59].mxu1  ;;  %v2416_v38 = vadd.f32 %v2408_v28, %v7825_v8 }
 0x7ef   :  { %v2415_v14 = vadd.f32 %v2407_v4, %v12917_v22  ;;  %v2417_v36 = vadd.f32 %v2409_v59, %v7827_v0 }
 0x7f0   :  { %v5652_v61 = vmul.f32 -1.442695, %v2414_v23  ;;  %v5654_v27 = vmul.f32 -1.442695, %v2416_v38 }
 0x7f1   :  { %v5653_v20 = vmul.f32 -1.442695, %v2415_v14 }
 0x7f2   :  { %6420 = vpow2.f32 %v5652_v61 }
 0x7f3   :  { %6422 = vpow2.f32 %v5653_v20  ;;  %v2438_v20 = vrot.slane %v8980_v3, 7  ;;  %v13206_v3 = vld [vmem:[#allocation10_spill] sm:$0xff] }
 0x7f4   :  { %6424 = vtanh.f32 %v2417_v36 }
 0x7f5   :  { %6426 = vpow2.f32 %v5654_v27 }
 0x7f7   :  { %v6419_v19 = vpop.eup %6418 }
 0x7f8   :  { %v2319_v56 = vmul.f32 %v6419_v19, %v6417_v32 }
 0x7fa   :  { %v2446_v39 = vrot.slane %v2319_v56, 2 }
 0x7fc   :  { %v6421_v57 = vpop.eup %6420  ;;  %v2449_v11 = vpack.c.bf16 %v2446_v39, %v2446_v39 }
 0x7fd   :  { %v2427_v25 = vadd.f32 1.0, %v6421_v57  ;;  %v6423_v4 = vpop.eup %6422 }
 0x7fe   :  { %v2428_v23 = vadd.f32 1.0, %v6423_v4  ;;  %v2453_v21 = vrot.slane %v2449_v11, 3  ;;  %v6425_v58 = vpop.eup %6424  ;;  %v13229_v11 = vld [vmem:[#allocation44_spill] sm:$0xff]  ;;  %v13230_v4 = vld [vmem:[#allocation45_spill] sm:$0xff] }
 0x7ff   :  { %6428 = vrcp.f32 %v2427_v25  ;;  %v6427_v14 = vpop.eup %6426  ;;  %v13228_v25 = vld [vmem:[#allocation43_spill] sm:$0xff] }
 0x800   :  { %6430 = vrcp.f32 %v2428_v23  ;;  %2488 = vmatprep.mubr.bf16.mxu0 %v2453_v21  ;;  %2529 = vmatprep.mubr.bf16.mxu1 %v2453_v21  ;;  %v2429_v38 = vadd.f32 1.0, %v6427_v14  ;;  %v13231_v23 = vld [vmem:[#allocation46_spill] sm:$0xff]  ;;  %v13232_v21 = vld [vmem:[#allocation47_spill] sm:$0xff]  ;;  %v13234_v14 = vld [vmem:[#allocation49_spill] sm:$0xff] }
 0x802   :  { %6432 = vrcp.f32 %v2429_v38  ;;  %v13239_v38 = vld [vmem:[#allocation54_spill] sm:$0xff] }
 0x809   :  { %v6429_v61 = vpop.eup %6428 }
 0x80a   :  { %v2441_v28 = vmul.f32 %v6429_v61, %v6425_v58  ;;  %v6431_v59 = vpop.eup %6430  ;;  %v13233_v58 = vld [vmem:[#allocation48_spill] sm:$0xff]  ;;  %v13235_v61 = vld [vmem:[#allocation50_spill] sm:$0xff] }
 0x80b   :  { %v2440_v32 = vmul.f32 %v6431_v59, %v2438_v20  ;;  %v13236_v20 = vld [vmem:[#allocation51_spill] sm:$0xff]  ;;  %v13238_v59 = vld [vmem:[#allocation53_spill] sm:$0xff] }
 0x80c   :  { %v6433_v39 = vpop.eup %6432 }
 0x80d   :  { %v9489_v19 = vadd.f32 %v2441_v28, %v2440_v32  ;;  %v13237_v28 = vld [vmem:[#allocation52_spill] sm:$0xff]  ;;  %v13240_v32 = vld [vmem:[#allocation5_spill] sm:$0xff] }
 0x80f   :  { %6434 = vtanh.f32 %v9489_v19 }
 0x819   :  { %v6435_v27 = vpop.eup %6434 }
 0x81a   :  { %v2444_v36 = vmul.f32 %v6435_v27, %v6433_v39  ;;  %v13241_v39 = vld [vmem:[#allocation6_spill] sm:$0xff]  ;;  %v13242_v27 = vld [vmem:[#allocation9_spill] sm:$0xff] }
 0x81c   :  { %v2448_v56 = vpack.c.bf16 %v2444_v36, %v2444_v36  ;;  %v13243_v36 = vld [vmem:[#allocation61_spill] sm:$0xff] }
 0x81e   :  { %v2452_v57 = vrot.slane %v2448_v56, 3  ;;  %v13244_v56 = vld [vmem:[#allocation62_spill] sm:$0xff] }
 0x820   :  { %2489 = vmatmul.mubr.bf16.vlgmr.msra.gmra.mrb[52].mxu0 %v2452_v57  ;;  %2530 = vmatmul.mubr.bf16.vlgmr.msra.gmra.mrb[60].mxu1 %v2452_v57 }
 0x821   :  { %2563 = vmatpush1.bf16.msra.mxu0 %v8787_v16  ;;  %2604 = vmatpush1.bf16.msra.mxu1 %v8987_v1  ;;  %v13191_v16 = vld [vmem:[#allocation13_spill] sm:$0xff]  ;;  %v13207_v1 = vld [vmem:[#allocation11_spill] sm:$0xff] }
 0x822   :  { %2564 = vmatprep.subr.bf16.mxu0 %v8794_v6  ;;  %2605 = vmatprep.subr.bf16.mxu1 %v8994_v60  ;;  %v13192_v6 = vld [vmem:[#allocation14_spill] sm:$0xff]  ;;  %v13208_v60 = vld [vmem:[#allocation69_spill] sm:$0xff] }
 0x823   :  { %2594 = vmatprep.mubr.bf16.mxu0 %v12855_v9  ;;  %2635 = vmatprep.mubr.bf16.mxu1 %v12855_v9 }
 0x825   :  { %2565 = vmatpush1.bf16.msra.mxu0 %v8803_v15  ;;  %2606 = vmatpush1.bf16.msra.mxu1 %v9003_v62  ;;  %v13193_v15 = vld [vmem:[#allocation2_spill] sm:$0xff]  ;;  %v13209_v62 = vld [vmem:[#allocation24_spill] sm:$0xff] }
 0x826   :  { %2566 = vmatprep.subr.bf16.mxu0 %v8810_v12  ;;  %2607 = vmatprep.subr.bf16.mxu1 %v9010_v5  ;;  %v13194_v12 = vld [vmem:[#allocation4_spill] sm:$0xff]  ;;  %v13210_v5 = vld [vmem:[#allocation25_spill] sm:$0xff] }
 0x829   :  { %2567 = vmatpush1.bf16.msra.mxu0 %v8817_v30  ;;  %2608 = vmatpush1.bf16.msra.mxu1 %v9017_v7  ;;  %v13195_v30 = vld [vmem:[#allocation57_spill] sm:$0xff]  ;;  %v13211_v7 = vld [vmem:[#allocation26_spill] sm:$0xff] }
 0x82a   :  { %2568 = vmatprep.subr.bf16.mxu0 %v8824_v24  ;;  %2609 = vmatprep.subr.bf16.mxu1 %v9024_v10  ;;  %v13196_v24 = vld [vmem:[#allocation58_spill] sm:$0xff]  ;;  %v13212_v10 = vld [vmem:[#allocation27_spill] sm:$0xff] }
 0x82d   :  { %2569 = vmatpush1.bf16.msra.mxu0 %v8831_v2  ;;  %2610 = vmatpush1.bf16.msra.mxu1 %v9031_v13  ;;  %v13197_v2 = vld [vmem:[#allocation15_spill] sm:$0xff]  ;;  %v13213_v13 = vld [vmem:[#allocation28_spill] sm:$0xff] }
 0x82e   :  { %2570 = vmatprep.subr.bf16.mxu0 %v8838_v46  ;;  %2611 = vmatprep.subr.bf16.mxu1 %v9038_v26  ;;  %v13198_v46 = vld [vmem:[#allocation16_spill] sm:$0xff]  ;;  %v13214_v26 = vld [vmem:[#allocation29_spill] sm:$0xff] }
 0x831   :  { %2571 = vmatpush1.bf16.msra.mxu0 %v8845_v48  ;;  %2612 = vmatpush1.bf16.msra.mxu1 %v9045_v34  ;;  %v13199_v48 = vld [vmem:[#allocation17_spill] sm:$0xff]  ;;  %v13215_v34 = vld [vmem:[#allocation30_spill] sm:$0xff] }
 0x832   :  { %2572 = vmatprep.subr.bf16.mxu0 %v8852_v49  ;;  %2613 = vmatprep.subr.bf16.mxu1 %v9052_v63  ;;  %v13200_v49 = vld [vmem:[#allocation18_spill] sm:$0xff]  ;;  %v13216_v63 = vld [vmem:[#allocation31_spill] sm:$0xff] }
 0x835   :  { %2573 = vmatpush1.bf16.msra.mxu0 %v8859_v50  ;;  %2614 = vmatpush1.bf16.msra.mxu1 %v9059_v29  ;;  %v13201_v50 = vld [vmem:[#allocation19_spill] sm:$0xff]  ;;  %v13217_v29 = vld [vmem:[#allocation32_spill] sm:$0xff] }
 0x836   :  { %2574 = vmatprep.subr.bf16.mxu0 %v8866_v52  ;;  %2615 = vmatprep.subr.bf16.mxu1 %v9066_v31  ;;  %v13202_v52 = vld [vmem:[#allocation20_spill] sm:$0xff]  ;;  %v13218_v31 = vld [vmem:[#allocation33_spill] sm:$0xff] }
 0x839   :  { %2575 = vmatpush1.bf16.msra.mxu0 %v8873_v53  ;;  %2616 = vmatpush1.bf16.msra.mxu1 %v9073_v33  ;;  %v13203_v53 = vld [vmem:[#allocation21_spill] sm:$0xff]  ;;  %v13219_v33 = vld [vmem:[#allocation34_spill] sm:$0xff] }
 0x83a   :  { %2576 = vmatprep.subr.bf16.mxu0 %v8880_v54  ;;  %2617 = vmatprep.subr.bf16.mxu1 %v9080_v37  ;;  %v13204_v54 = vld [vmem:[#allocation22_spill] sm:$0xff]  ;;  %v13220_v37 = vld [vmem:[#allocation35_spill] sm:$0xff] }
 0x83d   :  { %2577 = vmatpush1.bf16.msra.mxu0 %v8887_v55  ;;  %2618 = vmatpush1.bf16.msra.mxu1 %v9087_v40  ;;  %v13205_v55 = vld [vmem:[#allocation23_spill] sm:$0xff]  ;;  %v13221_v40 = vld [vmem:[#allocation36_spill] sm:$0xff] }
 0x83e   :  { %2702 = vmatprep.subr.bf16.mxu0 %v9093_v41  ;;  %2743 = vmatprep.subr.bf16.mxu1 %v9099_v42  ;;  %v13222_v41 = vld [vmem:[#allocation37_spill] sm:$0xff]  ;;  %v13223_v42 = vld [vmem:[#allocation38_spill] sm:$0xff] }
 0x840   :  { %2595 = vmatmul.mubr.bf16.vlgmr.msra.gmra.mrb[56].mxu0 %v2452_v57  ;;  %2636 = vmatmul.mubr.bf16.vlgmr.msra.gmra.mrb[64].mxu1 %v2452_v57  ;;  %v13245_v57 = vld [vmem:[#allocation63_spill] sm:$0xff] }
 0x841   :  { %2703 = vmatpush1.bf16.msra.mxu0 %v9105_v43  ;;  %2744 = vmatpush1.bf16.msra.mxu1 %v9111_v44  ;;  %v13224_v43 = vld [vmem:[#allocation39_spill] sm:$0xff]  ;;  %v13225_v44 = vld [vmem:[#allocation40_spill] sm:$0xff] }
 0x842   :  { %2704 = vmatprep.subr.bf16.mxu0 %v9117_v45  ;;  %2745 = vmatprep.subr.bf16.mxu1 %v9123_v18  ;;  %v13226_v45 = vld [vmem:[#allocation41_spill] sm:$0xff]  ;;  %v13227_v18 = vld [vmem:[#allocation42_spill] sm:$0xff] }
 0x845   :  { %2705 = vmatpush1.bf16.msra.mxu0 %v13191_v16  ;;  %2746 = vmatpush1.bf16.msra.mxu1 %v13192_v6  ;;  %v13246_v16 = vld [vmem:[#allocation64_spill] sm:$0xff]  ;;  %v13247_v6 = vld [vmem:[#allocation65_spill] sm:$0xff] }
 0x846   :  { %2706 = vmatprep.subr.bf16.mxu0 %v13193_v15  ;;  %2747 = vmatprep.subr.bf16.mxu1 %v13194_v12  ;;  %v13248_v15 = vld [vmem:[#allocation66_spill] sm:$0xff] }
 0x849   :  { %2707 = vmatpush1.bf16.msra.mxu0 %v13195_v30  ;;  %2748 = vmatpush1.bf16.msra.mxu1 %v13196_v24 }
 0x84a   :  { %2708 = vmatprep.subr.bf16.mxu0 %v13197_v2  ;;  %2749 = vmatprep.subr.bf16.mxu1 %v13198_v46 }
 0x84d   :  { %2709 = vmatpush1.bf16.msra.mxu0 %v13199_v48  ;;  %2750 = vmatpush1.bf16.msra.mxu1 %v13200_v49 }
 0x84e   :  { %2710 = vmatprep.subr.bf16.mxu0 %v13201_v50  ;;  %2751 = vmatprep.subr.bf16.mxu1 %v13202_v52 }
 0x851   :  { %2711 = vmatpush1.bf16.msra.mxu0 %v13203_v53  ;;  %2752 = vmatpush1.bf16.msra.mxu1 %v13204_v54 }
 0x852   :  { %2712 = vmatprep.subr.bf16.mxu0 %v13205_v55  ;;  %2753 = vmatprep.subr.bf16.mxu1 %v13206_v3 }
 0x855   :  { %2713 = vmatpush1.bf16.msra.mxu0 %v13207_v1  ;;  %2754 = vmatpush1.bf16.msra.mxu1 %v13208_v60  ;;  %v13249_v1 = vld [vmem:[#allocation8_spill] sm:$0xff] }
 0x856   :  { %2714 = vmatprep.subr.bf16.mxu0 %v13209_v62  ;;  %2755 = vmatprep.subr.bf16.mxu1 %v13210_v5 }
 0x859   :  { %2715 = vmatpush1.bf16.msra.mxu0 %v13211_v7  ;;  %2756 = vmatpush1.bf16.msra.mxu1 %v13212_v10 }
 0x85a   :  { %2716 = vmatprep.subr.bf16.mxu0 %v13213_v13  ;;  %2757 = vmatprep.subr.bf16.mxu1 %v13214_v26 }
 0x85d   :  { %2717 = vmatpush1.bf16.msra.mxu0 %v13215_v34  ;;  %2758 = vmatpush1.bf16.msra.mxu1 %v13216_v63 }
 0x85e   :  { %2718 = vmatprep.subr.bf16.mxu0 %v13217_v29  ;;  %2759 = vmatprep.subr.bf16.mxu1 %v13218_v31 }
 0x861   :  { %2719 = vmatpush1.bf16.msra.mxu0 %v13219_v33  ;;  %2760 = vmatpush1.bf16.msra.mxu1 %v13220_v37  ;;  %v13250_v37 = vld [vmem:[#allocation67_spill] sm:$0xff] }
 0x862   :  { %2720 = vmatprep.subr.bf16.mxu0 %v13221_v40  ;;  %2761 = vmatprep.subr.bf16.mxu1 %v13222_v41 }
 0x865   :  { %2721 = vmatpush1.bf16.msra.mxu0 %v13223_v42  ;;  %2762 = vmatpush1.bf16.msra.mxu1 %v13224_v43 }
 0x866   :  { %2722 = vmatprep.subr.bf16.mxu0 %v13225_v44  ;;  %2763 = vmatprep.subr.bf16.mxu1 %v13226_v45 }
 0x869   :  { %2723 = vmatpush1.bf16.msra.mxu0 %v13227_v18  ;;  %2764 = vmatpush1.bf16.msra.mxu1 %v13228_v25 }
 0x86a   :  { %2724 = vmatprep.subr.bf16.mxu0 %v13229_v11  ;;  %2765 = vmatprep.subr.bf16.mxu1 %v13230_v4 }
 0x86d   :  { %2725 = vmatpush1.bf16.msra.mxu0 %v13231_v23  ;;  %2766 = vmatpush1.bf16.msra.mxu1 %v13232_v21 }
 0x86e   :  { %2726 = vmatprep.subr.bf16.mxu0 %v13233_v58  ;;  %2767 = vmatprep.subr.bf16.mxu1 %v13234_v14 }
 0x871   :  { %2727 = vmatpush1.bf16.msra.mxu0 %v13235_v61  ;;  %2768 = vmatpush1.bf16.msra.mxu1 %v13236_v20 }
 0x872   :  { %2728 = vmatprep.subr.bf16.mxu0 %v13237_v28  ;;  %2769 = vmatprep.subr.bf16.mxu1 %v13238_v59 }
 0x875   :  { %2729 = vmatpush1.bf16.msra.mxu0 %v13239_v38  ;;  %2770 = vmatpush1.bf16.msra.mxu1 %v13240_v32 }
 0x876   :  { %2730 = vmatprep.subr.bf16.mxu0 %v13241_v39  ;;  %2771 = vmatprep.subr.bf16.mxu1 %v13242_v27 }
 0x879   :  { %2731 = vmatpush1.bf16.msra.mxu0 %v13243_v36  ;;  %2772 = vmatpush1.bf16.msra.mxu1 %v13244_v56 }
 0x87a   :  { %2732 = vmatprep.subr.bf16.mxu0 %v13245_v57  ;;  %2773 = vmatprep.subr.bf16.mxu1 %v13246_v16 }
 0x87d   :  { %2733 = vmatpush1.bf16.msra.mxu0 %v13247_v6  ;;  %2774 = vmatpush1.bf16.msra.mxu1 %v13248_v15 }
 0x8f3   :  { %v2490_v12 = vpop.f32.mrb[52].mxu0  ;;  %v2531_v30 = vpop.f32.mrb[60].mxu1 }
 0x8f4   :  { %v2491_v24 = vadd.f32 %v2490_v12, %v12960_v47  ;;  %v2492_v2 = vpop.f32.mrb[53].mxu0  ;;  %v2533_v46 = vpop.f32.mrb[61].mxu1  ;;  %v2532_v3 = vadd.f32 %v2531_v30, %v13129_v35 }
 0x8f5   :  { %v2493_v48 = vadd.f32 %v2492_v2, %v12961_v51  ;;  %v2494_v49 = vpop.f32.mrb[54].mxu0  ;;  %v2535_v50 = vpop.f32.mrb[62].mxu1  ;;  %v2534_v60 = vadd.f32 %v2533_v46, %v13249_v1 }
 0x8f6   :  { %v5655_v52 = vmul.f32 -1.442695, %v2491_v24  ;;  %v2495_v53 = vpop.f32.mrb[55].mxu0  ;;  %v2536_v54 = vpop.f32.mrb[63].mxu1  ;;  %v5657_v62 = vmul.f32 -1.442695, %v2532_v3 }
 0x8f7   :  { %v5656_v55 = vmul.f32 -1.442695, %v2493_v48 }
 0x8f8   :  { %6436 = vpow2.f32 %v5655_v52 }
 0x8f9   :  { %6438 = vpow2.f32 %v5656_v55 }
 0x8fa   :  { %6440 = vtanh.f32 %v2534_v60 }
 0x8fb   :  { %6442 = vpow2.f32 %v5657_v62 }
 0x902   :  { %v6437_v5 = vpop.eup %6436 }
 0x903   :  { %v2547_v7 = vadd.f32 1.0, %v6437_v5  ;;  %v6439_v10 = vpop.eup %6438  ;;  %v6028_v5 = vld [vmem:[%s12169_s6] ss:$16 sps:$4 sm:$0xff]  }
 0x904   :  { %v2548_v13 = vadd.f32 1.0, %v6439_v10  ;;  %v6441_v26 = vpop.eup %6440  ;;  %v6033_v10 = vld [vmem:[%s12169_s6 + $0xc] ss:$16 sps:$4 sm:$0xff]  }
 0x905   :  { %6444 = vrcp.f32 %v2547_v7  ;;  %v6443_v34 = vpop.eup %6442  ;;  %v6031_v7 = vld [vmem:[%s12169_s6 + $0x8] ss:$16 sps:$4 sm:$0xff]   ;;  %3064 = vmatprep.subr.bf16.mxu1 %v6033_v10 }
 0x906   :  { %6446 = vrcp.f32 %v2548_v13  ;;  %v2549_v33 = vadd.f32 1.0, %v6443_v34  ;;  %v6036_v13 = vld [vmem:[%s12169_s6 + $0x24] ss:$16 sps:$4 sm:$0xff]   ;;  %v6034_v34 = vld [vmem:[%s12169_s6 + $0x20] ss:$16 sps:$4 sm:$0xff]  }
 0x907   :  { %v9724_v10 = vld [vmem:[%s12170_s7 + $0x8] ss:$16 sps:$4 sm:$0xff]  }
 0x908   :  { %6448 = vrcp.f32 %v2549_v33  ;;  %v6040_v33 = vld [vmem:[%s12169_s6 + $0x40] ss:$16 sps:$4 sm:$0xff]  }
 0x90f   :  { %v6445_v63 = vpop.eup %6444 }
 0x910   :  { %v2558_v29 = vmul.f32 %v6445_v63, %v6441_v26  ;;  %v6447_v31 = vpop.eup %6446  ;;  %v6039_v26 = vld [vmem:[%s12169_s6 + $0x2c] ss:$16 sps:$4 sm:$0xff]   ;;  %v6037_v63 = vld [vmem:[%s12169_s6 + $0x28] ss:$16 sps:$4 sm:$0xff]  }
 0x911   :  { %v2557_v40 = vmul.f32 %v6447_v31, %v13250_v37  ;;  %v6045_v31 = vld [vmem:[%s12169_s6 + $0x4c] ss:$16 sps:$4 sm:$0xff]   ;;  %v6043_v37 = vld [vmem:[%s12169_s6 + $0x48] ss:$16 sps:$4 sm:$0xff]  }
 0x912   :  { %v6449_v32 = vpop.eup %6448 }
 0x913   :  { %v2596_v41 = vpop.f32.mrb[56].mxu0  ;;  %v2637_v42 = vpop.f32.mrb[64].mxu1  ;;  %v9593_v43 = vadd.f32 %v2558_v29, %v2557_v40  ;;  %v6042_v29 = vld [vmem:[%s12169_s6 + $0x44] ss:$16 sps:$4 sm:$0xff]  }
 0x914   :  { %v2648_v44 = vrot.slane %v2596_v41, 1  ;;  %v2598_v45 = vpop.f32.mrb[57].mxu0  ;;  %v2639_v18 = vpop.f32.mrb[65].mxu1  ;;  %v2650_v28 = vrot.slane %v2637_v42, 1  ;;  %v6048_v40 = vld [vmem:[%s12169_s6 + $0x64] ss:$16 sps:$4 sm:$0xff]  }
 0x915   :  { %v2649_v25 = vrot.slane %v2598_v45, 1  ;;  %v2600_v11 = vpop.f32.mrb[58].mxu0  ;;  %v2641_v4 = vpop.f32.mrb[66].mxu1  ;;  %6450 = vtanh.f32 %v9593_v43  ;;  %v2651_v59 = vrot.slane %v2639_v18, 1  ;;  %v6051_v41 = vld [vmem:[%s12169_s6 + $0x6c] ss:$16 sps:$4 sm:$0xff]  }
 0x916   :  { %v2656_v23 = vadd.f32 %v2648_v44, %v12916_v17  ;;  %v2601_v21 = vpop.f32.mrb[59].mxu0  ;;  %v2642_v58 = vpop.f32.mrb[67].mxu1  ;;  %v2658_v38 = vadd.f32 %v2650_v28, %v7825_v8  ;;  %v6046_v42 = vld [vmem:[%s12169_s6 + $0x60] ss:$16 sps:$4 sm:$0xff]   ;;  %v6049_v44 = vld [vmem:[%s12169_s6 + $0x68] ss:$16 sps:$4 sm:$0xff]  }
 0x917   :  { %v2657_v14 = vadd.f32 %v2649_v25, %v12917_v22  ;;  %v2659_v27 = vadd.f32 %v2651_v59, %v7827_v0  ;;  %v2680_v0 = vrot.slane %v9489_v19, 7  ;;  %v6030_v19 = vld [vmem:[%s12169_s6 + $0x4] ss:$16 sps:$4 sm:$0xff]   ;;  %v6057_v18 = vld [vmem:[%s12169_s6 + $0x8c] ss:$16 sps:$4 sm:$0xff]  }
 0x918   :  { %v5658_v61 = vmul.f32 -1.442695, %v2656_v23  ;;  %v5660_v56 = vmul.f32 -1.442695, %v2658_v38  ;;  %3023 = vmatprep.subr.bf16.mxu0 %v6030_v19  ;;  %v6054_v45 = vld [vmem:[%s12169_s6 + $0x84] ss:$16 sps:$4 sm:$0xff]  }
 0x919   :  { %v5659_v20 = vmul.f32 -1.442695, %v2657_v14  ;;  %v6052_v25 = vld [vmem:[%s12169_s6 + $0x80] ss:$16 sps:$4 sm:$0xff]   ;;  %v6055_v11 = vld [vmem:[%s12169_s6 + $0x88] ss:$16 sps:$4 sm:$0xff]  }
 0x91a   :  { %6452 = vpow2.f32 %v5658_v61  ;;  %v6058_v4 = vld [vmem:[%s12169_s6 + $0xa0] ss:$16 sps:$4 sm:$0xff]   ;;  %v6060_v23 = vld [vmem:[%s12169_s6 + $0xa4] ss:$16 sps:$4 sm:$0xff]   ;;  %v6061_v21 = vld [vmem:[%s12169_s6 + $0xa8] ss:$16 sps:$4 sm:$0xff]  }
 0x91b   :  { %6454 = vpow2.f32 %v5659_v20  ;;  %v6063_v58 = vld [vmem:[%s12169_s6 + $0xac] ss:$16 sps:$4 sm:$0xff]   ;;  %v6066_v14 = vld [vmem:[%s12169_s6 + $0xc4] ss:$16 sps:$4 sm:$0xff]   ;;  %v6064_v20 = vld [vmem:[%s12169_s6 + $0xc0] ss:$16 sps:$4 sm:$0xff]  }
 0x91c   :  { %6456 = vtanh.f32 %v2659_v27  ;;  %v6069_v61 = vld [vmem:[%s12169_s6 + $0xcc] ss:$16 sps:$4 sm:$0xff]   ;;  %v6067_v28 = vld [vmem:[%s12169_s6 + $0xc8] ss:$16 sps:$4 sm:$0xff]   ;;  %v6072_v59 = vld [vmem:[%s12169_s6 + $0xe4] ss:$16 sps:$4 sm:$0xff]  }
 0x91d   :  { %6458 = vpow2.f32 %v5660_v56  ;;  %v6070_v38 = vld [vmem:[%s12169_s6 + $0xe0] ss:$16 sps:$4 sm:$0xff]   ;;  %v6073_v27 = vld [vmem:[%s12169_s6 + $0xe8] ss:$16 sps:$4 sm:$0xff]  }
 0x91f   :  { %v6451_v39 = vpop.eup %6450 }
 0x920   :  { %v2561_v36 = vmul.f32 %v6451_v39, %v6449_v32  ;;  %v6075_v32 = vld [vmem:[%s12169_s6 + $0xec] ss:$16 sps:$4 sm:$0xff]   ;;  %v9699_v39 = vld [vmem:[%s12170_s7 + $0x4] ss:$16 sps:$4 sm:$0xff]  }
 0x921   :  { %13251 = vst [vmem:[#allocation68_spill] sm:$0xff] %v9699_v39 }
 0x922   :  { %v2688_v57 = vrot.slane %v2561_v36, 1  ;;  %v9707_v36 = vld [vmem:[%s12170_s7 + $0xc] ss:$16 sps:$4 sm:$0xff]  }
 0x923   :  { %13252 = vst [vmem:[#allocation7_spill] sm:$0xff] %v9707_v36 }
 0x924   :  { %v6453_v17 = vpop.eup %6452  ;;  %v2691_v6 = vpack.c.bf16 %v2688_v57, %v2688_v57 }
 0x925   :  { %v2669_v16 = vadd.f32 1.0, %v6453_v17  ;;  %v6455_v22 = vpop.eup %6454 }
 0x926   :  { %v2670_v15 = vadd.f32 1.0, %v6455_v22  ;;  %v2697_v12 = vshrl.u32 %v2691_v6, 16  ;;  %v6457_v8 = vpop.eup %6456 }
 0x927   :  { %6460 = vrcp.f32 %v2669_v16  ;;  %v6459_v24 = vpop.eup %6458 }
 0x928   :  { %6462 = vrcp.f32 %v2670_v15  ;;  %v2699_v30 = vrot.slane %v2697_v12, 3  ;;  %v2671_v49 = vadd.f32 1.0, %v6459_v24 }
 0x92a   :  { %2734 = vmatprep.mubr.bf16.mxu0 %v2699_v30  ;;  %2775 = vmatprep.mubr.bf16.mxu1 %v2699_v30  ;;  %6464 = vrcp.f32 %v2671_v49 }
 0x931   :  { %v6461_v2 = vpop.eup %6460 }
 0x932   :  { %v2683_v46 = vmul.f32 %v6461_v2, %v6457_v8  ;;  %v6463_v48 = vpop.eup %6462 }
 0x933   :  { %v2682_v50 = vmul.f32 %v6463_v48, %v2680_v0 }
 0x934   :  { %v6465_v53 = vpop.eup %6464 }
 0x935   :  { %v2684_v52 = vadd.f32 %v2683_v46, %v2682_v50 }
 0x937   :  { %6466 = vtanh.f32 %v2684_v52 }
 0x941   :  { %v6467_v54 = vpop.eup %6466 }
 0x942   :  { %v2686_v55 = vmul.f32 %v6467_v54, %v6465_v53 }
 0x944   :  { %v2690_v3 = vpack.c.bf16 %v2686_v55, %v2686_v55 }
 0x946   :  { %v2693_v60 = vshrl.u32 %v2690_v3, 16 }
 0x948   :  { %v2695_v62 = vrot.slane %v2693_v60, 3 }
 0x94a   :  { %2735 = vmatmul.mubr.bf16.vlgmr.msra.gmra.mrb[60].mxu0 %v2695_v62  ;;  %2776 = vmatmul.mubr.bf16.vlgmr.msra.gmra.mrb[68].mxu1 %v2695_v62 }
 0x94b   :  { %3055 = vmatprep.mubr.bf16.mxu0 %v12855_v9  ;;  %3096 = vmatprep.mubr.bf16.mxu1 %v12855_v9 }
 0x94c   :  { %3024 = vmatpush1.bf16.msra.mxu0 %v6028_v5  ;;  %3065 = vmatpush1.bf16.msra.mxu1 %v6031_v7  ;;  %v9719_v7 = vld [vmem:[%s12170_s7] ss:$16 sps:$4 sm:$0xff]  }
 0x94d   :  { %3025 = vmatprep.subr.bf16.mxu0 %v6036_v13  ;;  %3066 = vmatprep.subr.bf16.mxu1 %v6039_v26  ;;  %v9734_v26 = vld [vmem:[%s12170_s7 + $0x2c] ss:$16 sps:$4 sm:$0xff]  }
 0x950   :  { %3026 = vmatpush1.bf16.msra.mxu0 %v6034_v34  ;;  %3067 = vmatpush1.bf16.msra.mxu1 %v6037_v63  ;;  %v9741_v34 = vld [vmem:[%s12170_s7 + $0x20] ss:$16 sps:$4 sm:$0xff]   ;;  %v9746_v63 = vld [vmem:[%s12170_s7 + $0x28] ss:$16 sps:$4 sm:$0xff]  }
 0x951   :  { %3027 = vmatprep.subr.bf16.mxu0 %v6042_v29  ;;  %3068 = vmatprep.subr.bf16.mxu1 %v6045_v31  ;;  %v9753_v29 = vld [vmem:[%s12170_s7 + $0x44] ss:$16 sps:$4 sm:$0xff]   ;;  %v9758_v31 = vld [vmem:[%s12170_s7 + $0x4c] ss:$16 sps:$4 sm:$0xff]  }
 0x954   :  { %3028 = vmatpush1.bf16.msra.mxu0 %v6040_v33  ;;  %3069 = vmatpush1.bf16.msra.mxu1 %v6043_v37  ;;  %v9767_v33 = vld [vmem:[%s12170_s7 + $0x40] ss:$16 sps:$4 sm:$0xff]   ;;  %v9772_v37 = vld [vmem:[%s12170_s7 + $0x48] ss:$16 sps:$4 sm:$0xff]  }
 0x955   :  { %3029 = vmatprep.subr.bf16.mxu0 %v6048_v40  ;;  %3070 = vmatprep.subr.bf16.mxu1 %v6051_v41  ;;  %v9779_v40 = vld [vmem:[%s12170_s7 + $0x64] ss:$16 sps:$4 sm:$0xff]   ;;  %v9784_v41 = vld [vmem:[%s12170_s7 + $0x6c] ss:$16 sps:$4 sm:$0xff]  }
 0x958   :  { %3030 = vmatpush1.bf16.msra.mxu0 %v6046_v42  ;;  %3071 = vmatpush1.bf16.msra.mxu1 %v6049_v44  ;;  %v9791_v42 = vld [vmem:[%s12170_s7 + $0x60] ss:$16 sps:$4 sm:$0xff]   ;;  %v9796_v44 = vld [vmem:[%s12170_s7 + $0x68] ss:$16 sps:$4 sm:$0xff]  }
 0x959   :  { %3031 = vmatprep.subr.bf16.mxu0 %v6054_v45  ;;  %3072 = vmatprep.subr.bf16.mxu1 %v6057_v18  ;;  %v9803_v45 = vld [vmem:[%s12170_s7 + $0x84] ss:$16 sps:$4 sm:$0xff]   ;;  %v9808_v18 = vld [vmem:[%s12170_s7 + $0x8c] ss:$16 sps:$4 sm:$0xff]  }
 0x95c   :  { %3032 = vmatpush1.bf16.msra.mxu0 %v6052_v25  ;;  %3073 = vmatpush1.bf16.msra.mxu1 %v6055_v11  ;;  %v9815_v25 = vld [vmem:[%s12170_s7 + $0x80] ss:$16 sps:$4 sm:$0xff]   ;;  %v9820_v11 = vld [vmem:[%s12170_s7 + $0x88] ss:$16 sps:$4 sm:$0xff]  }
 0x95d   :  { %3033 = vmatprep.subr.bf16.mxu0 %v6060_v23  ;;  %3074 = vmatprep.subr.bf16.mxu1 %v6063_v58  ;;  %v9832_v23 = vld [vmem:[%s12170_s7 + $0xac] ss:$16 sps:$4 sm:$0xff]   ;;  %v9844_v58 = vld [vmem:[%s12170_s7 + $0xa8] ss:$16 sps:$4 sm:$0xff]  }
 0x960   :  { %3034 = vmatpush1.bf16.msra.mxu0 %v6058_v4  ;;  %3075 = vmatpush1.bf16.msra.mxu1 %v6061_v21  ;;  %v9827_v4 = vld [vmem:[%s12170_s7 + $0xa4] ss:$16 sps:$4 sm:$0xff]   ;;  %v9839_v21 = vld [vmem:[%s12170_s7 + $0xa0] ss:$16 sps:$4 sm:$0xff]  }
 0x961   :  { %3035 = vmatprep.subr.bf16.mxu0 %v6066_v14  ;;  %3076 = vmatprep.subr.bf16.mxu1 %v6069_v61  ;;  %v9851_v14 = vld [vmem:[%s12170_s7 + $0xc4] ss:$16 sps:$4 sm:$0xff]   ;;  %v9856_v61 = vld [vmem:[%s12170_s7 + $0xcc] ss:$16 sps:$4 sm:$0xff]  }
 0x964   :  { %3036 = vmatpush1.bf16.msra.mxu0 %v6064_v20  ;;  %3077 = vmatpush1.bf16.msra.mxu1 %v6067_v28  ;;  %v9863_v20 = vld [vmem:[%s12170_s7 + $0xc0] ss:$16 sps:$4 sm:$0xff]   ;;  %v9868_v28 = vld [vmem:[%s12170_s7 + $0xc8] ss:$16 sps:$4 sm:$0xff]  }
 0x965   :  { %3037 = vmatprep.subr.bf16.mxu0 %v6072_v59  ;;  %3078 = vmatprep.subr.bf16.mxu1 %v6075_v32  ;;  %v9875_v59 = vld [vmem:[%s12170_s7 + $0xe4] ss:$16 sps:$4 sm:$0xff]   ;;  %v9887_v32 = vld [vmem:[%s12170_s7 + $0xe0] ss:$16 sps:$4 sm:$0xff]  }
 0x968   :  { %3038 = vmatpush1.bf16.msra.mxu0 %v6070_v38  ;;  %3079 = vmatpush1.bf16.msra.mxu1 %v6073_v27  ;;  %v9880_v38 = vld [vmem:[%s12170_s7 + $0xec] ss:$16 sps:$4 sm:$0xff]   ;;  %v9892_v27 = vld [vmem:[%s12170_s7 + $0xe8] ss:$16 sps:$4 sm:$0xff]  }
 0x969   :  { %3267 = vmatprep.subr.bf16.mxu0 %v9699_v39  ;;  %3308 = vmatprep.subr.bf16.mxu1 %v9707_v36 }
 0xa1d   :  { %v2736_v56 = vpop.f32.mrb[60].mxu0  ;;  %v2777_v57 = vpop.f32.mrb[68].mxu1 }
 0xa1e   :  { %v2737_v17 = vadd.f32 %v2736_v56, %v12960_v47  ;;  %v2738_v16 = vpop.f32.mrb[61].mxu0  ;;  %v2779_v6 = vpop.f32.mrb[69].mxu1  ;;  %v2778_v0 = vadd.f32 %v2777_v57, %v13129_v35  ;;  %v13253_v56 = vmov 0.0|0.0   ;;  %v9905_v57 = vld [vmem:[%s12171_s9 + $0x4] ss:$16 sps:$4 sm:$0xff]  }
 0xa1f   :  { %v2739_v22 = vadd.f32 %v2738_v16, %v12961_v51  ;;  %v2740_v15 = vpop.f32.mrb[62].mxu0  ;;  %v2781_v12 = vpop.f32.mrb[70].mxu1  ;;  %v2780_v46 = vadd.f32 %v2779_v6, %v13249_v1  ;;  %v9916_v16 = vld [vmem:[%s12171_s9] ss:$16 sps:$4 sm:$0xff]   ;;  %v9921_v6 = vld [vmem:[%s12171_s9 + $0x8] ss:$16 sps:$4 sm:$0xff]  }
 0xa20   :  { %v5661_v30 = vmul.f32 -1.442695, %v2737_v17  ;;  %v2741_v8 = vpop.f32.mrb[63].mxu0  ;;  %v2782_v24 = vpop.f32.mrb[71].mxu1  ;;  %v5663_v48 = vmul.f32 -1.442695, %v2778_v0 }
 0xa21   :  { %v5662_v2 = vmul.f32 -1.442695, %v2739_v22  ;;  %v9910_v17 = vld [vmem:[%s12171_s9 + $0xc] ss:$16 sps:$4 sm:$0xff]   ;;  %v9927_v22 = vld [vmem:[%s12171_s9 + $0x24] ss:$16 sps:$4 sm:$0xff]  }
 0xa22   :  { %6468 = vpow2.f32 %v5661_v30  ;;  %v9934_v15 = vld [vmem:[%s12171_s9 + $0x2c] ss:$16 sps:$4 sm:$0xff]   ;;  %v9939_v12 = vld [vmem:[%s12171_s9 + $0x20] ss:$16 sps:$4 sm:$0xff]   ;;  %v9945_v30 = vld [vmem:[%s12171_s9 + $0x28] ss:$16 sps:$4 sm:$0xff]  }
 0xa23   :  { %6470 = vpow2.f32 %v5662_v2  ;;  %v9951_v8 = vld [vmem:[%s12171_s9 + $0x44] ss:$16 sps:$4 sm:$0xff]   ;;  %v9956_v24 = vld [vmem:[%s12171_s9 + $0x4c] ss:$16 sps:$4 sm:$0xff]   ;;  %v9961_v2 = vld [vmem:[%s12171_s9 + $0x40] ss:$16 sps:$4 sm:$0xff]  }
 0xa24   :  { %6472 = vtanh.f32 %v2780_v46  ;;  %13254 = vst [vmem:[#allocation12_spill] sm:$0xff] %v9956_v24  ;;  %13255 = vst [vmem:[#allocation13_spill] sm:$0xff] %v9961_v2  ;;  %v9966_v0 = vld [vmem:[%s12171_s9 + $0x48] ss:$16 sps:$4 sm:$0xff]   ;;  %v9973_v46 = vld [vmem:[%s12171_s9 + $0x64] ss:$16 sps:$4 sm:$0xff]  }
 0xa25   :  { %6474 = vpow2.f32 %v5663_v48  ;;  %13256 = vst [vmem:[#allocation14_spill] sm:$0xff] %v9966_v0  ;;  %13257 = vst [vmem:[#allocation2_spill] sm:$0xff] %v9973_v46  ;;  %v9980_v48 = vld [vmem:[%s12171_s9 + $0x6c] ss:$16 sps:$4 sm:$0xff]  }
 0xa26   :  { %13258 = vst [vmem:[#allocation4_spill] sm:$0xff] %v9980_v48 }
 0xa2c   :  { %v6469_v49 = vpop.eup %6468 }
 0xa2d   :  { %v2793_v50 = vadd.f32 1.0, %v6469_v49  ;;  %v6471_v47 = vpop.eup %6470  ;;  %v9985_v49 = vld [vmem:[%s12171_s9 + $0x60] ss:$16 sps:$4 sm:$0xff]  }
 0xa2e   :  { %v2794_v51 = vadd.f32 1.0, %v6471_v47  ;;  %v6473_v52 = vpop.eup %6472  ;;  %13259 = vst [vmem:[#allocation57_spill] sm:$0xff] %v9985_v49  ;;  %v10001_v47 = vld [vmem:[%s12171_s9 + $0x84] ss:$16 sps:$4 sm:$0xff]  }
 0xa2f   :  { %6476 = vrcp.f32 %v2793_v50  ;;  %v6475_v53 = vpop.eup %6474  ;;  %v9990_v50 = vld [vmem:[%s12171_s9 + $0x68] ss:$16 sps:$4 sm:$0xff]   ;;  %13261 = vst [vmem:[#allocation15_spill] sm:$0xff] %v10001_v47 }
 0xa30   :  { %6478 = vrcp.f32 %v2794_v51  ;;  %v2795_v60 = vadd.f32 1.0, %v6475_v53  ;;  %13260 = vst [vmem:[#allocation58_spill] sm:$0xff] %v9990_v50  ;;  %v10006_v51 = vld [vmem:[%s12171_s9 + $0x8c] ss:$16 sps:$4 sm:$0xff]   ;;  %v10016_v53 = vld [vmem:[%s12171_s9 + $0x88] ss:$16 sps:$4 sm:$0xff]  }
 0xa31   :  { %13262 = vst [vmem:[#allocation16_spill] sm:$0xff] %v10006_v51  ;;  %13264 = vst [vmem:[#allocation18_spill] sm:$0xff] %v10016_v53 }
 0xa32   :  { %6480 = vrcp.f32 %v2795_v60  ;;  %v10040_v60 = vld [vmem:[%s12171_s9 + $0xa8] ss:$16 sps:$4 sm:$0xff]  }
 0xa33   :  { %13268 = vst [vmem:[#allocation22_spill] sm:$0xff] %v10040_v60 }
 0xa39   :  { %v6477_v54 = vpop.eup %6476 }
 0xa3a   :  { %v2804_v55 = vmul.f32 %v6477_v54, %v6473_v52  ;;  %v6479_v3 = vpop.eup %6478  ;;  %v10011_v52 = vld [vmem:[%s12171_s9 + $0x80] ss:$16 sps:$4 sm:$0xff]   ;;  %v10025_v54 = vld [vmem:[%s12171_s9 + $0xa4] ss:$16 sps:$4 sm:$0xff]  }
 0xa3b   :  { %v2803_v62 = vmul.f32 %v6479_v3, %v9593_v43  ;;  %v9729_v43 = vld [vmem:[%s12170_s7 + $0x24] ss:$16 sps:$4 sm:$0xff]   ;;  %13263 = vst [vmem:[#allocation17_spill] sm:$0xff] %v10011_v52  ;;  %13265 = vst [vmem:[#allocation19_spill] sm:$0xff] %v10025_v54  ;;  %v10035_v3 = vld [vmem:[%s12171_s9 + $0xa0] ss:$16 sps:$4 sm:$0xff]  }
 0xa3c   :  { %v6481_v1 = vpop.eup %6480  ;;  %13267 = vst [vmem:[#allocation21_spill] sm:$0xff] %v10035_v3 }
 0xa3d   :  { %v2805_v35 = vadd.f32 %v2804_v55, %v2803_v62  ;;  %v10030_v55 = vld [vmem:[%s12171_s9 + $0xac] ss:$16 sps:$4 sm:$0xff]   ;;  %v10049_v62 = vld [vmem:[%s12171_s9 + $0xc4] ss:$16 sps:$4 sm:$0xff]  }
 0xa3e   :  { %13266 = vst [vmem:[#allocation20_spill] sm:$0xff] %v10030_v55  ;;  %13269 = vst [vmem:[#allocation23_spill] sm:$0xff] %v10049_v62 }
 0xa3f   :  { %6482 = vtanh.f32 %v2805_v35  ;;  %v10054_v35 = vld [vmem:[%s12171_s9 + $0xcc] ss:$16 sps:$4 sm:$0xff]  }
 0xa40   :  { %13270 = vst [vmem:[#allocation10_spill] sm:$0xff] %v10054_v35 }
 0xa49   :  { %v6483_v19 = vpop.eup %6482 }
 0xa4a   :  { %v2807_v5 = vmul.f32 %v6483_v19, %v6481_v1  ;;  %v10059_v1 = vld [vmem:[%s12171_s9 + $0xc0] ss:$16 sps:$4 sm:$0xff]   ;;  %v10064_v19 = vld [vmem:[%s12171_s9 + $0xc8] ss:$16 sps:$4 sm:$0xff]  }
 0xa4b   :  { %13271 = vst [vmem:[#allocation11_spill] sm:$0xff] %v10059_v1  ;;  %13272 = vst [vmem:[#allocation69_spill] sm:$0xff] %v10064_v19 }
 0xa4c   :  { %v2808_v13 = vpack.c.bf16 %v2807_v5, %v2807_v5  ;;  %v10073_v5 = vld [vmem:[%s12171_s9 + $0xe4] ss:$16 sps:$4 sm:$0xff]  }
 0xa4d   :  { %13273 = vst [vmem:[#allocation24_spill] sm:$0xff] %v10073_v5 }
 0xa4e   :  { %3056 = vmatmul.mubr.bf16.vlgmr.msra.gmra.mrb[64].mxu0 %v2808_v13  ;;  %3097 = vmatmul.mubr.bf16.vlgmr.msra.gmra.mrb[72].mxu1 %v2808_v13  ;;  %v10078_v13 = vld [vmem:[%s12171_s9 + $0xec] ss:$16 sps:$4 sm:$0xff]  }
 0xa4f   :  { %3268 = vmatpush1.bf16.msra.mxu0 %v9719_v7  ;;  %3309 = vmatpush1.bf16.msra.mxu1 %v9724_v10  ;;  %13274 = vst [vmem:[#allocation25_spill] sm:$0xff] %v10078_v13 }
 0xa50   :  { %3269 = vmatprep.subr.bf16.mxu0 %v9729_v43  ;;  %3310 = vmatprep.subr.bf16.mxu1 %v9734_v26 }
 0xa51   :  { %3299 = vmatprep.mubr.bf16.mxu0 %v12855_v9  ;;  %3340 = vmatprep.mubr.bf16.mxu1 %v12855_v9 }
 0xa53   :  { %3270 = vmatpush1.bf16.msra.mxu0 %v9741_v34  ;;  %3311 = vmatpush1.bf16.msra.mxu1 %v9746_v63 }
 0xa54   :  { %3271 = vmatprep.subr.bf16.mxu0 %v9753_v29  ;;  %3312 = vmatprep.subr.bf16.mxu1 %v9758_v31 }
 0xa57   :  { %3272 = vmatpush1.bf16.msra.mxu0 %v9767_v33  ;;  %3313 = vmatpush1.bf16.msra.mxu1 %v9772_v37 }
 0xa58   :  { %3273 = vmatprep.subr.bf16.mxu0 %v9779_v40  ;;  %3314 = vmatprep.subr.bf16.mxu1 %v9784_v41 }
 0xa5b   :  { %3274 = vmatpush1.bf16.msra.mxu0 %v9791_v42  ;;  %3315 = vmatpush1.bf16.msra.mxu1 %v9796_v44 }
 0xa5c   :  { %3275 = vmatprep.subr.bf16.mxu0 %v9803_v45  ;;  %3316 = vmatprep.subr.bf16.mxu1 %v9808_v18 }
 0xa5f   :  { %3276 = vmatpush1.bf16.msra.mxu0 %v9815_v25  ;;  %3317 = vmatpush1.bf16.msra.mxu1 %v9820_v11 }
 0xa60   :  { %3277 = vmatprep.subr.bf16.mxu0 %v9827_v4  ;;  %3318 = vmatprep.subr.bf16.mxu1 %v9832_v23 }
 0xa63   :  { %3278 = vmatpush1.bf16.msra.mxu0 %v9839_v21  ;;  %3319 = vmatpush1.bf16.msra.mxu1 %v9844_v58 }
 0xa64   :  { %3279 = vmatprep.subr.bf16.mxu0 %v9851_v14  ;;  %3320 = vmatprep.subr.bf16.mxu1 %v9856_v61 }
 0xa67   :  { %3280 = vmatpush1.bf16.msra.mxu0 %v9863_v20  ;;  %3321 = vmatpush1.bf16.msra.mxu1 %v9868_v28 }
 0xa68   :  { %3281 = vmatprep.subr.bf16.mxu0 %v9875_v59  ;;  %3322 = vmatprep.subr.bf16.mxu1 %v9880_v38 }
 0xa6b   :  { %3282 = vmatpush1.bf16.msra.mxu0 %v9887_v32  ;;  %3323 = vmatpush1.bf16.msra.mxu1 %v9892_v27 }
 0xa6c   :  { %3719 = vmatprep.subr.bf16.mxu0 %v9905_v57  ;;  %3760 = vmatprep.subr.bf16.mxu1 %v9910_v17 }
 0xa6e   :  { %3300 = vmatmul.mubr.bf16.vlgmr.msra.gmra.mrb[68].mxu0 %v12855_v9  ;;  %3341 = vmatmul.mubr.bf16.vlgmr.msra.gmra.mrb[76].mxu1 %v12855_v9 }
 0xa6f   :  { %3751 = vmatprep.mubr.bf16.mxu0 %v13253_v56  ;;  %3792 = vmatprep.mubr.bf16.mxu1 %v13253_v56  ;;  %v10083_v56 = vld [vmem:[%s12171_s9 + $0xe0] ss:$16 sps:$4 sm:$0xff]  }
 0xa70   :  { %3720 = vmatpush1.bf16.msra.mxu0 %v9916_v16  ;;  %3761 = vmatpush1.bf16.msra.mxu1 %v9921_v6  ;;  %13275 = vst [vmem:[#allocation26_spill] sm:$0xff] %v10083_v56 }
 0xa71   :  { %3721 = vmatprep.subr.bf16.mxu0 %v9927_v22  ;;  %3762 = vmatprep.subr.bf16.mxu1 %v9934_v15 }
 0xa74   :  { %3722 = vmatpush1.bf16.msra.mxu0 %v9939_v12  ;;  %3763 = vmatpush1.bf16.msra.mxu1 %v9945_v30 }
 0xa75   :  { %3723 = vmatprep.subr.bf16.mxu0 %v9951_v8  ;;  %3764 = vmatprep.subr.bf16.mxu1 %v9956_v24 }
 0xa78   :  { %3724 = vmatpush1.bf16.msra.mxu0 %v9961_v2  ;;  %3765 = vmatpush1.bf16.msra.mxu1 %v9966_v0 }
 0xa79   :  { %3725 = vmatprep.subr.bf16.mxu0 %v9973_v46  ;;  %3766 = vmatprep.subr.bf16.mxu1 %v9980_v48  ;;  %v13313_v48 = vld [vmem:[#allocation59_spill] sm:$0xff] }
 0xa7c   :  { %3726 = vmatpush1.bf16.msra.mxu0 %v9985_v49  ;;  %3767 = vmatpush1.bf16.msra.mxu1 %v9990_v50 }
 0xa7d   :  { %3727 = vmatprep.subr.bf16.mxu0 %v10001_v47  ;;  %3768 = vmatprep.subr.bf16.mxu1 %v10006_v51 }
 0xa80   :  { %3728 = vmatpush1.bf16.msra.mxu0 %v10011_v52  ;;  %3769 = vmatpush1.bf16.msra.mxu1 %v10016_v53  ;;  %v13310_v52 = vld [vmem:[#allocation56_spill] sm:$0xff] }
 0xa81   :  { %3729 = vmatprep.subr.bf16.mxu0 %v10025_v54  ;;  %3770 = vmatprep.subr.bf16.mxu1 %v10030_v55 }
 0xa84   :  { %3730 = vmatpush1.bf16.msra.mxu0 %v10035_v3  ;;  %3771 = vmatpush1.bf16.msra.mxu1 %v10040_v60  ;;  %v10256_v60 = vld [vmem:[%s12171_s9 + $0x1c8] ss:$16 sps:$4 sm:$0xff]  }
 0xa85   :  { %3731 = vmatprep.subr.bf16.mxu0 %v10049_v62  ;;  %3772 = vmatprep.subr.bf16.mxu1 %v10054_v35  ;;  %v10102_v35 = vld [vmem:[%s12171_s9 + $0x10c] ss:$16 sps:$4 sm:$0xff]   ;;  %v10251_v62 = vld [vmem:[%s12171_s9 + $0x1c0] ss:$16 sps:$4 sm:$0xff]   ;;  %13304 = vst [vmem:[#allocation5_spill] sm:$0xff] %v10256_v60 }
 0xa86   :  { %13278 = vst [vmem:[#allocation29_spill] sm:$0xff] %v10102_v35  ;;  %13303 = vst [vmem:[#allocation54_spill] sm:$0xff] %v10251_v62 }
 0xa88   :  { %3732 = vmatpush1.bf16.msra.mxu0 %v10059_v1  ;;  %3773 = vmatpush1.bf16.msra.mxu1 %v10064_v19  ;;  %v10088_v1 = vld [vmem:[%s12171_s9 + $0xe8] ss:$16 sps:$4 sm:$0xff]   ;;  %v10097_v19 = vld [vmem:[%s12171_s9 + $0x104] ss:$16 sps:$4 sm:$0xff]  }
 0xa89   :  { %13276 = vst [vmem:[#allocation27_spill] sm:$0xff] %v10088_v1  ;;  %3733 = vmatprep.subr.bf16.mxu0 %v10073_v5  ;;  %3774 = vmatprep.subr.bf16.mxu1 %v10078_v13  ;;  %13277 = vst [vmem:[#allocation28_spill] sm:$0xff] %v10097_v19  ;;  %v10107_v5 = vld [vmem:[%s12171_s9 + $0x100] ss:$16 sps:$4 sm:$0xff]   ;;  %v10126_v13 = vld [vmem:[%s12171_s9 + $0x12c] ss:$16 sps:$4 sm:$0xff]  }
 0xa8a   :  { %13279 = vst [vmem:[#allocation30_spill] sm:$0xff] %v10107_v5  ;;  %13282 = vst [vmem:[#allocation33_spill] sm:$0xff] %v10126_v13 }
 0xa8c   :  { %3734 = vmatpush1.bf16.msra.mxu0 %v10083_v56  ;;  %3775 = vmatpush1.bf16.msra.mxu1 %v10088_v1  ;;  %v10112_v56 = vld [vmem:[%s12171_s9 + $0x108] ss:$16 sps:$4 sm:$0xff]   ;;  %v10121_v1 = vld [vmem:[%s12171_s9 + $0x124] ss:$16 sps:$4 sm:$0xff]  }
 0xa8d   :  { %13280 = vst [vmem:[#allocation31_spill] sm:$0xff] %v10112_v56  ;;  %3735 = vmatprep.subr.bf16.mxu0 %v10097_v19  ;;  %3776 = vmatprep.subr.bf16.mxu1 %v10102_v35  ;;  %13281 = vst [vmem:[#allocation32_spill] sm:$0xff] %v10121_v1  ;;  %v10131_v19 = vld [vmem:[%s12171_s9 + $0x120] ss:$16 sps:$4 sm:$0xff]   ;;  %v10150_v35 = vld [vmem:[%s12171_s9 + $0x14c] ss:$16 sps:$4 sm:$0xff]  }
 0xa8e   :  { %13283 = vst [vmem:[#allocation34_spill] sm:$0xff] %v10131_v19  ;;  %13286 = vst [vmem:[#allocation37_spill] sm:$0xff] %v10150_v35 }
 0xa90   :  { %3736 = vmatpush1.bf16.msra.mxu0 %v10107_v5  ;;  %3777 = vmatpush1.bf16.msra.mxu1 %v10112_v56  ;;  %v10136_v5 = vld [vmem:[%s12171_s9 + $0x128] ss:$16 sps:$4 sm:$0xff]   ;;  %v10145_v56 = vld [vmem:[%s12171_s9 + $0x144] ss:$16 sps:$4 sm:$0xff]  }
 0xa91   :  { %13284 = vst [vmem:[#allocation35_spill] sm:$0xff] %v10136_v5  ;;  %3737 = vmatprep.subr.bf16.mxu0 %v10121_v1  ;;  %3778 = vmatprep.subr.bf16.mxu1 %v10126_v13  ;;  %13285 = vst [vmem:[#allocation36_spill] sm:$0xff] %v10145_v56  ;;  %v10155_v1 = vld [vmem:[%s12171_s9 + $0x140] ss:$16 sps:$4 sm:$0xff]   ;;  %v10174_v13 = vld [vmem:[%s12171_s9 + $0x16c] ss:$16 sps:$4 sm:$0xff]  }
 0xa92   :  { %13287 = vst [vmem:[#allocation38_spill] sm:$0xff] %v10155_v1  ;;  %13290 = vst [vmem:[#allocation41_spill] sm:$0xff] %v10174_v13 }
 0xa94   :  { %3738 = vmatpush1.bf16.msra.mxu0 %v10131_v19  ;;  %3779 = vmatpush1.bf16.msra.mxu1 %v10136_v5  ;;  %v10160_v19 = vld [vmem:[%s12171_s9 + $0x148] ss:$16 sps:$4 sm:$0xff]   ;;  %v10169_v5 = vld [vmem:[%s12171_s9 + $0x164] ss:$16 sps:$4 sm:$0xff]  }
 0xa95   :  { %13288 = vst [vmem:[#allocation39_spill] sm:$0xff] %v10160_v19  ;;  %3739 = vmatprep.subr.bf16.mxu0 %v10145_v56  ;;  %3780 = vmatprep.subr.bf16.mxu1 %v10150_v35  ;;  %13289 = vst [vmem:[#allocation40_spill] sm:$0xff] %v10169_v5  ;;  %v10179_v56 = vld [vmem:[%s12171_s9 + $0x160] ss:$16 sps:$4 sm:$0xff]   ;;  %v10198_v35 = vld [vmem:[%s12171_s9 + $0x18c] ss:$16 sps:$4 sm:$0xff]  }
 0xa96   :  { %13291 = vst [vmem:[#allocation42_spill] sm:$0xff] %v10179_v56  ;;  %13294 = vst [vmem:[#allocation45_spill] sm:$0xff] %v10198_v35 }
 0xa98   :  { %3740 = vmatpush1.bf16.msra.mxu0 %v10155_v1  ;;  %3781 = vmatpush1.bf16.msra.mxu1 %v10160_v19  ;;  %v10184_v1 = vld [vmem:[%s12171_s9 + $0x168] ss:$16 sps:$4 sm:$0xff]   ;;  %v10193_v19 = vld [vmem:[%s12171_s9 + $0x184] ss:$16 sps:$4 sm:$0xff]  }
 0xa99   :  { %13292 = vst [vmem:[#allocation43_spill] sm:$0xff] %v10184_v1  ;;  %3741 = vmatprep.subr.bf16.mxu0 %v10169_v5  ;;  %3782 = vmatprep.subr.bf16.mxu1 %v10174_v13  ;;  %13293 = vst [vmem:[#allocation44_spill] sm:$0xff] %v10193_v19  ;;  %v10203_v5 = vld [vmem:[%s12171_s9 + $0x180] ss:$16 sps:$4 sm:$0xff]   ;;  %v10222_v13 = vld [vmem:[%s12171_s9 + $0x1ac] ss:$16 sps:$4 sm:$0xff]  }
 0xa9a   :  { %13295 = vst [vmem:[#allocation46_spill] sm:$0xff] %v10203_v5  ;;  %13298 = vst [vmem:[#allocation49_spill] sm:$0xff] %v10222_v13 }
 0xa9c   :  { %3742 = vmatpush1.bf16.msra.mxu0 %v10179_v56  ;;  %3783 = vmatpush1.bf16.msra.mxu1 %v10184_v1  ;;  %v10208_v56 = vld [vmem:[%s12171_s9 + $0x188] ss:$16 sps:$4 sm:$0xff]   ;;  %v10217_v1 = vld [vmem:[%s12171_s9 + $0x1a4] ss:$16 sps:$4 sm:$0xff]  }
 0xa9d   :  { %13296 = vst [vmem:[#allocation47_spill] sm:$0xff] %v10208_v56  ;;  %3743 = vmatprep.subr.bf16.mxu0 %v10193_v19  ;;  %3784 = vmatprep.subr.bf16.mxu1 %v10198_v35  ;;  %13297 = vst [vmem:[#allocation48_spill] sm:$0xff] %v10217_v1  ;;  %v10227_v19 = vld [vmem:[%s12171_s9 + $0x1a0] ss:$16 sps:$4 sm:$0xff]   ;;  %v10242_v35 = vld [vmem:[%s12171_s9 + $0x1cc] ss:$16 sps:$4 sm:$0xff]  }
 0xa9e   :  { %13299 = vst [vmem:[#allocation50_spill] sm:$0xff] %v10227_v19  ;;  %13302 = vst [vmem:[#allocation53_spill] sm:$0xff] %v10242_v35 }
 0xaa0   :  { %3744 = vmatpush1.bf16.msra.mxu0 %v10203_v5  ;;  %3785 = vmatpush1.bf16.msra.mxu1 %v10208_v56  ;;  %v10232_v5 = vld [vmem:[%s12171_s9 + $0x1a8] ss:$16 sps:$4 sm:$0xff]   ;;  %v10237_v56 = vld [vmem:[%s12171_s9 + $0x1c4] ss:$16 sps:$4 sm:$0xff]  }
 0xaa1   :  { %13300 = vst [vmem:[#allocation51_spill] sm:$0xff] %v10232_v5  ;;  %13301 = vst [vmem:[#allocation52_spill] sm:$0xff] %v10237_v56  ;;  %3745 = vmatprep.subr.bf16.mxu0 %v10217_v1  ;;  %3786 = vmatprep.subr.bf16.mxu1 %v10222_v13 }
 0xaa4   :  { %3746 = vmatpush1.bf16.msra.mxu0 %v10227_v19  ;;  %3787 = vmatpush1.bf16.msra.mxu1 %v10232_v5  ;;  %v10263_v19 = vld [vmem:[%s12171_s9 + $0x1e4] ss:$16 sps:$4 sm:$0xff]   ;;  %v10268_v5 = vld [vmem:[%s12171_s9 + $0x1ec] ss:$16 sps:$4 sm:$0xff]  }
 0xaa5   :  { %3747 = vmatprep.subr.bf16.mxu0 %v10237_v56  ;;  %3788 = vmatprep.subr.bf16.mxu1 %v10242_v35  ;;  %13305 = vst [vmem:[#allocation6_spill] sm:$0xff] %v10263_v19  ;;  %13306 = vst [vmem:[#allocation9_spill] sm:$0xff] %v10268_v5  ;;  %v10275_v56 = vld [vmem:[%s12171_s9 + $0x1e0] ss:$16 sps:$4 sm:$0xff]   ;;  %v10280_v35 = vld [vmem:[%s12171_s9 + $0x1e8] ss:$16 sps:$4 sm:$0xff]  }
 0xaa6   :  { %13307 = vst [vmem:[#allocation61_spill] sm:$0xff] %v10275_v56  ;;  %13308 = vst [vmem:[#allocation62_spill] sm:$0xff] %v10280_v35 }
 0xaa8   :  { %3748 = vmatpush1.bf16.msra.mxu0 %v10251_v62  ;;  %3789 = vmatpush1.bf16.msra.mxu1 %v10256_v60 }
 0xaa9   :  { %3749 = vmatprep.subr.bf16.mxu0 %v10263_v19  ;;  %3790 = vmatprep.subr.bf16.mxu1 %v10268_v5  ;;  %v2841_v5 = vld [vmem:[%s12172_s8] sm:$0xf]  ;;  %v13309_v19 = vld [vmem:[#allocation55_spill] sm:$0xff] }
 0xaaa   :  { %v3014_v46 = vrot.slane %v2841_v5, %v13313_v48 }
 0xaac   :  { %3750 = vmatpush1.bf16.msra.mxu0 %v10275_v56  ;;  %3791 = vmatpush1.bf16.msra.mxu1 %v10280_v35  ;;  %v3006_v56 = vrot.slane %v2841_v5, %v13309_v19  ;;  %v3010_v35 = vrot.slane %v2841_v5, %v13310_v52 }
 0xaad   :  { %3831 = vmatprep.subr.bf16.mxu0 %v9699_v39  ;;  %3872 = vmatprep.subr.bf16.mxu1 %v9707_v36 }
 0xb21   :  { %v3057_v60 = vpop.f32.mrb[64].mxu0  ;;  %v3098_v62 = vpop.f32.mrb[72].mxu1 }
 0xb22   :  { %v3059_v13 = vpop.f32.mrb[65].mxu0  ;;  %v3100_v1 = vpop.f32.mrb[73].mxu1  ;;  %v10293_v51 = vadd.f32 %v3057_v60, %v3006_v56  ;;  %v13314_v60 = vld [vmem:[#allocation60_spill] sm:$0xff] }
 0xb23   :  { %v3061_v3 = vpop.f32.mrb[66].mxu0  ;;  %v3102_v55 = vpop.f32.mrb[74].mxu1  ;;  %v10295_v39 = vadd.f32 %v3059_v13, %v3010_v35  ;;  %v3018_v35 = vrot.slane %v2841_v5, %v13314_v60  ;;  %v10301_v13 = vadd.f32 %v3098_v62, %v3014_v46 }
 0xb24   :  { %v3062_v54 = vpop.f32.mrb[67].mxu0  ;;  %v3103_v53 = vpop.f32.mrb[75].mxu1  ;;  %13311 = vst [vmem:[#allocation63_spill] sm:$0xff] %v10293_v51 }
 0xb25   :  { %13312 = vst [vmem:[#allocation64_spill] sm:$0xff] %v10295_v39  ;;  %v10304_v56 = vadd.f32 %v3100_v1, %v3018_v35 }
 0xb41   :  { %v3301_v36 = vpop.f32.mrb[68].mxu0  ;;  %v3342_v47 = vpop.f32.mrb[76].mxu1 }
 0xb42   :  { %v3349_v50 = vadd.f32 %v3301_v36, %v10293_v51  ;;  %v3303_v3 = vpop.f32.mrb[69].mxu0  ;;  %v3344_v55 = vpop.f32.mrb[77].mxu1  ;;  %v3351_v36 = vadd.f32 %v3342_v47, %v10301_v13 }
 0xb43   :  { %v3350_v53 = vadd.f32 %v3303_v3, %v10295_v39  ;;  %v3305_v54 = vpop.f32.mrb[70].mxu0  ;;  %v3346_v49 = vpop.f32.mrb[78].mxu1  ;;  %v3352_v3 = vadd.f32 %v3344_v55, %v10304_v56 }
 0xb44   :  { %v5728_v0 = vmul.f32 -1.442695, %v3349_v50  ;;  %v3306_v19 = vpop.f32.mrb[71].mxu0  ;;  %v3347_v2 = vpop.f32.mrb[79].mxu1  ;;  %v5730_v54 = vmul.f32 -1.442695, %v3351_v36 }
 0xb45   :  { %v5729_v52 = vmul.f32 -1.442695, %v3350_v53 }
 0xb46   :  { %6484 = vpow2.f32 %v5728_v0 }
 0xb47   :  { %6486 = vpow2.f32 %v5729_v52 }
 0xb48   :  { %6488 = vtanh.f32 %v3352_v3  ;;  %v13316_v3 = vld [vmem:[#allocation14_spill] sm:$0xff] }
 0xb49   :  { %6490 = vpow2.f32 %v5730_v54  ;;  %v13317_v54 = vld [vmem:[#allocation2_spill] sm:$0xff] }
 0xb50   :  { %v6485_v49 = vpop.eup %6484 }
 0xb51   :  { %v3362_v39 = vadd.f32 1.0, %v6485_v49  ;;  %v6487_v50 = vpop.eup %6486  ;;  %v13318_v49 = vld [vmem:[#allocation4_spill] sm:$0xff] }
 0xb52   :  { %v3363_v2 = vadd.f32 1.0, %v6487_v50  ;;  %v6489_v0 = vpop.eup %6488  ;;  %v13319_v50 = vld [vmem:[#allocation57_spill] sm:$0xff] }
 0xb53   :  { %6492 = vrcp.f32 %v3362_v39  ;;  %v6491_v19 = vpop.eup %6490  ;;  %v13315_v39 = vld [vmem:[#allocation13_spill] sm:$0xff] }
 0xb54   :  { %6494 = vrcp.f32 %v3363_v2  ;;  %v3364_v5 = vadd.f32 1.0, %v6491_v19  ;;  %v13320_v2 = vld [vmem:[#allocation58_spill] sm:$0xff]  ;;  %v13322_v19 = vld [vmem:[#allocation16_spill] sm:$0xff] }
 0xb56   :  { %6496 = vrcp.f32 %v3364_v5  ;;  %v13326_v5 = vld [vmem:[#allocation20_spill] sm:$0xff] }
 0xb5d   :  { %v6493_v46 = vpop.eup %6492 }
 0xb5e   :  { %v3373_v62 = vmul.f32 %v6493_v46, %v6489_v0  ;;  %v6495_v52 = vpop.eup %6494  ;;  %v13321_v0 = vld [vmem:[#allocation15_spill] sm:$0xff]  ;;  %v13323_v46 = vld [vmem:[#allocation17_spill] sm:$0xff] }
 0xb5f   :  { %v3372_v47 = vmul.f32 0.0, %v6495_v52  ;;  %v13325_v52 = vld [vmem:[#allocation19_spill] sm:$0xff] }
 0xb60   :  { %v6497_v55 = vpop.eup %6496 }
 0xb61   :  { %v10307_v1 = vadd.f32 %v3373_v62, %v3372_v47  ;;  %v13324_v62 = vld [vmem:[#allocation18_spill] sm:$0xff]  ;;  %v13327_v47 = vld [vmem:[#allocation21_spill] sm:$0xff] }
 0xb63   :  { %6498 = vtanh.f32 %v10307_v1 }
 0xb6d   :  { %v6499_v53 = vpop.eup %6498 }
 0xb6e   :  { %v3376_v35 = vmul.f32 %v6499_v53, %v6497_v55  ;;  %v13328_v55 = vld [vmem:[#allocation22_spill] sm:$0xff]  ;;  %v13329_v53 = vld [vmem:[#allocation23_spill] sm:$0xff] }
 0xb70   :  { %v3377_v36 = vpack.c.bf16 %v3376_v35, %v3376_v35  ;;  %v13330_v35 = vld [vmem:[#allocation10_spill] sm:$0xff] }
 0xb72   :  { %3752 = vmatmul.mubr.bf16.vlgmr.msra.gmra.mrb[72].mxu0 %v3377_v36  ;;  %3793 = vmatmul.mubr.bf16.vlgmr.msra.gmra.mrb[80].mxu1 %v3377_v36 }
 0xb73   :  { %3832 = vmatpush1.bf16.msra.mxu0 %v9719_v7  ;;  %3873 = vmatpush1.bf16.msra.mxu1 %v9724_v10 }
 0xb74   :  { %3833 = vmatprep.subr.bf16.mxu0 %v9729_v43  ;;  %3874 = vmatprep.subr.bf16.mxu1 %v9734_v26 }
 0xb75   :  { %3863 = vmatprep.mubr.bf16.mxu0 %v12855_v9  ;;  %3904 = vmatprep.mubr.bf16.mxu1 %v12855_v9 }
 0xb77   :  { %3834 = vmatpush1.bf16.msra.mxu0 %v9741_v34  ;;  %3875 = vmatpush1.bf16.msra.mxu1 %v9746_v63 }
 0xb78   :  { %3835 = vmatprep.subr.bf16.mxu0 %v9753_v29  ;;  %3876 = vmatprep.subr.bf16.mxu1 %v9758_v31 }
 0xb7b   :  { %3836 = vmatpush1.bf16.msra.mxu0 %v9767_v33  ;;  %3877 = vmatpush1.bf16.msra.mxu1 %v9772_v37 }
 0xb7c   :  { %3837 = vmatprep.subr.bf16.mxu0 %v9779_v40  ;;  %3878 = vmatprep.subr.bf16.mxu1 %v9784_v41 }
 0xb7f   :  { %3838 = vmatpush1.bf16.msra.mxu0 %v9791_v42  ;;  %3879 = vmatpush1.bf16.msra.mxu1 %v9796_v44 }
 0xb80   :  { %3839 = vmatprep.subr.bf16.mxu0 %v9803_v45  ;;  %3880 = vmatprep.subr.bf16.mxu1 %v9808_v18 }
 0xb83   :  { %3840 = vmatpush1.bf16.msra.mxu0 %v9815_v25  ;;  %3881 = vmatpush1.bf16.msra.mxu1 %v9820_v11 }
 0xb84   :  { %3841 = vmatprep.subr.bf16.mxu0 %v9827_v4  ;;  %3882 = vmatprep.subr.bf16.mxu1 %v9832_v23 }
 0xb87   :  { %3842 = vmatpush1.bf16.msra.mxu0 %v9839_v21  ;;  %3883 = vmatpush1.bf16.msra.mxu1 %v9844_v58 }
 0xb88   :  { %3843 = vmatprep.subr.bf16.mxu0 %v9851_v14  ;;  %3884 = vmatprep.subr.bf16.mxu1 %v9856_v61 }
 0xb8b   :  { %3844 = vmatpush1.bf16.msra.mxu0 %v9863_v20  ;;  %3885 = vmatpush1.bf16.msra.mxu1 %v9868_v28 }
 0xb8c   :  { %3845 = vmatprep.subr.bf16.mxu0 %v9875_v59  ;;  %3886 = vmatprep.subr.bf16.mxu1 %v9880_v38 }
 0xb8f   :  { %3846 = vmatpush1.bf16.msra.mxu0 %v9887_v32  ;;  %3887 = vmatpush1.bf16.msra.mxu1 %v9892_v27 }
 0xb90   :  { %3943 = vmatprep.subr.bf16.mxu0 %v9905_v57  ;;  %3984 = vmatprep.subr.bf16.mxu1 %v9910_v17 }
 0xb92   :  { %3864 = vmatmul.mubr.bf16.vlgmr.msra.gmra.mrb[76].mxu0 %v3377_v36  ;;  %3905 = vmatmul.mubr.bf16.vlgmr.msra.gmra.mrb[84].mxu1 %v3377_v36  ;;  %v13331_v36 = vld [vmem:[#allocation11_spill] sm:$0xff] }
 0xb93   :  { %3944 = vmatpush1.bf16.msra.mxu0 %v9916_v16  ;;  %3985 = vmatpush1.bf16.msra.mxu1 %v9921_v6 }
 0xb94   :  { %3945 = vmatprep.subr.bf16.mxu0 %v9927_v22  ;;  %3986 = vmatprep.subr.bf16.mxu1 %v9934_v15 }
 0xb97   :  { %3946 = vmatpush1.bf16.msra.mxu0 %v9939_v12  ;;  %3987 = vmatpush1.bf16.msra.mxu1 %v9945_v30 }
 0xb98   :  { %3947 = vmatprep.subr.bf16.mxu0 %v9951_v8  ;;  %3988 = vmatprep.subr.bf16.mxu1 %v9956_v24 }
 0xb9b   :  { %3948 = vmatpush1.bf16.msra.mxu0 %v13315_v39  ;;  %3989 = vmatpush1.bf16.msra.mxu1 %v13316_v3 }
 0xb9c   :  { %3949 = vmatprep.subr.bf16.mxu0 %v13317_v54  ;;  %3990 = vmatprep.subr.bf16.mxu1 %v13318_v49 }
 0xb9f   :  { %3950 = vmatpush1.bf16.msra.mxu0 %v13319_v50  ;;  %3991 = vmatpush1.bf16.msra.mxu1 %v13320_v2 }
 0xba0   :  { %3951 = vmatprep.subr.bf16.mxu0 %v13321_v0  ;;  %3992 = vmatprep.subr.bf16.mxu1 %v13322_v19  ;;  %v13332_v0 = vld [vmem:[#allocation69_spill] sm:$0xff]  ;;  %v13333_v19 = vld [vmem:[#allocation24_spill] sm:$0xff] }
 0xba3   :  { %3952 = vmatpush1.bf16.msra.mxu0 %v13323_v46  ;;  %3993 = vmatpush1.bf16.msra.mxu1 %v13324_v62  ;;  %v13334_v46 = vld [vmem:[#allocation25_spill] sm:$0xff]  ;;  %v13335_v62 = vld [vmem:[#allocation26_spill] sm:$0xff] }
 0xba4   :  { %3953 = vmatprep.subr.bf16.mxu0 %v13325_v52  ;;  %3994 = vmatprep.subr.bf16.mxu1 %v13326_v5  ;;  %v13336_v52 = vld [vmem:[#allocation27_spill] sm:$0xff]  ;;  %v13337_v5 = vld [vmem:[#allocation28_spill] sm:$0xff] }
 0xba7   :  { %3954 = vmatpush1.bf16.msra.mxu0 %v13327_v47  ;;  %3995 = vmatpush1.bf16.msra.mxu1 %v13328_v55  ;;  %v13338_v47 = vld [vmem:[#allocation29_spill] sm:$0xff]  ;;  %v13339_v55 = vld [vmem:[#allocation30_spill] sm:$0xff] }
 0xba8   :  { %3955 = vmatprep.subr.bf16.mxu0 %v13329_v53  ;;  %3996 = vmatprep.subr.bf16.mxu1 %v13330_v35  ;;  %v13340_v53 = vld [vmem:[#allocation31_spill] sm:$0xff]  ;;  %v13341_v35 = vld [vmem:[#allocation32_spill] sm:$0xff] }
 0xbab   :  { %3956 = vmatpush1.bf16.msra.mxu0 %v13331_v36  ;;  %3997 = vmatpush1.bf16.msra.mxu1 %v13332_v0  ;;  %v13342_v36 = vld [vmem:[#allocation33_spill] sm:$0xff]  ;;  %v13343_v0 = vld [vmem:[#allocation34_spill] sm:$0xff] }
 0xbac   :  { %3957 = vmatprep.subr.bf16.mxu0 %v13333_v19  ;;  %3998 = vmatprep.subr.bf16.mxu1 %v13334_v46  ;;  %v13344_v19 = vld [vmem:[#allocation35_spill] sm:$0xff]  ;;  %v13345_v46 = vld [vmem:[#allocation36_spill] sm:$0xff] }
 0xbaf   :  { %3958 = vmatpush1.bf16.msra.mxu0 %v13335_v62  ;;  %3999 = vmatpush1.bf16.msra.mxu1 %v13336_v52  ;;  %v13346_v62 = vld [vmem:[#allocation37_spill] sm:$0xff]  ;;  %v13347_v52 = vld [vmem:[#allocation38_spill] sm:$0xff] }
 0xbb0   :  { %3959 = vmatprep.subr.bf16.mxu0 %v13337_v5  ;;  %4000 = vmatprep.subr.bf16.mxu1 %v13338_v47  ;;  %v13348_v5 = vld [vmem:[#allocation39_spill] sm:$0xff]  ;;  %v13349_v47 = vld [vmem:[#allocation40_spill] sm:$0xff] }
 0xbb3   :  { %3960 = vmatpush1.bf16.msra.mxu0 %v13339_v55  ;;  %4001 = vmatpush1.bf16.msra.mxu1 %v13340_v53  ;;  %v13350_v55 = vld [vmem:[#allocation41_spill] sm:$0xff]  ;;  %v13351_v53 = vld [vmem:[#allocation42_spill] sm:$0xff] }
 0xbb4   :  { %3961 = vmatprep.subr.bf16.mxu0 %v13341_v35  ;;  %4002 = vmatprep.subr.bf16.mxu1 %v13342_v36  ;;  %v13352_v35 = vld [vmem:[#allocation43_spill] sm:$0xff]  ;;  %v13353_v36 = vld [vmem:[#allocation44_spill] sm:$0xff] }
 0xbb7   :  { %3962 = vmatpush1.bf16.msra.mxu0 %v13343_v0  ;;  %4003 = vmatpush1.bf16.msra.mxu1 %v13344_v19  ;;  %v13354_v0 = vld [vmem:[#allocation45_spill] sm:$0xff]  ;;  %v13355_v19 = vld [vmem:[#allocation46_spill] sm:$0xff] }
 0xbb8   :  { %3963 = vmatprep.subr.bf16.mxu0 %v13345_v46  ;;  %4004 = vmatprep.subr.bf16.mxu1 %v13346_v62  ;;  %v13356_v46 = vld [vmem:[#allocation47_spill] sm:$0xff]  ;;  %v13357_v62 = vld [vmem:[#allocation48_spill] sm:$0xff] }
 0xbbb   :  { %3964 = vmatpush1.bf16.msra.mxu0 %v13347_v52  ;;  %4005 = vmatpush1.bf16.msra.mxu1 %v13348_v5  ;;  %v13358_v52 = vld [vmem:[#allocation49_spill] sm:$0xff]  ;;  %v13359_v5 = vld [vmem:[#allocation50_spill] sm:$0xff] }
 0xbbc   :  { %3965 = vmatprep.subr.bf16.mxu0 %v13349_v47  ;;  %4006 = vmatprep.subr.bf16.mxu1 %v13350_v55  ;;  %v13360_v47 = vld [vmem:[#allocation51_spill] sm:$0xff]  ;;  %v13361_v55 = vld [vmem:[#allocation52_spill] sm:$0xff] }
 0xbbf   :  { %3966 = vmatpush1.bf16.msra.mxu0 %v13351_v53  ;;  %4007 = vmatpush1.bf16.msra.mxu1 %v13352_v35  ;;  %v13362_v53 = vld [vmem:[#allocation53_spill] sm:$0xff]  ;;  %v13363_v35 = vld [vmem:[#allocation54_spill] sm:$0xff] }
 0xbc0   :  { %3967 = vmatprep.subr.bf16.mxu0 %v13353_v36  ;;  %4008 = vmatprep.subr.bf16.mxu1 %v13354_v0  ;;  %v13364_v36 = vld [vmem:[#allocation5_spill] sm:$0xff]  ;;  %v13365_v0 = vld [vmem:[#allocation6_spill] sm:$0xff] }
 0xbc3   :  { %3968 = vmatpush1.bf16.msra.mxu0 %v13355_v19  ;;  %4009 = vmatpush1.bf16.msra.mxu1 %v13356_v46  ;;  %v13366_v19 = vld [vmem:[#allocation9_spill] sm:$0xff] }
 0xbc4   :  { %3969 = vmatprep.subr.bf16.mxu0 %v13357_v62  ;;  %4010 = vmatprep.subr.bf16.mxu1 %v13358_v52  ;;  %v13367_v46 = vld [vmem:[#allocation61_spill] sm:$0xff]  ;;  %v13368_v62 = vld [vmem:[#allocation62_spill] sm:$0xff]  ;;  %v13369_v52 = vld [vmem:[#allocation68_spill] sm:$0xff] }
 0xbc7   :  { %3970 = vmatpush1.bf16.msra.mxu0 %v13359_v5  ;;  %4011 = vmatpush1.bf16.msra.mxu1 %v13360_v47  ;;  %v13370_v5 = vld [vmem:[#allocation7_spill] sm:$0xff] }
 0xbc8   :  { %3971 = vmatprep.subr.bf16.mxu0 %v13361_v55  ;;  %4012 = vmatprep.subr.bf16.mxu1 %v13362_v53  ;;  %v238_v53 = vld [vmem:[%s12173_s10] sm:$0xf]  ;;  %v13371_v55 = vld [vmem:[#allocation55_spill] sm:$0xff] }
 0xbcb   :  { %3972 = vmatpush1.bf16.msra.mxu0 %v13363_v35  ;;  %4013 = vmatpush1.bf16.msra.mxu1 %v13364_v36  ;;  %v10412_v35 = vrot.slane %v238_v53, %v13371_v55  ;;  %v13373_v36 = vld [vmem:[#allocation56_spill] sm:$0xff]  ;;  %v10420_v55 = vrot.slane %v238_v53, %v13313_v48 }
 0xbcc   :  { %3973 = vmatprep.subr.bf16.mxu0 %v13365_v0  ;;  %4014 = vmatprep.subr.bf16.mxu1 %v13366_v19  ;;  %v10415_v47 = vrot.slane %v238_v53, %v13373_v36  ;;  %v10423_v36 = vrot.slane %v238_v53, %v13314_v60 }
 0xbcd   :  { %13372 = vst [vmem:[#allocation65_spill] sm:$0xff] %v10412_v35  ;;  %13374 = vst [vmem:[#allocation66_spill] sm:$0xff] %v10420_v55 }
 0xbce   :  { %13375 = vst [vmem:[#allocation8_spill] sm:$0xff] %v10423_v36 }
 0xbcf   :  { %3974 = vmatpush1.bf16.msra.mxu0 %v13367_v46  ;;  %4015 = vmatpush1.bf16.msra.mxu1 %v13368_v62 }
 0xbd0   :  { %4055 = vmatprep.subr.bf16.mxu0 %v13369_v52  ;;  %4096 = vmatprep.subr.bf16.mxu1 %v13370_v5 }
 0xc45   :  { %v3753_v0 = vpop.f32.mrb[72].mxu0  ;;  %v3794_v19 = vpop.f32.mrb[80].mxu1 }
 0xc46   :  { %v3754_v46 = vadd.f32 %v3753_v0, %v10412_v35  ;;  %v3755_v2 = vpop.f32.mrb[73].mxu0  ;;  %v3796_v62 = vpop.f32.mrb[81].mxu1  ;;  %v3795_v0 = vadd.f32 %v3794_v19, %v10420_v55 }
 0xc47   :  { %v3756_v52 = vadd.f32 %v3755_v2, %v10415_v47  ;;  %v3757_v50 = vpop.f32.mrb[74].mxu0  ;;  %v3798_v5 = vpop.f32.mrb[82].mxu1  ;;  %v3797_v35 = vadd.f32 %v3796_v62, %v10423_v36 }
 0xc48   :  { %v5795_v49 = vmul.f32 -1.442695, %v3754_v46  ;;  %v3758_v54 = vpop.f32.mrb[75].mxu0  ;;  %v3799_v3 = vpop.f32.mrb[83].mxu1  ;;  %v5797_v24 = vmul.f32 -1.442695, %v3795_v0 }
 0xc49   :  { %v5796_v39 = vmul.f32 -1.442695, %v3756_v52 }
 0xc4a   :  { %6500 = vpow2.f32 %v5795_v49 }
 0xc4b   :  { %6502 = vpow2.f32 %v5796_v39 }
 0xc4c   :  { %6504 = vtanh.f32 %v3797_v35 }
 0xc4d   :  { %6506 = vpow2.f32 %v5797_v24  ;;  %v13376_v24 = vld [vmem:[#allocation64_spill] sm:$0xff] }
 0xc54   :  { %v6501_v2 = vpop.eup %6500 }
 0xc55   :  { %v3810_v50 = vadd.f32 1.0, %v6501_v2  ;;  %v6503_v46 = vpop.eup %6502 }
 0xc56   :  { %v3811_v3 = vadd.f32 1.0, %v6503_v46  ;;  %v6505_v48 = vpop.eup %6504 }
 0xc57   :  { %6508 = vrcp.f32 %v3810_v50  ;;  %v6507_v54 = vpop.eup %6506 }
 0xc58   :  { %6510 = vrcp.f32 %v3811_v3  ;;  %v3812_v60 = vadd.f32 1.0, %v6507_v54 }
 0xc5a   :  { %6512 = vrcp.f32 %v3812_v60 }
 0xc61   :  { %v6509_v49 = vpop.eup %6508 }
 0xc62   :  { %v3821_v39 = vmul.f32 %v6509_v49, %v6505_v48  ;;  %v6511_v52 = vpop.eup %6510 }
 0xc63   :  { %v3820_v53 = vmul.f32 0.0, %v6511_v52 }
 0xc64   :  { %v6513_v52 = vpop.eup %6512 }
 0xc65   :  { %v3865_v5 = vpop.f32.mrb[76].mxu0  ;;  %v3906_v19 = vpop.f32.mrb[84].mxu1  ;;  %v10427_v55 = vadd.f32 %v3821_v39, %v3820_v53 }
 0xc66   :  { %v3913_v62 = vadd.f32 %v3865_v5, %v10293_v51  ;;  %v3867_v0 = vpop.f32.mrb[77].mxu0  ;;  %v3908_v35 = vpop.f32.mrb[85].mxu1  ;;  %v3915_v39 = vadd.f32 %v3906_v19, %v10301_v13 }
 0xc67   :  { %v3914_v2 = vadd.f32 %v3867_v0, %v13376_v24  ;;  %v3869_v50 = vpop.f32.mrb[78].mxu0  ;;  %v3910_v46 = vpop.f32.mrb[86].mxu1  ;;  %6514 = vtanh.f32 %v10427_v55  ;;  %v3916_v53 = vadd.f32 %v3908_v35, %v10304_v56 }
 0xc68   :  { %v5798_v3 = vmul.f32 -1.442695, %v3913_v62  ;;  %v3870_v48 = vpop.f32.mrb[79].mxu0  ;;  %v3911_v49 = vpop.f32.mrb[87].mxu1  ;;  %v5800_v51 = vmul.f32 -1.442695, %v3915_v39 }
 0xc69   :  { %v5799_v54 = vmul.f32 -1.442695, %v3914_v2 }
 0xc6a   :  { %6516 = vpow2.f32 %v5798_v3 }
 0xc6b   :  { %6518 = vpow2.f32 %v5799_v54 }
 0xc6c   :  { %6520 = vtanh.f32 %v3916_v53 }
 0xc6d   :  { %6522 = vpow2.f32 %v5800_v51 }
 0xc71   :  { %v6515_v5 = vpop.eup %6514 }
 0xc72   :  { %v10434_v60 = vmul.f32 %v6515_v5, %v6513_v52 }
 0xc74   :  { %v6517_v0 = vpop.eup %6516  ;;  %v3942_v62 = vpack.c.bf16 %v10434_v60, %v10434_v60 }
 0xc75   :  { %v3926_v50 = vadd.f32 1.0, %v6517_v0  ;;  %v6519_v46 = vpop.eup %6518 }
 0xc76   :  { %v3927_v2 = vadd.f32 1.0, %v6519_v46  ;;  %3975 = vmatprep.mubr.bf16.mxu0 %v3942_v62  ;;  %4016 = vmatprep.mubr.bf16.mxu1 %v3942_v62  ;;  %v6521_v19 = vpop.eup %6520  ;;  %v13418_v62 = vld [vmem:[#allocation46_spill] sm:$0xff]  ;;  %v13419_v46 = vld [vmem:[#allocation47_spill] sm:$0xff] }
 0xc77   :  { %6524 = vrcp.f32 %v3926_v50  ;;  %v6523_v3 = vpop.eup %6522  ;;  %v13417_v50 = vld [vmem:[#allocation45_spill] sm:$0xff] }
 0xc78   :  { %6526 = vrcp.f32 %v3927_v2  ;;  %v3928_v54 = vadd.f32 1.0, %v6523_v3  ;;  %v13420_v2 = vld [vmem:[#allocation48_spill] sm:$0xff]  ;;  %v13422_v3 = vld [vmem:[#allocation50_spill] sm:$0xff] }
 0xc7a   :  { %6528 = vrcp.f32 %v3928_v54  ;;  %v13426_v54 = vld [vmem:[#allocation54_spill] sm:$0xff] }
 0xc81   :  { %v6525_v35 = vpop.eup %6524 }
 0xc82   :  { %v3937_v48 = vmul.f32 %v6525_v35, %v6521_v19  ;;  %v6527_v49 = vpop.eup %6526  ;;  %v13421_v19 = vld [vmem:[#allocation49_spill] sm:$0xff]  ;;  %v13423_v35 = vld [vmem:[#allocation51_spill] sm:$0xff] }
 0xc83   :  { %v3936_v39 = vmul.f32 %v6527_v49, %v10307_v1  ;;  %v13416_v1 = vld [vmem:[#allocation44_spill] sm:$0xff]  ;;  %v13425_v49 = vld [vmem:[#allocation53_spill] sm:$0xff] }
 0xc84   :  { %v6529_v53 = vpop.eup %6528 }
 0xc85   :  { %v10439_v52 = vadd.f32 %v3937_v48, %v3936_v39  ;;  %v13424_v48 = vld [vmem:[#allocation52_spill] sm:$0xff]  ;;  %v13427_v39 = vld [vmem:[#allocation5_spill] sm:$0xff] }
 0xc87   :  { %6530 = vtanh.f32 %v10439_v52 }
 0xc91   :  { %v6531_v51 = vpop.eup %6530 }
 0xc92   :  { %v3940_v5 = vmul.f32 %v6531_v51, %v6529_v53  ;;  %v13428_v53 = vld [vmem:[#allocation6_spill] sm:$0xff]  ;;  %v13429_v51 = vld [vmem:[#allocation9_spill] sm:$0xff] }
 0xc94   :  { %v3941_v0 = vpack.c.bf16 %v3940_v5, %v3940_v5  ;;  %v13430_v5 = vld [vmem:[#allocation61_spill] sm:$0xff] }
 0xc96   :  { %3976 = vmatmul.mubr.bf16.vlgmr.msra.gmra.mrb[80].mxu0 %v3941_v0  ;;  %4017 = vmatmul.mubr.bf16.vlgmr.msra.gmra.mrb[88].mxu1 %v3941_v0 }
 0xc97   :  { %4056 = vmatpush1.bf16.msra.mxu0 %v9719_v7  ;;  %4097 = vmatpush1.bf16.msra.mxu1 %v9724_v10  ;;  %v13377_v7 = vld [vmem:[#allocation12_spill] sm:$0xff]  ;;  %v13378_v10 = vld [vmem:[#allocation13_spill] sm:$0xff] }
 0xc98   :  { %4057 = vmatprep.subr.bf16.mxu0 %v9729_v43  ;;  %4098 = vmatprep.subr.bf16.mxu1 %v9734_v26  ;;  %v13379_v43 = vld [vmem:[#allocation14_spill] sm:$0xff] }
 0xc99   :  { %4087 = vmatprep.mubr.bf16.mxu0 %v12855_v9  ;;  %4128 = vmatprep.mubr.bf16.mxu1 %v12855_v9  ;;  %v13380_v26 = vld [vmem:[#allocation2_spill] sm:$0xff] }
 0xc9b   :  { %4058 = vmatpush1.bf16.msra.mxu0 %v9741_v34  ;;  %4099 = vmatpush1.bf16.msra.mxu1 %v9746_v63  ;;  %v13381_v34 = vld [vmem:[#allocation4_spill] sm:$0xff]  ;;  %v13382_v63 = vld [vmem:[#allocation57_spill] sm:$0xff] }
 0xc9c   :  { %4059 = vmatprep.subr.bf16.mxu0 %v9753_v29  ;;  %4100 = vmatprep.subr.bf16.mxu1 %v9758_v31  ;;  %v13383_v29 = vld [vmem:[#allocation58_spill] sm:$0xff]  ;;  %v13384_v31 = vld [vmem:[#allocation15_spill] sm:$0xff] }
 0xc9f   :  { %4060 = vmatpush1.bf16.msra.mxu0 %v9767_v33  ;;  %4101 = vmatpush1.bf16.msra.mxu1 %v9772_v37  ;;  %v13385_v33 = vld [vmem:[#allocation16_spill] sm:$0xff]  ;;  %v13386_v37 = vld [vmem:[#allocation17_spill] sm:$0xff] }
 0xca0   :  { %4061 = vmatprep.subr.bf16.mxu0 %v9779_v40  ;;  %4102 = vmatprep.subr.bf16.mxu1 %v9784_v41  ;;  %v13387_v40 = vld [vmem:[#allocation18_spill] sm:$0xff]  ;;  %v13388_v41 = vld [vmem:[#allocation19_spill] sm:$0xff] }
 0xca3   :  { %4062 = vmatpush1.bf16.msra.mxu0 %v9791_v42  ;;  %4103 = vmatpush1.bf16.msra.mxu1 %v9796_v44  ;;  %v13389_v42 = vld [vmem:[#allocation20_spill] sm:$0xff]  ;;  %v13390_v44 = vld [vmem:[#allocation21_spill] sm:$0xff] }
 0xca4   :  { %4063 = vmatprep.subr.bf16.mxu0 %v9803_v45  ;;  %4104 = vmatprep.subr.bf16.mxu1 %v9808_v18  ;;  %v13391_v45 = vld [vmem:[#allocation22_spill] sm:$0xff]  ;;  %v13392_v18 = vld [vmem:[#allocation23_spill] sm:$0xff] }
 0xca7   :  { %4064 = vmatpush1.bf16.msra.mxu0 %v9815_v25  ;;  %4105 = vmatpush1.bf16.msra.mxu1 %v9820_v11  ;;  %v13393_v25 = vld [vmem:[#allocation10_spill] sm:$0xff]  ;;  %v13394_v11 = vld [vmem:[#allocation11_spill] sm:$0xff] }
 0xca8   :  { %4065 = vmatprep.subr.bf16.mxu0 %v9827_v4  ;;  %4106 = vmatprep.subr.bf16.mxu1 %v9832_v23  ;;  %v13395_v4 = vld [vmem:[#allocation69_spill] sm:$0xff]  ;;  %v13396_v23 = vld [vmem:[#allocation24_spill] sm:$0xff] }
 0xcab   :  { %4066 = vmatpush1.bf16.msra.mxu0 %v9839_v21  ;;  %4107 = vmatpush1.bf16.msra.mxu1 %v9844_v58  ;;  %v13397_v21 = vld [vmem:[#allocation25_spill] sm:$0xff]  ;;  %v13398_v58 = vld [vmem:[#allocation26_spill] sm:$0xff] }
 0xcac   :  { %4067 = vmatprep.subr.bf16.mxu0 %v9851_v14  ;;  %4108 = vmatprep.subr.bf16.mxu1 %v9856_v61  ;;  %v13399_v14 = vld [vmem:[#allocation27_spill] sm:$0xff]  ;;  %v13400_v61 = vld [vmem:[#allocation28_spill] sm:$0xff] }
 0xcaf   :  { %4068 = vmatpush1.bf16.msra.mxu0 %v9863_v20  ;;  %4109 = vmatpush1.bf16.msra.mxu1 %v9868_v28  ;;  %v13401_v20 = vld [vmem:[#allocation29_spill] sm:$0xff]  ;;  %v13402_v28 = vld [vmem:[#allocation30_spill] sm:$0xff] }
 0xcb0   :  { %4069 = vmatprep.subr.bf16.mxu0 %v9875_v59  ;;  %4110 = vmatprep.subr.bf16.mxu1 %v9880_v38  ;;  %v13403_v59 = vld [vmem:[#allocation31_spill] sm:$0xff]  ;;  %v13404_v38 = vld [vmem:[#allocation32_spill] sm:$0xff] }
 0xcb3   :  { %4070 = vmatpush1.bf16.msra.mxu0 %v9887_v32  ;;  %4111 = vmatpush1.bf16.msra.mxu1 %v9892_v27  ;;  %v13405_v32 = vld [vmem:[#allocation33_spill] sm:$0xff]  ;;  %v13406_v27 = vld [vmem:[#allocation34_spill] sm:$0xff] }
 0xcb4   :  { %4167 = vmatprep.subr.bf16.mxu0 %v9905_v57  ;;  %4208 = vmatprep.subr.bf16.mxu1 %v9910_v17  ;;  %v13407_v57 = vld [vmem:[#allocation35_spill] sm:$0xff]  ;;  %v13408_v17 = vld [vmem:[#allocation36_spill] sm:$0xff] }
 0xcb6   :  { %4088 = vmatmul.mubr.bf16.vlgmr.msra.gmra.mrb[84].mxu0 %v3941_v0  ;;  %4129 = vmatmul.mubr.bf16.vlgmr.msra.gmra.mrb[92].mxu1 %v3941_v0  ;;  %v13431_v0 = vld [vmem:[#allocation62_spill] sm:$0xff] }
 0xcb7   :  { %4168 = vmatpush1.bf16.msra.mxu0 %v9916_v16  ;;  %4209 = vmatpush1.bf16.msra.mxu1 %v9921_v6  ;;  %v13409_v16 = vld [vmem:[#allocation37_spill] sm:$0xff]  ;;  %v13410_v6 = vld [vmem:[#allocation38_spill] sm:$0xff] }
 0xcb8   :  { %4169 = vmatprep.subr.bf16.mxu0 %v9927_v22  ;;  %4210 = vmatprep.subr.bf16.mxu1 %v9934_v15  ;;  %v13411_v22 = vld [vmem:[#allocation39_spill] sm:$0xff]  ;;  %v13412_v15 = vld [vmem:[#allocation40_spill] sm:$0xff] }
 0xcbb   :  { %4170 = vmatpush1.bf16.msra.mxu0 %v9939_v12  ;;  %4211 = vmatpush1.bf16.msra.mxu1 %v9945_v30  ;;  %v13413_v12 = vld [vmem:[#allocation41_spill] sm:$0xff]  ;;  %v13414_v30 = vld [vmem:[#allocation42_spill] sm:$0xff] }
 0xcbc   :  { %4171 = vmatprep.subr.bf16.mxu0 %v9951_v8  ;;  %4212 = vmatprep.subr.bf16.mxu1 %v13377_v7  ;;  %v13415_v8 = vld [vmem:[#allocation43_spill] sm:$0xff]  ;;  %v10541_v7 = vld [vmem:[%s12170_s7 + $0x4] ss:$16 sps:$4 sm:$0xff]  }
 0xcbd   :  { %13432 = vst [vmem:[#allocation67_spill] sm:$0xff] %v10541_v7 }
 0xcbf   :  { %4172 = vmatpush1.bf16.msra.mxu0 %v13378_v10  ;;  %4213 = vmatpush1.bf16.msra.mxu1 %v13379_v43  ;;  %v10547_v10 = vld [vmem:[%s12170_s7 + $0xc] ss:$16 sps:$4 sm:$0xff]  }
 0xcc0   :  { %4173 = vmatprep.subr.bf16.mxu0 %v13380_v26  ;;  %4214 = vmatprep.subr.bf16.mxu1 %v13381_v34  ;;  %13433 = vst [vmem:[#allocation59_spill] sm:$0xff] %v10547_v10  ;;  %v13434_v34 = vld [vmem:[#allocation65_spill] sm:$0xff] }
 0xcc3   :  { %4174 = vmatpush1.bf16.msra.mxu0 %v13382_v63  ;;  %4215 = vmatpush1.bf16.msra.mxu1 %v13383_v29 }
 0xcc4   :  { %4175 = vmatprep.subr.bf16.mxu0 %v13384_v31  ;;  %4216 = vmatprep.subr.bf16.mxu1 %v13385_v33 }
 0xcc7   :  { %4176 = vmatpush1.bf16.msra.mxu0 %v13386_v37  ;;  %4217 = vmatpush1.bf16.msra.mxu1 %v13387_v40 }
 0xcc8   :  { %4177 = vmatprep.subr.bf16.mxu0 %v13388_v41  ;;  %4218 = vmatprep.subr.bf16.mxu1 %v13389_v42 }
 0xccb   :  { %4178 = vmatpush1.bf16.msra.mxu0 %v13390_v44  ;;  %4219 = vmatpush1.bf16.msra.mxu1 %v13391_v45 }
 0xccc   :  { %4179 = vmatprep.subr.bf16.mxu0 %v13392_v18  ;;  %4220 = vmatprep.subr.bf16.mxu1 %v13393_v25  ;;  %v13435_v18 = vld [vmem:[#allocation66_spill] sm:$0xff] }
 0xccf   :  { %4180 = vmatpush1.bf16.msra.mxu0 %v13394_v11  ;;  %4221 = vmatpush1.bf16.msra.mxu1 %v13395_v4 }
 0xcd0   :  { %4181 = vmatprep.subr.bf16.mxu0 %v13396_v23  ;;  %4222 = vmatprep.subr.bf16.mxu1 %v13397_v21 }
 0xcd3   :  { %4182 = vmatpush1.bf16.msra.mxu0 %v13398_v58  ;;  %4223 = vmatpush1.bf16.msra.mxu1 %v13399_v14 }
 0xcd4   :  { %4183 = vmatprep.subr.bf16.mxu0 %v13400_v61  ;;  %4224 = vmatprep.subr.bf16.mxu1 %v13401_v20 }
 0xcd7   :  { %4184 = vmatpush1.bf16.msra.mxu0 %v13402_v28  ;;  %4225 = vmatpush1.bf16.msra.mxu1 %v13403_v59 }
 0xcd8   :  { %4185 = vmatprep.subr.bf16.mxu0 %v13404_v38  ;;  %4226 = vmatprep.subr.bf16.mxu1 %v13405_v32 }
 0xcdb   :  { %4186 = vmatpush1.bf16.msra.mxu0 %v13406_v27  ;;  %4227 = vmatpush1.bf16.msra.mxu1 %v13407_v57 }
 0xcdc   :  { %4187 = vmatprep.subr.bf16.mxu0 %v13408_v17  ;;  %4228 = vmatprep.subr.bf16.mxu1 %v13409_v16 }
 0xcdf   :  { %4188 = vmatpush1.bf16.msra.mxu0 %v13410_v6  ;;  %4229 = vmatpush1.bf16.msra.mxu1 %v13411_v22  ;;  %v13436_v6 = vld [vmem:[#allocation63_spill] sm:$0xff] }
 0xce0   :  { %4189 = vmatprep.subr.bf16.mxu0 %v13412_v15  ;;  %4230 = vmatprep.subr.bf16.mxu1 %v13413_v12 }
 0xce3   :  { %4190 = vmatpush1.bf16.msra.mxu0 %v13414_v30  ;;  %4231 = vmatpush1.bf16.msra.mxu1 %v13415_v8 }
 0xce4   :  { %4191 = vmatprep.subr.bf16.mxu0 %v13416_v1  ;;  %4232 = vmatprep.subr.bf16.mxu1 %v13417_v50 }
 0xce7   :  { %4192 = vmatpush1.bf16.msra.mxu0 %v13418_v62  ;;  %4233 = vmatpush1.bf16.msra.mxu1 %v13419_v46 }
 0xce8   :  { %4193 = vmatprep.subr.bf16.mxu0 %v13420_v2  ;;  %4234 = vmatprep.subr.bf16.mxu1 %v13421_v19 }
 0xceb   :  { %4194 = vmatpush1.bf16.msra.mxu0 %v13422_v3  ;;  %4235 = vmatpush1.bf16.msra.mxu1 %v13423_v35 }
 0xcec   :  { %4195 = vmatprep.subr.bf16.mxu0 %v13424_v48  ;;  %4236 = vmatprep.subr.bf16.mxu1 %v13425_v49  ;;  %v13437_v48 = vld [vmem:[#allocation55_spill] sm:$0xff] }
 0xced   :  { %v3829_v49 = vrot.slane %v10434_v60, %v13437_v48 }
 0xcef   :  { %4196 = vmatpush1.bf16.msra.mxu0 %v13426_v54  ;;  %4237 = vmatpush1.bf16.msra.mxu1 %v13427_v39  ;;  %v13438_v39 = vld [vmem:[#allocation3_spill] sm:$0xff] }
 0xcf0   :  { %4197 = vmatprep.subr.bf16.mxu0 %v13428_v53  ;;  %4238 = vmatprep.subr.bf16.mxu1 %v13429_v51  ;;  %vm3825_vm2 = vcmp.eq.s32.totalorder %v13438_v39, 0  ;;  %vm4049_vm3 = vcmp.eq.s32.totalorder %v13438_v39, 1  ;;  %vm4273_vm4 = vcmp.eq.s32.totalorder %v13438_v39, 2  ;;  %vm4497_vm5 = vcmp.eq.s32.totalorder %v13438_v39, 3 }
 0xcf1   :  { %vm4721_vm6 = vcmp.eq.s32.totalorder %v13438_v39, 4  ;;  %vm4945_vm7 = vcmp.eq.s32.totalorder %v13438_v39, 5  ;;  %vm5169_vm8 = vcmp.eq.s32.totalorder %v13438_v39, 6  ;;  %vm5393_vm10 = vcmp.eq.s32.totalorder %v13438_v39, 7 }
 0xcf3   :  { %4198 = vmatpush1.bf16.msra.mxu0 %v13430_v5  ;;  %4239 = vmatpush1.bf16.msra.mxu1 %v13431_v0 }
 0xcf4   :  { %4279 = vmatprep.subr.bf16.mxu0 %v10541_v7  ;;  %4320 = vmatprep.subr.bf16.mxu1 %v10547_v10 }
 0xd69   :  { %v3977_v43 = vpop.f32.mrb[80].mxu0  ;;  %v4018_v26 = vpop.f32.mrb[88].mxu1 }
 0xd6a   :  { %v3978_v63 = vadd.f32 %v3977_v43, %v13434_v34  ;;  %v3979_v29 = vpop.f32.mrb[81].mxu0  ;;  %v4020_v31 = vpop.f32.mrb[89].mxu1  ;;  %v4019_v25 = vadd.f32 %v4018_v26, %v13435_v18 }
 0xd6b   :  { %v3980_v33 = vadd.f32 %v3979_v29, %v10415_v47  ;;  %v3981_v37 = vpop.f32.mrb[82].mxu0  ;;  %v4022_v40 = vpop.f32.mrb[90].mxu1  ;;  %v4021_v11 = vadd.f32 %v4020_v31, %v10423_v36 }
 0xd6c   :  { %v5801_v41 = vmul.f32 -1.442695, %v3978_v63  ;;  %v3982_v42 = vpop.f32.mrb[83].mxu0  ;;  %v4023_v44 = vpop.f32.mrb[91].mxu1  ;;  %v5803_v4 = vmul.f32 -1.442695, %v4019_v25 }
 0xd6d   :  { %v5802_v45 = vmul.f32 -1.442695, %v3980_v33  ;;  %v3830_v63 = vsel %vm3825_vm2, %v3829_v49, 0.0  ;;  %v10744_v49 = vld [vmem:[%s12170_s7 + $0xec] ss:$16 sps:$4 sm:$0xff]  }
 0xd6e   :  { %6532 = vpow2.f32 %v5801_v41 }
 0xd6f   :  { %6534 = vpow2.f32 %v5802_v45 }
 0xd70   :  { %6536 = vtanh.f32 %v4021_v11 }
 0xd71   :  { %6538 = vpow2.f32 %v5803_v4 }
 0xd78   :  { %v6533_v23 = vpop.eup %6532 }
 0xd79   :  { %v4034_v21 = vadd.f32 1.0, %v6533_v23  ;;  %v6535_v58 = vpop.eup %6534 }
 0xd7a   :  { %v4035_v14 = vadd.f32 1.0, %v6535_v58  ;;  %v6537_v61 = vpop.eup %6536  ;;  %v10592_v58 = vld [vmem:[%s12170_s7 + $0x24] ss:$16 sps:$4 sm:$0xff]  }
 0xd7b   :  { %6540 = vrcp.f32 %v4034_v21  ;;  %v6539_v20 = vpop.eup %6538  ;;  %v10580_v21 = vld [vmem:[%s12170_s7] ss:$16 sps:$4 sm:$0xff]  }
 0xd7c   :  { %6542 = vrcp.f32 %v4035_v14  ;;  %v4036_v32 = vadd.f32 1.0, %v6539_v20  ;;  %v10598_v14 = vld [vmem:[%s12170_s7 + $0x2c] ss:$16 sps:$4 sm:$0xff]   ;;  %v10612_v20 = vld [vmem:[%s12170_s7 + $0x28] ss:$16 sps:$4 sm:$0xff]  }
 0xd7e   :  { %6544 = vrcp.f32 %v4036_v32  ;;  %v10636_v32 = vld [vmem:[%s12170_s7 + $0x48] ss:$16 sps:$4 sm:$0xff]  }
 0xd85   :  { %v6541_v28 = vpop.eup %6540 }
 0xd86   :  { %v4045_v59 = vmul.f32 %v6541_v28, %v6537_v61  ;;  %v6543_v38 = vpop.eup %6542  ;;  %v10606_v61 = vld [vmem:[%s12170_s7 + $0x20] ss:$16 sps:$4 sm:$0xff]   ;;  %v10618_v28 = vld [vmem:[%s12170_s7 + $0x44] ss:$16 sps:$4 sm:$0xff]  }
 0xd87   :  { %v4044_v27 = vmul.f32 %v6543_v38, %v10427_v55  ;;  %v10630_v38 = vld [vmem:[%s12170_s7 + $0x40] ss:$16 sps:$4 sm:$0xff]  }
 0xd88   :  { %v6545_v19 = vpop.eup %6544 }
 0xd89   :  { %v4089_v57 = vpop.f32.mrb[84].mxu0  ;;  %v4130_v17 = vpop.f32.mrb[92].mxu1  ;;  %v10555_v16 = vadd.f32 %v4045_v59, %v4044_v27  ;;  %v10624_v59 = vld [vmem:[%s12170_s7 + $0x4c] ss:$16 sps:$4 sm:$0xff]   ;;  %v10642_v27 = vld [vmem:[%s12170_s7 + $0x64] ss:$16 sps:$4 sm:$0xff]  }
 0xd8a   :  { %v4137_v22 = vadd.f32 %v4089_v57, %v13436_v6  ;;  %v4091_v15 = vpop.f32.mrb[85].mxu0  ;;  %v4132_v12 = vpop.f32.mrb[93].mxu1  ;;  %v4139_v55 = vadd.f32 %v4130_v17, %v10301_v13  ;;  %v10648_v57 = vld [vmem:[%s12170_s7 + $0x6c] ss:$16 sps:$4 sm:$0xff]   ;;  %v10654_v17 = vld [vmem:[%s12170_s7 + $0x60] ss:$16 sps:$4 sm:$0xff]  }
 0xd8b   :  { %v4138_v30 = vadd.f32 %v4091_v15, %v13376_v24  ;;  %v4093_v8 = vpop.f32.mrb[86].mxu0  ;;  %v4134_v1 = vpop.f32.mrb[94].mxu1  ;;  %6546 = vtanh.f32 %v10555_v16  ;;  %v4140_v3 = vadd.f32 %v4132_v12, %v10304_v56  ;;  %v10666_v15 = vld [vmem:[%s12170_s7 + $0x84] ss:$16 sps:$4 sm:$0xff]   ;;  %v10672_v12 = vld [vmem:[%s12170_s7 + $0x8c] ss:$16 sps:$4 sm:$0xff]  }
 0xd8c   :  { %v5804_v50 = vmul.f32 -1.442695, %v4137_v22  ;;  %v4094_v62 = vpop.f32.mrb[87].mxu0  ;;  %v4135_v46 = vpop.f32.mrb[95].mxu1  ;;  %v5806_v54 = vmul.f32 -1.442695, %v4139_v55 }
 0xd8d   :  { %v5805_v2 = vmul.f32 -1.442695, %v4138_v30  ;;  %v10660_v22 = vld [vmem:[%s12170_s7 + $0x68] ss:$16 sps:$4 sm:$0xff]   ;;  %v10678_v30 = vld [vmem:[%s12170_s7 + $0x80] ss:$16 sps:$4 sm:$0xff]  }
 0xd8e   :  { %6548 = vpow2.f32 %v5804_v50  ;;  %v10684_v8 = vld [vmem:[%s12170_s7 + $0x88] ss:$16 sps:$4 sm:$0xff]   ;;  %v10690_v1 = vld [vmem:[%s12170_s7 + $0xa4] ss:$16 sps:$4 sm:$0xff]   ;;  %v10696_v50 = vld [vmem:[%s12170_s7 + $0xac] ss:$16 sps:$4 sm:$0xff]  }
 0xd8f   :  { %6550 = vpow2.f32 %v5805_v2  ;;  %v10702_v62 = vld [vmem:[%s12170_s7 + $0xa0] ss:$16 sps:$4 sm:$0xff]   ;;  %v10708_v46 = vld [vmem:[%s12170_s7 + $0xa8] ss:$16 sps:$4 sm:$0xff]   ;;  %v10714_v2 = vld [vmem:[%s12170_s7 + $0xc4] ss:$16 sps:$4 sm:$0xff]  }
 0xd90   :  { %6552 = vtanh.f32 %v4140_v3  ;;  %v10720_v55 = vld [vmem:[%s12170_s7 + $0xcc] ss:$16 sps:$4 sm:$0xff]   ;;  %v10732_v3 = vld [vmem:[%s12170_s7 + $0xc8] ss:$16 sps:$4 sm:$0xff]  }
 0xd91   :  { %6554 = vpow2.f32 %v5806_v54  ;;  %v10750_v54 = vld [vmem:[%s12170_s7 + $0xe0] ss:$16 sps:$4 sm:$0xff]  }
 0xd95   :  { %v6547_v35 = vpop.eup %6546 }
 0xd96   :  { %v4048_v53 = vmul.f32 %v6547_v35, %v6545_v19  ;;  %v10726_v19 = vld [vmem:[%s12170_s7 + $0xc0] ss:$16 sps:$4 sm:$0xff]   ;;  %v10738_v35 = vld [vmem:[%s12170_s7 + $0xe4] ss:$16 sps:$4 sm:$0xff]  }
 0xd98   :  { %v6549_v51 = vpop.eup %6548  ;;  %v4053_v0 = vrot.slane %v4048_v53, %v13437_v48  ;;  %v4166_v43 = vpack.c.bf16 %v4048_v53, %v4048_v53  ;;  %v10756_v53 = vld [vmem:[%s12170_s7 + $0xe8] ss:$16 sps:$4 sm:$0xff]  }
 0xd99   :  { %v4150_v5 = vadd.f32 1.0, %v6549_v51  ;;  %v6551_v26 = vpop.eup %6550  ;;  %v10762_v51 = vld [vmem:[%s12171_s9 + $0x4] ss:$16 sps:$4 sm:$0xff]  }
 0xd9a   :  { %v4151_v29 = vadd.f32 1.0, %v6551_v26  ;;  %v10567_v31 = vsel %vm4049_vm3, %v4053_v0, %v3830_v63  ;;  %4199 = vmatprep.mubr.bf16.mxu0 %v4166_v43  ;;  %4240 = vmatprep.mubr.bf16.mxu1 %v4166_v43  ;;  %v6553_v60 = vpop.eup %6552  ;;  %v10776_v0 = vld [vmem:[%s12171_s9] ss:$16 sps:$4 sm:$0xff]   ;;  %v10782_v43 = vld [vmem:[%s12171_s9 + $0x8] ss:$16 sps:$4 sm:$0xff]  }
 0xd9b   :  { %6556 = vrcp.f32 %v4150_v5  ;;  %v6555_v33 = vpop.eup %6554  ;;  %v10768_v5 = vld [vmem:[%s12171_s9 + $0xc] ss:$16 sps:$4 sm:$0xff]   ;;  %13439 = vst [vmem:[#allocation60_spill] sm:$0xff] %v10782_v43  ;;  %v10788_v26 = vld [vmem:[%s12171_s9 + $0x24] ss:$16 sps:$4 sm:$0xff]  }
 0xd9c   :  { %6558 = vrcp.f32 %v4151_v29  ;;  %v4152_v42 = vadd.f32 1.0, %v6555_v33  ;;  %13440 = vst [vmem:[#allocation68_spill] sm:$0xff] %v10788_v26  ;;  %v10794_v63 = vld [vmem:[%s12171_s9 + $0x2c] ss:$16 sps:$4 sm:$0xff]   ;;  %v10800_v29 = vld [vmem:[%s12171_s9 + $0x20] ss:$16 sps:$4 sm:$0xff]  }
 0xd9d   :  { %13441 = vst [vmem:[#allocation7_spill] sm:$0xff] %v10794_v63  ;;  %13442 = vst [vmem:[#allocation56_spill] sm:$0xff] %v10800_v29  ;;  %v10812_v33 = vld [vmem:[%s12171_s9 + $0x44] ss:$16 sps:$4 sm:$0xff]  }
 0xd9e   :  { %6560 = vrcp.f32 %v4152_v42  ;;  %13444 = vst [vmem:[#allocation12_spill] sm:$0xff] %v10812_v33  ;;  %v10836_v42 = vld [vmem:[%s12171_s9 + $0x64] ss:$16 sps:$4 sm:$0xff]  }
 0xd9f   :  { %13448 = vst [vmem:[#allocation4_spill] sm:$0xff] %v10836_v42 }
 0xda5   :  { %v6557_v37 = vpop.eup %6556 }
 0xda6   :  { %v4161_v40 = vmul.f32 %v6557_v37, %v6553_v60  ;;  %v6559_v41 = vpop.eup %6558  ;;  %v10806_v60 = vld [vmem:[%s12171_s9 + $0x28] ss:$16 sps:$4 sm:$0xff]   ;;  %v10818_v37 = vld [vmem:[%s12171_s9 + $0x4c] ss:$16 sps:$4 sm:$0xff]  }
 0xda7   :  { %v4160_v44 = vmul.f32 %v6559_v41, %v10439_v52  ;;  %v10586_v52 = vld [vmem:[%s12170_s7 + $0x8] ss:$16 sps:$4 sm:$0xff]   ;;  %13443 = vst [vmem:[#allocation64_spill] sm:$0xff] %v10806_v60  ;;  %13445 = vst [vmem:[#allocation13_spill] sm:$0xff] %v10818_v37 }
 0xda8   :  { %v6561_v25 = vpop.eup %6560  ;;  %v10830_v41 = vld [vmem:[%s12171_s9 + $0x48] ss:$16 sps:$4 sm:$0xff]  }
 0xda9   :  { %v10570_v45 = vadd.f32 %v4161_v40, %v4160_v44  ;;  %v10824_v40 = vld [vmem:[%s12171_s9 + $0x40] ss:$16 sps:$4 sm:$0xff]   ;;  %13447 = vst [vmem:[#allocation2_spill] sm:$0xff] %v10830_v41  ;;  %v10842_v44 = vld [vmem:[%s12171_s9 + $0x6c] ss:$16 sps:$4 sm:$0xff]  }
 0xdaa   :  { %13446 = vst [vmem:[#allocation14_spill] sm:$0xff] %v10824_v40  ;;  %13449 = vst [vmem:[#allocation57_spill] sm:$0xff] %v10842_v44 }
 0xdab   :  { %6562 = vtanh.f32 %v10570_v45 }
 0xdb5   :  { %v6563_v11 = vpop.eup %6562 }
 0xdb6   :  { %v4164_v4 = vmul.f32 %v6563_v11, %v6561_v25  ;;  %v10848_v25 = vld [vmem:[%s12171_s9 + $0x60] ss:$16 sps:$4 sm:$0xff]   ;;  %v10854_v11 = vld [vmem:[%s12171_s9 + $0x68] ss:$16 sps:$4 sm:$0xff]  }
 0xdb7   :  { %13450 = vst [vmem:[#allocation58_spill] sm:$0xff] %v10848_v25  ;;  %13451 = vst [vmem:[#allocation15_spill] sm:$0xff] %v10854_v11 }
 0xdb8   :  { %v10573_v23 = vpack.c.bf16 %v4164_v4, %v4164_v4  ;;  %v10860_v4 = vld [vmem:[%s12171_s9 + $0x84] ss:$16 sps:$4 sm:$0xff]  }
 0xdb9   :  { %13452 = vst [vmem:[#allocation16_spill] sm:$0xff] %v10860_v4 }
 0xdba   :  { %4200 = vmatmul.mubr.bf16.vlgmr.msra.gmra.mrb[88].mxu0 %v10573_v23  ;;  %4241 = vmatmul.mubr.bf16.vlgmr.msra.gmra.mrb[96].mxu1 %v10573_v23 }
 0xdbb   :  { %4280 = vmatpush1.bf16.msra.mxu0 %v10580_v21  ;;  %4321 = vmatpush1.bf16.msra.mxu1 %v10586_v52 }
 0xdbc   :  { %4281 = vmatprep.subr.bf16.mxu0 %v10592_v58  ;;  %4322 = vmatprep.subr.bf16.mxu1 %v10598_v14 }
 0xdbd   :  { %4311 = vmatprep.mubr.bf16.mxu0 %v12855_v9  ;;  %4352 = vmatprep.mubr.bf16.mxu1 %v12855_v9 }
 0xdbf   :  { %4282 = vmatpush1.bf16.msra.mxu0 %v10606_v61  ;;  %4323 = vmatpush1.bf16.msra.mxu1 %v10612_v20 }
 0xdc0   :  { %4283 = vmatprep.subr.bf16.mxu0 %v10618_v28  ;;  %4324 = vmatprep.subr.bf16.mxu1 %v10624_v59 }
 0xdc3   :  { %4284 = vmatpush1.bf16.msra.mxu0 %v10630_v38  ;;  %4325 = vmatpush1.bf16.msra.mxu1 %v10636_v32 }
 0xdc4   :  { %4285 = vmatprep.subr.bf16.mxu0 %v10642_v27  ;;  %4326 = vmatprep.subr.bf16.mxu1 %v10648_v57 }
 0xdc7   :  { %4286 = vmatpush1.bf16.msra.mxu0 %v10654_v17  ;;  %4327 = vmatpush1.bf16.msra.mxu1 %v10660_v22 }
 0xdc8   :  { %4287 = vmatprep.subr.bf16.mxu0 %v10666_v15  ;;  %4328 = vmatprep.subr.bf16.mxu1 %v10672_v12 }
 0xdcb   :  { %4288 = vmatpush1.bf16.msra.mxu0 %v10678_v30  ;;  %4329 = vmatpush1.bf16.msra.mxu1 %v10684_v8 }
 0xdcc   :  { %4289 = vmatprep.subr.bf16.mxu0 %v10690_v1  ;;  %4330 = vmatprep.subr.bf16.mxu1 %v10696_v50 }
 0xdcf   :  { %4290 = vmatpush1.bf16.msra.mxu0 %v10702_v62  ;;  %4331 = vmatpush1.bf16.msra.mxu1 %v10708_v46 }
 0xdd0   :  { %4291 = vmatprep.subr.bf16.mxu0 %v10714_v2  ;;  %4332 = vmatprep.subr.bf16.mxu1 %v10720_v55 }
 0xdd3   :  { %4292 = vmatpush1.bf16.msra.mxu0 %v10726_v19  ;;  %4333 = vmatpush1.bf16.msra.mxu1 %v10732_v3 }
 0xdd4   :  { %4293 = vmatprep.subr.bf16.mxu0 %v10738_v35  ;;  %4334 = vmatprep.subr.bf16.mxu1 %v10744_v49 }
 0xdd7   :  { %4294 = vmatpush1.bf16.msra.mxu0 %v10750_v54  ;;  %4335 = vmatpush1.bf16.msra.mxu1 %v10756_v53 }
 0xdd8   :  { %4391 = vmatprep.subr.bf16.mxu0 %v10762_v51  ;;  %4432 = vmatprep.subr.bf16.mxu1 %v10768_v5 }
 0xdda   :  { %4312 = vmatmul.mubr.bf16.vlgmr.msra.gmra.mrb[92].mxu0 %v10573_v23  ;;  %4353 = vmatmul.mubr.bf16.vlgmr.msra.gmra.mrb[100].mxu1 %v10573_v23  ;;  %v10866_v23 = vld [vmem:[%s12171_s9 + $0x8c] ss:$16 sps:$4 sm:$0xff]  }
 0xddb   :  { %4392 = vmatpush1.bf16.msra.mxu0 %v10776_v0  ;;  %4433 = vmatpush1.bf16.msra.mxu1 %v10782_v43  ;;  %13453 = vst [vmem:[#allocation17_spill] sm:$0xff] %v10866_v23 }
 0xddc   :  { %4393 = vmatprep.subr.bf16.mxu0 %v10788_v26  ;;  %4434 = vmatprep.subr.bf16.mxu1 %v10794_v63 }
 0xddf   :  { %4394 = vmatpush1.bf16.msra.mxu0 %v10800_v29  ;;  %4435 = vmatpush1.bf16.msra.mxu1 %v10806_v60 }
 0xde0   :  { %4395 = vmatprep.subr.bf16.mxu0 %v10812_v33  ;;  %4436 = vmatprep.subr.bf16.mxu1 %v10818_v37 }
 0xde3   :  { %4396 = vmatpush1.bf16.msra.mxu0 %v10824_v40  ;;  %4437 = vmatpush1.bf16.msra.mxu1 %v10830_v41 }
 0xde4   :  { %4397 = vmatprep.subr.bf16.mxu0 %v10836_v42  ;;  %4438 = vmatprep.subr.bf16.mxu1 %v10842_v44 }
 0xde7   :  { %4398 = vmatpush1.bf16.msra.mxu0 %v10848_v25  ;;  %4439 = vmatpush1.bf16.msra.mxu1 %v10854_v11  ;;  %v10872_v25 = vld [vmem:[%s12171_s9 + $0x80] ss:$16 sps:$4 sm:$0xff]   ;;  %v10878_v11 = vld [vmem:[%s12171_s9 + $0x88] ss:$16 sps:$4 sm:$0xff]  }
 0xde8   :  { %4399 = vmatprep.subr.bf16.mxu0 %v10860_v4  ;;  %4440 = vmatprep.subr.bf16.mxu1 %v10866_v23  ;;  %13454 = vst [vmem:[#allocation18_spill] sm:$0xff] %v10872_v25  ;;  %13455 = vst [vmem:[#allocation19_spill] sm:$0xff] %v10878_v11  ;;  %v10884_v4 = vld [vmem:[%s12171_s9 + $0xa4] ss:$16 sps:$4 sm:$0xff]   ;;  %v10890_v23 = vld [vmem:[%s12171_s9 + $0xac] ss:$16 sps:$4 sm:$0xff]  }
 0xde9   :  { %13456 = vst [vmem:[#allocation20_spill] sm:$0xff] %v10884_v4  ;;  %13457 = vst [vmem:[#allocation21_spill] sm:$0xff] %v10890_v23 }
 0xdeb   :  { %4400 = vmatpush1.bf16.msra.mxu0 %v10872_v25  ;;  %4441 = vmatpush1.bf16.msra.mxu1 %v10878_v11  ;;  %v10896_v25 = vld [vmem:[%s12171_s9 + $0xa0] ss:$16 sps:$4 sm:$0xff]   ;;  %v10902_v11 = vld [vmem:[%s12171_s9 + $0xa8] ss:$16 sps:$4 sm:$0xff]  }
 0xdec   :  { %4401 = vmatprep.subr.bf16.mxu0 %v10884_v4  ;;  %4442 = vmatprep.subr.bf16.mxu1 %v10890_v23  ;;  %13458 = vst [vmem:[#allocation22_spill] sm:$0xff] %v10896_v25  ;;  %13459 = vst [vmem:[#allocation23_spill] sm:$0xff] %v10902_v11  ;;  %v10908_v4 = vld [vmem:[%s12171_s9 + $0xc4] ss:$16 sps:$4 sm:$0xff]   ;;  %v10914_v23 = vld [vmem:[%s12171_s9 + $0xcc] ss:$16 sps:$4 sm:$0xff]  }
 0xded   :  { %13460 = vst [vmem:[#allocation10_spill] sm:$0xff] %v10908_v4  ;;  %13461 = vst [vmem:[#allocation11_spill] sm:$0xff] %v10914_v23 }
 0xdef   :  { %4402 = vmatpush1.bf16.msra.mxu0 %v10896_v25  ;;  %4443 = vmatpush1.bf16.msra.mxu1 %v10902_v11  ;;  %v10920_v25 = vld [vmem:[%s12171_s9 + $0xc0] ss:$16 sps:$4 sm:$0xff]   ;;  %v10926_v11 = vld [vmem:[%s12171_s9 + $0xc8] ss:$16 sps:$4 sm:$0xff]  }
 0xdf0   :  { %4403 = vmatprep.subr.bf16.mxu0 %v10908_v4  ;;  %4444 = vmatprep.subr.bf16.mxu1 %v10914_v23  ;;  %13462 = vst [vmem:[#allocation69_spill] sm:$0xff] %v10920_v25  ;;  %13463 = vst [vmem:[#allocation24_spill] sm:$0xff] %v10926_v11  ;;  %v10932_v4 = vld [vmem:[%s12171_s9 + $0xe4] ss:$16 sps:$4 sm:$0xff]   ;;  %v10938_v23 = vld [vmem:[%s12171_s9 + $0xec] ss:$16 sps:$4 sm:$0xff]  }
 0xdf1   :  { %13464 = vst [vmem:[#allocation25_spill] sm:$0xff] %v10932_v4  ;;  %13465 = vst [vmem:[#allocation26_spill] sm:$0xff] %v10938_v23 }
 0xdf3   :  { %4404 = vmatpush1.bf16.msra.mxu0 %v10920_v25  ;;  %4445 = vmatpush1.bf16.msra.mxu1 %v10926_v11  ;;  %v10944_v25 = vld [vmem:[%s12171_s9 + $0xe0] ss:$16 sps:$4 sm:$0xff]   ;;  %v10950_v11 = vld [vmem:[%s12171_s9 + $0xe8] ss:$16 sps:$4 sm:$0xff]  }
 0xdf4   :  { %4405 = vmatprep.subr.bf16.mxu0 %v10932_v4  ;;  %4446 = vmatprep.subr.bf16.mxu1 %v10938_v23  ;;  %13466 = vst [vmem:[#allocation27_spill] sm:$0xff] %v10944_v25  ;;  %13467 = vst [vmem:[#allocation28_spill] sm:$0xff] %v10950_v11  ;;  %v10956_v4 = vld [vmem:[%s12171_s9 + $0x104] ss:$16 sps:$4 sm:$0xff]   ;;  %v10962_v23 = vld [vmem:[%s12171_s9 + $0x10c] ss:$16 sps:$4 sm:$0xff]  }
 0xdf5   :  { %13468 = vst [vmem:[#allocation29_spill] sm:$0xff] %v10956_v4  ;;  %13469 = vst [vmem:[#allocation30_spill] sm:$0xff] %v10962_v23 }
 0xdf7   :  { %4406 = vmatpush1.bf16.msra.mxu0 %v10944_v25  ;;  %4447 = vmatpush1.bf16.msra.mxu1 %v10950_v11  ;;  %v10968_v25 = vld [vmem:[%s12171_s9 + $0x100] ss:$16 sps:$4 sm:$0xff]   ;;  %v10974_v11 = vld [vmem:[%s12171_s9 + $0x108] ss:$16 sps:$4 sm:$0xff]  }
 0xdf8   :  { %4407 = vmatprep.subr.bf16.mxu0 %v10956_v4  ;;  %4448 = vmatprep.subr.bf16.mxu1 %v10962_v23  ;;  %13470 = vst [vmem:[#allocation31_spill] sm:$0xff] %v10968_v25  ;;  %13471 = vst [vmem:[#allocation32_spill] sm:$0xff] %v10974_v11  ;;  %v10980_v4 = vld [vmem:[%s12171_s9 + $0x124] ss:$16 sps:$4 sm:$0xff]   ;;  %v10986_v23 = vld [vmem:[%s12171_s9 + $0x12c] ss:$16 sps:$4 sm:$0xff]  }
 0xdf9   :  { %13472 = vst [vmem:[#allocation33_spill] sm:$0xff] %v10980_v4  ;;  %13473 = vst [vmem:[#allocation34_spill] sm:$0xff] %v10986_v23 }
 0xdfb   :  { %4408 = vmatpush1.bf16.msra.mxu0 %v10968_v25  ;;  %4449 = vmatpush1.bf16.msra.mxu1 %v10974_v11  ;;  %v10992_v25 = vld [vmem:[%s12171_s9 + $0x120] ss:$16 sps:$4 sm:$0xff]   ;;  %v10998_v11 = vld [vmem:[%s12171_s9 + $0x128] ss:$16 sps:$4 sm:$0xff]  }
 0xdfc   :  { %4409 = vmatprep.subr.bf16.mxu0 %v10980_v4  ;;  %4450 = vmatprep.subr.bf16.mxu1 %v10986_v23  ;;  %13474 = vst [vmem:[#allocation35_spill] sm:$0xff] %v10992_v25  ;;  %13475 = vst [vmem:[#allocation36_spill] sm:$0xff] %v10998_v11  ;;  %v11004_v4 = vld [vmem:[%s12171_s9 + $0x144] ss:$16 sps:$4 sm:$0xff]   ;;  %v11010_v23 = vld [vmem:[%s12171_s9 + $0x14c] ss:$16 sps:$4 sm:$0xff]  }
 0xdfd   :  { %13476 = vst [vmem:[#allocation37_spill] sm:$0xff] %v11004_v4  ;;  %13477 = vst [vmem:[#allocation38_spill] sm:$0xff] %v11010_v23 }
 0xdff   :  { %4410 = vmatpush1.bf16.msra.mxu0 %v10992_v25  ;;  %4451 = vmatpush1.bf16.msra.mxu1 %v10998_v11  ;;  %v11016_v25 = vld [vmem:[%s12171_s9 + $0x140] ss:$16 sps:$4 sm:$0xff]   ;;  %v11022_v11 = vld [vmem:[%s12171_s9 + $0x148] ss:$16 sps:$4 sm:$0xff]  }
 0xe00   :  { %4411 = vmatprep.subr.bf16.mxu0 %v11004_v4  ;;  %4452 = vmatprep.subr.bf16.mxu1 %v11010_v23  ;;  %13478 = vst [vmem:[#allocation39_spill] sm:$0xff] %v11016_v25  ;;  %13479 = vst [vmem:[#allocation40_spill] sm:$0xff] %v11022_v11  ;;  %v11028_v4 = vld [vmem:[%s12171_s9 + $0x164] ss:$16 sps:$4 sm:$0xff]   ;;  %v11034_v23 = vld [vmem:[%s12171_s9 + $0x16c] ss:$16 sps:$4 sm:$0xff]  }
 0xe01   :  { %13480 = vst [vmem:[#allocation41_spill] sm:$0xff] %v11028_v4  ;;  %13481 = vst [vmem:[#allocation42_spill] sm:$0xff] %v11034_v23 }
 0xe03   :  { %4412 = vmatpush1.bf16.msra.mxu0 %v11016_v25  ;;  %4453 = vmatpush1.bf16.msra.mxu1 %v11022_v11  ;;  %v11040_v25 = vld [vmem:[%s12171_s9 + $0x160] ss:$16 sps:$4 sm:$0xff]   ;;  %v11046_v11 = vld [vmem:[%s12171_s9 + $0x168] ss:$16 sps:$4 sm:$0xff]  }
 0xe04   :  { %4413 = vmatprep.subr.bf16.mxu0 %v11028_v4  ;;  %4454 = vmatprep.subr.bf16.mxu1 %v11034_v23  ;;  %13482 = vst [vmem:[#allocation43_spill] sm:$0xff] %v11040_v25  ;;  %13483 = vst [vmem:[#allocation44_spill] sm:$0xff] %v11046_v11  ;;  %v11052_v4 = vld [vmem:[%s12171_s9 + $0x184] ss:$16 sps:$4 sm:$0xff]   ;;  %v11058_v23 = vld [vmem:[%s12171_s9 + $0x18c] ss:$16 sps:$4 sm:$0xff]  }
 0xe05   :  { %13484 = vst [vmem:[#allocation45_spill] sm:$0xff] %v11052_v4  ;;  %13485 = vst [vmem:[#allocation46_spill] sm:$0xff] %v11058_v23 }
 0xe07   :  { %4414 = vmatpush1.bf16.msra.mxu0 %v11040_v25  ;;  %4455 = vmatpush1.bf16.msra.mxu1 %v11046_v11  ;;  %v11064_v25 = vld [vmem:[%s12171_s9 + $0x180] ss:$16 sps:$4 sm:$0xff]   ;;  %v11070_v11 = vld [vmem:[%s12171_s9 + $0x188] ss:$16 sps:$4 sm:$0xff]  }
 0xe08   :  { %4415 = vmatprep.subr.bf16.mxu0 %v11052_v4  ;;  %4456 = vmatprep.subr.bf16.mxu1 %v11058_v23  ;;  %13486 = vst [vmem:[#allocation47_spill] sm:$0xff] %v11064_v25  ;;  %13487 = vst [vmem:[#allocation48_spill] sm:$0xff] %v11070_v11  ;;  %v11076_v4 = vld [vmem:[%s12171_s9 + $0x1a4] ss:$16 sps:$4 sm:$0xff]   ;;  %v11082_v23 = vld [vmem:[%s12171_s9 + $0x1ac] ss:$16 sps:$4 sm:$0xff]  }
 0xe09   :  { %13488 = vst [vmem:[#allocation49_spill] sm:$0xff] %v11076_v4  ;;  %13489 = vst [vmem:[#allocation50_spill] sm:$0xff] %v11082_v23 }
 0xe0b   :  { %4416 = vmatpush1.bf16.msra.mxu0 %v11064_v25  ;;  %4457 = vmatpush1.bf16.msra.mxu1 %v11070_v11  ;;  %v11088_v25 = vld [vmem:[%s12171_s9 + $0x1a0] ss:$16 sps:$4 sm:$0xff]   ;;  %v11094_v11 = vld [vmem:[%s12171_s9 + $0x1a8] ss:$16 sps:$4 sm:$0xff]  }
 0xe0c   :  { %4417 = vmatprep.subr.bf16.mxu0 %v11076_v4  ;;  %4458 = vmatprep.subr.bf16.mxu1 %v11082_v23  ;;  %13490 = vst [vmem:[#allocation51_spill] sm:$0xff] %v11088_v25  ;;  %13491 = vst [vmem:[#allocation52_spill] sm:$0xff] %v11094_v11  ;;  %v11100_v4 = vld [vmem:[%s12171_s9 + $0x1c4] ss:$16 sps:$4 sm:$0xff]   ;;  %v11106_v23 = vld [vmem:[%s12171_s9 + $0x1cc] ss:$16 sps:$4 sm:$0xff]  }
 0xe0d   :  { %13492 = vst [vmem:[#allocation53_spill] sm:$0xff] %v11100_v4  ;;  %13493 = vst [vmem:[#allocation54_spill] sm:$0xff] %v11106_v23 }
 0xe0f   :  { %4418 = vmatpush1.bf16.msra.mxu0 %v11088_v25  ;;  %4459 = vmatpush1.bf16.msra.mxu1 %v11094_v11  ;;  %v11112_v25 = vld [vmem:[%s12171_s9 + $0x1c0] ss:$16 sps:$4 sm:$0xff]   ;;  %v11118_v11 = vld [vmem:[%s12171_s9 + $0x1c8] ss:$16 sps:$4 sm:$0xff]  }
 0xe10   :  { %4419 = vmatprep.subr.bf16.mxu0 %v11100_v4  ;;  %4460 = vmatprep.subr.bf16.mxu1 %v11106_v23  ;;  %13494 = vst [vmem:[#allocation5_spill] sm:$0xff] %v11112_v25  ;;  %13495 = vst [vmem:[#allocation6_spill] sm:$0xff] %v11118_v11  ;;  %v11124_v4 = vld [vmem:[%s12171_s9 + $0x1e4] ss:$16 sps:$4 sm:$0xff]   ;;  %v11130_v23 = vld [vmem:[%s12171_s9 + $0x1ec] ss:$16 sps:$4 sm:$0xff]  }
 0xe11   :  { %13496 = vst [vmem:[#allocation9_spill] sm:$0xff] %v11124_v4  ;;  %13497 = vst [vmem:[#allocation61_spill] sm:$0xff] %v11130_v23 }
 0xe13   :  { %4420 = vmatpush1.bf16.msra.mxu0 %v11112_v25  ;;  %4461 = vmatpush1.bf16.msra.mxu1 %v11118_v11  ;;  %v11136_v25 = vld [vmem:[%s12171_s9 + $0x1e0] ss:$16 sps:$4 sm:$0xff]   ;;  %v11142_v11 = vld [vmem:[%s12171_s9 + $0x1e8] ss:$16 sps:$4 sm:$0xff]  }
 0xe14   :  { %4421 = vmatprep.subr.bf16.mxu0 %v11124_v4  ;;  %4462 = vmatprep.subr.bf16.mxu1 %v11130_v23  ;;  %13498 = vst [vmem:[#allocation62_spill] sm:$0xff] %v11136_v25  ;;  %13499 = vst [vmem:[#allocation65_spill] sm:$0xff] %v11142_v11 }
 0xe17   :  { %4422 = vmatpush1.bf16.msra.mxu0 %v11136_v25  ;;  %4463 = vmatpush1.bf16.msra.mxu1 %v11142_v11 }
 0xe18   :  { %4503 = vmatprep.subr.bf16.mxu0 %v10541_v7  ;;  %4544 = vmatprep.subr.bf16.mxu1 %v10547_v10 }
 0xe8d   :  { %v4201_v4 = vpop.f32.mrb[88].mxu0  ;;  %v4242_v23 = vpop.f32.mrb[96].mxu1 }
 0xe8e   :  { %v4202_v44 = vadd.f32 %v4201_v4, %v13434_v34  ;;  %v4203_v42 = vpop.f32.mrb[89].mxu0  ;;  %v4244_v41 = vpop.f32.mrb[97].mxu1  ;;  %v4243_v7 = vadd.f32 %v4242_v23, %v13435_v18 }
 0xe8f   :  { %v4204_v40 = vadd.f32 %v4203_v42, %v10415_v47  ;;  %v4205_v25 = vpop.f32.mrb[90].mxu0  ;;  %v4246_v37 = vpop.f32.mrb[98].mxu1  ;;  %v4245_v10 = vadd.f32 %v4244_v41, %v10423_v36 }
 0xe90   :  { %v5807_v33 = vmul.f32 -1.442695, %v4202_v44  ;;  %v4206_v60 = vpop.f32.mrb[91].mxu0  ;;  %v4247_v29 = vpop.f32.mrb[99].mxu1  ;;  %v5809_v11 = vmul.f32 -1.442695, %v4243_v7 }
 0xe91   :  { %v5808_v63 = vmul.f32 -1.442695, %v4204_v40 }
 0xe92   :  { %6564 = vpow2.f32 %v5807_v33 }
 0xe93   :  { %6566 = vpow2.f32 %v5808_v63 }
 0xe94   :  { %6568 = vtanh.f32 %v4245_v10 }
 0xe95   :  { %6570 = vpow2.f32 %v5809_v11 }
 0xe9c   :  { %v6565_v26 = vpop.eup %6564 }
 0xe9d   :  { %v4258_v43 = vadd.f32 1.0, %v6565_v26  ;;  %v6567_v4 = vpop.eup %6566 }
 0xe9e   :  { %v4259_v42 = vadd.f32 1.0, %v6567_v4  ;;  %v6569_v37 = vpop.eup %6568 }
 0xe9f   :  { %6572 = vrcp.f32 %v4258_v43  ;;  %v6571_v44 = vpop.eup %6570 }
 0xea0   :  { %6574 = vrcp.f32 %v4259_v42  ;;  %v4260_v33 = vadd.f32 1.0, %v6571_v44 }
 0xea2   :  { %6576 = vrcp.f32 %v4260_v33 }
 0xea9   :  { %v6573_v60 = vpop.eup %6572 }
 0xeaa   :  { %v4269_v29 = vmul.f32 %v6573_v60, %v6569_v37  ;;  %v6575_v40 = vpop.eup %6574 }
 0xeab   :  { %v4268_v63 = vmul.f32 %v6575_v40, %v10555_v16 }
 0xead   :  { %v4313_v25 = vpop.f32.mrb[92].mxu0  ;;  %v4354_v23 = vpop.f32.mrb[100].mxu1  ;;  %v11152_v41 = vadd.f32 %v4269_v29, %v4268_v63 }
 0xeae   :  { %v4361_v7 = vadd.f32 %v4313_v25, %v13436_v6  ;;  %v4315_v10 = vpop.f32.mrb[93].mxu0  ;;  %v4356_v26 = vpop.f32.mrb[101].mxu1  ;;  %v4363_v16 = vadd.f32 %v4354_v23, %v10301_v13 }
 0xeaf   :  { %v4362_v43 = vadd.f32 %v4315_v10, %v13376_v24  ;;  %v4317_v11 = vpop.f32.mrb[94].mxu0  ;;  %v4358_v4 = vpop.f32.mrb[102].mxu1  ;;  %6578 = vtanh.f32 %v11152_v41  ;;  %v4364_v40 = vadd.f32 %v4356_v26, %v10304_v56 }
 0xeb0   :  { %v5810_v42 = vmul.f32 -1.442695, %v4361_v7  ;;  %v4318_v37 = vpop.f32.mrb[95].mxu0  ;;  %v4359_v44 = vpop.f32.mrb[103].mxu1  ;;  %v5812_v25 = vmul.f32 -1.442695, %v4363_v16 }
 0xeb1   :  { %v5811_v60 = vmul.f32 -1.442695, %v4362_v43  ;;  %v6577_v29 = vpop.eup %6576 }
 0xeb2   :  { %6580 = vpow2.f32 %v5810_v42 }
 0xeb3   :  { %6582 = vpow2.f32 %v5811_v60 }
 0xeb4   :  { %6584 = vtanh.f32 %v4364_v40 }
 0xeb5   :  { %6586 = vpow2.f32 %v5812_v25 }
 0xeb9   :  { %v6579_v63 = vpop.eup %6578 }
 0xeba   :  { %v4272_v33 = vmul.f32 %v6579_v63, %v6577_v29 }
 0xebc   :  { %v6581_v6 = vpop.eup %6580  ;;  %v4277_v7 = vrot.slane %v4272_v33, %v13437_v48  ;;  %v4390_v11 = vpack.c.bf16 %v4272_v33, %v4272_v33  ;;  %v13501_v33 = vld [vmem:[#allocation68_spill] sm:$0xff] }
 0xebd   :  { %v4374_v10 = vadd.f32 1.0, %v6581_v6  ;;  %v6583_v4 = vpop.eup %6582 }
 0xebe   :  { %v4375_v43 = vadd.f32 1.0, %v6583_v4  ;;  %v11162_v23 = vsel %vm4273_vm4, %v4277_v7, %v10567_v31  ;;  %4423 = vmatprep.mubr.bf16.mxu0 %v4390_v11  ;;  %4464 = vmatprep.mubr.bf16.mxu1 %v4390_v11  ;;  %v6585_v26 = vpop.eup %6584  ;;  %v13503_v7 = vld [vmem:[#allocation56_spill] sm:$0xff] }
 0xebf   :  { %6588 = vrcp.f32 %v4374_v10  ;;  %v6587_v42 = vpop.eup %6586  ;;  %v13502_v10 = vld [vmem:[#allocation7_spill] sm:$0xff]  ;;  %v13504_v11 = vld [vmem:[#allocation64_spill] sm:$0xff] }
 0xec0   :  { %6590 = vrcp.f32 %v4375_v43  ;;  %v4376_v6 = vadd.f32 1.0, %v6587_v42  ;;  %v13505_v4 = vld [vmem:[#allocation12_spill] sm:$0xff]  ;;  %v13506_v43 = vld [vmem:[#allocation13_spill] sm:$0xff]  ;;  %v13508_v42 = vld [vmem:[#allocation2_spill] sm:$0xff] }
 0xec2   :  { %6592 = vrcp.f32 %v4376_v6  ;;  %v13512_v6 = vld [vmem:[#allocation15_spill] sm:$0xff] }
 0xec9   :  { %v6589_v37 = vpop.eup %6588 }
 0xeca   :  { %v4385_v44 = vmul.f32 %v6589_v37, %v6585_v26  ;;  %v6591_v60 = vpop.eup %6590  ;;  %v13507_v26 = vld [vmem:[#allocation14_spill] sm:$0xff]  ;;  %v13509_v37 = vld [vmem:[#allocation4_spill] sm:$0xff] }
 0xecb   :  { %v4384_v16 = vmul.f32 %v6591_v60, %v10570_v45  ;;  %v13500_v45 = vld [vmem:[#allocation60_spill] sm:$0xff]  ;;  %v13511_v60 = vld [vmem:[#allocation58_spill] sm:$0xff] }
 0xecc   :  { %v6593_v40 = vpop.eup %6592 }
 0xecd   :  { %v11165_v29 = vadd.f32 %v4385_v44, %v4384_v16  ;;  %v13510_v44 = vld [vmem:[#allocation57_spill] sm:$0xff]  ;;  %v13513_v16 = vld [vmem:[#allocation16_spill] sm:$0xff] }
 0xecf   :  { %6594 = vtanh.f32 %v11165_v29 }
 0xed9   :  { %v6595_v63 = vpop.eup %6594 }
 0xeda   :  { %v4388_v31 = vmul.f32 %v6595_v63, %v6593_v40  ;;  %v13514_v40 = vld [vmem:[#allocation17_spill] sm:$0xff]  ;;  %v13515_v63 = vld [vmem:[#allocation18_spill] sm:$0xff] }
 0xedc   :  { %v4389_v25 = vpack.c.bf16 %v4388_v31, %v4388_v31  ;;  %v13516_v31 = vld [vmem:[#allocation19_spill] sm:$0xff] }
 0xede   :  { %4424 = vmatmul.mubr.bf16.vlgmr.msra.gmra.mrb[96].mxu0 %v4389_v25  ;;  %4465 = vmatmul.mubr.bf16.vlgmr.msra.gmra.mrb[104].mxu1 %v4389_v25 }
 0xedf   :  { %4504 = vmatpush1.bf16.msra.mxu0 %v10580_v21  ;;  %4545 = vmatpush1.bf16.msra.mxu1 %v10586_v52 }
 0xee0   :  { %4505 = vmatprep.subr.bf16.mxu0 %v10592_v58  ;;  %4546 = vmatprep.subr.bf16.mxu1 %v10598_v14 }
 0xee1   :  { %4535 = vmatprep.mubr.bf16.mxu0 %v12855_v9  ;;  %4576 = vmatprep.mubr.bf16.mxu1 %v12855_v9 }
 0xee3   :  { %4506 = vmatpush1.bf16.msra.mxu0 %v10606_v61  ;;  %4547 = vmatpush1.bf16.msra.mxu1 %v10612_v20 }
 0xee4   :  { %4507 = vmatprep.subr.bf16.mxu0 %v10618_v28  ;;  %4548 = vmatprep.subr.bf16.mxu1 %v10624_v59 }
 0xee7   :  { %4508 = vmatpush1.bf16.msra.mxu0 %v10630_v38  ;;  %4549 = vmatpush1.bf16.msra.mxu1 %v10636_v32 }
 0xee8   :  { %4509 = vmatprep.subr.bf16.mxu0 %v10642_v27  ;;  %4550 = vmatprep.subr.bf16.mxu1 %v10648_v57 }
 0xeeb   :  { %4510 = vmatpush1.bf16.msra.mxu0 %v10654_v17  ;;  %4551 = vmatpush1.bf16.msra.mxu1 %v10660_v22 }
 0xeec   :  { %4511 = vmatprep.subr.bf16.mxu0 %v10666_v15  ;;  %4552 = vmatprep.subr.bf16.mxu1 %v10672_v12 }
 0xeef   :  { %4512 = vmatpush1.bf16.msra.mxu0 %v10678_v30  ;;  %4553 = vmatpush1.bf16.msra.mxu1 %v10684_v8 }
 0xef0   :  { %4513 = vmatprep.subr.bf16.mxu0 %v10690_v1  ;;  %4554 = vmatprep.subr.bf16.mxu1 %v10696_v50 }
 0xef3   :  { %4514 = vmatpush1.bf16.msra.mxu0 %v10702_v62  ;;  %4555 = vmatpush1.bf16.msra.mxu1 %v10708_v46 }
 0xef4   :  { %4515 = vmatprep.subr.bf16.mxu0 %v10714_v2  ;;  %4556 = vmatprep.subr.bf16.mxu1 %v10720_v55 }
 0xef7   :  { %4516 = vmatpush1.bf16.msra.mxu0 %v10726_v19  ;;  %4557 = vmatpush1.bf16.msra.mxu1 %v10732_v3 }
 0xef8   :  { %4517 = vmatprep.subr.bf16.mxu0 %v10738_v35  ;;  %4558 = vmatprep.subr.bf16.mxu1 %v10744_v49 }
 0xefb   :  { %4518 = vmatpush1.bf16.msra.mxu0 %v10750_v54  ;;  %4559 = vmatpush1.bf16.msra.mxu1 %v10756_v53 }
 0xefc   :  { %4615 = vmatprep.subr.bf16.mxu0 %v10762_v51  ;;  %4656 = vmatprep.subr.bf16.mxu1 %v10768_v5 }
 0xefe   :  { %4536 = vmatmul.mubr.bf16.vlgmr.msra.gmra.mrb[100].mxu0 %v4389_v25  ;;  %4577 = vmatmul.mubr.bf16.vlgmr.msra.gmra.mrb[108].mxu1 %v4389_v25  ;;  %v13517_v25 = vld [vmem:[#allocation20_spill] sm:$0xff] }
 0xeff   :  { %4616 = vmatpush1.bf16.msra.mxu0 %v10776_v0  ;;  %4657 = vmatpush1.bf16.msra.mxu1 %v13500_v45 }
 0xf00   :  { %4617 = vmatprep.subr.bf16.mxu0 %v13501_v33  ;;  %4658 = vmatprep.subr.bf16.mxu1 %v13502_v10 }
 0xf03   :  { %4618 = vmatpush1.bf16.msra.mxu0 %v13503_v7  ;;  %4659 = vmatpush1.bf16.msra.mxu1 %v13504_v11 }
 0xf04   :  { %4619 = vmatprep.subr.bf16.mxu0 %v13505_v4  ;;  %4660 = vmatprep.subr.bf16.mxu1 %v13506_v43 }
 0xf07   :  { %4620 = vmatpush1.bf16.msra.mxu0 %v13507_v26  ;;  %4661 = vmatpush1.bf16.msra.mxu1 %v13508_v42  ;;  %v13518_v26 = vld [vmem:[#allocation21_spill] sm:$0xff]  ;;  %v13519_v42 = vld [vmem:[#allocation22_spill] sm:$0xff] }
 0xf08   :  { %4621 = vmatprep.subr.bf16.mxu0 %v13509_v37  ;;  %4662 = vmatprep.subr.bf16.mxu1 %v13510_v44  ;;  %v13520_v37 = vld [vmem:[#allocation23_spill] sm:$0xff]  ;;  %v13521_v44 = vld [vmem:[#allocation10_spill] sm:$0xff] }
 0xf0b   :  { %4622 = vmatpush1.bf16.msra.mxu0 %v13511_v60  ;;  %4663 = vmatpush1.bf16.msra.mxu1 %v13512_v6  ;;  %v13522_v60 = vld [vmem:[#allocation11_spill] sm:$0xff]  ;;  %v13523_v6 = vld [vmem:[#allocation69_spill] sm:$0xff] }
 0xf0c   :  { %4623 = vmatprep.subr.bf16.mxu0 %v13513_v16  ;;  %4664 = vmatprep.subr.bf16.mxu1 %v13514_v40  ;;  %v13524_v16 = vld [vmem:[#allocation24_spill] sm:$0xff]  ;;  %v13525_v40 = vld [vmem:[#allocation25_spill] sm:$0xff] }
 0xf0f   :  { %4624 = vmatpush1.bf16.msra.mxu0 %v13515_v63  ;;  %4665 = vmatpush1.bf16.msra.mxu1 %v13516_v31  ;;  %v13526_v63 = vld [vmem:[#allocation26_spill] sm:$0xff]  ;;  %v13527_v31 = vld [vmem:[#allocation27_spill] sm:$0xff] }
 0xf10   :  { %4625 = vmatprep.subr.bf16.mxu0 %v13517_v25  ;;  %4666 = vmatprep.subr.bf16.mxu1 %v13518_v26  ;;  %v13528_v25 = vld [vmem:[#allocation28_spill] sm:$0xff]  ;;  %v13529_v26 = vld [vmem:[#allocation29_spill] sm:$0xff] }
 0xf13   :  { %4626 = vmatpush1.bf16.msra.mxu0 %v13519_v42  ;;  %4667 = vmatpush1.bf16.msra.mxu1 %v13520_v37  ;;  %v13530_v42 = vld [vmem:[#allocation30_spill] sm:$0xff]  ;;  %v13531_v37 = vld [vmem:[#allocation31_spill] sm:$0xff] }
 0xf14   :  { %4627 = vmatprep.subr.bf16.mxu0 %v13521_v44  ;;  %4668 = vmatprep.subr.bf16.mxu1 %v13522_v60  ;;  %v13532_v44 = vld [vmem:[#allocation32_spill] sm:$0xff]  ;;  %v13533_v60 = vld [vmem:[#allocation33_spill] sm:$0xff] }
 0xf17   :  { %4628 = vmatpush1.bf16.msra.mxu0 %v13523_v6  ;;  %4669 = vmatpush1.bf16.msra.mxu1 %v13524_v16  ;;  %v13534_v6 = vld [vmem:[#allocation34_spill] sm:$0xff]  ;;  %v13535_v16 = vld [vmem:[#allocation35_spill] sm:$0xff] }
 0xf18   :  { %4629 = vmatprep.subr.bf16.mxu0 %v13525_v40  ;;  %4670 = vmatprep.subr.bf16.mxu1 %v13526_v63  ;;  %v13536_v40 = vld [vmem:[#allocation36_spill] sm:$0xff]  ;;  %v13537_v63 = vld [vmem:[#allocation37_spill] sm:$0xff] }
 0xf1b   :  { %4630 = vmatpush1.bf16.msra.mxu0 %v13527_v31  ;;  %4671 = vmatpush1.bf16.msra.mxu1 %v13528_v25  ;;  %v13538_v31 = vld [vmem:[#allocation38_spill] sm:$0xff]  ;;  %v13539_v25 = vld [vmem:[#allocation39_spill] sm:$0xff] }
 0xf1c   :  { %4631 = vmatprep.subr.bf16.mxu0 %v13529_v26  ;;  %4672 = vmatprep.subr.bf16.mxu1 %v13530_v42  ;;  %v13540_v26 = vld [vmem:[#allocation40_spill] sm:$0xff]  ;;  %v13541_v42 = vld [vmem:[#allocation41_spill] sm:$0xff] }
 0xf1f   :  { %4632 = vmatpush1.bf16.msra.mxu0 %v13531_v37  ;;  %4673 = vmatpush1.bf16.msra.mxu1 %v13532_v44  ;;  %v13542_v37 = vld [vmem:[#allocation42_spill] sm:$0xff]  ;;  %v13543_v44 = vld [vmem:[#allocation43_spill] sm:$0xff] }
 0xf20   :  { %4633 = vmatprep.subr.bf16.mxu0 %v13533_v60  ;;  %4674 = vmatprep.subr.bf16.mxu1 %v13534_v6  ;;  %v13544_v60 = vld [vmem:[#allocation44_spill] sm:$0xff]  ;;  %v13545_v6 = vld [vmem:[#allocation45_spill] sm:$0xff] }
 0xf23   :  { %4634 = vmatpush1.bf16.msra.mxu0 %v13535_v16  ;;  %4675 = vmatpush1.bf16.msra.mxu1 %v13536_v40  ;;  %v13546_v16 = vld [vmem:[#allocation46_spill] sm:$0xff]  ;;  %v13547_v40 = vld [vmem:[#allocation47_spill] sm:$0xff] }
 0xf24   :  { %4635 = vmatprep.subr.bf16.mxu0 %v13537_v63  ;;  %4676 = vmatprep.subr.bf16.mxu1 %v13538_v31  ;;  %v13548_v63 = vld [vmem:[#allocation48_spill] sm:$0xff]  ;;  %v13549_v31 = vld [vmem:[#allocation49_spill] sm:$0xff] }
 0xf27   :  { %4636 = vmatpush1.bf16.msra.mxu0 %v13539_v25  ;;  %4677 = vmatpush1.bf16.msra.mxu1 %v13540_v26  ;;  %v13550_v25 = vld [vmem:[#allocation50_spill] sm:$0xff]  ;;  %v13551_v26 = vld [vmem:[#allocation51_spill] sm:$0xff] }
 0xf28   :  { %4637 = vmatprep.subr.bf16.mxu0 %v13541_v42  ;;  %4678 = vmatprep.subr.bf16.mxu1 %v13542_v37  ;;  %v13552_v42 = vld [vmem:[#allocation52_spill] sm:$0xff]  ;;  %v13553_v37 = vld [vmem:[#allocation53_spill] sm:$0xff] }
 0xf2b   :  { %4638 = vmatpush1.bf16.msra.mxu0 %v13543_v44  ;;  %4679 = vmatpush1.bf16.msra.mxu1 %v13544_v60  ;;  %v13554_v44 = vld [vmem:[#allocation54_spill] sm:$0xff]  ;;  %v13555_v60 = vld [vmem:[#allocation5_spill] sm:$0xff] }
 0xf2c   :  { %4639 = vmatprep.subr.bf16.mxu0 %v13545_v6  ;;  %4680 = vmatprep.subr.bf16.mxu1 %v13546_v16  ;;  %v13556_v6 = vld [vmem:[#allocation6_spill] sm:$0xff]  ;;  %v13557_v16 = vld [vmem:[#allocation9_spill] sm:$0xff] }
 0xf2f   :  { %4640 = vmatpush1.bf16.msra.mxu0 %v13547_v40  ;;  %4681 = vmatpush1.bf16.msra.mxu1 %v13548_v63  ;;  %v13558_v40 = vld [vmem:[#allocation61_spill] sm:$0xff]  ;;  %v13559_v63 = vld [vmem:[#allocation62_spill] sm:$0xff] }
 0xf30   :  { %4641 = vmatprep.subr.bf16.mxu0 %v13549_v31  ;;  %4682 = vmatprep.subr.bf16.mxu1 %v13550_v25  ;;  %v13560_v31 = vld [vmem:[#allocation65_spill] sm:$0xff]  ;;  %v13561_v25 = vld [vmem:[#allocation67_spill] sm:$0xff] }
 0xf33   :  { %4642 = vmatpush1.bf16.msra.mxu0 %v13551_v26  ;;  %4683 = vmatpush1.bf16.msra.mxu1 %v13552_v42  ;;  %v13562_v26 = vld [vmem:[#allocation59_spill] sm:$0xff] }
 0xf34   :  { %4643 = vmatprep.subr.bf16.mxu0 %v13553_v37  ;;  %4684 = vmatprep.subr.bf16.mxu1 %v13554_v44 }
 0xf37   :  { %4644 = vmatpush1.bf16.msra.mxu0 %v13555_v60  ;;  %4685 = vmatpush1.bf16.msra.mxu1 %v13556_v6 }
 0xf38   :  { %4645 = vmatprep.subr.bf16.mxu0 %v13557_v16  ;;  %4686 = vmatprep.subr.bf16.mxu1 %v13558_v40 }
 0xf3b   :  { %4646 = vmatpush1.bf16.msra.mxu0 %v13559_v63  ;;  %4687 = vmatpush1.bf16.msra.mxu1 %v13560_v31 }
 0xf3c   :  { %4727 = vmatprep.subr.bf16.mxu0 %v13561_v25  ;;  %4768 = vmatprep.subr.bf16.mxu1 %v13562_v26 }
 0xfb1   :  { %v4425_v42 = vpop.f32.mrb[96].mxu0  ;;  %v4466_v37 = vpop.f32.mrb[104].mxu1 }
 0xfb2   :  { %v4426_v44 = vadd.f32 %v4425_v42, %v13434_v34  ;;  %v4427_v43 = vpop.f32.mrb[97].mxu0  ;;  %v4468_v60 = vpop.f32.mrb[105].mxu1  ;;  %v4467_v25 = vadd.f32 %v4466_v37, %v13435_v18 }
 0xfb3   :  { %v4428_v6 = vadd.f32 %v4427_v43, %v10415_v47  ;;  %v4429_v4 = vpop.f32.mrb[98].mxu0  ;;  %v4470_v16 = vpop.f32.mrb[106].mxu1  ;;  %v4469_v26 = vadd.f32 %v4468_v60, %v10423_v36 }
 0xfb4   :  { %v5813_v11 = vmul.f32 -1.442695, %v4426_v44  ;;  %v4430_v40 = vpop.f32.mrb[99].mxu0  ;;  %v4471_v7 = vpop.f32.mrb[107].mxu1  ;;  %v5815_v31 = vmul.f32 -1.442695, %v4467_v25 }
 0xfb5   :  { %v5814_v63 = vmul.f32 -1.442695, %v4428_v6  ;;  %v13563_v25 = vld [vmem:[#allocation63_spill] sm:$0xff] }
 0xfb6   :  { %6596 = vpow2.f32 %v5813_v11 }
 0xfb7   :  { %6598 = vpow2.f32 %v5814_v63 }
 0xfb8   :  { %6600 = vtanh.f32 %v4469_v26 }
 0xfb9   :  { %6602 = vpow2.f32 %v5815_v31 }
 0xfc0   :  { %v6597_v10 = vpop.eup %6596 }
 0xfc1   :  { %v4482_v33 = vadd.f32 1.0, %v6597_v10  ;;  %v6599_v42 = vpop.eup %6598 }
 0xfc2   :  { %v4483_v43 = vadd.f32 1.0, %v6599_v42  ;;  %v6601_v4 = vpop.eup %6600 }
 0xfc3   :  { %6604 = vrcp.f32 %v4482_v33  ;;  %v6603_v44 = vpop.eup %6602 }
 0xfc4   :  { %6606 = vrcp.f32 %v4483_v43  ;;  %v4484_v11 = vadd.f32 1.0, %v6603_v44 }
 0xfc6   :  { %6608 = vrcp.f32 %v4484_v11 }
 0xfcd   :  { %v6605_v16 = vpop.eup %6604 }
 0xfce   :  { %v4493_v7 = vmul.f32 %v6605_v16, %v6601_v4  ;;  %v6607_v6 = vpop.eup %6606 }
 0xfcf   :  { %v4492_v40 = vmul.f32 %v6607_v6, %v11152_v41 }
 0xfd1   :  { %v4537_v37 = vpop.f32.mrb[100].mxu0  ;;  %v4578_v63 = vpop.f32.mrb[108].mxu1  ;;  %v11271_v60 = vadd.f32 %v4493_v7, %v4492_v40 }
 0xfd2   :  { %v4585_v10 = vadd.f32 %v4537_v37, %v13563_v25  ;;  %v4539_v26 = vpop.f32.mrb[101].mxu0  ;;  %v4580_v36 = vpop.f32.mrb[109].mxu1  ;;  %v4587_v41 = vadd.f32 %v4578_v63, %v10301_v13 }
 0xfd3   :  { %v4586_v33 = vadd.f32 %v4539_v26, %v13376_v24  ;;  %v4541_v31 = vpop.f32.mrb[102].mxu0  ;;  %v4582_v42 = vpop.f32.mrb[110].mxu1  ;;  %6610 = vtanh.f32 %v11271_v60  ;;  %v4588_v6 = vadd.f32 %v4580_v36, %v10304_v56 }
 0xfd4   :  { %v5816_v43 = vmul.f32 -1.442695, %v4585_v10  ;;  %v4542_v4 = vpop.f32.mrb[103].mxu0  ;;  %v4583_v44 = vpop.f32.mrb[111].mxu1  ;;  %v5818_v37 = vmul.f32 -1.442695, %v4587_v41 }
 0xfd5   :  { %v5817_v16 = vmul.f32 -1.442695, %v4586_v33  ;;  %v6609_v7 = vpop.eup %6608 }
 0xfd6   :  { %6612 = vpow2.f32 %v5816_v43 }
 0xfd7   :  { %6614 = vpow2.f32 %v5817_v16 }
 0xfd8   :  { %6616 = vtanh.f32 %v4588_v6 }
 0xfd9   :  { %6618 = vpow2.f32 %v5818_v37 }
 0xfdd   :  { %v6611_v40 = vpop.eup %6610 }
 0xfde   :  { %v4496_v11 = vmul.f32 %v6611_v40, %v6609_v7 }
 0xfe0   :  { %v6613_v25 = vpop.eup %6612  ;;  %v4501_v10 = vrot.slane %v4496_v11, %v13437_v48  ;;  %v4614_v31 = vpack.c.bf16 %v4496_v11, %v4496_v11  ;;  %v13599_v11 = vld [vmem:[#allocation36_spill] sm:$0xff] }
 0xfe1   :  { %v4598_v26 = vadd.f32 1.0, %v6613_v25  ;;  %v6615_v42 = vpop.eup %6614 }
 0xfe2   :  { %v4599_v33 = vadd.f32 1.0, %v6615_v42  ;;  %v11281_v63 = vsel %vm4497_vm5, %v4501_v10, %v11162_v23  ;;  %4647 = vmatprep.mubr.bf16.mxu0 %v4614_v31  ;;  %4688 = vmatprep.mubr.bf16.mxu1 %v4614_v31  ;;  %v6617_v36 = vpop.eup %6616  ;;  %v13601_v10 = vld [vmem:[#allocation38_spill] sm:$0xff]  ;;  %v13602_v31 = vld [vmem:[#allocation39_spill] sm:$0xff]  ;;  %v13603_v42 = vld [vmem:[#allocation40_spill] sm:$0xff] }
 0xfe3   :  { %6620 = vrcp.f32 %v4598_v26  ;;  %v6619_v43 = vpop.eup %6618  ;;  %v13600_v26 = vld [vmem:[#allocation37_spill] sm:$0xff] }
 0xfe4   :  { %6622 = vrcp.f32 %v4599_v33  ;;  %v4600_v25 = vadd.f32 1.0, %v6619_v43  ;;  %v13604_v33 = vld [vmem:[#allocation41_spill] sm:$0xff]  ;;  %v13606_v43 = vld [vmem:[#allocation43_spill] sm:$0xff] }
 0xfe6   :  { %6624 = vrcp.f32 %v4600_v25  ;;  %v13610_v25 = vld [vmem:[#allocation47_spill] sm:$0xff] }
 0xfed   :  { %v6621_v4 = vpop.eup %6620 }
 0xfee   :  { %v4609_v44 = vmul.f32 %v6621_v4, %v6617_v36  ;;  %v6623_v16 = vpop.eup %6622  ;;  %v13605_v36 = vld [vmem:[#allocation42_spill] sm:$0xff]  ;;  %v13607_v4 = vld [vmem:[#allocation44_spill] sm:$0xff] }
 0xfef   :  { %v4608_v41 = vmul.f32 %v6623_v16, %v11165_v29  ;;  %v13597_v29 = vld [vmem:[#allocation34_spill] sm:$0xff] }
 0xff0   :  { %v6625_v6 = vpop.eup %6624  ;;  %v13609_v16 = vld [vmem:[#allocation46_spill] sm:$0xff] }
 0xff1   :  { %v11284_v7 = vadd.f32 %v4609_v44, %v4608_v41  ;;  %v13608_v44 = vld [vmem:[#allocation45_spill] sm:$0xff]  ;;  %v13611_v41 = vld [vmem:[#allocation48_spill] sm:$0xff] }
 0xff3   :  { %6626 = vtanh.f32 %v11284_v7 }
 0xffd   :  { %v6627_v40 = vpop.eup %6626 }
 0xffe   :  { %v4612_v23 = vmul.f32 %v6627_v40, %v6625_v6  ;;  %v13612_v6 = vld [vmem:[#allocation49_spill] sm:$0xff]  ;;  %v13613_v40 = vld [vmem:[#allocation50_spill] sm:$0xff] }
0x1000   :  { %v4613_v37 = vpack.c.bf16 %v4612_v23, %v4612_v23  ;;  %v13614_v23 = vld [vmem:[#allocation51_spill] sm:$0xff] }
0x1002   :  { %4648 = vmatmul.mubr.bf16.vlgmr.msra.gmra.mrb[104].mxu0 %v4613_v37  ;;  %4689 = vmatmul.mubr.bf16.vlgmr.msra.gmra.mrb[112].mxu1 %v4613_v37 }
0x1003   :  { %4728 = vmatpush1.bf16.msra.mxu0 %v10580_v21  ;;  %4769 = vmatpush1.bf16.msra.mxu1 %v10586_v52  ;;  %v13564_v21 = vld [vmem:[#allocation68_spill] sm:$0xff]  ;;  %v13565_v52 = vld [vmem:[#allocation7_spill] sm:$0xff] }
0x1004   :  { %4729 = vmatprep.subr.bf16.mxu0 %v10592_v58  ;;  %4770 = vmatprep.subr.bf16.mxu1 %v10598_v14  ;;  %v13566_v58 = vld [vmem:[#allocation56_spill] sm:$0xff] }
0x1005   :  { %4759 = vmatprep.mubr.bf16.mxu0 %v12855_v9  ;;  %4800 = vmatprep.mubr.bf16.mxu1 %v12855_v9  ;;  %v13567_v14 = vld [vmem:[#allocation64_spill] sm:$0xff] }
0x1007   :  { %4730 = vmatpush1.bf16.msra.mxu0 %v10606_v61  ;;  %4771 = vmatpush1.bf16.msra.mxu1 %v10612_v20  ;;  %v13568_v61 = vld [vmem:[#allocation12_spill] sm:$0xff]  ;;  %v13569_v20 = vld [vmem:[#allocation13_spill] sm:$0xff] }
0x1008   :  { %4731 = vmatprep.subr.bf16.mxu0 %v10618_v28  ;;  %4772 = vmatprep.subr.bf16.mxu1 %v10624_v59  ;;  %v13570_v28 = vld [vmem:[#allocation14_spill] sm:$0xff] }
0x1009   :  { %v13571_v59 = vld [vmem:[#allocation2_spill] sm:$0xff] }
0x100b   :  { %4732 = vmatpush1.bf16.msra.mxu0 %v10630_v38  ;;  %4773 = vmatpush1.bf16.msra.mxu1 %v10636_v32  ;;  %v13572_v38 = vld [vmem:[#allocation4_spill] sm:$0xff]  ;;  %v13573_v32 = vld [vmem:[#allocation57_spill] sm:$0xff] }
0x100c   :  { %4733 = vmatprep.subr.bf16.mxu0 %v10642_v27  ;;  %4774 = vmatprep.subr.bf16.mxu1 %v10648_v57  ;;  %v13574_v27 = vld [vmem:[#allocation58_spill] sm:$0xff]  ;;  %v13575_v57 = vld [vmem:[#allocation15_spill] sm:$0xff] }
0x100f   :  { %4734 = vmatpush1.bf16.msra.mxu0 %v10654_v17  ;;  %4775 = vmatpush1.bf16.msra.mxu1 %v10660_v22  ;;  %v13576_v17 = vld [vmem:[#allocation16_spill] sm:$0xff]  ;;  %v13577_v22 = vld [vmem:[#allocation17_spill] sm:$0xff] }
0x1010   :  { %4735 = vmatprep.subr.bf16.mxu0 %v10666_v15  ;;  %4776 = vmatprep.subr.bf16.mxu1 %v10672_v12  ;;  %v13578_v15 = vld [vmem:[#allocation18_spill] sm:$0xff]  ;;  %v13579_v12 = vld [vmem:[#allocation19_spill] sm:$0xff] }
0x1013   :  { %4736 = vmatpush1.bf16.msra.mxu0 %v10678_v30  ;;  %4777 = vmatpush1.bf16.msra.mxu1 %v10684_v8  ;;  %v13580_v30 = vld [vmem:[#allocation20_spill] sm:$0xff]  ;;  %v13581_v8 = vld [vmem:[#allocation21_spill] sm:$0xff] }
0x1014   :  { %4737 = vmatprep.subr.bf16.mxu0 %v10690_v1  ;;  %4778 = vmatprep.subr.bf16.mxu1 %v10696_v50  ;;  %v13582_v1 = vld [vmem:[#allocation22_spill] sm:$0xff]  ;;  %v13583_v50 = vld [vmem:[#allocation23_spill] sm:$0xff] }
0x1017   :  { %4738 = vmatpush1.bf16.msra.mxu0 %v10702_v62  ;;  %4779 = vmatpush1.bf16.msra.mxu1 %v10708_v46  ;;  %v13584_v62 = vld [vmem:[#allocation10_spill] sm:$0xff]  ;;  %v13585_v46 = vld [vmem:[#allocation11_spill] sm:$0xff] }
0x1018   :  { %4739 = vmatprep.subr.bf16.mxu0 %v10714_v2  ;;  %4780 = vmatprep.subr.bf16.mxu1 %v10720_v55  ;;  %v13586_v2 = vld [vmem:[#allocation69_spill] sm:$0xff]  ;;  %v13587_v55 = vld [vmem:[#allocation24_spill] sm:$0xff] }
0x101b   :  { %4740 = vmatpush1.bf16.msra.mxu0 %v10726_v19  ;;  %4781 = vmatpush1.bf16.msra.mxu1 %v10732_v3  ;;  %v13588_v19 = vld [vmem:[#allocation25_spill] sm:$0xff]  ;;  %v13589_v3 = vld [vmem:[#allocation26_spill] sm:$0xff] }
0x101c   :  { %4741 = vmatprep.subr.bf16.mxu0 %v10738_v35  ;;  %4782 = vmatprep.subr.bf16.mxu1 %v10744_v49  ;;  %v13590_v35 = vld [vmem:[#allocation27_spill] sm:$0xff]  ;;  %v13591_v49 = vld [vmem:[#allocation28_spill] sm:$0xff] }
0x101f   :  { %4742 = vmatpush1.bf16.msra.mxu0 %v10750_v54  ;;  %4783 = vmatpush1.bf16.msra.mxu1 %v10756_v53  ;;  %v13592_v54 = vld [vmem:[#allocation29_spill] sm:$0xff]  ;;  %v13593_v53 = vld [vmem:[#allocation30_spill] sm:$0xff] }
0x1020   :  { %4839 = vmatprep.subr.bf16.mxu0 %v10762_v51  ;;  %4880 = vmatprep.subr.bf16.mxu1 %v10768_v5  ;;  %v13594_v51 = vld [vmem:[#allocation31_spill] sm:$0xff]  ;;  %v13595_v5 = vld [vmem:[#allocation32_spill] sm:$0xff] }
0x1022   :  { %4760 = vmatmul.mubr.bf16.vlgmr.msra.gmra.mrb[108].mxu0 %v4613_v37  ;;  %4801 = vmatmul.mubr.bf16.vlgmr.msra.gmra.mrb[116].mxu1 %v4613_v37  ;;  %v13615_v37 = vld [vmem:[#allocation52_spill] sm:$0xff] }
0x1023   :  { %4840 = vmatpush1.bf16.msra.mxu0 %v10776_v0  ;;  %4881 = vmatpush1.bf16.msra.mxu1 %v13500_v45  ;;  %v13596_v0 = vld [vmem:[#allocation33_spill] sm:$0xff]  ;;  %v13598_v45 = vld [vmem:[#allocation35_spill] sm:$0xff] }
0x1024   :  { %4841 = vmatprep.subr.bf16.mxu0 %v13564_v21  ;;  %4882 = vmatprep.subr.bf16.mxu1 %v13565_v52  ;;  %v13616_v21 = vld [vmem:[#allocation53_spill] sm:$0xff]  ;;  %v13617_v52 = vld [vmem:[#allocation54_spill] sm:$0xff] }
0x1027   :  { %4842 = vmatpush1.bf16.msra.mxu0 %v13566_v58  ;;  %4883 = vmatpush1.bf16.msra.mxu1 %v13567_v14  ;;  %v13618_v58 = vld [vmem:[#allocation5_spill] sm:$0xff]  ;;  %v13619_v14 = vld [vmem:[#allocation6_spill] sm:$0xff] }
0x1028   :  { %4843 = vmatprep.subr.bf16.mxu0 %v13568_v61  ;;  %4884 = vmatprep.subr.bf16.mxu1 %v13569_v20  ;;  %v13620_v61 = vld [vmem:[#allocation9_spill] sm:$0xff] }
0x1029   :  { %v13621_v20 = vld [vmem:[#allocation61_spill] sm:$0xff] }
0x102b   :  { %4844 = vmatpush1.bf16.msra.mxu0 %v13570_v28  ;;  %4885 = vmatpush1.bf16.msra.mxu1 %v13571_v59  ;;  %v13622_v28 = vld [vmem:[#allocation62_spill] sm:$0xff]  ;;  %v13623_v59 = vld [vmem:[#allocation65_spill] sm:$0xff] }
0x102c   :  { %4845 = vmatprep.subr.bf16.mxu0 %v13572_v38  ;;  %4886 = vmatprep.subr.bf16.mxu1 %v13573_v32  ;;  %v11386_v38 = vld [vmem:[%s12170_s7 + $0x4] ss:$16 sps:$4 sm:$0xff]   ;;  %v11392_v32 = vld [vmem:[%s12170_s7 + $0xc] ss:$16 sps:$4 sm:$0xff]  }
0x102f   :  { %4846 = vmatpush1.bf16.msra.mxu0 %v13574_v27  ;;  %4887 = vmatpush1.bf16.msra.mxu1 %v13575_v57 }
0x1030   :  { %4847 = vmatprep.subr.bf16.mxu0 %v13576_v17  ;;  %4888 = vmatprep.subr.bf16.mxu1 %v13577_v22 }
0x1033   :  { %4848 = vmatpush1.bf16.msra.mxu0 %v13578_v15  ;;  %4889 = vmatpush1.bf16.msra.mxu1 %v13579_v12 }
0x1034   :  { %4849 = vmatprep.subr.bf16.mxu0 %v13580_v30  ;;  %4890 = vmatprep.subr.bf16.mxu1 %v13581_v8 }
0x1037   :  { %4850 = vmatpush1.bf16.msra.mxu0 %v13582_v1  ;;  %4891 = vmatpush1.bf16.msra.mxu1 %v13583_v50 }
0x1038   :  { %4851 = vmatprep.subr.bf16.mxu0 %v13584_v62  ;;  %4892 = vmatprep.subr.bf16.mxu1 %v13585_v46 }
0x103b   :  { %4852 = vmatpush1.bf16.msra.mxu0 %v13586_v2  ;;  %4893 = vmatpush1.bf16.msra.mxu1 %v13587_v55  ;;  %v13624_v55 = vld [vmem:[#allocation8_spill] sm:$0xff] }
0x103c   :  { %4853 = vmatprep.subr.bf16.mxu0 %v13588_v19  ;;  %4894 = vmatprep.subr.bf16.mxu1 %v13589_v3 }
0x103f   :  { %4854 = vmatpush1.bf16.msra.mxu0 %v13590_v35  ;;  %4895 = vmatpush1.bf16.msra.mxu1 %v13591_v49 }
0x1040   :  { %4855 = vmatprep.subr.bf16.mxu0 %v13592_v54  ;;  %4896 = vmatprep.subr.bf16.mxu1 %v13593_v53 }
0x1043   :  { %4856 = vmatpush1.bf16.msra.mxu0 %v13594_v51  ;;  %4897 = vmatpush1.bf16.msra.mxu1 %v13595_v5 }
0x1044   :  { %4857 = vmatprep.subr.bf16.mxu0 %v13596_v0  ;;  %4898 = vmatprep.subr.bf16.mxu1 %v13597_v29 }
0x1047   :  { %4858 = vmatpush1.bf16.msra.mxu0 %v13598_v45  ;;  %4899 = vmatpush1.bf16.msra.mxu1 %v13599_v11 }
0x1048   :  { %4859 = vmatprep.subr.bf16.mxu0 %v13600_v26  ;;  %4900 = vmatprep.subr.bf16.mxu1 %v13601_v10 }
0x104b   :  { %4860 = vmatpush1.bf16.msra.mxu0 %v13602_v31  ;;  %4901 = vmatpush1.bf16.msra.mxu1 %v13603_v42 }
0x104c   :  { %4861 = vmatprep.subr.bf16.mxu0 %v13604_v33  ;;  %4902 = vmatprep.subr.bf16.mxu1 %v13605_v36  ;;  %v13625_v33 = vld [vmem:[#allocation63_spill] sm:$0xff] }
0x104f   :  { %4862 = vmatpush1.bf16.msra.mxu0 %v13606_v43  ;;  %4903 = vmatpush1.bf16.msra.mxu1 %v13607_v4 }
0x1050   :  { %4863 = vmatprep.subr.bf16.mxu0 %v13608_v44  ;;  %4904 = vmatprep.subr.bf16.mxu1 %v13609_v16 }
0x1053   :  { %4864 = vmatpush1.bf16.msra.mxu0 %v13610_v25  ;;  %4905 = vmatpush1.bf16.msra.mxu1 %v13611_v41 }
0x1054   :  { %4865 = vmatprep.subr.bf16.mxu0 %v13612_v6  ;;  %4906 = vmatprep.subr.bf16.mxu1 %v13613_v40 }
0x1057   :  { %4866 = vmatpush1.bf16.msra.mxu0 %v13614_v23  ;;  %4907 = vmatpush1.bf16.msra.mxu1 %v13615_v37 }
0x1058   :  { %4867 = vmatprep.subr.bf16.mxu0 %v13616_v21  ;;  %4908 = vmatprep.subr.bf16.mxu1 %v13617_v52 }
0x105b   :  { %4868 = vmatpush1.bf16.msra.mxu0 %v13618_v58  ;;  %4909 = vmatpush1.bf16.msra.mxu1 %v13619_v14 }
0x105c   :  { %4869 = vmatprep.subr.bf16.mxu0 %v13620_v61  ;;  %4910 = vmatprep.subr.bf16.mxu1 %v13621_v20 }
0x105f   :  { %4870 = vmatpush1.bf16.msra.mxu0 %v13622_v28  ;;  %4911 = vmatpush1.bf16.msra.mxu1 %v13623_v59 }
0x1060   :  { %4951 = vmatprep.subr.bf16.mxu0 %v11386_v38  ;;  %4992 = vmatprep.subr.bf16.mxu1 %v11392_v32 }
0x10d5   :  { %v4649_v27 = vpop.f32.mrb[104].mxu0  ;;  %v4690_v57 = vpop.f32.mrb[112].mxu1 }
0x10d6   :  { %v4650_v17 = vadd.f32 %v4649_v27, %v13434_v34  ;;  %v4651_v22 = vpop.f32.mrb[105].mxu0  ;;  %v4692_v15 = vpop.f32.mrb[113].mxu1  ;;  %v4691_v2 = vadd.f32 %v4690_v57, %v13435_v18 }
0x10d7   :  { %v4652_v12 = vadd.f32 %v4651_v22, %v10415_v47  ;;  %v4653_v30 = vpop.f32.mrb[106].mxu0  ;;  %v4694_v8 = vpop.f32.mrb[114].mxu1  ;;  %v4693_v19 = vadd.f32 %v4692_v15, %v13624_v55 }
0x10d8   :  { %v5819_v1 = vmul.f32 -1.442695, %v4650_v17  ;;  %v4654_v50 = vpop.f32.mrb[107].mxu0  ;;  %v4695_v62 = vpop.f32.mrb[115].mxu1  ;;  %v5821_v3 = vmul.f32 -1.442695, %v4691_v2 }
0x10d9   :  { %v5820_v46 = vmul.f32 -1.442695, %v4652_v12 }
0x10da   :  { %6628 = vpow2.f32 %v5819_v1 }
0x10db   :  { %6630 = vpow2.f32 %v5820_v46 }
0x10dc   :  { %6632 = vtanh.f32 %v4693_v19 }
0x10dd   :  { %6634 = vpow2.f32 %v5821_v3  ;;  %v11423_v3 = vld [vmem:[%s12170_s7] ss:$16 sps:$4 sm:$0xff]  }
0x10e4   :  { %v6629_v35 = vpop.eup %6628 }
0x10e5   :  { %v4706_v49 = vadd.f32 1.0, %v6629_v35  ;;  %v6631_v54 = vpop.eup %6630  ;;  %v11435_v35 = vld [vmem:[%s12170_s7 + $0x24] ss:$16 sps:$4 sm:$0xff]  }
0x10e6   :  { %v4707_v53 = vadd.f32 1.0, %v6631_v54  ;;  %v6633_v51 = vpop.eup %6632  ;;  %v11449_v54 = vld [vmem:[%s12170_s7 + $0x20] ss:$16 sps:$4 sm:$0xff]  }
0x10e7   :  { %6636 = vrcp.f32 %v4706_v49  ;;  %v6635_v5 = vpop.eup %6634  ;;  %v11441_v49 = vld [vmem:[%s12170_s7 + $0x2c] ss:$16 sps:$4 sm:$0xff]  }
0x10e8   :  { %6638 = vrcp.f32 %v4707_v53  ;;  %v4708_v11 = vadd.f32 1.0, %v6635_v5  ;;  %v11455_v53 = vld [vmem:[%s12170_s7 + $0x28] ss:$16 sps:$4 sm:$0xff]   ;;  %v11467_v5 = vld [vmem:[%s12170_s7 + $0x4c] ss:$16 sps:$4 sm:$0xff]  }
0x10ea   :  { %6640 = vrcp.f32 %v4708_v11  ;;  %v11491_v11 = vld [vmem:[%s12170_s7 + $0x6c] ss:$16 sps:$4 sm:$0xff]  }
0x10f1   :  { %v6637_v0 = vpop.eup %6636 }
0x10f2   :  { %v4717_v29 = vmul.f32 %v6637_v0, %v6633_v51  ;;  %v6639_v45 = vpop.eup %6638  ;;  %v11461_v51 = vld [vmem:[%s12170_s7 + $0x44] ss:$16 sps:$4 sm:$0xff]   ;;  %v11473_v0 = vld [vmem:[%s12170_s7 + $0x40] ss:$16 sps:$4 sm:$0xff]  }
0x10f3   :  { %v4716_v26 = vmul.f32 %v6639_v45, %v11271_v60  ;;  %v11485_v45 = vld [vmem:[%s12170_s7 + $0x64] ss:$16 sps:$4 sm:$0xff]  }
0x10f4   :  { %v6641_v37 = vpop.eup %6640 }
0x10f5   :  { %v4761_v10 = vpop.f32.mrb[108].mxu0  ;;  %v4802_v31 = vpop.f32.mrb[116].mxu1  ;;  %v11400_v42 = vadd.f32 %v4717_v29, %v4716_v26  ;;  %v11479_v29 = vld [vmem:[%s12170_s7 + $0x48] ss:$16 sps:$4 sm:$0xff]   ;;  %v11497_v26 = vld [vmem:[%s12170_s7 + $0x60] ss:$16 sps:$4 sm:$0xff]  }
0x10f6   :  { %v4809_v36 = vadd.f32 %v4761_v10, %v13625_v33  ;;  %v4763_v43 = vpop.f32.mrb[109].mxu0  ;;  %v4804_v4 = vpop.f32.mrb[117].mxu1  ;;  %v4811_v60 = vadd.f32 %v4802_v31, %v10301_v13  ;;  %v11503_v10 = vld [vmem:[%s12170_s7 + $0x68] ss:$16 sps:$4 sm:$0xff]   ;;  %v11509_v31 = vld [vmem:[%s12170_s7 + $0x84] ss:$16 sps:$4 sm:$0xff]  }
0x10f7   :  { %v4810_v44 = vadd.f32 %v4763_v43, %v13376_v24  ;;  %v4765_v16 = vpop.f32.mrb[110].mxu0  ;;  %v4806_v25 = vpop.f32.mrb[118].mxu1  ;;  %6642 = vtanh.f32 %v11400_v42  ;;  %v4812_v21 = vadd.f32 %v4804_v4, %v10304_v56  ;;  %v11521_v43 = vld [vmem:[%s12170_s7 + $0x80] ss:$16 sps:$4 sm:$0xff]   ;;  %v11527_v4 = vld [vmem:[%s12170_s7 + $0x88] ss:$16 sps:$4 sm:$0xff]  }
0x10f8   :  { %v5822_v41 = vmul.f32 -1.442695, %v4809_v36  ;;  %v4766_v6 = vpop.f32.mrb[111].mxu0  ;;  %v4807_v40 = vpop.f32.mrb[119].mxu1  ;;  %v5824_v58 = vmul.f32 -1.442695, %v4811_v60 }
0x10f9   :  { %v5823_v23 = vmul.f32 -1.442695, %v4810_v44  ;;  %v11515_v36 = vld [vmem:[%s12170_s7 + $0x8c] ss:$16 sps:$4 sm:$0xff]   ;;  %v11533_v44 = vld [vmem:[%s12170_s7 + $0xa4] ss:$16 sps:$4 sm:$0xff]  }
0x10fa   :  { %6644 = vpow2.f32 %v5822_v41  ;;  %v11539_v16 = vld [vmem:[%s12170_s7 + $0xac] ss:$16 sps:$4 sm:$0xff]   ;;  %v11545_v25 = vld [vmem:[%s12170_s7 + $0xa0] ss:$16 sps:$4 sm:$0xff]   ;;  %v11551_v41 = vld [vmem:[%s12170_s7 + $0xa8] ss:$16 sps:$4 sm:$0xff]  }
0x10fb   :  { %6646 = vpow2.f32 %v5823_v23  ;;  %v11557_v6 = vld [vmem:[%s12170_s7 + $0xc4] ss:$16 sps:$4 sm:$0xff]   ;;  %v11563_v40 = vld [vmem:[%s12170_s7 + $0xcc] ss:$16 sps:$4 sm:$0xff]   ;;  %v11569_v23 = vld [vmem:[%s12170_s7 + $0xc0] ss:$16 sps:$4 sm:$0xff]  }
0x10fc   :  { %6648 = vtanh.f32 %v4812_v21  ;;  %v11575_v60 = vld [vmem:[%s12170_s7 + $0xc8] ss:$16 sps:$4 sm:$0xff]   ;;  %v11587_v21 = vld [vmem:[%s12170_s7 + $0xec] ss:$16 sps:$4 sm:$0xff]  }
0x10fd   :  { %6650 = vpow2.f32 %v5824_v58  ;;  %v11599_v58 = vld [vmem:[%s12170_s7 + $0xe8] ss:$16 sps:$4 sm:$0xff]  }
0x1101   :  { %v6643_v52 = vpop.eup %6642 }
0x1102   :  { %v4720_v14 = vmul.f32 %v6643_v52, %v6641_v37  ;;  %v11581_v37 = vld [vmem:[%s12170_s7 + $0xe4] ss:$16 sps:$4 sm:$0xff]   ;;  %v11593_v52 = vld [vmem:[%s12170_s7 + $0xe0] ss:$16 sps:$4 sm:$0xff]  }
0x1104   :  { %v6645_v61 = vpop.eup %6644  ;;  %v4725_v28 = vrot.slane %v4720_v14, %v13437_v48  ;;  %v4838_v59 = vpack.c.bf16 %v4720_v14, %v4720_v14  ;;  %v11605_v14 = vld [vmem:[%s12171_s9 + $0x4] ss:$16 sps:$4 sm:$0xff]  }
0x1105   :  { %v4822_v20 = vadd.f32 1.0, %v6645_v61  ;;  %v6647_v27 = vpop.eup %6646  ;;  %v11611_v61 = vld [vmem:[%s12171_s9 + $0xc] ss:$16 sps:$4 sm:$0xff]  }
0x1106   :  { %v4823_v57 = vadd.f32 1.0, %v6647_v27  ;;  %v11410_v17 = vsel %vm4721_vm6, %v4725_v28, %v11281_v63  ;;  %4871 = vmatprep.mubr.bf16.mxu0 %v4838_v59  ;;  %4912 = vmatprep.mubr.bf16.mxu1 %v4838_v59  ;;  %v6649_v22 = vpop.eup %6648  ;;  %v11625_v28 = vld [vmem:[%s12171_s9 + $0x8] ss:$16 sps:$4 sm:$0xff]   ;;  %v11631_v59 = vld [vmem:[%s12171_s9 + $0x24] ss:$16 sps:$4 sm:$0xff]  }
0x1107   :  { %6652 = vrcp.f32 %v4822_v20  ;;  %v6651_v15 = vpop.eup %6650  ;;  %v11619_v20 = vld [vmem:[%s12171_s9] ss:$16 sps:$4 sm:$0xff]   ;;  %13626 = vst [vmem:[#allocation66_spill] sm:$0xff] %v11625_v28  ;;  %13627 = vst [vmem:[#allocation55_spill] sm:$0xff] %v11631_v59  ;;  %v11637_v27 = vld [vmem:[%s12171_s9 + $0x2c] ss:$16 sps:$4 sm:$0xff]  }
0x1108   :  { %6654 = vrcp.f32 %v4823_v57  ;;  %v4824_v1 = vadd.f32 1.0, %v6651_v15  ;;  %13628 = vst [vmem:[#allocation3_spill] sm:$0xff] %v11637_v27  ;;  %v11643_v57 = vld [vmem:[%s12171_s9 + $0x20] ss:$16 sps:$4 sm:$0xff]   ;;  %v11655_v15 = vld [vmem:[%s12171_s9 + $0x44] ss:$16 sps:$4 sm:$0xff]  }
0x1109   :  { %13629 = vst [vmem:[#allocation60_spill] sm:$0xff] %v11643_v57  ;;  %13631 = vst [vmem:[#allocation59_spill] sm:$0xff] %v11655_v15 }
0x110a   :  { %6656 = vrcp.f32 %v4824_v1  ;;  %v11679_v1 = vld [vmem:[%s12171_s9 + $0x64] ss:$16 sps:$4 sm:$0xff]  }
0x110b   :  { %13635 = vst [vmem:[#allocation64_spill] sm:$0xff] %v11679_v1 }
0x1111   :  { %v6653_v12 = vpop.eup %6652 }
0x1112   :  { %v4833_v30 = vmul.f32 %v6653_v12, %v6649_v22  ;;  %v6655_v8 = vpop.eup %6654  ;;  %v11649_v22 = vld [vmem:[%s12171_s9 + $0x28] ss:$16 sps:$4 sm:$0xff]   ;;  %v11661_v12 = vld [vmem:[%s12171_s9 + $0x4c] ss:$16 sps:$4 sm:$0xff]  }
0x1113   :  { %v4832_v50 = vmul.f32 %v6655_v8, %v11284_v7  ;;  %v11429_v7 = vld [vmem:[%s12170_s7 + $0x8] ss:$16 sps:$4 sm:$0xff]   ;;  %13630 = vst [vmem:[#allocation67_spill] sm:$0xff] %v11649_v22  ;;  %13632 = vst [vmem:[#allocation68_spill] sm:$0xff] %v11661_v12 }
0x1114   :  { %v6657_v46 = vpop.eup %6656  ;;  %v11673_v8 = vld [vmem:[%s12171_s9 + $0x48] ss:$16 sps:$4 sm:$0xff]  }
0x1115   :  { %v11413_v62 = vadd.f32 %v4833_v30, %v4832_v50  ;;  %v11667_v30 = vld [vmem:[%s12171_s9 + $0x40] ss:$16 sps:$4 sm:$0xff]   ;;  %13634 = vst [vmem:[#allocation56_spill] sm:$0xff] %v11673_v8  ;;  %v11685_v50 = vld [vmem:[%s12171_s9 + $0x6c] ss:$16 sps:$4 sm:$0xff]  }
0x1116   :  { %13633 = vst [vmem:[#allocation7_spill] sm:$0xff] %v11667_v30  ;;  %13636 = vst [vmem:[#allocation12_spill] sm:$0xff] %v11685_v50 }
0x1117   :  { %6658 = vtanh.f32 %v11413_v62 }
0x1121   :  { %v6659_v2 = vpop.eup %6658 }
0x1122   :  { %v4836_v63 = vmul.f32 %v6659_v2, %v6657_v46  ;;  %v11691_v46 = vld [vmem:[%s12171_s9 + $0x60] ss:$16 sps:$4 sm:$0xff]   ;;  %v11697_v2 = vld [vmem:[%s12171_s9 + $0x68] ss:$16 sps:$4 sm:$0xff]  }
0x1123   :  { %13637 = vst [vmem:[#allocation13_spill] sm:$0xff] %v11691_v46  ;;  %13638 = vst [vmem:[#allocation14_spill] sm:$0xff] %v11697_v2 }
0x1124   :  { %v11416_v19 = vpack.c.bf16 %v4836_v63, %v4836_v63  ;;  %v11703_v63 = vld [vmem:[%s12171_s9 + $0x84] ss:$16 sps:$4 sm:$0xff]  }
0x1125   :  { %13639 = vst [vmem:[#allocation2_spill] sm:$0xff] %v11703_v63 }
0x1126   :  { %4872 = vmatmul.mubr.bf16.vlgmr.msra.gmra.mrb[112].mxu0 %v11416_v19  ;;  %4913 = vmatmul.mubr.bf16.vlgmr.msra.gmra.mrb[120].mxu1 %v11416_v19 }
0x1127   :  { %4952 = vmatpush1.bf16.msra.mxu0 %v11423_v3  ;;  %4993 = vmatpush1.bf16.msra.mxu1 %v11429_v7 }
0x1128   :  { %4953 = vmatprep.subr.bf16.mxu0 %v11435_v35  ;;  %4994 = vmatprep.subr.bf16.mxu1 %v11441_v49 }
0x1129   :  { %4983 = vmatprep.mubr.bf16.mxu0 %v12855_v9  ;;  %5024 = vmatprep.mubr.bf16.mxu1 %v12855_v9 }
0x112b   :  { %4954 = vmatpush1.bf16.msra.mxu0 %v11449_v54  ;;  %4995 = vmatpush1.bf16.msra.mxu1 %v11455_v53 }
0x112c   :  { %4955 = vmatprep.subr.bf16.mxu0 %v11461_v51  ;;  %4996 = vmatprep.subr.bf16.mxu1 %v11467_v5 }
0x112f   :  { %4956 = vmatpush1.bf16.msra.mxu0 %v11473_v0  ;;  %4997 = vmatpush1.bf16.msra.mxu1 %v11479_v29 }
0x1130   :  { %4957 = vmatprep.subr.bf16.mxu0 %v11485_v45  ;;  %4998 = vmatprep.subr.bf16.mxu1 %v11491_v11 }
0x1133   :  { %4958 = vmatpush1.bf16.msra.mxu0 %v11497_v26  ;;  %4999 = vmatpush1.bf16.msra.mxu1 %v11503_v10 }
0x1134   :  { %4959 = vmatprep.subr.bf16.mxu0 %v11509_v31  ;;  %5000 = vmatprep.subr.bf16.mxu1 %v11515_v36 }
0x1137   :  { %4960 = vmatpush1.bf16.msra.mxu0 %v11521_v43  ;;  %5001 = vmatpush1.bf16.msra.mxu1 %v11527_v4 }
0x1138   :  { %4961 = vmatprep.subr.bf16.mxu0 %v11533_v44  ;;  %5002 = vmatprep.subr.bf16.mxu1 %v11539_v16 }
0x113b   :  { %4962 = vmatpush1.bf16.msra.mxu0 %v11545_v25  ;;  %5003 = vmatpush1.bf16.msra.mxu1 %v11551_v41 }
0x113c   :  { %4963 = vmatprep.subr.bf16.mxu0 %v11557_v6  ;;  %5004 = vmatprep.subr.bf16.mxu1 %v11563_v40 }
0x113f   :  { %4964 = vmatpush1.bf16.msra.mxu0 %v11569_v23  ;;  %5005 = vmatpush1.bf16.msra.mxu1 %v11575_v60 }
0x1140   :  { %4965 = vmatprep.subr.bf16.mxu0 %v11581_v37  ;;  %5006 = vmatprep.subr.bf16.mxu1 %v11587_v21 }
0x1143   :  { %4966 = vmatpush1.bf16.msra.mxu0 %v11593_v52  ;;  %5007 = vmatpush1.bf16.msra.mxu1 %v11599_v58 }
0x1144   :  { %5063 = vmatprep.subr.bf16.mxu0 %v11605_v14  ;;  %5104 = vmatprep.subr.bf16.mxu1 %v11611_v61 }
0x1146   :  { %4984 = vmatmul.mubr.bf16.vlgmr.msra.gmra.mrb[116].mxu0 %v11416_v19  ;;  %5025 = vmatmul.mubr.bf16.vlgmr.msra.gmra.mrb[124].mxu1 %v11416_v19  ;;  %v11709_v19 = vld [vmem:[%s12171_s9 + $0x8c] ss:$16 sps:$4 sm:$0xff]  }
0x1147   :  { %5064 = vmatpush1.bf16.msra.mxu0 %v11619_v20  ;;  %5105 = vmatpush1.bf16.msra.mxu1 %v11625_v28  ;;  %13640 = vst [vmem:[#allocation4_spill] sm:$0xff] %v11709_v19 }
0x1148   :  { %5065 = vmatprep.subr.bf16.mxu0 %v11631_v59  ;;  %5106 = vmatprep.subr.bf16.mxu1 %v11637_v27 }
0x114b   :  { %5066 = vmatpush1.bf16.msra.mxu0 %v11643_v57  ;;  %5107 = vmatpush1.bf16.msra.mxu1 %v11649_v22 }
0x114c   :  { %5067 = vmatprep.subr.bf16.mxu0 %v11655_v15  ;;  %5108 = vmatprep.subr.bf16.mxu1 %v11661_v12 }
0x114f   :  { %5068 = vmatpush1.bf16.msra.mxu0 %v11667_v30  ;;  %5109 = vmatpush1.bf16.msra.mxu1 %v11673_v8 }
0x1150   :  { %5069 = vmatprep.subr.bf16.mxu0 %v11679_v1  ;;  %5110 = vmatprep.subr.bf16.mxu1 %v11685_v50 }
0x1153   :  { %5070 = vmatpush1.bf16.msra.mxu0 %v11691_v46  ;;  %5111 = vmatpush1.bf16.msra.mxu1 %v11697_v2  ;;  %v11715_v46 = vld [vmem:[%s12171_s9 + $0x80] ss:$16 sps:$4 sm:$0xff]   ;;  %v11721_v2 = vld [vmem:[%s12171_s9 + $0x88] ss:$16 sps:$4 sm:$0xff]  }
0x1154   :  { %5071 = vmatprep.subr.bf16.mxu0 %v11703_v63  ;;  %5112 = vmatprep.subr.bf16.mxu1 %v11709_v19  ;;  %13641 = vst [vmem:[#allocation57_spill] sm:$0xff] %v11715_v46  ;;  %13642 = vst [vmem:[#allocation58_spill] sm:$0xff] %v11721_v2  ;;  %v11727_v63 = vld [vmem:[%s12171_s9 + $0xa4] ss:$16 sps:$4 sm:$0xff]   ;;  %v11733_v19 = vld [vmem:[%s12171_s9 + $0xac] ss:$16 sps:$4 sm:$0xff]  }
0x1155   :  { %13643 = vst [vmem:[#allocation15_spill] sm:$0xff] %v11727_v63  ;;  %13644 = vst [vmem:[#allocation16_spill] sm:$0xff] %v11733_v19 }
0x1157   :  { %5072 = vmatpush1.bf16.msra.mxu0 %v11715_v46  ;;  %5113 = vmatpush1.bf16.msra.mxu1 %v11721_v2  ;;  %v11739_v46 = vld [vmem:[%s12171_s9 + $0xa0] ss:$16 sps:$4 sm:$0xff]   ;;  %v11745_v2 = vld [vmem:[%s12171_s9 + $0xa8] ss:$16 sps:$4 sm:$0xff]  }
0x1158   :  { %5073 = vmatprep.subr.bf16.mxu0 %v11727_v63  ;;  %5114 = vmatprep.subr.bf16.mxu1 %v11733_v19  ;;  %13645 = vst [vmem:[#allocation17_spill] sm:$0xff] %v11739_v46  ;;  %13646 = vst [vmem:[#allocation18_spill] sm:$0xff] %v11745_v2  ;;  %v11751_v63 = vld [vmem:[%s12171_s9 + $0xc4] ss:$16 sps:$4 sm:$0xff]   ;;  %v11757_v19 = vld [vmem:[%s12171_s9 + $0xcc] ss:$16 sps:$4 sm:$0xff]  }
0x1159   :  { %13647 = vst [vmem:[#allocation19_spill] sm:$0xff] %v11751_v63  ;;  %13648 = vst [vmem:[#allocation20_spill] sm:$0xff] %v11757_v19 }
0x115b   :  { %5074 = vmatpush1.bf16.msra.mxu0 %v11739_v46  ;;  %5115 = vmatpush1.bf16.msra.mxu1 %v11745_v2  ;;  %v11763_v46 = vld [vmem:[%s12171_s9 + $0xc0] ss:$16 sps:$4 sm:$0xff]   ;;  %v11769_v2 = vld [vmem:[%s12171_s9 + $0xc8] ss:$16 sps:$4 sm:$0xff]  }
0x115c   :  { %5075 = vmatprep.subr.bf16.mxu0 %v11751_v63  ;;  %5116 = vmatprep.subr.bf16.mxu1 %v11757_v19  ;;  %13649 = vst [vmem:[#allocation21_spill] sm:$0xff] %v11763_v46  ;;  %13650 = vst [vmem:[#allocation22_spill] sm:$0xff] %v11769_v2  ;;  %v11775_v63 = vld [vmem:[%s12171_s9 + $0xe4] ss:$16 sps:$4 sm:$0xff]   ;;  %v11781_v19 = vld [vmem:[%s12171_s9 + $0xec] ss:$16 sps:$4 sm:$0xff]  }
0x115d   :  { %13651 = vst [vmem:[#allocation23_spill] sm:$0xff] %v11775_v63  ;;  %13652 = vst [vmem:[#allocation10_spill] sm:$0xff] %v11781_v19 }
0x115f   :  { %5076 = vmatpush1.bf16.msra.mxu0 %v11763_v46  ;;  %5117 = vmatpush1.bf16.msra.mxu1 %v11769_v2  ;;  %v11787_v46 = vld [vmem:[%s12171_s9 + $0xe0] ss:$16 sps:$4 sm:$0xff]   ;;  %v11793_v2 = vld [vmem:[%s12171_s9 + $0xe8] ss:$16 sps:$4 sm:$0xff]  }
0x1160   :  { %5077 = vmatprep.subr.bf16.mxu0 %v11775_v63  ;;  %5118 = vmatprep.subr.bf16.mxu1 %v11781_v19  ;;  %13653 = vst [vmem:[#allocation11_spill] sm:$0xff] %v11787_v46  ;;  %13654 = vst [vmem:[#allocation69_spill] sm:$0xff] %v11793_v2  ;;  %v11799_v63 = vld [vmem:[%s12171_s9 + $0x104] ss:$16 sps:$4 sm:$0xff]   ;;  %v11805_v19 = vld [vmem:[%s12171_s9 + $0x10c] ss:$16 sps:$4 sm:$0xff]  }
0x1161   :  { %13655 = vst [vmem:[#allocation24_spill] sm:$0xff] %v11799_v63  ;;  %13656 = vst [vmem:[#allocation25_spill] sm:$0xff] %v11805_v19 }
0x1163   :  { %5078 = vmatpush1.bf16.msra.mxu0 %v11787_v46  ;;  %5119 = vmatpush1.bf16.msra.mxu1 %v11793_v2  ;;  %v11811_v46 = vld [vmem:[%s12171_s9 + $0x100] ss:$16 sps:$4 sm:$0xff]   ;;  %v11817_v2 = vld [vmem:[%s12171_s9 + $0x108] ss:$16 sps:$4 sm:$0xff]  }
0x1164   :  { %5079 = vmatprep.subr.bf16.mxu0 %v11799_v63  ;;  %5120 = vmatprep.subr.bf16.mxu1 %v11805_v19  ;;  %13657 = vst [vmem:[#allocation26_spill] sm:$0xff] %v11811_v46  ;;  %13658 = vst [vmem:[#allocation27_spill] sm:$0xff] %v11817_v2  ;;  %v11823_v63 = vld [vmem:[%s12171_s9 + $0x124] ss:$16 sps:$4 sm:$0xff]   ;;  %v11829_v19 = vld [vmem:[%s12171_s9 + $0x12c] ss:$16 sps:$4 sm:$0xff]  }
0x1165   :  { %13659 = vst [vmem:[#allocation28_spill] sm:$0xff] %v11823_v63  ;;  %13660 = vst [vmem:[#allocation29_spill] sm:$0xff] %v11829_v19 }
0x1167   :  { %5080 = vmatpush1.bf16.msra.mxu0 %v11811_v46  ;;  %5121 = vmatpush1.bf16.msra.mxu1 %v11817_v2  ;;  %v11835_v46 = vld [vmem:[%s12171_s9 + $0x120] ss:$16 sps:$4 sm:$0xff]   ;;  %v11841_v2 = vld [vmem:[%s12171_s9 + $0x128] ss:$16 sps:$4 sm:$0xff]  }
0x1168   :  { %5081 = vmatprep.subr.bf16.mxu0 %v11823_v63  ;;  %5122 = vmatprep.subr.bf16.mxu1 %v11829_v19  ;;  %13661 = vst [vmem:[#allocation30_spill] sm:$0xff] %v11835_v46  ;;  %13662 = vst [vmem:[#allocation31_spill] sm:$0xff] %v11841_v2  ;;  %v11847_v63 = vld [vmem:[%s12171_s9 + $0x144] ss:$16 sps:$4 sm:$0xff]   ;;  %v11853_v19 = vld [vmem:[%s12171_s9 + $0x14c] ss:$16 sps:$4 sm:$0xff]  }
0x1169   :  { %13663 = vst [vmem:[#allocation32_spill] sm:$0xff] %v11847_v63  ;;  %13664 = vst [vmem:[#allocation33_spill] sm:$0xff] %v11853_v19 }
0x116b   :  { %5082 = vmatpush1.bf16.msra.mxu0 %v11835_v46  ;;  %5123 = vmatpush1.bf16.msra.mxu1 %v11841_v2  ;;  %v11859_v46 = vld [vmem:[%s12171_s9 + $0x140] ss:$16 sps:$4 sm:$0xff]   ;;  %v11865_v2 = vld [vmem:[%s12171_s9 + $0x148] ss:$16 sps:$4 sm:$0xff]  }
0x116c   :  { %5083 = vmatprep.subr.bf16.mxu0 %v11847_v63  ;;  %5124 = vmatprep.subr.bf16.mxu1 %v11853_v19  ;;  %13665 = vst [vmem:[#allocation34_spill] sm:$0xff] %v11859_v46  ;;  %13666 = vst [vmem:[#allocation35_spill] sm:$0xff] %v11865_v2  ;;  %v11871_v63 = vld [vmem:[%s12171_s9 + $0x164] ss:$16 sps:$4 sm:$0xff]   ;;  %v11877_v19 = vld [vmem:[%s12171_s9 + $0x16c] ss:$16 sps:$4 sm:$0xff]  }
0x116d   :  { %13667 = vst [vmem:[#allocation36_spill] sm:$0xff] %v11871_v63  ;;  %13668 = vst [vmem:[#allocation37_spill] sm:$0xff] %v11877_v19 }
0x116f   :  { %5084 = vmatpush1.bf16.msra.mxu0 %v11859_v46  ;;  %5125 = vmatpush1.bf16.msra.mxu1 %v11865_v2  ;;  %v11883_v46 = vld [vmem:[%s12171_s9 + $0x160] ss:$16 sps:$4 sm:$0xff]   ;;  %v11889_v2 = vld [vmem:[%s12171_s9 + $0x168] ss:$16 sps:$4 sm:$0xff]  }
0x1170   :  { %5085 = vmatprep.subr.bf16.mxu0 %v11871_v63  ;;  %5126 = vmatprep.subr.bf16.mxu1 %v11877_v19  ;;  %13669 = vst [vmem:[#allocation38_spill] sm:$0xff] %v11883_v46  ;;  %13670 = vst [vmem:[#allocation39_spill] sm:$0xff] %v11889_v2  ;;  %v11895_v63 = vld [vmem:[%s12171_s9 + $0x184] ss:$16 sps:$4 sm:$0xff]   ;;  %v11901_v19 = vld [vmem:[%s12171_s9 + $0x18c] ss:$16 sps:$4 sm:$0xff]  }
0x1171   :  { %13671 = vst [vmem:[#allocation40_spill] sm:$0xff] %v11895_v63  ;;  %13672 = vst [vmem:[#allocation41_spill] sm:$0xff] %v11901_v19 }
0x1173   :  { %5086 = vmatpush1.bf16.msra.mxu0 %v11883_v46  ;;  %5127 = vmatpush1.bf16.msra.mxu1 %v11889_v2  ;;  %v11907_v46 = vld [vmem:[%s12171_s9 + $0x180] ss:$16 sps:$4 sm:$0xff]   ;;  %v11913_v2 = vld [vmem:[%s12171_s9 + $0x188] ss:$16 sps:$4 sm:$0xff]  }
0x1174   :  { %5087 = vmatprep.subr.bf16.mxu0 %v11895_v63  ;;  %5128 = vmatprep.subr.bf16.mxu1 %v11901_v19  ;;  %13673 = vst [vmem:[#allocation42_spill] sm:$0xff] %v11907_v46  ;;  %13674 = vst [vmem:[#allocation43_spill] sm:$0xff] %v11913_v2  ;;  %v11919_v63 = vld [vmem:[%s12171_s9 + $0x1a4] ss:$16 sps:$4 sm:$0xff]   ;;  %v11925_v19 = vld [vmem:[%s12171_s9 + $0x1ac] ss:$16 sps:$4 sm:$0xff]  }
0x1175   :  { %13675 = vst [vmem:[#allocation44_spill] sm:$0xff] %v11919_v63  ;;  %13676 = vst [vmem:[#allocation45_spill] sm:$0xff] %v11925_v19 }
0x1177   :  { %5088 = vmatpush1.bf16.msra.mxu0 %v11907_v46  ;;  %5129 = vmatpush1.bf16.msra.mxu1 %v11913_v2  ;;  %v11931_v46 = vld [vmem:[%s12171_s9 + $0x1a0] ss:$16 sps:$4 sm:$0xff]   ;;  %v11937_v2 = vld [vmem:[%s12171_s9 + $0x1a8] ss:$16 sps:$4 sm:$0xff]  }
0x1178   :  { %5089 = vmatprep.subr.bf16.mxu0 %v11919_v63  ;;  %5130 = vmatprep.subr.bf16.mxu1 %v11925_v19  ;;  %13677 = vst [vmem:[#allocation46_spill] sm:$0xff] %v11931_v46  ;;  %13678 = vst [vmem:[#allocation47_spill] sm:$0xff] %v11937_v2  ;;  %v11943_v63 = vld [vmem:[%s12171_s9 + $0x1c4] ss:$16 sps:$4 sm:$0xff]   ;;  %v11949_v19 = vld [vmem:[%s12171_s9 + $0x1cc] ss:$16 sps:$4 sm:$0xff]  }
0x1179   :  { %13679 = vst [vmem:[#allocation48_spill] sm:$0xff] %v11943_v63  ;;  %13680 = vst [vmem:[#allocation49_spill] sm:$0xff] %v11949_v19 }
0x117b   :  { %5090 = vmatpush1.bf16.msra.mxu0 %v11931_v46  ;;  %5131 = vmatpush1.bf16.msra.mxu1 %v11937_v2  ;;  %v11955_v46 = vld [vmem:[%s12171_s9 + $0x1c0] ss:$16 sps:$4 sm:$0xff]   ;;  %v11961_v2 = vld [vmem:[%s12171_s9 + $0x1c8] ss:$16 sps:$4 sm:$0xff]  }
0x117c   :  { %5091 = vmatprep.subr.bf16.mxu0 %v11943_v63  ;;  %5132 = vmatprep.subr.bf16.mxu1 %v11949_v19  ;;  %13681 = vst [vmem:[#allocation50_spill] sm:$0xff] %v11955_v46  ;;  %13682 = vst [vmem:[#allocation51_spill] sm:$0xff] %v11961_v2  ;;  %v11967_v63 = vld [vmem:[%s12171_s9 + $0x1e4] ss:$16 sps:$4 sm:$0xff]   ;;  %v11973_v19 = vld [vmem:[%s12171_s9 + $0x1ec] ss:$16 sps:$4 sm:$0xff]  }
0x117d   :  { %13683 = vst [vmem:[#allocation52_spill] sm:$0xff] %v11967_v63  ;;  %13684 = vst [vmem:[#allocation53_spill] sm:$0xff] %v11973_v19 }
0x117f   :  { %5092 = vmatpush1.bf16.msra.mxu0 %v11955_v46  ;;  %5133 = vmatpush1.bf16.msra.mxu1 %v11961_v2  ;;  %v11979_v46 = vld [vmem:[%s12171_s9 + $0x1e0] ss:$16 sps:$4 sm:$0xff]   ;;  %v11985_v2 = vld [vmem:[%s12171_s9 + $0x1e8] ss:$16 sps:$4 sm:$0xff]  }
0x1180   :  { %5093 = vmatprep.subr.bf16.mxu0 %v11967_v63  ;;  %5134 = vmatprep.subr.bf16.mxu1 %v11973_v19  ;;  %13685 = vst [vmem:[#allocation54_spill] sm:$0xff] %v11979_v46  ;;  %13686 = vst [vmem:[#allocation5_spill] sm:$0xff] %v11985_v2 }
0x1183   :  { %5094 = vmatpush1.bf16.msra.mxu0 %v11979_v46  ;;  %5135 = vmatpush1.bf16.msra.mxu1 %v11985_v2 }
0x1184   :  { %5175 = vmatprep.subr.bf16.mxu0 %v11386_v38  ;;  %5216 = vmatprep.subr.bf16.mxu1 %v11392_v32 }
0x11f9   :  { %v4873_v63 = vpop.f32.mrb[112].mxu0  ;;  %v4914_v19 = vpop.f32.mrb[120].mxu1 }
0x11fa   :  { %v4874_v50 = vadd.f32 %v4873_v63, %v13434_v34  ;;  %v4875_v1 = vpop.f32.mrb[113].mxu0  ;;  %v4916_v8 = vpop.f32.mrb[121].mxu1  ;;  %v4915_v38 = vadd.f32 %v4914_v19, %v13435_v18 }
0x11fb   :  { %v4876_v30 = vadd.f32 %v4875_v1, %v10415_v47  ;;  %v4877_v46 = vpop.f32.mrb[114].mxu0  ;;  %v4918_v12 = vpop.f32.mrb[122].mxu1  ;;  %v4917_v32 = vadd.f32 %v4916_v8, %v13624_v55 }
0x11fc   :  { %v5825_v15 = vmul.f32 -1.442695, %v4874_v50  ;;  %v4878_v22 = vpop.f32.mrb[115].mxu0  ;;  %v4919_v57 = vpop.f32.mrb[123].mxu1  ;;  %v5827_v2 = vmul.f32 -1.442695, %v4915_v38 }
0x11fd   :  { %v5826_v27 = vmul.f32 -1.442695, %v4876_v30 }
0x11fe   :  { %6660 = vpow2.f32 %v5825_v15 }
0x11ff   :  { %6662 = vpow2.f32 %v5826_v27 }
0x1200   :  { %6664 = vtanh.f32 %v4917_v32 }
0x1201   :  { %6666 = vpow2.f32 %v5827_v2 }
0x1208   :  { %v6661_v59 = vpop.eup %6660 }
0x1209   :  { %v4930_v28 = vadd.f32 1.0, %v6661_v59  ;;  %v6663_v63 = vpop.eup %6662 }
0x120a   :  { %v4931_v1 = vadd.f32 1.0, %v6663_v63  ;;  %v6665_v12 = vpop.eup %6664 }
0x120b   :  { %6668 = vrcp.f32 %v4930_v28  ;;  %v6667_v50 = vpop.eup %6666 }
0x120c   :  { %6670 = vrcp.f32 %v4931_v1  ;;  %v4932_v15 = vadd.f32 1.0, %v6667_v50 }
0x120e   :  { %6672 = vrcp.f32 %v4932_v15 }
0x1215   :  { %v6669_v22 = vpop.eup %6668 }
0x1216   :  { %v4941_v57 = vmul.f32 %v6669_v22, %v6665_v12  ;;  %v6671_v30 = vpop.eup %6670 }
0x1217   :  { %v4940_v27 = vmul.f32 %v6671_v30, %v11400_v42 }
0x1219   :  { %v4985_v46 = vpop.f32.mrb[116].mxu0  ;;  %v5026_v19 = vpop.f32.mrb[124].mxu1  ;;  %v11995_v8 = vadd.f32 %v4941_v57, %v4940_v27 }
0x121a   :  { %v5033_v59 = vadd.f32 %v4985_v46, %v13625_v33  ;;  %v4987_v38 = vpop.f32.mrb[117].mxu0  ;;  %v5028_v32 = vpop.f32.mrb[125].mxu1  ;;  %v5035_v42 = vadd.f32 %v5026_v19, %v10301_v13 }
0x121b   :  { %v5034_v28 = vadd.f32 %v4987_v38, %v13376_v24  ;;  %v4989_v2 = vpop.f32.mrb[118].mxu0  ;;  %v5030_v63 = vpop.f32.mrb[126].mxu1  ;;  %6674 = vtanh.f32 %v11995_v8  ;;  %v5036_v30 = vadd.f32 %v5028_v32, %v10304_v56 }
0x121c   :  { %v5828_v1 = vmul.f32 -1.442695, %v5033_v59  ;;  %v4990_v12 = vpop.f32.mrb[119].mxu0  ;;  %v5031_v50 = vpop.f32.mrb[127].mxu1  ;;  %v5830_v46 = vmul.f32 -1.442695, %v5035_v42 }
0x121d   :  { %v5829_v22 = vmul.f32 -1.442695, %v5034_v28  ;;  %v6673_v57 = vpop.eup %6672 }
0x121e   :  { %6676 = vpow2.f32 %v5828_v1 }
0x121f   :  { %6678 = vpow2.f32 %v5829_v22 }
0x1220   :  { %6680 = vtanh.f32 %v5036_v30 }
0x1221   :  { %6682 = vpow2.f32 %v5830_v46 }
0x1225   :  { %v6675_v27 = vpop.eup %6674 }
0x1226   :  { %v4944_v15 = vmul.f32 %v6675_v27, %v6673_v57 }
0x1228   :  { %v6677_v33 = vpop.eup %6676  ;;  %v4949_v59 = vrot.slane %v4944_v15, %v13437_v48  ;;  %v5062_v2 = vpack.c.bf16 %v4944_v15, %v4944_v15 }
0x1229   :  { %v5046_v38 = vadd.f32 1.0, %v6677_v33  ;;  %v6679_v63 = vpop.eup %6678 }
0x122a   :  { %v5047_v28 = vadd.f32 1.0, %v6679_v63  ;;  %5095 = vmatprep.mubr.bf16.mxu0 %v5062_v2  ;;  %5136 = vmatprep.mubr.bf16.mxu1 %v5062_v2  ;;  %v12005_v19 = vsel %vm4945_vm7, %v4949_v59, %v11410_v17  ;;  %v6681_v32 = vpop.eup %6680  ;;  %v13688_v17 = vld [vmem:[#allocation55_spill] sm:$0xff]  ;;  %v13724_v59 = vld [vmem:[#allocation32_spill] sm:$0xff]  ;;  %v13725_v2 = vld [vmem:[#allocation33_spill] sm:$0xff] }
0x122b   :  { %6684 = vrcp.f32 %v5046_v38  ;;  %v6683_v1 = vpop.eup %6682  ;;  %v13723_v38 = vld [vmem:[#allocation31_spill] sm:$0xff]  ;;  %v13726_v63 = vld [vmem:[#allocation34_spill] sm:$0xff] }
0x122c   :  { %6686 = vrcp.f32 %v5047_v28  ;;  %v5048_v33 = vadd.f32 1.0, %v6683_v1  ;;  %v13727_v28 = vld [vmem:[#allocation35_spill] sm:$0xff]  ;;  %v13729_v1 = vld [vmem:[#allocation37_spill] sm:$0xff] }
0x122e   :  { %6688 = vrcp.f32 %v5048_v33  ;;  %v13733_v33 = vld [vmem:[#allocation41_spill] sm:$0xff] }
0x1235   :  { %v6685_v12 = vpop.eup %6684 }
0x1236   :  { %v5057_v50 = vmul.f32 %v6685_v12, %v6681_v32  ;;  %v6687_v22 = vpop.eup %6686  ;;  %v13728_v32 = vld [vmem:[#allocation36_spill] sm:$0xff]  ;;  %v13730_v12 = vld [vmem:[#allocation38_spill] sm:$0xff] }
0x1237   :  { %v5056_v42 = vmul.f32 %v6687_v22, %v11413_v62  ;;  %v13689_v62 = vld [vmem:[#allocation3_spill] sm:$0xff]  ;;  %v13732_v22 = vld [vmem:[#allocation40_spill] sm:$0xff] }
0x1238   :  { %v6689_v30 = vpop.eup %6688 }
0x1239   :  { %v12008_v57 = vadd.f32 %v5057_v50, %v5056_v42  ;;  %v13731_v50 = vld [vmem:[#allocation39_spill] sm:$0xff]  ;;  %v13734_v42 = vld [vmem:[#allocation42_spill] sm:$0xff] }
0x123b   :  { %6690 = vtanh.f32 %v12008_v57 }
0x1245   :  { %v6691_v27 = vpop.eup %6690 }
0x1246   :  { %v5060_v46 = vmul.f32 %v6691_v27, %v6689_v30  ;;  %v13735_v30 = vld [vmem:[#allocation43_spill] sm:$0xff]  ;;  %v13736_v27 = vld [vmem:[#allocation44_spill] sm:$0xff] }
0x1248   :  { %v5061_v15 = vpack.c.bf16 %v5060_v46, %v5060_v46  ;;  %v13737_v46 = vld [vmem:[#allocation45_spill] sm:$0xff] }
0x124a   :  { %5096 = vmatmul.mubr.bf16.vlgmr.msra.gmra.mrb[120].mxu0 %v5061_v15  ;;  %5137 = vmatmul.mubr.bf16.vlgmr.msra.gmra.mrb[128].mxu1 %v5061_v15 }
0x124b   :  { %5176 = vmatpush1.bf16.msra.mxu0 %v11423_v3  ;;  %5217 = vmatpush1.bf16.msra.mxu1 %v11429_v7  ;;  %v13690_v3 = vld [vmem:[#allocation60_spill] sm:$0xff]  ;;  %v13691_v7 = vld [vmem:[#allocation67_spill] sm:$0xff] }
0x124c   :  { %5177 = vmatprep.subr.bf16.mxu0 %v11435_v35  ;;  %5218 = vmatprep.subr.bf16.mxu1 %v11441_v49  ;;  %v13692_v35 = vld [vmem:[#allocation59_spill] sm:$0xff]  ;;  %v13693_v49 = vld [vmem:[#allocation68_spill] sm:$0xff] }
0x124d   :  { %5207 = vmatprep.mubr.bf16.mxu0 %v12855_v9  ;;  %5248 = vmatprep.mubr.bf16.mxu1 %v12855_v9  ;;  %v13687_v9 = vld [vmem:[#allocation66_spill] sm:$0xff] }
0x124f   :  { %5178 = vmatpush1.bf16.msra.mxu0 %v11449_v54  ;;  %5219 = vmatpush1.bf16.msra.mxu1 %v11455_v53  ;;  %v13694_v54 = vld [vmem:[#allocation7_spill] sm:$0xff]  ;;  %v13695_v53 = vld [vmem:[#allocation56_spill] sm:$0xff] }
0x1250   :  { %5179 = vmatprep.subr.bf16.mxu0 %v11461_v51  ;;  %5220 = vmatprep.subr.bf16.mxu1 %v11467_v5  ;;  %v13696_v51 = vld [vmem:[#allocation64_spill] sm:$0xff] }
0x1251   :  { %v13697_v5 = vld [vmem:[#allocation12_spill] sm:$0xff] }
0x1253   :  { %5180 = vmatpush1.bf16.msra.mxu0 %v11473_v0  ;;  %5221 = vmatpush1.bf16.msra.mxu1 %v11479_v29  ;;  %v13698_v0 = vld [vmem:[#allocation13_spill] sm:$0xff]  ;;  %v13699_v29 = vld [vmem:[#allocation14_spill] sm:$0xff] }
0x1254   :  { %5181 = vmatprep.subr.bf16.mxu0 %v11485_v45  ;;  %5222 = vmatprep.subr.bf16.mxu1 %v11491_v11  ;;  %v13700_v45 = vld [vmem:[#allocation2_spill] sm:$0xff]  ;;  %v13701_v11 = vld [vmem:[#allocation4_spill] sm:$0xff] }
0x1257   :  { %5182 = vmatpush1.bf16.msra.mxu0 %v11497_v26  ;;  %5223 = vmatpush1.bf16.msra.mxu1 %v11503_v10  ;;  %v13702_v26 = vld [vmem:[#allocation57_spill] sm:$0xff]  ;;  %v13703_v10 = vld [vmem:[#allocation58_spill] sm:$0xff] }
0x1258   :  { %5183 = vmatprep.subr.bf16.mxu0 %v11509_v31  ;;  %5224 = vmatprep.subr.bf16.mxu1 %v11515_v36  ;;  %v13704_v31 = vld [vmem:[#allocation15_spill] sm:$0xff]  ;;  %v13705_v36 = vld [vmem:[#allocation16_spill] sm:$0xff] }
0x125b   :  { %5184 = vmatpush1.bf16.msra.mxu0 %v11521_v43  ;;  %5225 = vmatpush1.bf16.msra.mxu1 %v11527_v4  ;;  %v13706_v43 = vld [vmem:[#allocation17_spill] sm:$0xff]  ;;  %v13707_v4 = vld [vmem:[#allocation18_spill] sm:$0xff] }
0x125c   :  { %5185 = vmatprep.subr.bf16.mxu0 %v11533_v44  ;;  %5226 = vmatprep.subr.bf16.mxu1 %v11539_v16  ;;  %v13708_v44 = vld [vmem:[#allocation19_spill] sm:$0xff]  ;;  %v13709_v16 = vld [vmem:[#allocation20_spill] sm:$0xff] }
0x125f   :  { %5186 = vmatpush1.bf16.msra.mxu0 %v11545_v25  ;;  %5227 = vmatpush1.bf16.msra.mxu1 %v11551_v41  ;;  %v13710_v25 = vld [vmem:[#allocation21_spill] sm:$0xff]  ;;  %v13711_v41 = vld [vmem:[#allocation22_spill] sm:$0xff] }
0x1260   :  { %5187 = vmatprep.subr.bf16.mxu0 %v11557_v6  ;;  %5228 = vmatprep.subr.bf16.mxu1 %v11563_v40  ;;  %v13712_v6 = vld [vmem:[#allocation23_spill] sm:$0xff]  ;;  %v13713_v40 = vld [vmem:[#allocation10_spill] sm:$0xff] }
0x1263   :  { %5188 = vmatpush1.bf16.msra.mxu0 %v11569_v23  ;;  %5229 = vmatpush1.bf16.msra.mxu1 %v11575_v60  ;;  %v13714_v23 = vld [vmem:[#allocation11_spill] sm:$0xff]  ;;  %v13715_v60 = vld [vmem:[#allocation69_spill] sm:$0xff] }
0x1264   :  { %5189 = vmatprep.subr.bf16.mxu0 %v11581_v37  ;;  %5230 = vmatprep.subr.bf16.mxu1 %v11587_v21  ;;  %v13716_v37 = vld [vmem:[#allocation24_spill] sm:$0xff]  ;;  %v13717_v21 = vld [vmem:[#allocation25_spill] sm:$0xff] }
0x1267   :  { %5190 = vmatpush1.bf16.msra.mxu0 %v11593_v52  ;;  %5231 = vmatpush1.bf16.msra.mxu1 %v11599_v58  ;;  %v13718_v52 = vld [vmem:[#allocation26_spill] sm:$0xff]  ;;  %v13719_v58 = vld [vmem:[#allocation27_spill] sm:$0xff] }
0x1268   :  { %5287 = vmatprep.subr.bf16.mxu0 %v11605_v14  ;;  %5328 = vmatprep.subr.bf16.mxu1 %v11611_v61  ;;  %v13720_v14 = vld [vmem:[#allocation28_spill] sm:$0xff]  ;;  %v13721_v61 = vld [vmem:[#allocation29_spill] sm:$0xff] }
0x126a   :  { %5208 = vmatmul.mubr.bf16.vlgmr.msra.gmra.mrb[124].mxu0 %v5061_v15  ;;  %5249 = vmatmul.mubr.bf16.vlgmr.msra.gmra.mrb[132].mxu1 %v5061_v15  ;;  %v13738_v15 = vld [vmem:[#allocation46_spill] sm:$0xff] }
0x126b   :  { %5288 = vmatpush1.bf16.msra.mxu0 %v11619_v20  ;;  %5329 = vmatpush1.bf16.msra.mxu1 %v13687_v9  ;;  %v13722_v20 = vld [vmem:[#allocation30_spill] sm:$0xff]  ;;  %v13739_v9 = vld [vmem:[#allocation47_spill] sm:$0xff] }
0x126c   :  { %5289 = vmatprep.subr.bf16.mxu0 %v13688_v17  ;;  %5330 = vmatprep.subr.bf16.mxu1 %v13689_v62  ;;  %v13740_v17 = vld [vmem:[#allocation48_spill] sm:$0xff]  ;;  %v13741_v62 = vld [vmem:[#allocation49_spill] sm:$0xff] }
0x126f   :  { %5290 = vmatpush1.bf16.msra.mxu0 %v13690_v3  ;;  %5331 = vmatpush1.bf16.msra.mxu1 %v13691_v7  ;;  %v13742_v3 = vld [vmem:[#allocation50_spill] sm:$0xff]  ;;  %v13743_v7 = vld [vmem:[#allocation51_spill] sm:$0xff] }
0x1270   :  { %5291 = vmatprep.subr.bf16.mxu0 %v13692_v35  ;;  %5332 = vmatprep.subr.bf16.mxu1 %v13693_v49  ;;  %v13744_v35 = vld [vmem:[#allocation52_spill] sm:$0xff]  ;;  %v13745_v49 = vld [vmem:[#allocation53_spill] sm:$0xff] }
0x1273   :  { %5292 = vmatpush1.bf16.msra.mxu0 %v13694_v54  ;;  %5333 = vmatpush1.bf16.msra.mxu1 %v13695_v53  ;;  %v13746_v54 = vld [vmem:[#allocation54_spill] sm:$0xff]  ;;  %v13747_v53 = vld [vmem:[#allocation5_spill] sm:$0xff] }
0x1274   :  { %5293 = vmatprep.subr.bf16.mxu0 %v13696_v51  ;;  %5334 = vmatprep.subr.bf16.mxu1 %v13697_v5 }
0x1277   :  { %5294 = vmatpush1.bf16.msra.mxu0 %v13698_v0  ;;  %5335 = vmatpush1.bf16.msra.mxu1 %v13699_v29 }
0x1278   :  { %5295 = vmatprep.subr.bf16.mxu0 %v13700_v45  ;;  %5336 = vmatprep.subr.bf16.mxu1 %v13701_v11 }
0x127b   :  { %5296 = vmatpush1.bf16.msra.mxu0 %v13702_v26  ;;  %5337 = vmatpush1.bf16.msra.mxu1 %v13703_v10 }
0x127c   :  { %5297 = vmatprep.subr.bf16.mxu0 %v13704_v31  ;;  %5338 = vmatprep.subr.bf16.mxu1 %v13705_v36 }
0x127f   :  { %5298 = vmatpush1.bf16.msra.mxu0 %v13706_v43  ;;  %5339 = vmatpush1.bf16.msra.mxu1 %v13707_v4 }
0x1280   :  { %5299 = vmatprep.subr.bf16.mxu0 %v13708_v44  ;;  %5340 = vmatprep.subr.bf16.mxu1 %v13709_v16 }
0x1283   :  { %5300 = vmatpush1.bf16.msra.mxu0 %v13710_v25  ;;  %5341 = vmatpush1.bf16.msra.mxu1 %v13711_v41 }
0x1284   :  { %5301 = vmatprep.subr.bf16.mxu0 %v13712_v6  ;;  %5342 = vmatprep.subr.bf16.mxu1 %v13713_v40 }
0x1287   :  { %5302 = vmatpush1.bf16.msra.mxu0 %v13714_v23  ;;  %5343 = vmatpush1.bf16.msra.mxu1 %v13715_v60 }
0x1288   :  { %5303 = vmatprep.subr.bf16.mxu0 %v13716_v37  ;;  %5344 = vmatprep.subr.bf16.mxu1 %v13717_v21 }
0x128b   :  { %5304 = vmatpush1.bf16.msra.mxu0 %v13718_v52  ;;  %5345 = vmatpush1.bf16.msra.mxu1 %v13719_v58 }
0x128c   :  { %5305 = vmatprep.subr.bf16.mxu0 %v13720_v14  ;;  %5346 = vmatprep.subr.bf16.mxu1 %v13721_v61 }
0x128f   :  { %5306 = vmatpush1.bf16.msra.mxu0 %v13722_v20  ;;  %5347 = vmatpush1.bf16.msra.mxu1 %v13723_v38 }
0x1290   :  { %5307 = vmatprep.subr.bf16.mxu0 %v13724_v59  ;;  %5348 = vmatprep.subr.bf16.mxu1 %v13725_v2  ;;  %v13748_v2 = vld [vmem:[#allocation63_spill] sm:$0xff] }
0x1293   :  { %5308 = vmatpush1.bf16.msra.mxu0 %v13726_v63  ;;  %5349 = vmatpush1.bf16.msra.mxu1 %v13727_v28 }
0x1294   :  { %5309 = vmatprep.subr.bf16.mxu0 %v13728_v32  ;;  %5350 = vmatprep.subr.bf16.mxu1 %v13729_v1 }
0x1297   :  { %5310 = vmatpush1.bf16.msra.mxu0 %v13730_v12  ;;  %5351 = vmatpush1.bf16.msra.mxu1 %v13731_v50 }
0x1298   :  { %5311 = vmatprep.subr.bf16.mxu0 %v13732_v22  ;;  %5352 = vmatprep.subr.bf16.mxu1 %v13733_v33 }
0x129b   :  { %5312 = vmatpush1.bf16.msra.mxu0 %v13734_v42  ;;  %5353 = vmatpush1.bf16.msra.mxu1 %v13735_v30 }
0x129c   :  { %5313 = vmatprep.subr.bf16.mxu0 %v13736_v27  ;;  %5354 = vmatprep.subr.bf16.mxu1 %v13737_v46 }
0x129f   :  { %5314 = vmatpush1.bf16.msra.mxu0 %v13738_v15  ;;  %5355 = vmatpush1.bf16.msra.mxu1 %v13739_v9 }
0x12a0   :  { %5315 = vmatprep.subr.bf16.mxu0 %v13740_v17  ;;  %5356 = vmatprep.subr.bf16.mxu1 %v13741_v62 }
0x12a3   :  { %5316 = vmatpush1.bf16.msra.mxu0 %v13742_v3  ;;  %5357 = vmatpush1.bf16.msra.mxu1 %v13743_v7 }
0x12a4   :  { %5317 = vmatprep.subr.bf16.mxu0 %v13744_v35  ;;  %5358 = vmatprep.subr.bf16.mxu1 %v13745_v49 }
0x12a7   :  { %5318 = vmatpush1.bf16.msra.mxu0 %v13746_v54  ;;  %5359 = vmatpush1.bf16.msra.mxu1 %v13747_v53 }
0x131d   :  { %v5097_v51 = vpop.f32.mrb[120].mxu0  ;;  %v5138_v5 = vpop.f32.mrb[128].mxu1 }
0x131e   :  { %v5098_v0 = vadd.f32 %v5097_v51, %v13434_v34  ;;  %v5099_v29 = vpop.f32.mrb[121].mxu0  ;;  %v5140_v45 = vpop.f32.mrb[129].mxu1  ;;  %v5139_v44 = vadd.f32 %v5138_v5, %v13435_v18 }
0x131f   :  { %v5100_v11 = vadd.f32 %v5099_v29, %v10415_v47  ;;  %v5101_v26 = vpop.f32.mrb[122].mxu0  ;;  %v5142_v10 = vpop.f32.mrb[130].mxu1  ;;  %v5141_v16 = vadd.f32 %v5140_v45, %v13624_v55 }
0x1320   :  { %v5831_v31 = vmul.f32 -1.442695, %v5098_v0  ;;  %v5102_v36 = vpop.f32.mrb[123].mxu0  ;;  %v5143_v43 = vpop.f32.mrb[131].mxu1  ;;  %v5833_v25 = vmul.f32 -1.442695, %v5139_v44 }
0x1321   :  { %v5832_v4 = vmul.f32 -1.442695, %v5100_v11  ;;  %v7127_v36 = vmov 0.0   ;;  %v6222_v43 = vld [vmem:[%s12174_s11 + $0x10] sm:$0xff]   ;;  %v6224_v44 = vld [vmem:[%s12174_s11 + $0x20] sm:$0xff]  }
0x1322   :  { %6692 = vpow2.f32 %v5831_v31  ;;  %5858 = vmatprep.subr.bf16.mxu0 %v7127_v36 }
0x1323   :  { %6694 = vpow2.f32 %v5832_v4  ;;  %v6223_v4 = vld [vmem:[%s12174_s11 + $0x18] sm:$0xff]  }
0x1324   :  { %6696 = vtanh.f32 %v5141_v16  ;;  %v6225_v16 = vld [vmem:[%s12174_s11 + $0x28] sm:$0xff]  }
0x1325   :  { %6698 = vpow2.f32 %v5833_v25  ;;  %v6226_v25 = vld [vmem:[%s12174_s11 + $0x30] sm:$0xff]  }
0x132c   :  { %v6693_v41 = vpop.eup %6692 }
0x132d   :  { %v5154_v6 = vadd.f32 1.0, %v6693_v41  ;;  %v6695_v40 = vpop.eup %6694  ;;  %v6227_v41 = vld [vmem:[%s12174_s11 + $0x38] sm:$0xff]  }
0x132e   :  { %v5155_v23 = vadd.f32 1.0, %v6695_v40  ;;  %v6697_v60 = vpop.eup %6696 }
0x132f   :  { %6700 = vrcp.f32 %v5154_v6  ;;  %v6699_v37 = vpop.eup %6698 }
0x1330   :  { %6702 = vrcp.f32 %v5155_v23  ;;  %v5156_v14 = vadd.f32 1.0, %v6699_v37 }
0x1332   :  { %6704 = vrcp.f32 %v5156_v14 }
0x1339   :  { %v6701_v21 = vpop.eup %6700 }
0x133a   :  { %v5165_v52 = vmul.f32 %v6701_v21, %v6697_v60  ;;  %v6703_v58 = vpop.eup %6702 }
0x133b   :  { %v5164_v61 = vmul.f32 %v6703_v58, %v11995_v8 }
0x133c   :  { %v6705_v27 = vpop.eup %6704 }
0x133d   :  { %v5209_v20 = vpop.f32.mrb[124].mxu0  ;;  %v5250_v38 = vpop.f32.mrb[132].mxu1  ;;  %v12112_v59 = vadd.f32 %v5165_v52, %v5164_v61 }
0x133e   :  { %v5257_v63 = vadd.f32 %v5209_v20, %v13748_v2  ;;  %v5211_v28 = vpop.f32.mrb[125].mxu0  ;;  %v5252_v32 = vpop.f32.mrb[133].mxu1  ;;  %v5259_v8 = vadd.f32 %v5250_v38, %v10301_v13 }
0x133f   :  { %v5258_v1 = vadd.f32 %v5211_v28, %v13376_v24  ;;  %v5213_v12 = vpop.f32.mrb[126].mxu0  ;;  %v5254_v50 = vpop.f32.mrb[134].mxu1  ;;  %6706 = vtanh.f32 %v12112_v59  ;;  %v5260_v46 = vadd.f32 %v5252_v32, %v10304_v56 }
0x1340   :  { %v5834_v22 = vmul.f32 -1.442695, %v5257_v63  ;;  %v5214_v33 = vpop.f32.mrb[127].mxu0  ;;  %v5255_v42 = vpop.f32.mrb[135].mxu1  ;;  %v5836_v9 = vmul.f32 -1.442695, %v5259_v8 }
0x1341   :  { %v5835_v30 = vmul.f32 -1.442695, %v5258_v1 }
0x1342   :  { %6708 = vpow2.f32 %v5834_v22 }
0x1343   :  { %6710 = vpow2.f32 %v5835_v30 }
0x1344   :  { %6712 = vtanh.f32 %v5260_v46 }
0x1345   :  { %6714 = vpow2.f32 %v5836_v9 }
0x1349   :  { %v6707_v15 = vpop.eup %6706 }
0x134a   :  { %v5168_v17 = vmul.f32 %v6707_v15, %v6705_v27 }
0x134c   :  { %v6709_v62 = vpop.eup %6708  ;;  %v5173_v3 = vrot.slane %v5168_v17, %v13437_v48  ;;  %v5286_v7 = vpack.c.bf16 %v5168_v17, %v5168_v17 }
0x134d   :  { %v5270_v24 = vadd.f32 1.0, %v6709_v62  ;;  %v6711_v35 = vpop.eup %6710  ;;  %v5840_v62 = vld [vmem:[%s12175_s12] ss:$0 sm:$0xff] }
0x134e   :  { %v5271_v49 = vadd.f32 1.0, %v6711_v35  ;;  %5319 = vmatprep.mubr.bf16.mxu0 %v5286_v7  ;;  %5360 = vmatprep.mubr.bf16.mxu1 %v5286_v7  ;;  %v12122_v13 = vsel %vm5169_vm8, %v5173_v3, %v12005_v19  ;;  %v6713_v56 = vpop.eup %6712  ;;  %v6220_v19 = vld [vmem:[%s12174_s11] sm:$0xff]  }
0x134f   :  { %6716 = vrcp.f32 %v5270_v24  ;;  %v6715_v54 = vpop.eup %6714 }
0x1350   :  { %6718 = vrcp.f32 %v5271_v49  ;;  %v5272_v0 = vadd.f32 1.0, %v6715_v54 }
0x1352   :  { %6720 = vrcp.f32 %v5272_v0 }
0x1359   :  { %v6717_v53 = vpop.eup %6716 }
0x135a   :  { %v5281_v51 = vmul.f32 %v6717_v53, %v6713_v56  ;;  %v6719_v5 = vpop.eup %6718 }
0x135b   :  { %v5280_v29 = vmul.f32 %v6719_v5, %v12008_v57  ;;  %v6221_v57 = vld [vmem:[%s12174_s11 + $0x8] sm:$0xff]  }
0x135c   :  { %v6721_v11 = vpop.eup %6720 }
0x135d   :  { %v5282_v45 = vadd.f32 %v5281_v51, %v5280_v29 }
0x135f   :  { %6722 = vtanh.f32 %v5282_v45 }
0x1369   :  { %v6723_v26 = vpop.eup %6722 }
0x136a   :  { %v5284_v10 = vmul.f32 %v6723_v26, %v6721_v11 }
0x136c   :  { %v5285_v31 = vpack.c.bf16 %v5284_v10, %v5284_v10 }
0x136e   :  { %5320 = vmatmul.mubr.bf16.vlgmr.msra.gmra.mrb[128].mxu0 %v5285_v31  ;;  %5361 = vmatmul.mubr.bf16.vlgmr.msra.gmra.mrb[136].mxu1 %v5285_v31 }
0x136f   :  { %5859 = vmatpush3.bf16.msra.mxu0 %v6220_v19  ;;  %5874 = vmatprep.mubr.msk.bf16.mxu0 %vm7128_vm9, %v7127_v36 }
0x1370   :  { %5860 = vmatprep.subr.bf16.mxu0 %v7127_v36 }
0x1373   :  { %5861 = vmatpush3.bf16.msra.mxu0 %v6221_v57 }
0x1374   :  { %5862 = vmatprep.subr.bf16.mxu0 %v7127_v36 }
0x1377   :  { %5863 = vmatpush3.bf16.msra.mxu0 %v6222_v43 }
0x1378   :  { %5864 = vmatprep.subr.bf16.mxu0 %v7127_v36 }
0x137b   :  { %5865 = vmatpush3.bf16.msra.mxu0 %v6223_v4 }
0x137c   :  { %5866 = vmatprep.subr.bf16.mxu0 %v7127_v36 }
0x137f   :  { %5867 = vmatpush3.bf16.msra.mxu0 %v6224_v44 }
0x1380   :  { %5868 = vmatprep.subr.bf16.mxu0 %v7127_v36 }
0x1383   :  { %5869 = vmatpush3.bf16.msra.mxu0 %v6225_v16 }
0x1384   :  { %5870 = vmatprep.subr.bf16.mxu0 %v7127_v36 }
0x1387   :  { %5871 = vmatpush3.bf16.msra.mxu0 %v6226_v25 }
0x1388   :  { %5872 = vmatprep.subr.bf16.mxu0 %v7127_v36 }
0x138b   :  { %5873 = vmatpush3.bf16.msra.mxu0 %v6227_v41 }
0x1441   :  { %v5321_v6 = vpop.f32.mrb[128].mxu0  ;;  %v5362_v40 = vpop.f32.mrb[136].mxu1 }
0x1442   :  { %v5322_v23 = vadd.f32 %v5321_v6, %v13434_v34  ;;  %v5323_v60 = vpop.f32.mrb[129].mxu0  ;;  %v5364_v37 = vpop.f32.mrb[137].mxu1  ;;  %v5363_v2 = vadd.f32 %v5362_v40, %v13435_v18 }
0x1443   :  { %v5324_v21 = vadd.f32 %v5323_v60, %v10415_v47  ;;  %v5325_v52 = vpop.f32.mrb[130].mxu0  ;;  %v5366_v58 = vpop.f32.mrb[138].mxu1  ;;  %v5365_v63 = vadd.f32 %v5364_v37, %v13624_v55 }
0x1444   :  { %v5837_v14 = vmul.f32 -1.442695, %v5322_v23  ;;  %v5326_v61 = vpop.f32.mrb[131].mxu0  ;;  %v5367_v20 = vpop.f32.mrb[139].mxu1  ;;  %v5839_v28 = vmul.f32 -1.442695, %v5363_v2 }
0x1445   :  { %v5838_v38 = vmul.f32 -1.442695, %v5324_v21 }
0x1446   :  { %6724 = vpow2.f32 %v5837_v14 }
0x1447   :  { %6726 = vpow2.f32 %v5838_v38 }
0x1448   :  { %6728 = vtanh.f32 %v5365_v63 }
0x1449   :  { %6730 = vpow2.f32 %v5839_v28 }
0x1450   :  { %v6725_v32 = vpop.eup %6724 }
0x1451   :  { %v5378_v1 = vadd.f32 1.0, %v6725_v32  ;;  %v6727_v34 = vpop.eup %6726 }
0x1452   :  { %v5379_v47 = vadd.f32 1.0, %v6727_v34  ;;  %v6729_v12 = vpop.eup %6728 }
0x1453   :  { %6732 = vrcp.f32 %v5378_v1  ;;  %v6731_v50 = vpop.eup %6730 }
0x1454   :  { %6734 = vrcp.f32 %v5379_v47  ;;  %v5380_v30 = vadd.f32 1.0, %v6731_v50 }
0x1456   :  { %6736 = vrcp.f32 %v5380_v30 }
0x145d   :  { %v6733_v22 = vpop.eup %6732 }
0x145e   :  { %v5389_v33 = vmul.f32 %v6733_v22, %v6729_v12  ;;  %v6735_v42 = vpop.eup %6734 }
0x145f   :  { %v5388_v8 = vmul.f32 %v6735_v42, %v12112_v59 }
0x1460   :  { %v6737_v55 = vpop.eup %6736 }
0x1461   :  { %v5390_v18 = vadd.f32 %v5389_v33, %v5388_v8 }
0x1463   :  { %6738 = vtanh.f32 %v5390_v18 }
0x146d   :  { %v6739_v27 = vpop.eup %6738 }
0x146e   :  { %v5392_v46 = vmul.f32 %v6739_v27, %v6737_v55 }
0x1470   :  { %v5397_v15 = vrot.slane %v5392_v46, %v13437_v48 }
0x1472   :  { %v5398_v9 = vsel %vm5393_vm10, %v5397_v15, %v12122_v13 }
0x1473   :  { %v5399_v17 = vpack.c.bf16 %v5398_v9, %v5398_v9 }
0x1475   :  { %5875 = vmatmul.mubr.bf16.vlgmr.msra.gmra.mrb[132].mxu0 %v5399_v17 }
0x1548   :  { %v5505_v24 = vpop.f32.mrb[132].mxu0 }
0x1549   :  { %v5506_v59 = vadd.f32 %v5840_v62, %v5505_v24  ;;  %v5876_v3 = vpop.f32.mrb[133].mxu0 }
0x154a   :  { %v5508_v7 = vpop.f32.mrb[134].mxu0 }
0x154b   :  { %5511 = vst [vmem:[%s12176_s13] sm:$0xff] %v5506_v59  ;;  %v5877_v35 = vpop.f32.mrb[135].mxu0 }

</bundles_post_ra>
